<compile_context>
chip_gen: v7x
topology: tpu7x:2x2x1
jax: 0.10.0
libtpu: 0.0.40
codegen_flags: <defaults>
</compile_context>

<pallas_src>
import functools

import jax
import jax.numpy as jnp
from jax.experimental import pallas as pl
from jax.experimental.pallas import tpu as pltpu


def _round_up(x, m):
    return ((x + m - 1) // m) * m


# ----------------------------------------------------------------------------
# Fused _DenseLayer kernel (one image per grid step)
# ----------------------------------------------------------------------------
def _dense_layer_kernel(x_ref, s1_ref, b1_ref, w1_ref, s2_ref, b2_ref, w2_ref,
                        o_ref, a2_ref, *, cin, cmid, cout, w, hw, pad):
    """Fused dense-layer body.

    x_ref : (HW, cin)          bf16  flattened NHWC input features (prev concat)
    s1,b1 : (1, cin)           f32   fused eval-BN1 scale/shift
    w1    : (cin, cmid)        bf16  1x1 conv weight
    s2,b2 : (1, cmid)          f32   fused eval-BN2 scale/shift
    w2    : (9*cmid, cout)     bf16  3x3 conv weight, taps stacked as ky*3+kx
    o_ref : (HW, cin+cout)     bf16  [ input passthrough | new features ]
    a2_ref: (pad+HW+pad, cmid) f32   VMEM scratch: zero-row-padded a2
    """
    x = x_ref[...]                                              # bf16 (HW, cin)

    # ---- concat passthrough: previous features copied unchanged -----------
    o_ref[:, :cin] = x

    # ---- bn1 -> relu1 (f32 math) -> conv1x1 (bf16 MXU, f32 accumulation) ---
    a = jnp.maximum(x.astype(jnp.float32) * s1_ref[...] + b1_ref[...], 0.0)
    y = jnp.dot(a.astype(jnp.bfloat16), w1_ref[...],
                preferred_element_type=jnp.float32)             # (HW, cmid) f32

    # ---- bn2 -> relu2 -------------------------------------------------------
    a2 = jnp.maximum(y * s2_ref[...] + b2_ref[...], 0.0)        # f32

    # ---- stage a2 in VMEM with zero row-padding (conv2's zero pad) ---------
    zeros_pad = jnp.zeros((pad, cmid), jnp.float32)
    a2_ref[:pad, :] = zeros_pad                 # rows above the image
    a2_ref[pad + hw:, :] = zeros_pad            # rows below the image
    a2_ref[pad:pad + hw, :] = a2                # real rows (8-aligned offset)

    # ---- conv3x3 (padding=1) as 9 shifted, column-masked matmuls -----------
    # Output flat index j = ho*W + wo; tap (dy,dx) reads scratch row
    #   pad + (ho+dy)*W + (wo+dx) = (pad + dy*W + dx) + j,
    # a contiguous window.  Row validity comes from the zeroed pad rows,
    # column validity (wo+dx in [0,W)) from the masks below.
    col = jax.lax.broadcasted_iota(jnp.int32, (hw, 1), 0) % w
    mask_l = col >= 1            # tap dx = -1 invalid at wo == 0
    mask_r = col <= w - 2        # tap dx = +1 invalid at wo == W-1

    acc = jnp.zeros((hw, cout), jnp.float32)
    for ky in range(3):
        for kx in range(3):
            dx = kx - 1
            off = pad + (ky - 1) * w + dx                     # static offset
            tap = a2_ref[off:off + hw, :]                     # (HW, cmid) f32
            if dx == -1:
                tap = jnp.where(mask_l, tap, 0.0)
            elif dx == 1:
                tap = jnp.where(mask_r, tap, 0.0)
            t = ky * 3 + kx
            wt = w2_ref[t * cmid:(t + 1) * cmid, :]           # (cmid, cout) bf16
            acc = acc + jnp.dot(tap.astype(jnp.bfloat16), wt,
                                preferred_element_type=jnp.float32)
    # TODO(synk): a single long-K dot over an assembled (HW, 9*cmid) patch tile
    # would fill the 256x256 MXU of v6e/v7x better; at these channel counts the
    # 9 short dots keep the kernel simple and the traffic win is already taken.

    o_ref[:, cin:] = acc.astype(o_ref.dtype)


def dense_layer_pallas(feats, params, h, w):
    """feats: (N, H*W, Cin) bf16 -> (N, H*W, Cin + growth) bf16."""
    n, hw, cin = feats.shape
    cmid = params["w1"].shape[1]
    cout = params["w2"].shape[-1]
    pad = _round_up(w + 1, 8)    # >= W+1 zero rows above/below, 8-aligned

    w2f = params["w2"].reshape(9 * cmid, cout).astype(jnp.bfloat16)
    kern = functools.partial(_dense_layer_kernel, cin=cin, cmid=cmid, cout=cout,
                             w=w, hw=hw, pad=pad)

    # Explicit VMEM budget: double-buffered activation blocks + resident
    # (constant-index, still double-buffered) weights/scales + a2 scratch.
    est = (2 * (hw * cin + hw * (cin + cout)) * 2
           + 2 * ((cin * cmid + 9 * cmid * cout) * 2 + (2 * cin + 2 * cmid) * 4)
           + (2 * pad + hw) * cmid * 4)
    vmem_limit = int(min(64 * 2 ** 20, max(16 * 2 ** 20, 2 * est)))

    return pl.pallas_call(
        kern,
        out_shape=jax.ShapeDtypeStruct((n, hw, cin + cout), jnp.bfloat16),
        grid_spec=pltpu.PrefetchScalarGridSpec(
            num_scalar_prefetch=0,
            grid=(n,),
            in_specs=[
                pl.BlockSpec((None, hw, cin), lambda i: (i, 0, 0)),
                pl.BlockSpec((1, cin), lambda i: (0, 0)),
                pl.BlockSpec((1, cin), lambda i: (0, 0)),
                pl.BlockSpec((cin, cmid), lambda i: (0, 0)),
                pl.BlockSpec((1, cmid), lambda i: (0, 0)),
                pl.BlockSpec((1, cmid), lambda i: (0, 0)),
                pl.BlockSpec((9 * cmid, cout), lambda i: (0, 0)),
            ],
            out_specs=pl.BlockSpec((None, hw, cin + cout), lambda i: (i, 0, 0)),
            scratch_shapes=[pltpu.VMEM((pad + hw + pad, cmid), jnp.float32)],
        ),
        compiler_params=pltpu.CompilerParams(
            dimension_semantics=("parallel",),      # grid = N -> both v7x TCs
            vmem_limit_bytes=vmem_limit,
        ),
    )(feats,
      params["s1"].reshape(1, -1).astype(jnp.float32),
      params["b1"].reshape(1, -1).astype(jnp.float32),
      params["w1"].astype(jnp.bfloat16),
      params["s2"].reshape(1, -1).astype(jnp.float32),
      params["b2"].reshape(1, -1).astype(jnp.float32),
      w2f)


# ----------------------------------------------------------------------------
# _DenseBlock forward (NCHW in / NCHW out, like torch.cat(features, dim=1))
# ----------------------------------------------------------------------------
@jax.jit
def dense_block_forward(x_nchw, layer_params):
    n, c0, h, w = x_nchw.shape
    feats = jnp.transpose(x_nchw, (0, 2, 3, 1)).reshape(n, h * w, c0)
    feats = feats.astype(jnp.bfloat16)
    for p in layer_params:
        # each layer appends its new channels inside the kernel (no re-concat)
        feats = dense_layer_pallas(feats, p, h, w)
    out = feats.astype(jnp.float32).reshape(n, h, w, -1)
    return jnp.transpose(out, (0, 3, 1, 2))


# ----------------------------------------------------------------------------
# Deterministic parameter init (shapes per _DenseLayer.__init__, eval-mode BN)
# ----------------------------------------------------------------------------
def init_layer_params(key, cin, growth_rate, bn_size, eps=1e-5):
    cmid = bn_size * growth_rate
    ks = jax.random.split(key, 10)
    g1 = jax.random.uniform(ks[0], (cin,), minval=0.5, maxval=1.5)
    be1 = 0.1 * jax.random.normal(ks[1], (cin,))
    rm1 = 0.1 * jax.random.normal(ks[2], (cin,))
    rv1 = jax.random.uniform(ks[3], (cin,), minval=0.5, maxval=1.5)
    w1 = jax.random.normal(ks[4], (cin, cmid)) * (2.0 / cin) ** 0.5

    g2 = jax.random.uniform(ks[5], (cmid,), minval=0.5, maxval=1.5)
    be2 = 0.1 * jax.random.normal(ks[6], (cmid,))
    rm2 = 0.1 * jax.random.normal(ks[7], (cmid,))
    rv2 = jax.random.uniform(ks[8], (cmid,), minval=0.5, maxval=1.5)
    w2 = jax.random.normal(ks[9], (3, 3, cmid, growth_rate)) * (2.0 / (9 * cmid)) ** 0.5

    s1 = g1 / jnp.sqrt(rv1 + eps)
    sh1 = be1 - rm1 * s1
    s2 = g2 / jnp.sqrt(rv2 + eps)
    sh2 = be2 - rm2 * s2
    return {"s1": s1, "b1": sh1, "w1": w1, "s2": s2, "b2": sh2, "w2": w2}


# ----------------------------------------------------------------------------
# References: true f32 semantics, and a bf16-cast-matched variant for a tight
# numerical check of the kernel itself.
# ----------------------------------------------------------------------------
def ref_dense_block_f32(x_nchw, layer_params):
    feats = [jnp.transpose(x_nchw, (0, 2, 3, 1))]
    for p in layer_params:
        x = jnp.concatenate(feats, axis=-1)
        a = jnp.maximum(x * p["s1"] + p["b1"], 0.0)
        y = jnp.einsum("nhwc,cd->nhwd", a, p["w1"])
        a2 = jnp.maximum(y * p["s2"] + p["b2"], 0.0)
        z = jax.lax.conv_general_dilated(
            a2, p["w2"], window_strides=(1, 1), padding="SAME",
            dimension_numbers=("NHWC", "HWIO", "NHWC"))
        feats.append(z)
    return jnp.transpose(jnp.concatenate(feats, axis=-1), (0, 3, 1, 2))


def ref_dense_block_bf16(x_nchw, layer_params):
    # Mirrors the kernel's cast points: bf16 storage / matmul operands,
    # f32 BN+ReLU math and f32 accumulation.
    feats = jnp.transpose(x_nchw, (0, 2, 3, 1)).astype(jnp.bfloat16)
    for p in layer_params:
        a = jnp.maximum(feats.astype(jnp.float32) * p["s1"] + p["b1"], 0.0)
        y = jnp.einsum("nhwc,cd->nhwd", a.astype(jnp.bfloat16),
                       p["w1"].astype(jnp.bfloat16),
                       preferred_element_type=jnp.float32)
        a2 = jnp.maximum(y * p["s2"] + p["b2"], 0.0)
        z = jax.lax.conv_general_dilated(
            a2.astype(jnp.bfloat16), p["w2"].astype(jnp.bfloat16),
            window_strides=(1, 1), padding="SAME",
            dimension_numbers=("NHWC", "HWIO", "NHWC"),
            preferred_element_type=jnp.float32)
        feats = jnp.concatenate([feats, z.astype(jnp.bfloat16)], axis=-1)
    return jnp.transpose(feats.astype(jnp.float32), (0, 3, 1, 2))


if __name__ == "__main__":
    # Small _DenseBlock config (drop_rate = 0, eval mode)
    n, c0, h, w = 2, 16, 16, 16
    num_layers, growth_rate, bn_size = 3, 8, 4

    key = jax.random.PRNGKey(0)
    kx, kp = jax.random.split(key)
    x = jax.random.normal(kx, (n, c0, h, w), dtype=jnp.float32)   # NCHW

    layer_keys = jax.random.split(kp, num_layers)
    layer_params = [
        init_layer_params(layer_keys[i], c0 + i * growth_rate, growth_rate, bn_size)
        for i in range(num_layers)
    ]

    out = jax.block_until_ready(dense_block_forward(x, layer_params))
    expected_c = c0 + num_layers * growth_rate
    assert out.shape == (n, expected_c, h, w), out.shape

    # Tight check against a reference with matching bf16 cast points
    # (catches any indexing / conv-tap / fusion bug).
    ref16 = jax.block_until_ready(ref_dense_block_bf16(x, layer_params))
    if not jnp.allclose(out, ref16, rtol=2e-2, atol=2e-2):
        raise AssertionError("Pallas DenseBlock does not match bf16 reference")

    # Coarser check against the true all-f32 module semantics
    # (difference is only bf16 rounding of activations/weights).
    ref32 = jax.block_until_ready(ref_dense_block_f32(x, layer_params))
    if not jnp.allclose(out, ref32, rtol=1e-1, atol=1e-1):
        raise AssertionError("Pallas DenseBlock drifts too far from f32 reference")

    print("KERNEL_OK")
</pallas_src>

<mosaic_0001>
module attributes {stable_mosaic.version = 11 : i64} {
  func.func @_dense_layer_kernel(%arg0: i32, %arg1: memref<1x256x16xbf16, #tpu.memory_space<vmem>>, %arg2: memref<1x16xf32, #tpu.memory_space<vmem>>, %arg3: memref<1x16xf32, #tpu.memory_space<vmem>>, %arg4: memref<16x32xbf16, #tpu.memory_space<vmem>>, %arg5: memref<1x32xf32, #tpu.memory_space<vmem>>, %arg6: memref<1x32xf32, #tpu.memory_space<vmem>>, %arg7: memref<288x8xbf16, #tpu.memory_space<vmem>>, %arg8: memref<1x256x24xbf16, #tpu.memory_space<vmem>>, %arg9: memref<304x32xf32, #tpu.memory_space<vmem>>) attributes {dimension_semantics = [#tpu.dimension_semantics<parallel>], iteration_bounds = array<i64: 2>, scalar_prefetch = 0 : i64, scratch_operands = 1 : i64, tpu.core_type = #tpu.core_type<tc>, window_params = [{transform_indices = @transform_0, window_bounds = array<i64: 1, 256, 16>}, {pipeline_mode = #tpu.pipeline_mode<synchronous>, transform_indices = @transform_1, window_bounds = array<i64: 1, 16>}, {pipeline_mode = #tpu.pipeline_mode<synchronous>, transform_indices = @transform_2, window_bounds = array<i64: 1, 16>}, {pipeline_mode = #tpu.pipeline_mode<synchronous>, transform_indices = @transform_3, window_bounds = array<i64: 16, 32>}, {pipeline_mode = #tpu.pipeline_mode<synchronous>, transform_indices = @transform_4, window_bounds = array<i64: 1, 32>}, {pipeline_mode = #tpu.pipeline_mode<synchronous>, transform_indices = @transform_5, window_bounds = array<i64: 1, 32>}, {pipeline_mode = #tpu.pipeline_mode<synchronous>, transform_indices = @transform_6, window_bounds = array<i64: 288, 8>}, {transform_indices = @transform_7, window_bounds = array<i64: 1, 256, 24>}]} {
    %c0 = arith.constant 0 : index
    %c0_0 = arith.constant 0 : index
    %c0_1 = arith.constant 0 : index
    %0 = vector.load %arg1[%c0, %c0_0, %c0_1] : memref<1x256x16xbf16, #tpu.memory_space<vmem>>, vector<1x256x16xbf16>
    %1 = vector.shape_cast %0 : vector<1x256x16xbf16> to vector<256x16xbf16>
    %c0_2 = arith.constant 0 : index
    %c0_3 = arith.constant 0 : index
    %c0_4 = arith.constant 0 : index
    %2 = vector.load %arg8[%c0_2, %c0_3, %c0_4] : memref<1x256x24xbf16, #tpu.memory_space<vmem>>, vector<1x256x16xbf16>
    %3 = vector.shape_cast %2 : vector<1x256x16xbf16> to vector<256x16xbf16>
    %4 = vector.shape_cast %1 : vector<256x16xbf16> to vector<1x256x16xbf16>
    tpu.vector_store %arg8[%c0_2, %c0_3, %c0_4], %4 {strides = array<i32>} : memref<1x256x24xbf16, #tpu.memory_space<vmem>>, vector<1x256x16xbf16>,
    %5 = arith.extf %1 : vector<256x16xbf16> to vector<256x16xf32>
    %c0_5 = arith.constant 0 : index
    %c0_6 = arith.constant 0 : index
    %6 = vector.load %arg2[%c0_5, %c0_6] : memref<1x16xf32, #tpu.memory_space<vmem>>, vector<1x16xf32>
    %7 = vector.broadcast %6 : vector<1x16xf32> to vector<256x16xf32>
    %8 = arith.mulf %5, %7 : vector<256x16xf32>
    %c0_7 = arith.constant 0 : index
    %c0_8 = arith.constant 0 : index
    %9 = vector.load %arg3[%c0_7, %c0_8] : memref<1x16xf32, #tpu.memory_space<vmem>>, vector<1x16xf32>
    %10 = vector.broadcast %9 : vector<1x16xf32> to vector<256x16xf32>
    %11 = arith.addf %8, %10 : vector<256x16xf32>
    %cst = arith.constant 0.000000e+00 : f32
    %12 = vector.broadcast %cst : f32 to vector<256x16xf32>
    %13 = arith.maximumf %11, %12 : vector<256x16xf32>
    %14 = arith.truncf %13 : vector<256x16xf32> to vector<256x16xbf16>
    %c0_9 = arith.constant 0 : index
    %c0_10 = arith.constant 0 : index
    %15 = vector.load %arg4[%c0_9, %c0_10] : memref<16x32xbf16, #tpu.memory_space<vmem>>, vector<16x32xbf16>
    %cst_11 = arith.constant dense<0.000000e+00> : vector<256x32xf32>
    %16 = tpu.matmul %14, %15, %cst_11 {dimension_numbers = #tpu.dot_dimension_numbers<[1], [0], [0], [1], [0, 0, 1, 1], [], []>} : vector<256x16xbf16>, vector<16x32xbf16>, vector<256x32xf32> -> vector<256x32xf32>
    %c0_12 = arith.constant 0 : index
    %c0_13 = arith.constant 0 : index
    %17 = vector.load %arg5[%c0_12, %c0_13] : memref<1x32xf32, #tpu.memory_space<vmem>>, vector<1x32xf32>
    %18 = vector.broadcast %17 : vector<1x32xf32> to vector<256x32xf32>
    %19 = arith.mulf %16, %18 : vector<256x32xf32>
    %c0_14 = arith.constant 0 : index
    %c0_15 = arith.constant 0 : index
    %20 = vector.load %arg6[%c0_14, %c0_15] : memref<1x32xf32, #tpu.memory_space<vmem>>, vector<1x32xf32>
    %21 = vector.broadcast %20 : vector<1x32xf32> to vector<256x32xf32>
    %22 = arith.addf %19, %21 : vector<256x32xf32>
    %cst_16 = arith.constant 0.000000e+00 : f32
    %23 = vector.broadcast %cst_16 : f32 to vector<256x32xf32>
    %24 = arith.maximumf %22, %23 : vector<256x32xf32>
    %cst_17 = arith.constant 0.000000e+00 : f32
    %25 = vector.broadcast %cst_17 : f32 to vector<24x32xf32>
    %c0_18 = arith.constant 0 : index
    %c0_19 = arith.constant 0 : index
    %26 = vector.load %arg9[%c0_18, %c0_19] : memref<304x32xf32, #tpu.memory_space<vmem>>, vector<24x32xf32>
    tpu.vector_store %arg9[%c0_18, %c0_19], %25 {strides = array<i32>} : memref<304x32xf32, #tpu.memory_space<vmem>>, vector<24x32xf32>,
    %c280 = arith.constant 280 : index
    %c0_20 = arith.constant 0 : index
    %27 = vector.load %arg9[%c280, %c0_20] : memref<304x32xf32, #tpu.memory_space<vmem>>, vector<24x32xf32>
    tpu.vector_store %arg9[%c280, %c0_20], %25 {strides = array<i32>} : memref<304x32xf32, #tpu.memory_space<vmem>>, vector<24x32xf32>,
    %c24 = arith.constant 24 : index
    %c0_21 = arith.constant 0 : index
    %28 = vector.load %arg9[%c24, %c0_21] : memref<304x32xf32, #tpu.memory_space<vmem>>, vector<256x32xf32>
    tpu.vector_store %arg9[%c24, %c0_21], %24 {strides = array<i32>} : memref<304x32xf32, #tpu.memory_space<vmem>>, vector<256x32xf32>,
    %29 = tpu.iota {dimensions = array<i32: 0>} : vector<256x1xi32>
    %c16_i32 = arith.constant 16 : i32
    %c0_i32 = arith.constant 0 : i32
    %30 = arith.cmpi eq, %c16_i32, %c0_i32 : i32
    %c1_i32 = arith.constant 1 : i32
    %31 = arith.select %30, %c1_i32, %c16_i32 : i32
    %32 = vector.broadcast %31 : i32 to vector<256x1xi32>
    %33 = arith.remsi %29, %32 : vector<256x1xi32>
    %c0_i32_22 = arith.constant 0 : i32
    %34 = vector.broadcast %c0_i32_22 : i32 to vector<256x1xi32>
    %35 = arith.cmpi ne, %33, %34 : vector<256x1xi32>
    %c0_i32_23 = arith.constant 0 : i32
    %36 = vector.broadcast %c0_i32_23 : i32 to vector<256x1xi32>
    %37 = arith.cmpi slt, %33, %36 : vector<256x1xi32>
    %c0_i32_24 = arith.constant 0 : i32
    %38 = arith.cmpi slt, %31, %c0_i32_24 : i32
    %39 = vector.broadcast %38 : i1 to vector<256x1xi1>
    %40 = vector.broadcast %39 : vector<256x1xi1> to vector<256x1xi1>
    %41 = arith.xori %37, %40 : vector<256x1xi1>
    %42 = arith.andi %41, %35 : vector<256x1xi1>
    %43 = vector.broadcast %31 : i32 to vector<256x1xi32>
    %44 = arith.addi %33, %43 : vector<256x1xi32>
    %45 = arith.select %42, %44, %33 : vector<256x1xi1>, vector<256x1xi32>
    %c1_i32_25 = arith.constant 1 : i32
    %46 = vector.broadcast %c1_i32_25 : i32 to vector<256x1xi32>
    %47 = arith.cmpi sge, %45, %46 : vector<256x1xi32>
    %c14_i32 = arith.constant 14 : i32
    %48 = vector.broadcast %c14_i32 : i32 to vector<256x1xi32>
    %49 = arith.cmpi sle, %45, %48 : vector<256x1xi32>
    %cst_26 = arith.constant 0.000000e+00 : f32
    %50 = vector.broadcast %cst_26 : f32 to vector<256x8xf32>
    %c7 = arith.constant 7 : index
    %c0_27 = arith.constant 0 : index
    %51 = vector.load %arg9[%c7, %c0_27] : memref<304x32xf32, #tpu.memory_space<vmem>>, vector<256x32xf32>
    %cst_28 = arith.constant 0.000000e+00 : f32
    %52 = vector.shape_cast %47 : vector<256x1xi1> to vector<256x1xi1>
    %53 = vector.broadcast %52 : vector<256x1xi1> to vector<256x32xi1>
    %54 = vector.broadcast %cst_28 : f32 to vector<256x32xf32>
    %55 = arith.select %53, %51, %54 : vector<256x32xi1>, vector<256x32xf32>
    %c0_29 = arith.constant 0 : index
    %c0_30 = arith.constant 0 : index
    %56 = vector.load %arg7[%c0_29, %c0_30] : memref<288x8xbf16, #tpu.memory_space<vmem>>, vector<32x8xbf16>
    %57 = arith.truncf %55 : vector<256x32xf32> to vector<256x32xbf16>
    %cst_31 = arith.constant dense<0.000000e+00> : vector<256x8xf32>
    %58 = tpu.matmul %57, %56, %cst_31 {dimension_numbers = #tpu.dot_dimension_numbers<[1], [0], [0], [1], [0, 0, 1, 1], [], []>} : vector<256x32xbf16>, vector<32x8xbf16>, vector<256x8xf32> -> vector<256x8xf32>
    %59 = arith.addf %50, %58 : vector<256x8xf32>
    %c8 = arith.constant 8 : index
    %c0_32 = arith.constant 0 : index
    %60 = vector.load %arg9[%c8, %c0_32] : memref<304x32xf32, #tpu.memory_space<vmem>>, vector<256x32xf32>
    %c32 = arith.constant 32 : index
    %c0_33 = arith.constant 0 : index
    %61 = vector.load %arg7[%c32, %c0_33] : memref<288x8xbf16, #tpu.memory_space<vmem>>, vector<32x8xbf16>
    %62 = arith.truncf %60 : vector<256x32xf32> to vector<256x32xbf16>
    %cst_34 = arith.constant dense<0.000000e+00> : vector<256x8xf32>
    %63 = tpu.matmul %62, %61, %cst_34 {dimension_numbers = #tpu.dot_dimension_numbers<[1], [0], [0], [1], [0, 0, 1, 1], [], []>} : vector<256x32xbf16>, vector<32x8xbf16>, vector<256x8xf32> -> vector<256x8xf32>
    %64 = arith.addf %59, %63 : vector<256x8xf32>
    %c9 = arith.constant 9 : index
    %c0_35 = arith.constant 0 : index
    %65 = vector.load %arg9[%c9, %c0_35] : memref<304x32xf32, #tpu.memory_space<vmem>>, vector<256x32xf32>
    %cst_36 = arith.constant 0.000000e+00 : f32
    %66 = vector.shape_cast %49 : vector<256x1xi1> to vector<256x1xi1>
    %67 = vector.broadcast %66 : vector<256x1xi1> to vector<256x32xi1>
    %68 = vector.broadcast %cst_36 : f32 to vector<256x32xf32>
    %69 = arith.select %67, %65, %68 : vector<256x32xi1>, vector<256x32xf32>
    %c64 = arith.constant 64 : index
    %c0_37 = arith.constant 0 : index
    %70 = vector.load %arg7[%c64, %c0_37] : memref<288x8xbf16, #tpu.memory_space<vmem>>, vector<32x8xbf16>
    %71 = arith.truncf %69 : vector<256x32xf32> to vector<256x32xbf16>
    %cst_38 = arith.constant dense<0.000000e+00> : vector<256x8xf32>
    %72 = tpu.matmul %71, %70, %cst_38 {dimension_numbers = #tpu.dot_dimension_numbers<[1], [0], [0], [1], [0, 0, 1, 1], [], []>} : vector<256x32xbf16>, vector<32x8xbf16>, vector<256x8xf32> -> vector<256x8xf32>
    %73 = arith.addf %64, %72 : vector<256x8xf32>
    %c23 = arith.constant 23 : index
    %c0_39 = arith.constant 0 : index
    %74 = vector.load %arg9[%c23, %c0_39] : memref<304x32xf32, #tpu.memory_space<vmem>>, vector<256x32xf32>
    %cst_40 = arith.constant 0.000000e+00 : f32
    %75 = vector.shape_cast %47 : vector<256x1xi1> to vector<256x1xi1>
    %76 = vector.broadcast %75 : vector<256x1xi1> to vector<256x32xi1>
    %77 = vector.broadcast %cst_40 : f32 to vector<256x32xf32>
    %78 = arith.select %76, %74, %77 : vector<256x32xi1>, vector<256x32xf32>
    %c96 = arith.constant 96 : index
    %c0_41 = arith.constant 0 : index
    %79 = vector.load %arg7[%c96, %c0_41] : memref<288x8xbf16, #tpu.memory_space<vmem>>, vector<32x8xbf16>
    %80 = arith.truncf %78 : vector<256x32xf32> to vector<256x32xbf16>
    %cst_42 = arith.constant dense<0.000000e+00> : vector<256x8xf32>
    %81 = tpu.matmul %80, %79, %cst_42 {dimension_numbers = #tpu.dot_dimension_numbers<[1], [0], [0], [1], [0, 0, 1, 1], [], []>} : vector<256x32xbf16>, vector<32x8xbf16>, vector<256x8xf32> -> vector<256x8xf32>
    %82 = arith.addf %73, %81 : vector<256x8xf32>
    %c24_43 = arith.constant 24 : index
    %c0_44 = arith.constant 0 : index
    %83 = vector.load %arg9[%c24_43, %c0_44] : memref<304x32xf32, #tpu.memory_space<vmem>>, vector<256x32xf32>
    %c128 = arith.constant 128 : index
    %c0_45 = arith.constant 0 : index
    %84 = vector.load %arg7[%c128, %c0_45] : memref<288x8xbf16, #tpu.memory_space<vmem>>, vector<32x8xbf16>
    %85 = arith.truncf %83 : vector<256x32xf32> to vector<256x32xbf16>
    %cst_46 = arith.constant dense<0.000000e+00> : vector<256x8xf32>
    %86 = tpu.matmul %85, %84, %cst_46 {dimension_numbers = #tpu.dot_dimension_numbers<[1], [0], [0], [1], [0, 0, 1, 1], [], []>} : vector<256x32xbf16>, vector<32x8xbf16>, vector<256x8xf32> -> vector<256x8xf32>
    %87 = arith.addf %82, %86 : vector<256x8xf32>
    %c25 = arith.constant 25 : index
    %c0_47 = arith.constant 0 : index
    %88 = vector.load %arg9[%c25, %c0_47] : memref<304x32xf32, #tpu.memory_space<vmem>>, vector<256x32xf32>
    %cst_48 = arith.constant 0.000000e+00 : f32
    %89 = vector.shape_cast %49 : vector<256x1xi1> to vector<256x1xi1>
    %90 = vector.broadcast %89 : vector<256x1xi1> to vector<256x32xi1>
    %91 = vector.broadcast %cst_48 : f32 to vector<256x32xf32>
    %92 = arith.select %90, %88, %91 : vector<256x32xi1>, vector<256x32xf32>
    %c160 = arith.constant 160 : index
    %c0_49 = arith.constant 0 : index
    %93 = vector.load %arg7[%c160, %c0_49] : memref<288x8xbf16, #tpu.memory_space<vmem>>, vector<32x8xbf16>
    %94 = arith.truncf %92 : vector<256x32xf32> to vector<256x32xbf16>
    %cst_50 = arith.constant dense<0.000000e+00> : vector<256x8xf32>
    %95 = tpu.matmul %94, %93, %cst_50 {dimension_numbers = #tpu.dot_dimension_numbers<[1], [0], [0], [1], [0, 0, 1, 1], [], []>} : vector<256x32xbf16>, vector<32x8xbf16>, vector<256x8xf32> -> vector<256x8xf32>
    %96 = arith.addf %87, %95 : vector<256x8xf32>
    %c39 = arith.constant 39 : index
    %c0_51 = arith.constant 0 : index
    %97 = vector.load %arg9[%c39, %c0_51] : memref<304x32xf32, #tpu.memory_space<vmem>>, vector<256x32xf32>
    %cst_52 = arith.constant 0.000000e+00 : f32
    %98 = vector.shape_cast %47 : vector<256x1xi1> to vector<256x1xi1>
    %99 = vector.broadcast %98 : vector<256x1xi1> to vector<256x32xi1>
    %100 = vector.broadcast %cst_52 : f32 to vector<256x32xf32>
    %101 = arith.select %99, %97, %100 : vector<256x32xi1>, vector<256x32xf32>
    %c192 = arith.constant 192 : index
    %c0_53 = arith.constant 0 : index
    %102 = vector.load %arg7[%c192, %c0_53] : memref<288x8xbf16, #tpu.memory_space<vmem>>, vector<32x8xbf16>
    %103 = arith.truncf %101 : vector<256x32xf32> to vector<256x32xbf16>
    %cst_54 = arith.constant dense<0.000000e+00> : vector<256x8xf32>
    %104 = tpu.matmul %103, %102, %cst_54 {dimension_numbers = #tpu.dot_dimension_numbers<[1], [0], [0], [1], [0, 0, 1, 1], [], []>} : vector<256x32xbf16>, vector<32x8xbf16>, vector<256x8xf32> -> vector<256x8xf32>
    %105 = arith.addf %96, %104 : vector<256x8xf32>
    %c40 = arith.constant 40 : index
    %c0_55 = arith.constant 0 : index
    %106 = vector.load %arg9[%c40, %c0_55] : memref<304x32xf32, #tpu.memory_space<vmem>>, vector<256x32xf32>
    %c224 = arith.constant 224 : index
    %c0_56 = arith.constant 0 : index
    %107 = vector.load %arg7[%c224, %c0_56] : memref<288x8xbf16, #tpu.memory_space<vmem>>, vector<32x8xbf16>
    %108 = arith.truncf %106 : vector<256x32xf32> to vector<256x32xbf16>
    %cst_57 = arith.constant dense<0.000000e+00> : vector<256x8xf32>
    %109 = tpu.matmul %108, %107, %cst_57 {dimension_numbers = #tpu.dot_dimension_numbers<[1], [0], [0], [1], [0, 0, 1, 1], [], []>} : vector<256x32xbf16>, vector<32x8xbf16>, vector<256x8xf32> -> vector<256x8xf32>
    %110 = arith.addf %105, %109 : vector<256x8xf32>
    %c41 = arith.constant 41 : index
    %c0_58 = arith.constant 0 : index
    %111 = vector.load %arg9[%c41, %c0_58] : memref<304x32xf32, #tpu.memory_space<vmem>>, vector<256x32xf32>
    %cst_59 = arith.constant 0.000000e+00 : f32
    %112 = vector.shape_cast %49 : vector<256x1xi1> to vector<256x1xi1>
    %113 = vector.broadcast %112 : vector<256x1xi1> to vector<256x32xi1>
    %114 = vector.broadcast %cst_59 : f32 to vector<256x32xf32>
    %115 = arith.select %113, %111, %114 : vector<256x32xi1>, vector<256x32xf32>
    %c256 = arith.constant 256 : index
    %c0_60 = arith.constant 0 : index
    %116 = vector.load %arg7[%c256, %c0_60] : memref<288x8xbf16, #tpu.memory_space<vmem>>, vector<32x8xbf16>
    %117 = arith.truncf %115 : vector<256x32xf32> to vector<256x32xbf16>
    %cst_61 = arith.constant dense<0.000000e+00> : vector<256x8xf32>
    %118 = tpu.matmul %117, %116, %cst_61 {dimension_numbers = #tpu.dot_dimension_numbers<[1], [0], [0], [1], [0, 0, 1, 1], [], []>} : vector<256x32xbf16>, vector<32x8xbf16>, vector<256x8xf32> -> vector<256x8xf32>
    %119 = arith.addf %110, %118 : vector<256x8xf32>
    %120 = arith.truncf %119 : vector<256x8xf32> to vector<256x8xbf16>
    %c0_62 = arith.constant 0 : index
    %c0_63 = arith.constant 0 : index
    %c16 = arith.constant 16 : index
    %121 = vector.load %arg8[%c0_62, %c0_63, %c16] : memref<1x256x24xbf16, #tpu.memory_space<vmem>>, vector<1x256x8xbf16>
    %122 = vector.shape_cast %121 : vector<1x256x8xbf16> to vector<256x8xbf16>
    %123 = vector.shape_cast %120 : vector<256x8xbf16> to vector<1x256x8xbf16>
    tpu.vector_store %arg8[%c0_62, %c0_63, %c16], %123 {strides = array<i32>} : memref<1x256x24xbf16, #tpu.memory_space<vmem>>, vector<1x256x8xbf16>,
    return
  }
  func.func @transform_0(%arg0: i32) -> (i32, i32, i32) {
    %c0_i32 = arith.constant 0 : i32
    %c0_i32_0 = arith.constant 0 : i32
    %c0_i32_1 = arith.constant 0 : i32
    return %arg0, %c0_i32, %c0_i32_0 : i32, i32, i32
  }
  func.func @transform_1(%arg0: i32) -> (i32, i32) {
    %c0_i32 = arith.constant 0 : i32
    %c0_i32_0 = arith.constant 0 : i32
    %c0_i32_1 = arith.constant 0 : i32
    return %c0_i32, %c0_i32_0 : i32, i32
  }
  func.func @transform_2(%arg0: i32) -> (i32, i32) {
    %c0_i32 = arith.constant 0 : i32
    %c0_i32_0 = arith.constant 0 : i32
    %c0_i32_1 = arith.constant 0 : i32
    return %c0_i32, %c0_i32_0 : i32, i32
  }
  func.func @transform_3(%arg0: i32) -> (i32, i32) {
    %c0_i32 = arith.constant 0 : i32
    %c0_i32_0 = arith.constant 0 : i32
    %c0_i32_1 = arith.constant 0 : i32
    return %c0_i32, %c0_i32_0 : i32, i32
  }
  func.func @transform_4(%arg0: i32) -> (i32, i32) {
    %c0_i32 = arith.constant 0 : i32
    %c0_i32_0 = arith.constant 0 : i32
    %c0_i32_1 = arith.constant 0 : i32
    return %c0_i32, %c0_i32_0 : i32, i32
  }
  func.func @transform_5(%arg0: i32) -> (i32, i32) {
    %c0_i32 = arith.constant 0 : i32
    %c0_i32_0 = arith.constant 0 : i32
    %c0_i32_1 = arith.constant 0 : i32
    return %c0_i32, %c0_i32_0 : i32, i32
  }
  func.func @transform_6(%arg0: i32) -> (i32, i32) {
    %c0_i32 = arith.constant 0 : i32
    %c0_i32_0 = arith.constant 0 : i32
    %c0_i32_1 = arith.constant 0 : i32
    return %c0_i32, %c0_i32_0 : i32, i32
  }
  func.func @transform_7(%arg0: i32) -> (i32, i32, i32) {
    %c0_i32 = arith.constant 0 : i32
    %c0_i32_0 = arith.constant 0 : i32
    %c0_i32_1 = arith.constant 0 : i32
    return %arg0, %c0_i32, %c0_i32_0 : i32, i32, i32
  }
}

module attributes {stable_mosaic.version = 11 : i64} {
  func.func @_dense_layer_kernel(%arg0: i32, %arg1: memref<1x256x24xbf16, #tpu.memory_space<vmem>>, %arg2: memref<1x24xf32, #tpu.memory_space<vmem>>, %arg3: memref<1x24xf32, #tpu.memory_space<vmem>>, %arg4: memref<24x32xbf16, #tpu.memory_space<vmem>>, %arg5: memref<1x32xf32, #tpu.memory_space<vmem>>, %arg6: memref<1x32xf32, #tpu.memory_space<vmem>>, %arg7: memref<288x8xbf16, #tpu.memory_space<vmem>>, %arg8: memref<1x256x32xbf16, #tpu.memory_space<vmem>>, %arg9: memref<304x32xf32, #tpu.memory_space<vmem>>) attributes {dimension_semantics = [#tpu.dimension_semantics<parallel>], iteration_bounds = array<i64: 2>, scalar_prefetch = 0 : i64, scratch_operands = 1 : i64, tpu.core_type = #tpu.core_type<tc>, window_params = [{transform_indices = @transform_0, window_bounds = array<i64: 1, 256, 24>}, {pipeline_mode = #tpu.pipeline_mode<synchronous>, transform_indices = @transform_1, window_bounds = array<i64: 1, 24>}, {pipeline_mode = #tpu.pipeline_mode<synchronous>, transform_indices = @transform_2, window_bounds = array<i64: 1, 24>}, {pipeline_mode = #tpu.pipeline_mode<synchronous>, transform_indices = @transform_3, window_bounds = array<i64: 24, 32>}, {pipeline_mode = #tpu.pipeline_mode<synchronous>, transform_indices = @transform_4, window_bounds = array<i64: 1, 32>}, {pipeline_mode = #tpu.pipeline_mode<synchronous>, transform_indices = @transform_5, window_bounds = array<i64: 1, 32>}, {pipeline_mode = #tpu.pipeline_mode<synchronous>, transform_indices = @transform_6, window_bounds = array<i64: 288, 8>}, {transform_indices = @transform_7, window_bounds = array<i64: 1, 256, 32>}]} {
    %c0 = arith.constant 0 : index
    %c0_0 = arith.constant 0 : index
    %c0_1 = arith.constant 0 : index
    %0 = vector.load %arg1[%c0, %c0_0, %c0_1] : memref<1x256x24xbf16, #tpu.memory_space<vmem>>, vector<1x256x24xbf16>
    %1 = vector.shape_cast %0 : vector<1x256x24xbf16> to vector<256x24xbf16>
    %c0_2 = arith.constant 0 : index
    %c0_3 = arith.constant 0 : index
    %c0_4 = arith.constant 0 : index
    %2 = vector.load %arg8[%c0_2, %c0_3, %c0_4] : memref<1x256x32xbf16, #tpu.memory_space<vmem>>, vector<1x256x24xbf16>
    %3 = vector.shape_cast %2 : vector<1x256x24xbf16> to vector<256x24xbf16>
    %4 = vector.shape_cast %1 : vector<256x24xbf16> to vector<1x256x24xbf16>
    tpu.vector_store %arg8[%c0_2, %c0_3, %c0_4], %4 {strides = array<i32>} : memref<1x256x32xbf16, #tpu.memory_space<vmem>>, vector<1x256x24xbf16>,
    %5 = arith.extf %1 : vector<256x24xbf16> to vector<256x24xf32>
    %c0_5 = arith.constant 0 : index
    %c0_6 = arith.constant 0 : index
    %6 = vector.load %arg2[%c0_5, %c0_6] : memref<1x24xf32, #tpu.memory_space<vmem>>, vector<1x24xf32>
    %7 = vector.broadcast %6 : vector<1x24xf32> to vector<256x24xf32>
    %8 = arith.mulf %5, %7 : vector<256x24xf32>
    %c0_7 = arith.constant 0 : index
    %c0_8 = arith.constant 0 : index
    %9 = vector.load %arg3[%c0_7, %c0_8] : memref<1x24xf32, #tpu.memory_space<vmem>>, vector<1x24xf32>
    %10 = vector.broadcast %9 : vector<1x24xf32> to vector<256x24xf32>
    %11 = arith.addf %8, %10 : vector<256x24xf32>
    %cst = arith.constant 0.000000e+00 : f32
    %12 = vector.broadcast %cst : f32 to vector<256x24xf32>
    %13 = arith.maximumf %11, %12 : vector<256x24xf32>
    %14 = arith.truncf %13 : vector<256x24xf32> to vector<256x24xbf16>
    %c0_9 = arith.constant 0 : index
    %c0_10 = arith.constant 0 : index
    %15 = vector.load %arg4[%c0_9, %c0_10] : memref<24x32xbf16, #tpu.memory_space<vmem>>, vector<24x32xbf16>
    %cst_11 = arith.constant dense<0.000000e+00> : vector<256x32xf32>
    %16 = tpu.matmul %14, %15, %cst_11 {dimension_numbers = #tpu.dot_dimension_numbers<[1], [0], [0], [1], [0, 0, 1, 1], [], []>} : vector<256x24xbf16>, vector<24x32xbf16>, vector<256x32xf32> -> vector<256x32xf32>
    %c0_12 = arith.constant 0 : index
    %c0_13 = arith.constant 0 : index
    %17 = vector.load %arg5[%c0_12, %c0_13] : memref<1x32xf32, #tpu.memory_space<vmem>>, vector<1x32xf32>
    %18 = vector.broadcast %17 : vector<1x32xf32> to vector<256x32xf32>
    %19 = arith.mulf %16, %18 : vector<256x32xf32>
    %c0_14 = arith.constant 0 : index
    %c0_15 = arith.constant 0 : index
    %20 = vector.load %arg6[%c0_14, %c0_15] : memref<1x32xf32, #tpu.memory_space<vmem>>, vector<1x32xf32>
    %21 = vector.broadcast %20 : vector<1x32xf32> to vector<256x32xf32>
    %22 = arith.addf %19, %21 : vector<256x32xf32>
    %cst_16 = arith.constant 0.000000e+00 : f32
    %23 = vector.broadcast %cst_16 : f32 to vector<256x32xf32>
    %24 = arith.maximumf %22, %23 : vector<256x32xf32>
    %cst_17 = arith.constant 0.000000e+00 : f32
    %25 = vector.broadcast %cst_17 : f32 to vector<24x32xf32>
    %c0_18 = arith.constant 0 : index
    %c0_19 = arith.constant 0 : index
    %26 = vector.load %arg9[%c0_18, %c0_19] : memref<304x32xf32, #tpu.memory_space<vmem>>, vector<24x32xf32>
    tpu.vector_store %arg9[%c0_18, %c0_19], %25 {strides = array<i32>} : memref<304x32xf32, #tpu.memory_space<vmem>>, vector<24x32xf32>,
    %c280 = arith.constant 280 : index
    %c0_20 = arith.constant 0 : index
    %27 = vector.load %arg9[%c280, %c0_20] : memref<304x32xf32, #tpu.memory_space<vmem>>, vector<24x32xf32>
    tpu.vector_store %arg9[%c280, %c0_20], %25 {strides = array<i32>} : memref<304x32xf32, #tpu.memory_space<vmem>>, vector<24x32xf32>,
    %c24 = arith.constant 24 : index
    %c0_21 = arith.constant 0 : index
    %28 = vector.load %arg9[%c24, %c0_21] : memref<304x32xf32, #tpu.memory_space<vmem>>, vector<256x32xf32>
    tpu.vector_store %arg9[%c24, %c0_21], %24 {strides = array<i32>} : memref<304x32xf32, #tpu.memory_space<vmem>>, vector<256x32xf32>,
    %29 = tpu.iota {dimensions = array<i32: 0>} : vector<256x1xi32>
    %c16_i32 = arith.constant 16 : i32
    %c0_i32 = arith.constant 0 : i32
    %30 = arith.cmpi eq, %c16_i32, %c0_i32 : i32
    %c1_i32 = arith.constant 1 : i32
    %31 = arith.select %30, %c1_i32, %c16_i32 : i32
    %32 = vector.broadcast %31 : i32 to vector<256x1xi32>
    %33 = arith.remsi %29, %32 : vector<256x1xi32>
    %c0_i32_22 = arith.constant 0 : i32
    %34 = vector.broadcast %c0_i32_22 : i32 to vector<256x1xi32>
    %35 = arith.cmpi ne, %33, %34 : vector<256x1xi32>
    %c0_i32_23 = arith.constant 0 : i32
    %36 = vector.broadcast %c0_i32_23 : i32 to vector<256x1xi32>
    %37 = arith.cmpi slt, %33, %36 : vector<256x1xi32>
    %c0_i32_24 = arith.constant 0 : i32
    %38 = arith.cmpi slt, %31, %c0_i32_24 : i32
    %39 = vector.broadcast %38 : i1 to vector<256x1xi1>
    %40 = vector.broadcast %39 : vector<256x1xi1> to vector<256x1xi1>
    %41 = arith.xori %37, %40 : vector<256x1xi1>
    %42 = arith.andi %41, %35 : vector<256x1xi1>
    %43 = vector.broadcast %31 : i32 to vector<256x1xi32>
    %44 = arith.addi %33, %43 : vector<256x1xi32>
    %45 = arith.select %42, %44, %33 : vector<256x1xi1>, vector<256x1xi32>
    %c1_i32_25 = arith.constant 1 : i32
    %46 = vector.broadcast %c1_i32_25 : i32 to vector<256x1xi32>
    %47 = arith.cmpi sge, %45, %46 : vector<256x1xi32>
    %c14_i32 = arith.constant 14 : i32
    %48 = vector.broadcast %c14_i32 : i32 to vector<256x1xi32>
    %49 = arith.cmpi sle, %45, %48 : vector<256x1xi32>
    %cst_26 = arith.constant 0.000000e+00 : f32
    %50 = vector.broadcast %cst_26 : f32 to vector<256x8xf32>
    %c7 = arith.constant 7 : index
    %c0_27 = arith.constant 0 : index
    %51 = vector.load %arg9[%c7, %c0_27] : memref<304x32xf32, #tpu.memory_space<vmem>>, vector<256x32xf32>
    %cst_28 = arith.constant 0.000000e+00 : f32
    %52 = vector.shape_cast %47 : vector<256x1xi1> to vector<256x1xi1>
    %53 = vector.broadcast %52 : vector<256x1xi1> to vector<256x32xi1>
    %54 = vector.broadcast %cst_28 : f32 to vector<256x32xf32>
    %55 = arith.select %53, %51, %54 : vector<256x32xi1>, vector<256x32xf32>
    %c0_29 = arith.constant 0 : index
    %c0_30 = arith.constant 0 : index
    %56 = vector.load %arg7[%c0_29, %c0_30] : memref<288x8xbf16, #tpu.memory_space<vmem>>, vector<32x8xbf16>
    %57 = arith.truncf %55 : vector<256x32xf32> to vector<256x32xbf16>
    %cst_31 = arith.constant dense<0.000000e+00> : vector<256x8xf32>
    %58 = tpu.matmul %57, %56, %cst_31 {dimension_numbers = #tpu.dot_dimension_numbers<[1], [0], [0], [1], [0, 0, 1, 1], [], []>} : vector<256x32xbf16>, vector<32x8xbf16>, vector<256x8xf32> -> vector<256x8xf32>
    %59 = arith.addf %50, %58 : vector<256x8xf32>
    %c8 = arith.constant 8 : index
    %c0_32 = arith.constant 0 : index
    %60 = vector.load %arg9[%c8, %c0_32] : memref<304x32xf32, #tpu.memory_space<vmem>>, vector<256x32xf32>
    %c32 = arith.constant 32 : index
    %c0_33 = arith.constant 0 : index
    %61 = vector.load %arg7[%c32, %c0_33] : memref<288x8xbf16, #tpu.memory_space<vmem>>, vector<32x8xbf16>
    %62 = arith.truncf %60 : vector<256x32xf32> to vector<256x32xbf16>
    %cst_34 = arith.constant dense<0.000000e+00> : vector<256x8xf32>
    %63 = tpu.matmul %62, %61, %cst_34 {dimension_numbers = #tpu.dot_dimension_numbers<[1], [0], [0], [1], [0, 0, 1, 1], [], []>} : vector<256x32xbf16>, vector<32x8xbf16>, vector<256x8xf32> -> vector<256x8xf32>
    %64 = arith.addf %59, %63 : vector<256x8xf32>
    %c9 = arith.constant 9 : index
    %c0_35 = arith.constant 0 : index
    %65 = vector.load %arg9[%c9, %c0_35] : memref<304x32xf32, #tpu.memory_space<vmem>>, vector<256x32xf32>
    %cst_36 = arith.constant 0.000000e+00 : f32
    %66 = vector.shape_cast %49 : vector<256x1xi1> to vector<256x1xi1>
    %67 = vector.broadcast %66 : vector<256x1xi1> to vector<256x32xi1>
    %68 = vector.broadcast %cst_36 : f32 to vector<256x32xf32>
    %69 = arith.select %67, %65, %68 : vector<256x32xi1>, vector<256x32xf32>
    %c64 = arith.constant 64 : index
    %c0_37 = arith.constant 0 : index
    %70 = vector.load %arg7[%c64, %c0_37] : memref<288x8xbf16, #tpu.memory_space<vmem>>, vector<32x8xbf16>
    %71 = arith.truncf %69 : vector<256x32xf32> to vector<256x32xbf16>
    %cst_38 = arith.constant dense<0.000000e+00> : vector<256x8xf32>
    %72 = tpu.matmul %71, %70, %cst_38 {dimension_numbers = #tpu.dot_dimension_numbers<[1], [0], [0], [1], [0, 0, 1, 1], [], []>} : vector<256x32xbf16>, vector<32x8xbf16>, vector<256x8xf32> -> vector<256x8xf32>
    %73 = arith.addf %64, %72 : vector<256x8xf32>
    %c23 = arith.constant 23 : index
    %c0_39 = arith.constant 0 : index
    %74 = vector.load %arg9[%c23, %c0_39] : memref<304x32xf32, #tpu.memory_space<vmem>>, vector<256x32xf32>
    %cst_40 = arith.constant 0.000000e+00 : f32
    %75 = vector.shape_cast %47 : vector<256x1xi1> to vector<256x1xi1>
    %76 = vector.broadcast %75 : vector<256x1xi1> to vector<256x32xi1>
    %77 = vector.broadcast %cst_40 : f32 to vector<256x32xf32>
    %78 = arith.select %76, %74, %77 : vector<256x32xi1>, vector<256x32xf32>
    %c96 = arith.constant 96 : index
    %c0_41 = arith.constant 0 : index
    %79 = vector.load %arg7[%c96, %c0_41] : memref<288x8xbf16, #tpu.memory_space<vmem>>, vector<32x8xbf16>
    %80 = arith.truncf %78 : vector<256x32xf32> to vector<256x32xbf16>
    %cst_42 = arith.constant dense<0.000000e+00> : vector<256x8xf32>
    %81 = tpu.matmul %80, %79, %cst_42 {dimension_numbers = #tpu.dot_dimension_numbers<[1], [0], [0], [1], [0, 0, 1, 1], [], []>} : vector<256x32xbf16>, vector<32x8xbf16>, vector<256x8xf32> -> vector<256x8xf32>
    %82 = arith.addf %73, %81 : vector<256x8xf32>
    %c24_43 = arith.constant 24 : index
    %c0_44 = arith.constant 0 : index
    %83 = vector.load %arg9[%c24_43, %c0_44] : memref<304x32xf32, #tpu.memory_space<vmem>>, vector<256x32xf32>
    %c128 = arith.constant 128 : index
    %c0_45 = arith.constant 0 : index
    %84 = vector.load %arg7[%c128, %c0_45] : memref<288x8xbf16, #tpu.memory_space<vmem>>, vector<32x8xbf16>
    %85 = arith.truncf %83 : vector<256x32xf32> to vector<256x32xbf16>
    %cst_46 = arith.constant dense<0.000000e+00> : vector<256x8xf32>
    %86 = tpu.matmul %85, %84, %cst_46 {dimension_numbers = #tpu.dot_dimension_numbers<[1], [0], [0], [1], [0, 0, 1, 1], [], []>} : vector<256x32xbf16>, vector<32x8xbf16>, vector<256x8xf32> -> vector<256x8xf32>
    %87 = arith.addf %82, %86 : vector<256x8xf32>
    %c25 = arith.constant 25 : index
    %c0_47 = arith.constant 0 : index
    %88 = vector.load %arg9[%c25, %c0_47] : memref<304x32xf32, #tpu.memory_space<vmem>>, vector<256x32xf32>
    %cst_48 = arith.constant 0.000000e+00 : f32
    %89 = vector.shape_cast %49 : vector<256x1xi1> to vector<256x1xi1>
    %90 = vector.broadcast %89 : vector<256x1xi1> to vector<256x32xi1>
    %91 = vector.broadcast %cst_48 : f32 to vector<256x32xf32>
    %92 = arith.select %90, %88, %91 : vector<256x32xi1>, vector<256x32xf32>
    %c160 = arith.constant 160 : index
    %c0_49 = arith.constant 0 : index
    %93 = vector.load %arg7[%c160, %c0_49] : memref<288x8xbf16, #tpu.memory_space<vmem>>, vector<32x8xbf16>
    %94 = arith.truncf %92 : vector<256x32xf32> to vector<256x32xbf16>
    %cst_50 = arith.constant dense<0.000000e+00> : vector<256x8xf32>
    %95 = tpu.matmul %94, %93, %cst_50 {dimension_numbers = #tpu.dot_dimension_numbers<[1], [0], [0], [1], [0, 0, 1, 1], [], []>} : vector<256x32xbf16>, vector<32x8xbf16>, vector<256x8xf32> -> vector<256x8xf32>
    %96 = arith.addf %87, %95 : vector<256x8xf32>
    %c39 = arith.constant 39 : index
    %c0_51 = arith.constant 0 : index
    %97 = vector.load %arg9[%c39, %c0_51] : memref<304x32xf32, #tpu.memory_space<vmem>>, vector<256x32xf32>
    %cst_52 = arith.constant 0.000000e+00 : f32
    %98 = vector.shape_cast %47 : vector<256x1xi1> to vector<256x1xi1>
    %99 = vector.broadcast %98 : vector<256x1xi1> to vector<256x32xi1>
    %100 = vector.broadcast %cst_52 : f32 to vector<256x32xf32>
    %101 = arith.select %99, %97, %100 : vector<256x32xi1>, vector<256x32xf32>
    %c192 = arith.constant 192 : index
    %c0_53 = arith.constant 0 : index
    %102 = vector.load %arg7[%c192, %c0_53] : memref<288x8xbf16, #tpu.memory_space<vmem>>, vector<32x8xbf16>
    %103 = arith.truncf %101 : vector<256x32xf32> to vector<256x32xbf16>
    %cst_54 = arith.constant dense<0.000000e+00> : vector<256x8xf32>
    %104 = tpu.matmul %103, %102, %cst_54 {dimension_numbers = #tpu.dot_dimension_numbers<[1], [0], [0], [1], [0, 0, 1, 1], [], []>} : vector<256x32xbf16>, vector<32x8xbf16>, vector<256x8xf32> -> vector<256x8xf32>
    %105 = arith.addf %96, %104 : vector<256x8xf32>
    %c40 = arith.constant 40 : index
    %c0_55 = arith.constant 0 : index
    %106 = vector.load %arg9[%c40, %c0_55] : memref<304x32xf32, #tpu.memory_space<vmem>>, vector<256x32xf32>
    %c224 = arith.constant 224 : index
    %c0_56 = arith.constant 0 : index
    %107 = vector.load %arg7[%c224, %c0_56] : memref<288x8xbf16, #tpu.memory_space<vmem>>, vector<32x8xbf16>
    %108 = arith.truncf %106 : vector<256x32xf32> to vector<256x32xbf16>
    %cst_57 = arith.constant dense<0.000000e+00> : vector<256x8xf32>
    %109 = tpu.matmul %108, %107, %cst_57 {dimension_numbers = #tpu.dot_dimension_numbers<[1], [0], [0], [1], [0, 0, 1, 1], [], []>} : vector<256x32xbf16>, vector<32x8xbf16>, vector<256x8xf32> -> vector<256x8xf32>
    %110 = arith.addf %105, %109 : vector<256x8xf32>
    %c41 = arith.constant 41 : index
    %c0_58 = arith.constant 0 : index
    %111 = vector.load %arg9[%c41, %c0_58] : memref<304x32xf32, #tpu.memory_space<vmem>>, vector<256x32xf32>
    %cst_59 = arith.constant 0.000000e+00 : f32
    %112 = vector.shape_cast %49 : vector<256x1xi1> to vector<256x1xi1>
    %113 = vector.broadcast %112 : vector<256x1xi1> to vector<256x32xi1>
    %114 = vector.broadcast %cst_59 : f32 to vector<256x32xf32>
    %115 = arith.select %113, %111, %114 : vector<256x32xi1>, vector<256x32xf32>
    %c256 = arith.constant 256 : index
    %c0_60 = arith.constant 0 : index
    %116 = vector.load %arg7[%c256, %c0_60] : memref<288x8xbf16, #tpu.memory_space<vmem>>, vector<32x8xbf16>
    %117 = arith.truncf %115 : vector<256x32xf32> to vector<256x32xbf16>
    %cst_61 = arith.constant dense<0.000000e+00> : vector<256x8xf32>
    %118 = tpu.matmul %117, %116, %cst_61 {dimension_numbers = #tpu.dot_dimension_numbers<[1], [0], [0], [1], [0, 0, 1, 1], [], []>} : vector<256x32xbf16>, vector<32x8xbf16>, vector<256x8xf32> -> vector<256x8xf32>
    %119 = arith.addf %110, %118 : vector<256x8xf32>
    %120 = arith.truncf %119 : vector<256x8xf32> to vector<256x8xbf16>
    %c0_62 = arith.constant 0 : index
    %c0_63 = arith.constant 0 : index
    %c24_64 = arith.constant 24 : index
    %121 = vector.load %arg8[%c0_62, %c0_63, %c24_64] : memref<1x256x32xbf16, #tpu.memory_space<vmem>>, vector<1x256x8xbf16>
    %122 = vector.shape_cast %121 : vector<1x256x8xbf16> to vector<256x8xbf16>
    %123 = vector.shape_cast %120 : vector<256x8xbf16> to vector<1x256x8xbf16>
    tpu.vector_store %arg8[%c0_62, %c0_63, %c24_64], %123 {strides = array<i32>} : memref<1x256x32xbf16, #tpu.memory_space<vmem>>, vector<1x256x8xbf16>,
    return
  }
  func.func @transform_0(%arg0: i32) -> (i32, i32, i32) {
    %c0_i32 = arith.constant 0 : i32
    %c0_i32_0 = arith.constant 0 : i32
    %c0_i32_1 = arith.constant 0 : i32
    return %arg0, %c0_i32, %c0_i32_0 : i32, i32, i32
  }
  func.func @transform_1(%arg0: i32) -> (i32, i32) {
    %c0_i32 = arith.constant 0 : i32
    %c0_i32_0 = arith.constant 0 : i32
    %c0_i32_1 = arith.constant 0 : i32
    return %c0_i32, %c0_i32_0 : i32, i32
  }
  func.func @transform_2(%arg0: i32) -> (i32, i32) {
    %c0_i32 = arith.constant 0 : i32
    %c0_i32_0 = arith.constant 0 : i32
    %c0_i32_1 = arith.constant 0 : i32
    return %c0_i32, %c0_i32_0 : i32, i32
  }
  func.func @transform_3(%arg0: i32) -> (i32, i32) {
    %c0_i32 = arith.constant 0 : i32
    %c0_i32_0 = arith.constant 0 : i32
    %c0_i32_1 = arith.constant 0 : i32
    return %c0_i32, %c0_i32_0 : i32, i32
  }
  func.func @transform_4(%arg0: i32) -> (i32, i32) {
    %c0_i32 = arith.constant 0 : i32
    %c0_i32_0 = arith.constant 0 : i32
    %c0_i32_1 = arith.constant 0 : i32
    return %c0_i32, %c0_i32_0 : i32, i32
  }
  func.func @transform_5(%arg0: i32) -> (i32, i32) {
    %c0_i32 = arith.constant 0 : i32
    %c0_i32_0 = arith.constant 0 : i32
    %c0_i32_1 = arith.constant 0 : i32
    return %c0_i32, %c0_i32_0 : i32, i32
  }
  func.func @transform_6(%arg0: i32) -> (i32, i32) {
    %c0_i32 = arith.constant 0 : i32
    %c0_i32_0 = arith.constant 0 : i32
    %c0_i32_1 = arith.constant 0 : i32
    return %c0_i32, %c0_i32_0 : i32, i32
  }
  func.func @transform_7(%arg0: i32) -> (i32, i32, i32) {
    %c0_i32 = arith.constant 0 : i32
    %c0_i32_0 = arith.constant 0 : i32
    %c0_i32_1 = arith.constant 0 : i32
    return %arg0, %c0_i32, %c0_i32_0 : i32, i32, i32
  }
}

module attributes {stable_mosaic.version = 11 : i64} {
  func.func @_dense_layer_kernel(%arg0: i32, %arg1: memref<1x256x32xbf16, #tpu.memory_space<vmem>>, %arg2: memref<1x32xf32, #tpu.memory_space<vmem>>, %arg3: memref<1x32xf32, #tpu.memory_space<vmem>>, %arg4: memref<32x32xbf16, #tpu.memory_space<vmem>>, %arg5: memref<1x32xf32, #tpu.memory_space<vmem>>, %arg6: memref<1x32xf32, #tpu.memory_space<vmem>>, %arg7: memref<288x8xbf16, #tpu.memory_space<vmem>>, %arg8: memref<1x256x40xbf16, #tpu.memory_space<vmem>>, %arg9: memref<304x32xf32, #tpu.memory_space<vmem>>) attributes {dimension_semantics = [#tpu.dimension_semantics<parallel>], iteration_bounds = array<i64: 2>, scalar_prefetch = 0 : i64, scratch_operands = 1 : i64, tpu.core_type = #tpu.core_type<tc>, window_params = [{transform_indices = @transform_0, window_bounds = array<i64: 1, 256, 32>}, {pipeline_mode = #tpu.pipeline_mode<synchronous>, transform_indices = @transform_1, window_bounds = array<i64: 1, 32>}, {pipeline_mode = #tpu.pipeline_mode<synchronous>, transform_indices = @transform_2, window_bounds = array<i64: 1, 32>}, {pipeline_mode = #tpu.pipeline_mode<synchronous>, transform_indices = @transform_3, window_bounds = array<i64: 32, 32>}, {pipeline_mode = #tpu.pipeline_mode<synchronous>, transform_indices = @transform_4, window_bounds = array<i64: 1, 32>}, {pipeline_mode = #tpu.pipeline_mode<synchronous>, transform_indices = @transform_5, window_bounds = array<i64: 1, 32>}, {pipeline_mode = #tpu.pipeline_mode<synchronous>, transform_indices = @transform_6, window_bounds = array<i64: 288, 8>}, {transform_indices = @transform_7, window_bounds = array<i64: 1, 256, 40>}]} {
    %c0 = arith.constant 0 : index
    %c0_0 = arith.constant 0 : index
    %c0_1 = arith.constant 0 : index
    %0 = vector.load %arg1[%c0, %c0_0, %c0_1] : memref<1x256x32xbf16, #tpu.memory_space<vmem>>, vector<1x256x32xbf16>
    %1 = vector.shape_cast %0 : vector<1x256x32xbf16> to vector<256x32xbf16>
    %c0_2 = arith.constant 0 : index
    %c0_3 = arith.constant 0 : index
    %c0_4 = arith.constant 0 : index
    %2 = vector.load %arg8[%c0_2, %c0_3, %c0_4] : memref<1x256x40xbf16, #tpu.memory_space<vmem>>, vector<1x256x32xbf16>
    %3 = vector.shape_cast %2 : vector<1x256x32xbf16> to vector<256x32xbf16>
    %4 = vector.shape_cast %1 : vector<256x32xbf16> to vector<1x256x32xbf16>
    tpu.vector_store %arg8[%c0_2, %c0_3, %c0_4], %4 {strides = array<i32>} : memref<1x256x40xbf16, #tpu.memory_space<vmem>>, vector<1x256x32xbf16>,
    %5 = arith.extf %1 : vector<256x32xbf16> to vector<256x32xf32>
    %c0_5 = arith.constant 0 : index
    %c0_6 = arith.constant 0 : index
    %6 = vector.load %arg2[%c0_5, %c0_6] : memref<1x32xf32, #tpu.memory_space<vmem>>, vector<1x32xf32>
    %7 = vector.broadcast %6 : vector<1x32xf32> to vector<256x32xf32>
    %8 = arith.mulf %5, %7 : vector<256x32xf32>
    %c0_7 = arith.constant 0 : index
    %c0_8 = arith.constant 0 : index
    %9 = vector.load %arg3[%c0_7, %c0_8] : memref<1x32xf32, #tpu.memory_space<vmem>>, vector<1x32xf32>
    %10 = vector.broadcast %9 : vector<1x32xf32> to vector<256x32xf32>
    %11 = arith.addf %8, %10 : vector<256x32xf32>
    %cst = arith.constant 0.000000e+00 : f32
    %12 = vector.broadcast %cst : f32 to vector<256x32xf32>
    %13 = arith.maximumf %11, %12 : vector<256x32xf32>
    %14 = arith.truncf %13 : vector<256x32xf32> to vector<256x32xbf16>
    %c0_9 = arith.constant 0 : index
    %c0_10 = arith.constant 0 : index
    %15 = vector.load %arg4[%c0_9, %c0_10] : memref<32x32xbf16, #tpu.memory_space<vmem>>, vector<32x32xbf16>
    %cst_11 = arith.constant dense<0.000000e+00> : vector<256x32xf32>
    %16 = tpu.matmul %14, %15, %cst_11 {dimension_numbers = #tpu.dot_dimension_numbers<[1], [0], [0], [1], [0, 0, 1, 1], [], []>} : vector<256x32xbf16>, vector<32x32xbf16>, vector<256x32xf32> -> vector<256x32xf32>
    %c0_12 = arith.constant 0 : index
    %c0_13 = arith.constant 0 : index
    %17 = vector.load %arg5[%c0_12, %c0_13] : memref<1x32xf32, #tpu.memory_space<vmem>>, vector<1x32xf32>
    %18 = vector.broadcast %17 : vector<1x32xf32> to vector<256x32xf32>
    %19 = arith.mulf %16, %18 : vector<256x32xf32>
    %c0_14 = arith.constant 0 : index
    %c0_15 = arith.constant 0 : index
    %20 = vector.load %arg6[%c0_14, %c0_15] : memref<1x32xf32, #tpu.memory_space<vmem>>, vector<1x32xf32>
    %21 = vector.broadcast %20 : vector<1x32xf32> to vector<256x32xf32>
    %22 = arith.addf %19, %21 : vector<256x32xf32>
    %cst_16 = arith.constant 0.000000e+00 : f32
    %23 = vector.broadcast %cst_16 : f32 to vector<256x32xf32>
    %24 = arith.maximumf %22, %23 : vector<256x32xf32>
    %cst_17 = arith.constant 0.000000e+00 : f32
    %25 = vector.broadcast %cst_17 : f32 to vector<24x32xf32>
    %c0_18 = arith.constant 0 : index
    %c0_19 = arith.constant 0 : index
    %26 = vector.load %arg9[%c0_18, %c0_19] : memref<304x32xf32, #tpu.memory_space<vmem>>, vector<24x32xf32>
    tpu.vector_store %arg9[%c0_18, %c0_19], %25 {strides = array<i32>} : memref<304x32xf32, #tpu.memory_space<vmem>>, vector<24x32xf32>,
    %c280 = arith.constant 280 : index
    %c0_20 = arith.constant 0 : index
    %27 = vector.load %arg9[%c280, %c0_20] : memref<304x32xf32, #tpu.memory_space<vmem>>, vector<24x32xf32>
    tpu.vector_store %arg9[%c280, %c0_20], %25 {strides = array<i32>} : memref<304x32xf32, #tpu.memory_space<vmem>>, vector<24x32xf32>,
    %c24 = arith.constant 24 : index
    %c0_21 = arith.constant 0 : index
    %28 = vector.load %arg9[%c24, %c0_21] : memref<304x32xf32, #tpu.memory_space<vmem>>, vector<256x32xf32>
    tpu.vector_store %arg9[%c24, %c0_21], %24 {strides = array<i32>} : memref<304x32xf32, #tpu.memory_space<vmem>>, vector<256x32xf32>,
    %29 = tpu.iota {dimensions = array<i32: 0>} : vector<256x1xi32>
    %c16_i32 = arith.constant 16 : i32
    %c0_i32 = arith.constant 0 : i32
    %30 = arith.cmpi eq, %c16_i32, %c0_i32 : i32
    %c1_i32 = arith.constant 1 : i32
    %31 = arith.select %30, %c1_i32, %c16_i32 : i32
    %32 = vector.broadcast %31 : i32 to vector<256x1xi32>
    %33 = arith.remsi %29, %32 : vector<256x1xi32>
    %c0_i32_22 = arith.constant 0 : i32
    %34 = vector.broadcast %c0_i32_22 : i32 to vector<256x1xi32>
    %35 = arith.cmpi ne, %33, %34 : vector<256x1xi32>
    %c0_i32_23 = arith.constant 0 : i32
    %36 = vector.broadcast %c0_i32_23 : i32 to vector<256x1xi32>
    %37 = arith.cmpi slt, %33, %36 : vector<256x1xi32>
    %c0_i32_24 = arith.constant 0 : i32
    %38 = arith.cmpi slt, %31, %c0_i32_24 : i32
    %39 = vector.broadcast %38 : i1 to vector<256x1xi1>
    %40 = vector.broadcast %39 : vector<256x1xi1> to vector<256x1xi1>
    %41 = arith.xori %37, %40 : vector<256x1xi1>
    %42 = arith.andi %41, %35 : vector<256x1xi1>
    %43 = vector.broadcast %31 : i32 to vector<256x1xi32>
    %44 = arith.addi %33, %43 : vector<256x1xi32>
    %45 = arith.select %42, %44, %33 : vector<256x1xi1>, vector<256x1xi32>
    %c1_i32_25 = arith.constant 1 : i32
    %46 = vector.broadcast %c1_i32_25 : i32 to vector<256x1xi32>
    %47 = arith.cmpi sge, %45, %46 : vector<256x1xi32>
    %c14_i32 = arith.constant 14 : i32
    %48 = vector.broadcast %c14_i32 : i32 to vector<256x1xi32>
    %49 = arith.cmpi sle, %45, %48 : vector<256x1xi32>
    %cst_26 = arith.constant 0.000000e+00 : f32
    %50 = vector.broadcast %cst_26 : f32 to vector<256x8xf32>
    %c7 = arith.constant 7 : index
    %c0_27 = arith.constant 0 : index
    %51 = vector.load %arg9[%c7, %c0_27] : memref<304x32xf32, #tpu.memory_space<vmem>>, vector<256x32xf32>
    %cst_28 = arith.constant 0.000000e+00 : f32
    %52 = vector.shape_cast %47 : vector<256x1xi1> to vector<256x1xi1>
    %53 = vector.broadcast %52 : vector<256x1xi1> to vector<256x32xi1>
    %54 = vector.broadcast %cst_28 : f32 to vector<256x32xf32>
    %55 = arith.select %53, %51, %54 : vector<256x32xi1>, vector<256x32xf32>
    %c0_29 = arith.constant 0 : index
    %c0_30 = arith.constant 0 : index
    %56 = vector.load %arg7[%c0_29, %c0_30] : memref<288x8xbf16, #tpu.memory_space<vmem>>, vector<32x8xbf16>
    %57 = arith.truncf %55 : vector<256x32xf32> to vector<256x32xbf16>
    %cst_31 = arith.constant dense<0.000000e+00> : vector<256x8xf32>
    %58 = tpu.matmul %57, %56, %cst_31 {dimension_numbers = #tpu.dot_dimension_numbers<[1], [0], [0], [1], [0, 0, 1, 1], [], []>} : vector<256x32xbf16>, vector<32x8xbf16>, vector<256x8xf32> -> vector<256x8xf32>
    %59 = arith.addf %50, %58 : vector<256x8xf32>
    %c8 = arith.constant 8 : index
    %c0_32 = arith.constant 0 : index
    %60 = vector.load %arg9[%c8, %c0_32] : memref<304x32xf32, #tpu.memory_space<vmem>>, vector<256x32xf32>
    %c32 = arith.constant 32 : index
    %c0_33 = arith.constant 0 : index
    %61 = vector.load %arg7[%c32, %c0_33] : memref<288x8xbf16, #tpu.memory_space<vmem>>, vector<32x8xbf16>
    %62 = arith.truncf %60 : vector<256x32xf32> to vector<256x32xbf16>
    %cst_34 = arith.constant dense<0.000000e+00> : vector<256x8xf32>
    %63 = tpu.matmul %62, %61, %cst_34 {dimension_numbers = #tpu.dot_dimension_numbers<[1], [0], [0], [1], [0, 0, 1, 1], [], []>} : vector<256x32xbf16>, vector<32x8xbf16>, vector<256x8xf32> -> vector<256x8xf32>
    %64 = arith.addf %59, %63 : vector<256x8xf32>
    %c9 = arith.constant 9 : index
    %c0_35 = arith.constant 0 : index
    %65 = vector.load %arg9[%c9, %c0_35] : memref<304x32xf32, #tpu.memory_space<vmem>>, vector<256x32xf32>
    %cst_36 = arith.constant 0.000000e+00 : f32
    %66 = vector.shape_cast %49 : vector<256x1xi1> to vector<256x1xi1>
    %67 = vector.broadcast %66 : vector<256x1xi1> to vector<256x32xi1>
    %68 = vector.broadcast %cst_36 : f32 to vector<256x32xf32>
    %69 = arith.select %67, %65, %68 : vector<256x32xi1>, vector<256x32xf32>
    %c64 = arith.constant 64 : index
    %c0_37 = arith.constant 0 : index
    %70 = vector.load %arg7[%c64, %c0_37] : memref<288x8xbf16, #tpu.memory_space<vmem>>, vector<32x8xbf16>
    %71 = arith.truncf %69 : vector<256x32xf32> to vector<256x32xbf16>
    %cst_38 = arith.constant dense<0.000000e+00> : vector<256x8xf32>
    %72 = tpu.matmul %71, %70, %cst_38 {dimension_numbers = #tpu.dot_dimension_numbers<[1], [0], [0], [1], [0, 0, 1, 1], [], []>} : vector<256x32xbf16>, vector<32x8xbf16>, vector<256x8xf32> -> vector<256x8xf32>
    %73 = arith.addf %64, %72 : vector<256x8xf32>
    %c23 = arith.constant 23 : index
    %c0_39 = arith.constant 0 : index
    %74 = vector.load %arg9[%c23, %c0_39] : memref<304x32xf32, #tpu.memory_space<vmem>>, vector<256x32xf32>
    %cst_40 = arith.constant 0.000000e+00 : f32
    %75 = vector.shape_cast %47 : vector<256x1xi1> to vector<256x1xi1>
    %76 = vector.broadcast %75 : vector<256x1xi1> to vector<256x32xi1>
    %77 = vector.broadcast %cst_40 : f32 to vector<256x32xf32>
    %78 = arith.select %76, %74, %77 : vector<256x32xi1>, vector<256x32xf32>
    %c96 = arith.constant 96 : index
    %c0_41 = arith.constant 0 : index
    %79 = vector.load %arg7[%c96, %c0_41] : memref<288x8xbf16, #tpu.memory_space<vmem>>, vector<32x8xbf16>
    %80 = arith.truncf %78 : vector<256x32xf32> to vector<256x32xbf16>
    %cst_42 = arith.constant dense<0.000000e+00> : vector<256x8xf32>
    %81 = tpu.matmul %80, %79, %cst_42 {dimension_numbers = #tpu.dot_dimension_numbers<[1], [0], [0], [1], [0, 0, 1, 1], [], []>} : vector<256x32xbf16>, vector<32x8xbf16>, vector<256x8xf32> -> vector<256x8xf32>
    %82 = arith.addf %73, %81 : vector<256x8xf32>
    %c24_43 = arith.constant 24 : index
    %c0_44 = arith.constant 0 : index
    %83 = vector.load %arg9[%c24_43, %c0_44] : memref<304x32xf32, #tpu.memory_space<vmem>>, vector<256x32xf32>
    %c128 = arith.constant 128 : index
    %c0_45 = arith.constant 0 : index
    %84 = vector.load %arg7[%c128, %c0_45] : memref<288x8xbf16, #tpu.memory_space<vmem>>, vector<32x8xbf16>
    %85 = arith.truncf %83 : vector<256x32xf32> to vector<256x32xbf16>
    %cst_46 = arith.constant dense<0.000000e+00> : vector<256x8xf32>
    %86 = tpu.matmul %85, %84, %cst_46 {dimension_numbers = #tpu.dot_dimension_numbers<[1], [0], [0], [1], [0, 0, 1, 1], [], []>} : vector<256x32xbf16>, vector<32x8xbf16>, vector<256x8xf32> -> vector<256x8xf32>
    %87 = arith.addf %82, %86 : vector<256x8xf32>
    %c25 = arith.constant 25 : index
    %c0_47 = arith.constant 0 : index
    %88 = vector.load %arg9[%c25, %c0_47] : memref<304x32xf32, #tpu.memory_space<vmem>>, vector<256x32xf32>
    %cst_48 = arith.constant 0.000000e+00 : f32
    %89 = vector.shape_cast %49 : vector<256x1xi1> to vector<256x1xi1>
    %90 = vector.broadcast %89 : vector<256x1xi1> to vector<256x32xi1>
    %91 = vector.broadcast %cst_48 : f32 to vector<256x32xf32>
    %92 = arith.select %90, %88, %91 : vector<256x32xi1>, vector<256x32xf32>
    %c160 = arith.constant 160 : index
    %c0_49 = arith.constant 0 : index
    %93 = vector.load %arg7[%c160, %c0_49] : memref<288x8xbf16, #tpu.memory_space<vmem>>, vector<32x8xbf16>
    %94 = arith.truncf %92 : vector<256x32xf32> to vector<256x32xbf16>
    %cst_50 = arith.constant dense<0.000000e+00> : vector<256x8xf32>
    %95 = tpu.matmul %94, %93, %cst_50 {dimension_numbers = #tpu.dot_dimension_numbers<[1], [0], [0], [1], [0, 0, 1, 1], [], []>} : vector<256x32xbf16>, vector<32x8xbf16>, vector<256x8xf32> -> vector<256x8xf32>
    %96 = arith.addf %87, %95 : vector<256x8xf32>
    %c39 = arith.constant 39 : index
    %c0_51 = arith.constant 0 : index
    %97 = vector.load %arg9[%c39, %c0_51] : memref<304x32xf32, #tpu.memory_space<vmem>>, vector<256x32xf32>
    %cst_52 = arith.constant 0.000000e+00 : f32
    %98 = vector.shape_cast %47 : vector<256x1xi1> to vector<256x1xi1>
    %99 = vector.broadcast %98 : vector<256x1xi1> to vector<256x32xi1>
    %100 = vector.broadcast %cst_52 : f32 to vector<256x32xf32>
    %101 = arith.select %99, %97, %100 : vector<256x32xi1>, vector<256x32xf32>
    %c192 = arith.constant 192 : index
    %c0_53 = arith.constant 0 : index
    %102 = vector.load %arg7[%c192, %c0_53] : memref<288x8xbf16, #tpu.memory_space<vmem>>, vector<32x8xbf16>
    %103 = arith.truncf %101 : vector<256x32xf32> to vector<256x32xbf16>
    %cst_54 = arith.constant dense<0.000000e+00> : vector<256x8xf32>
    %104 = tpu.matmul %103, %102, %cst_54 {dimension_numbers = #tpu.dot_dimension_numbers<[1], [0], [0], [1], [0, 0, 1, 1], [], []>} : vector<256x32xbf16>, vector<32x8xbf16>, vector<256x8xf32> -> vector<256x8xf32>
    %105 = arith.addf %96, %104 : vector<256x8xf32>
    %c40 = arith.constant 40 : index
    %c0_55 = arith.constant 0 : index
    %106 = vector.load %arg9[%c40, %c0_55] : memref<304x32xf32, #tpu.memory_space<vmem>>, vector<256x32xf32>
    %c224 = arith.constant 224 : index
    %c0_56 = arith.constant 0 : index
    %107 = vector.load %arg7[%c224, %c0_56] : memref<288x8xbf16, #tpu.memory_space<vmem>>, vector<32x8xbf16>
    %108 = arith.truncf %106 : vector<256x32xf32> to vector<256x32xbf16>
    %cst_57 = arith.constant dense<0.000000e+00> : vector<256x8xf32>
    %109 = tpu.matmul %108, %107, %cst_57 {dimension_numbers = #tpu.dot_dimension_numbers<[1], [0], [0], [1], [0, 0, 1, 1], [], []>} : vector<256x32xbf16>, vector<32x8xbf16>, vector<256x8xf32> -> vector<256x8xf32>
    %110 = arith.addf %105, %109 : vector<256x8xf32>
    %c41 = arith.constant 41 : index
    %c0_58 = arith.constant 0 : index
    %111 = vector.load %arg9[%c41, %c0_58] : memref<304x32xf32, #tpu.memory_space<vmem>>, vector<256x32xf32>
    %cst_59 = arith.constant 0.000000e+00 : f32
    %112 = vector.shape_cast %49 : vector<256x1xi1> to vector<256x1xi1>
    %113 = vector.broadcast %112 : vector<256x1xi1> to vector<256x32xi1>
    %114 = vector.broadcast %cst_59 : f32 to vector<256x32xf32>
    %115 = arith.select %113, %111, %114 : vector<256x32xi1>, vector<256x32xf32>
    %c256 = arith.constant 256 : index
    %c0_60 = arith.constant 0 : index
    %116 = vector.load %arg7[%c256, %c0_60] : memref<288x8xbf16, #tpu.memory_space<vmem>>, vector<32x8xbf16>
    %117 = arith.truncf %115 : vector<256x32xf32> to vector<256x32xbf16>
    %cst_61 = arith.constant dense<0.000000e+00> : vector<256x8xf32>
    %118 = tpu.matmul %117, %116, %cst_61 {dimension_numbers = #tpu.dot_dimension_numbers<[1], [0], [0], [1], [0, 0, 1, 1], [], []>} : vector<256x32xbf16>, vector<32x8xbf16>, vector<256x8xf32> -> vector<256x8xf32>
    %119 = arith.addf %110, %118 : vector<256x8xf32>
    %120 = arith.truncf %119 : vector<256x8xf32> to vector<256x8xbf16>
    %c0_62 = arith.constant 0 : index
    %c0_63 = arith.constant 0 : index
    %c32_64 = arith.constant 32 : index
    %121 = vector.load %arg8[%c0_62, %c0_63, %c32_64] : memref<1x256x40xbf16, #tpu.memory_space<vmem>>, vector<1x256x8xbf16>
    %122 = vector.shape_cast %121 : vector<1x256x8xbf16> to vector<256x8xbf16>
    %123 = vector.shape_cast %120 : vector<256x8xbf16> to vector<1x256x8xbf16>
    tpu.vector_store %arg8[%c0_62, %c0_63, %c32_64], %123 {strides = array<i32>} : memref<1x256x40xbf16, #tpu.memory_space<vmem>>, vector<1x256x8xbf16>,
    return
  }
  func.func @transform_0(%arg0: i32) -> (i32, i32, i32) {
    %c0_i32 = arith.constant 0 : i32
    %c0_i32_0 = arith.constant 0 : i32
    %c0_i32_1 = arith.constant 0 : i32
    return %arg0, %c0_i32, %c0_i32_0 : i32, i32, i32
  }
  func.func @transform_1(%arg0: i32) -> (i32, i32) {
    %c0_i32 = arith.constant 0 : i32
    %c0_i32_0 = arith.constant 0 : i32
    %c0_i32_1 = arith.constant 0 : i32
    return %c0_i32, %c0_i32_0 : i32, i32
  }
  func.func @transform_2(%arg0: i32) -> (i32, i32) {
    %c0_i32 = arith.constant 0 : i32
    %c0_i32_0 = arith.constant 0 : i32
    %c0_i32_1 = arith.constant 0 : i32
    return %c0_i32, %c0_i32_0 : i32, i32
  }
  func.func @transform_3(%arg0: i32) -> (i32, i32) {
    %c0_i32 = arith.constant 0 : i32
    %c0_i32_0 = arith.constant 0 : i32
    %c0_i32_1 = arith.constant 0 : i32
    return %c0_i32, %c0_i32_0 : i32, i32
  }
  func.func @transform_4(%arg0: i32) -> (i32, i32) {
    %c0_i32 = arith.constant 0 : i32
    %c0_i32_0 = arith.constant 0 : i32
    %c0_i32_1 = arith.constant 0 : i32
    return %c0_i32, %c0_i32_0 : i32, i32
  }
  func.func @transform_5(%arg0: i32) -> (i32, i32) {
    %c0_i32 = arith.constant 0 : i32
    %c0_i32_0 = arith.constant 0 : i32
    %c0_i32_1 = arith.constant 0 : i32
    return %c0_i32, %c0_i32_0 : i32, i32
  }
  func.func @transform_6(%arg0: i32) -> (i32, i32) {
    %c0_i32 = arith.constant 0 : i32
    %c0_i32_0 = arith.constant 0 : i32
    %c0_i32_1 = arith.constant 0 : i32
    return %c0_i32, %c0_i32_0 : i32, i32
  }
  func.func @transform_7(%arg0: i32) -> (i32, i32, i32) {
    %c0_i32 = arith.constant 0 : i32
    %c0_i32_0 = arith.constant 0 : i32
    %c0_i32_1 = arith.constant 0 : i32
    return %arg0, %c0_i32, %c0_i32_0 : i32, i32, i32
  }
}

</mosaic_0001>

<bundles_post_ra>
// kernel: dense_block_forward.4
= control target key start
LH: loop header
LB: loop body
LE: loop exit
PB: predicated region body
PF: predicated region fallthrough
CT: control target
= control target key end

     0   :  { %s5779_s24 = smov 0   ;;  %s7432_s0 = inlined_call_operand.vmem [shape: bf16[2,256,24], index: 0, kind: input, shape index: {}]   ;;  %s7433_s1 = inlined_call_operand.vmem [shape: f32[1,24], index: 1, kind: input, shape index: {}]   ;;  %s7434_s2 = inlined_call_operand.vmem [shape: f32[1,24], index: 2, kind: input, shape index: {}]   ;;  %s7435_s3 = inlined_call_operand.vmem [shape: bf16[24,32], index: 3, kind: input, shape index: {}]   ;;  %s7436_s4 = inlined_call_operand.vmem [shape: f32[1,32], index: 4, kind: input, shape index: {}]   ;;  %s7437_s5 = inlined_call_operand.vmem [shape: f32[1,32], index: 5, kind: input, shape index: {}]   ;;  %s7438_s6 = inlined_call_operand.vmem [shape: bf16[288,8], index: 6, kind: input, shape index: {}]   ;;  %s7439_s7 = inlined_call_operand.vmem [shape: bf16[2,256,32], index: 7, kind: output, shape index: {}]  }
   0x1 LB: > { %s4640_s25 = sadd.s32 4294967295, %s5735_s24   ;;  %p4644_p0 = scmp.ge.s32.totalorder %s5735_s24, 1  ;;  %s5735_s24 = sphi %s5779_s24, %s17_s24  }
   0x2   : > { %p237_p1 = scmp.lt.s32.totalorder %s5735_s24, 3 }
   0x4   : > { %p238_p2 = pnand %p4644_p0, %p237_p1 }
   0x6   : > { %241 = sbr.rel (%p238_p2) target bundleno = 925 (0x39d), region = 48 }
   0xd   : > { %v5708_v0 = vld [vmem:[%s7435_s3] sm:$0xff]   ;;  %vm564_vm0 = vcmask 1043456   ;;  %v5709_v1 = vld [vmem:[%s7435_s3 + $0x8] ss:$0 sps:$4 sm:$0xff]   ;;  %p269_p3 = scmp.lt.s32.totalorder %s4640_s25, 1  ;;  %vm515_vm1 = vcmask 195584  }
   0xe   : > { %5081 = vmatprep.subr.bf16.mxu0 %v5708_v0  ;;  %v566_v2 = vsel %vm564_vm0, %v5709_v1, 0  ;;  %v5799_v3 = vld [vmem:[%s7433_s1] ss:$0 sm:$0xff]  ;;  %vm7541_vm2 = vcmask 261120  }
   0xf   : > { %5082 = vmatpush3.bf16.msra.mxu0 %v5708_v0  ;;  %s8047_s25 = smov (!%p269_p3, %s4640_s25), 1  ;;  %v5832_v13 = vld [vmem:[%s7434_s2] ss:$0 sm:$0xff] }
  0x10   : > { %5697 = vmatprep.subr.msk.bf16.mxu0 %vm564_vm0, %v5709_v1  ;;  %s4867_s30 = sshll.u32 %s8047_s25, 7  ;;  %s5738_s25 = smov 24  }
  0x11   : > { %s5806_s12 = scalar_lea.vmem %s7432_s0, %s4867_s30  ;;  %s7169_s17 = scalar_lea.vmem %s7439_s7, %s4867_s30 }
  0x12   : > { %v5809_v4 = vld [vmem:[%s5806_s12] sm:$0xf]  ;;  %v5812_v5 = vld [vmem:[%s5806_s12 + $0x4] sm:$0xf]  ;;  %v5815_v6 = vld [vmem:[%s5806_s12 + $0x8] sm:$0xf] }
  0x13   : > { %5084 = vmatpush3.bf16.msra.mxu0 %v566_v2  ;;  %7598 = vst [vmem:[#allocation3_spill] sm:$0xff] %v5809_v4  ;;  %7599 = vst [vmem:[#allocation4_spill] sm:$0xff] %v5812_v5  ;;  %v345_v7 = vunpack.c.l.bf16 %v5809_v4  ;;  %v346_v8 = vunpack.c.l.bf16 %v5812_v5  ;;  %v5820_v9 = vld [vmem:[%s5806_s12 + $0xc] sm:$0xf]  ;;  %v347_v10 = vunpack.c.l.bf16 %v5815_v6  ;;  %v5824_v11 = vld [vmem:[%s5806_s12 + $0x10] sm:$0xf] }
  0x14   : > { %7600 = vst [vmem:[#allocation5_spill] sm:$0xff] %v5815_v6  ;;  %7601 = vst [vmem:[#allocation6_spill] sm:$0xff] %v5820_v9  ;;  %v5827_v12 = vld [vmem:[%s5806_s12 + $0x14] sm:$0xf]  ;;  %v348_v14 = vunpack.c.l.bf16 %v5820_v9  ;;  %v349_v15 = vunpack.c.l.bf16 %v5824_v11  ;;  %v5838_v17 = vld [vmem:[%s5806_s12 + $0x18] sm:$0xf] }
  0x15   : > { %7602 = vst [vmem:[#allocation7_spill] sm:$0xff] %v5824_v11  ;;  %7603 = vst [vmem:[#allocation8_spill] sm:$0xff] %v5827_v12  ;;  %v350_v16 = vunpack.c.l.bf16 %v5827_v12  ;;  %v5841_v18 = vld [vmem:[%s5806_s12 + $0x1c] sm:$0xf]  ;;  %v384_v19 = vmul.f32 %v5799_v3, %v345_v7  ;;  %v385_v20 = vmul.f32 %v5799_v3, %v346_v8  ;;  %v386_v21 = vmul.f32 %v5799_v3, %v347_v10  ;;  %v5860_v35 = vld [vmem:[%s5806_s12 + $0x20] sm:$0xf] }
  0x16   : > { %7604 = vst [vmem:[#allocation9_spill] sm:$0xff] %v5838_v17  ;;  %7605 = vst [vmem:[#allocation10_spill] sm:$0xff] %v5841_v18  ;;  %v351_v22 = vunpack.c.l.bf16 %v5838_v17  ;;  %v387_v23 = vmul.f32 %v5799_v3, %v348_v14  ;;  %v388_v24 = vmul.f32 %v5799_v3, %v349_v15  ;;  %v352_v26 = vunpack.c.l.bf16 %v5841_v18  ;;  %v5863_v36 = vld [vmem:[%s5806_s12 + $0x24] sm:$0xf]  ;;  %v5866_v37 = vld [vmem:[%s5806_s12 + $0x28] sm:$0xf] }
  0x17   : > { %v389_v25 = vmul.f32 %v5799_v3, %v350_v16  ;;  %v423_v27 = vadd.f32 %v5832_v13, %v384_v19  ;;  %v424_v28 = vadd.f32 %v5832_v13, %v385_v20  ;;  %v425_v29 = vadd.f32 %v5832_v13, %v386_v21  ;;  %7606 = vst [vmem:[#allocation11_spill] sm:$0xff] %v5860_v35  ;;  %v5870_v42 = vld [vmem:[%s5806_s12 + $0x2c] sm:$0xf]  ;;  %v5874_v47 = vld [vmem:[%s5806_s12 + $0x30] sm:$0xf] }
  0x18   : > { %v390_v30 = vmul.f32 %v5799_v3, %v351_v22  ;;  %v426_v31 = vadd.f32 %v5832_v13, %v387_v23  ;;  %v427_v32 = vadd.f32 %v5832_v13, %v388_v24  ;;  %v391_v34 = vmul.f32 %v5799_v3, %v352_v26  ;;  %7607 = vst [vmem:[#allocation12_spill] sm:$0xff] %v5863_v36  ;;  %v5879_v51 = vld [vmem:[%s5806_s12 + $0x34] sm:$0xf]  ;;  %v5888_v59 = vld [vmem:[%s5806_s12 + $0x38] sm:$0xf] }
  0x19   : > { %v428_v33 = vadd.f32 %v5832_v13, %v389_v25  ;;  %7608 = vst [vmem:[#allocation13_spill] sm:$0xff] %v5866_v37  ;;  %v455_v38 = vmax.f32 %v423_v27, 0.0  ;;  %v456_v39 = vmax.f32 %v424_v28, 0.0  ;;  %v457_v40 = vmax.f32 %v425_v29, 0.0  ;;  %7609 = vst [vmem:[#allocation14_spill] sm:$0xff] %v5870_v42 }
  0x1a   : > { %v429_v41 = vadd.f32 %v5832_v13, %v390_v30  ;;  %v458_v43 = vmax.f32 %v426_v31, 0.0  ;;  %v459_v44 = vmax.f32 %v427_v32, 0.0  ;;  %v430_v46 = vadd.f32 %v5832_v13, %v391_v34  ;;  %7610 = vst [vmem:[#allocation15_spill] sm:$0xff] %v5874_v47  ;;  %7611 = vst [vmem:[#allocation16_spill] sm:$0xff] %v5879_v51  ;;  %v5891_v60 = vld [vmem:[%s5806_s12 + $0x3c] sm:$0xf] }
  0x1b   : > { %v460_v45 = vmax.f32 %v428_v33, 0.0  ;;  %v487_v48 = vpack.c.bf16 %v456_v39, %v455_v38  ;;  %v353_v49 = vunpack.c.l.bf16 %v5860_v35  ;;  %v354_v50 = vunpack.c.l.bf16 %v5863_v36  ;;  %7612 = vst [vmem:[#allocation17_spill] sm:$0xff] %v5888_v59  ;;  %7613 = vst [vmem:[#allocation18_spill] sm:$0xff] %v5891_v60  ;;  %v5897_v1 = vld [vmem:[%s5806_s12 + $0x40] sm:$0xf] }
  0x1c   : > { %v488_v52 = vpack.c.bf16 %v458_v43, %v457_v40  ;;  %v355_v54 = vunpack.c.l.bf16 %v5866_v37  ;;  %v356_v57 = vunpack.c.l.bf16 %v5870_v42  ;;  %v357_v58 = vunpack.c.l.bf16 %v5874_v47  ;;  %7614 = vst [vmem:[#allocation19_spill] sm:$0xff] %v5897_v1  ;;  %v5905_v14 = vld [vmem:[%s5806_s12 + $0x44] sm:$0xf]  ;;  %v5917_v32 = vld [vmem:[%s5806_s12 + $0x48] sm:$0xf] }
  0x1d   : > { %v489_v53 = vpack.c.bf16 %v460_v45, %v459_v44  ;;  %5085 = vmatprep.mubr.msk.bf16.mxu0 %vm515_vm1, %v487_v48  ;;  %v392_v55 = vmul.f32 %v5799_v3, %v353_v49  ;;  %v393_v56 = vmul.f32 %v5799_v3, %v354_v50  ;;  %v461_v61 = vmax.f32 %v429_v41, 0.0  ;;  %7615 = vst [vmem:[#allocation20_spill] sm:$0xff] %v5905_v14  ;;  %v5920_v33 = vld [vmem:[%s5806_s12 + $0x4c] sm:$0xf]  ;;  %v5924_v38 = vld [vmem:[%s5806_s12 + $0x50] sm:$0xf] }
  0x1e   : > { %5086 = vmatmul.mubr.msk.bf16.vlgmr.msra.gmra.mrb[0].mxu0 %vm515_vm1, %v488_v52  ;;  %v462_v62 = vmax.f32 %v430_v46, 0.0  ;;  %v394_v63 = vmul.f32 %v5799_v3, %v355_v54  ;;  %v358_v0 = vunpack.c.l.bf16 %v5879_v51  ;;  %v395_v8 = vmul.f32 %v5799_v3, %v356_v57  ;;  %7616 = vst [vmem:[#allocation21_spill] sm:$0xff] %v5917_v32  ;;  %7617 = vst [vmem:[#allocation22_spill] sm:$0xff] %v5920_v33  ;;  %v5927_v39 = vld [vmem:[%s5806_s12 + $0x54] sm:$0xf] }
  0x1f   : > { %5089 = vmatprep.mubr.msk.bf16.mxu0 %vm515_vm1, %v489_v53  ;;  %v431_v2 = vadd.f32 %v5832_v13, %v392_v55  ;;  %v432_v7 = vadd.f32 %v5832_v13, %v393_v56  ;;  %v396_v10 = vmul.f32 %v5799_v3, %v357_v58  ;;  %v359_v22 = vunpack.c.l.bf16 %v5888_v59  ;;  %7618 = vst [vmem:[#allocation23_spill] sm:$0xff] %v5924_v38 }
  0x20   : > { %v433_v15 = vadd.f32 %v5832_v13, %v394_v63  ;;  %v397_v16 = vmul.f32 %v5799_v3, %v358_v0  ;;  %v434_v21 = vadd.f32 %v5832_v13, %v395_v8  ;;  %v490_v23 = vpack.c.bf16 %v462_v62, %v461_v61  ;;  %7619 = vst [vmem:[#allocation24_spill] sm:$0xff] %v5927_v39 }
  0x21   : > { %v463_v19 = vmax.f32 %v431_v2, 0.0  ;;  %v464_v20 = vmax.f32 %v432_v7, 0.0  ;;  %v435_v24 = vadd.f32 %v5832_v13, %v396_v10  ;;  %v360_v26 = vunpack.c.l.bf16 %v5891_v60  ;;  %v5948_v7 = vld [vmem:[%s5806_s12 + $0x58] sm:$0xf] }
  0x22   : > { %v436_v25 = vadd.f32 %v5832_v13, %v397_v16  ;;  %v361_v28 = vunpack.c.l.bf16 %v5897_v1  ;;  %v465_v29 = vmax.f32 %v433_v15, 0.0  ;;  %v466_v30 = vmax.f32 %v434_v21, 0.0  ;;  %7620 = vst [vmem:[#allocation25_spill] sm:$0xff] %v5948_v7  ;;  %v5952_v15 = vld [vmem:[%s5806_s12 + $0x5c] sm:$0xf] }
  0x23   : > { %v491_v27 = vpack.c.bf16 %v464_v20, %v463_v19  ;;  %v362_v31 = vunpack.c.l.bf16 %v5905_v14  ;;  %v398_v34 = vmul.f32 %v5799_v3, %v359_v22  ;;  %v467_v40 = vmax.f32 %v435_v24, 0.0  ;;  %7621 = vst [vmem:[#allocation26_spill] sm:$0xff] %v5952_v15  ;;  %v5955_v16 = vld [vmem:[%s5806_s12 + $0x60] sm:$0xf]  ;;  %v5958_v19 = vld [vmem:[%s5806_s12 + $0x64] sm:$0xf] }
  0x24   : > { %v468_v41 = vmax.f32 %v436_v25, 0.0  ;;  %v399_v43 = vmul.f32 %v5799_v3, %v360_v26  ;;  %v400_v44 = vmul.f32 %v5799_v3, %v361_v28  ;;  %v363_v48 = vunpack.c.l.bf16 %v5917_v32  ;;  %7622 = vst [vmem:[#allocation27_spill] sm:$0xff] %v5955_v16  ;;  %7623 = vst [vmem:[#allocation28_spill] sm:$0xff] %v5958_v19 }
  0x25   : > { %v401_v45 = vmul.f32 %v5799_v3, %v362_v31  ;;  %v437_v46 = vadd.f32 %v5832_v13, %v398_v34  ;;  %v364_v49 = vunpack.c.l.bf16 %v5920_v33  ;;  %v492_v50 = vpack.c.bf16 %v466_v30, %v465_v29 }
  0x26   : > { %5090 = vmatmul.mubr.msk.bf16.gmra.mrb[4].mxu0 %vm515_vm1, %v490_v23  ;;  %v438_v52 = vadd.f32 %v5832_v13, %v399_v43  ;;  %v365_v53 = vunpack.c.l.bf16 %v5924_v38  ;;  %v366_v54 = vunpack.c.l.bf16 %v5927_v39  ;;  %v493_v55 = vpack.c.bf16 %v468_v41, %v467_v40 }
  0x27   : > { %5093 = vmatprep.mubr.msk.bf16.mxu0 %vm515_vm1, %v491_v27  ;;  %v439_v56 = vadd.f32 %v5832_v13, %v400_v44  ;;  %v440_v57 = vadd.f32 %v5832_v13, %v401_v45  ;;  %v402_v58 = vmul.f32 %v5799_v3, %v363_v48  ;;  %v403_v61 = vmul.f32 %v5799_v3, %v364_v49  ;;  %v5978_v48 = vld [vmem:[%s5806_s12 + $0x6c] sm:$0xf]  ;;  %v5981_v49 = vld [vmem:[%s5806_s12 + $0x70] sm:$0xf] }
  0x28   : > { %v469_v62 = vmax.f32 %v437_v46, 0.0  ;;  %v470_v63 = vmax.f32 %v438_v52, 0.0  ;;  %v404_v0 = vmul.f32 %v5799_v3, %v365_v53  ;;  %v405_v2 = vmul.f32 %v5799_v3, %v366_v54  ;;  %v5975_v46 = vld [vmem:[%s5806_s12 + $0x68] sm:$0xf]  ;;  %7625 = vst [vmem:[#allocation30_spill] sm:$0xff] %v5978_v48  ;;  %7626 = vst [vmem:[#allocation31_spill] sm:$0xff] %v5981_v49 }
  0x29   : > { %v471_v8 = vmax.f32 %v439_v56, 0.0  ;;  %v472_v10 = vmax.f32 %v440_v57, 0.0  ;;  %v441_v20 = vadd.f32 %v5832_v13, %v402_v58  ;;  %v442_v21 = vadd.f32 %v5832_v13, %v403_v61  ;;  %7624 = vst [vmem:[#allocation29_spill] sm:$0xff] %v5975_v46 }
  0x2a   : > { %v367_v22 = vunpack.c.l.bf16 %v5948_v7  ;;  %v494_v23 = vpack.c.bf16 %v470_v63, %v469_v62  ;;  %v443_v24 = vadd.f32 %v5832_v13, %v404_v0  ;;  %v444_v25 = vadd.f32 %v5832_v13, %v405_v2 }
  0x2b   : > { %v368_v26 = vunpack.c.l.bf16 %v5952_v15  ;;  %v495_v27 = vpack.c.bf16 %v472_v10, %v471_v8  ;;  %v369_v28 = vunpack.c.l.bf16 %v5955_v16  ;;  %v370_v29 = vunpack.c.l.bf16 %v5958_v19 }
  0x2c   : > { %v473_v30 = vmax.f32 %v441_v20, 0.0  ;;  %v474_v31 = vmax.f32 %v442_v21, 0.0  ;;  %v406_v34 = vmul.f32 %v5799_v3, %v367_v22  ;;  %v475_v40 = vmax.f32 %v443_v24, 0.0  ;;  %v5998_v20 = vld [vmem:[%s5806_s12 + $0x78] sm:$0xf] }
  0x2d   : > { %v476_v41 = vmax.f32 %v444_v25, 0.0  ;;  %v407_v43 = vmul.f32 %v5799_v3, %v368_v26  ;;  %v408_v44 = vmul.f32 %v5799_v3, %v369_v28  ;;  %v409_v45 = vmul.f32 %v5799_v3, %v370_v29  ;;  %7628 = vst [vmem:[#allocation33_spill] sm:$0xff] %v5998_v20  ;;  %v6004_v25 = vld [vmem:[%s5806_s12 + $0x7c] sm:$0xf] }
  0x2e   : > { %5094 = vmatmul.mubr.msk.bf16.gmra.mrb[8].mxu0 %vm515_vm1, %v492_v50  ;;  %v5984_v50 = vld [vmem:[%s5806_s12 + $0x74] sm:$0xf]  ;;  %v496_v52 = vpack.c.bf16 %v474_v31, %v473_v30  ;;  %v445_v53 = vadd.f32 %v5832_v13, %v406_v34  ;;  %v371_v56 = vunpack.c.l.bf16 %v5975_v46  ;;  %v372_v57 = vunpack.c.l.bf16 %v5978_v48  ;;  %7629 = vst [vmem:[#allocation34_spill] sm:$0xff] %v6004_v25 }
  0x2f   : > { %5097 = vmatprep.mubr.msk.bf16.mxu0 %vm515_vm1, %v493_v55  ;;  %7627 = vst [vmem:[#allocation32_spill] sm:$0xff] %v5984_v50  ;;  %v497_v54 = vpack.c.bf16 %v476_v41, %v475_v40  ;;  %v446_v55 = vadd.f32 %v5832_v13, %v407_v43  ;;  %v447_v58 = vadd.f32 %v5832_v13, %v408_v44  ;;  %v373_v62 = vunpack.c.l.bf16 %v5981_v49 }
  0x30   : > { %v448_v61 = vadd.f32 %v5832_v13, %v409_v45  ;;  %v374_v63 = vunpack.c.l.bf16 %v5984_v50  ;;  %v477_v0 = vmax.f32 %v445_v53, 0.0  ;;  %v410_v8 = vmul.f32 %v5799_v3, %v371_v56 }
  0x31   : > { %v478_v2 = vmax.f32 %v446_v55, 0.0  ;;  %v411_v10 = vmul.f32 %v5799_v3, %v372_v57  ;;  %v479_v21 = vmax.f32 %v447_v58, 0.0  ;;  %v375_v26 = vunpack.c.l.bf16 %v5998_v20 }
  0x32   : > { %v480_v22 = vmax.f32 %v448_v61, 0.0  ;;  %v413_v24 = vmul.f32 %v5799_v3, %v374_v63  ;;  %v449_v28 = vadd.f32 %v5832_v13, %v410_v8  ;;  %v376_v30 = vunpack.c.l.bf16 %v6004_v25  ;;  %v5711_v63 = vld [vmem:[%s7438_s6 + $0x40] sm:$0xff]  }
  0x33   : > { %v450_v29 = vadd.f32 %v5832_v13, %v411_v10  ;;  %v414_v44 = vmul.f32 %v5799_v3, %v375_v26  ;;  %5261 = vmatprep.subr.bf16.mxu1 %v5711_v63  ;;  %v7646_v48 = vmov 0  ;;  %v7656_v15 = vmov 0 }
  0x34   : > { %v499_v31 = vpack.c.bf16 %v480_v22, %v479_v21  ;;  %v452_v40 = vadd.f32 %v5832_v13, %v413_v24  ;;  %v481_v41 = vmax.f32 %v449_v28, 0.0  ;;  %v415_v45 = vmul.f32 %v5799_v3, %v376_v30  ;;  %5262 = vmatpush3.bf16.msra.mxu1 %v5711_v63  ;;  %v6043_v22 = vld [vmem:[%s7438_s6 + $0x50] sm:$0xff]   ;;  %v6055_v24 = vld [vmem:[%s7436_s4] ss:$0 sm:$0xff] }
  0x35   : > { %v482_v43 = vmax.f32 %v450_v29, 0.0  ;;  %v453_v55 = vadd.f32 %v5832_v13, %v414_v44  ;;  %v7664_v42 = vmov 0 }
  0x36   : > { %5098 = vmatmul.mubr.msk.bf16.gmra.mrb[12].mxu0 %vm515_vm1, %v494_v23  ;;  %v412_v23 = vmul.f32 %v5799_v3, %v373_v62  ;;  %v484_v53 = vmax.f32 %v452_v40, 0.0  ;;  %v454_v56 = vadd.f32 %v5832_v13, %v415_v45  ;;  %v5737_v3 = vmov 0.0  }
  0x37   : > { %5101 = vmatprep.mubr.msk.bf16.mxu0 %vm515_vm1, %v495_v27  ;;  %v498_v27 = vpack.c.bf16 %v478_v2, %v477_v0  ;;  %v485_v58 = vmax.f32 %v453_v55, 0.0  ;;  %841 = vst.msk [vmem:[#allocation2 + $0x8] sm:$0xff] %vm7541_vm2, %v5737_v3  ;;  %842 = vst.msk [vmem:[#allocation2 + $0x10] sm:$0xff] %vm7541_vm2, %v5737_v3  ;;  %v5712_v0 = vld [vmem:[%s7438_s6 + $0x18] sm:$0xff]   ;;  %v5713_v2 = vld [vmem:[%s7438_s6 + $0x48] sm:$0xff]  }
  0x38   : > { %v451_v34 = vadd.f32 %v5832_v13, %v412_v23  ;;  %v486_v61 = vmax.f32 %v454_v56, 0.0  ;;  %840 = vst.msk [vmem:[#allocation2] sm:$0xff] %vm7541_vm2, %v5737_v3  ;;  %843 = vst.msk [vmem:[#allocation2 + $0x118] sm:$0xff] %vm7541_vm2, %v5737_v3  ;;  %v5710_v13 = vld [vmem:[%s7438_s6 + $0x10] sm:$0xff]   ;;  %5263 = vmatprep.subr.bf16.mxu1 %v5713_v2  ;;  %v6049_v23 = vld [vmem:[%s7438_s6] sm:$0xff]  }
  0x39   : > { %844 = vst.msk [vmem:[#allocation2 + $0x120] sm:$0xff] %vm7541_vm2, %v5737_v3  ;;  %845 = vst.msk [vmem:[#allocation2 + $0x128] sm:$0xff] %vm7541_vm2, %v5737_v3  ;;  %5117 = vmatprep.subr.bf16.mxu0 %v5710_v13  ;;  %5264 = vmatpush3.bf16.msra.mxu1 %v5713_v2 }
  0x3a   : > { %v502_v62 = vpack.c.bf16 %v486_v61, %v485_v58  ;;  %5118 = vmatpush3.bf16.msra.mxu0 %v5710_v13  ;;  %5297 = vmatprep.subr.bf16.mxu1 %v6043_v22 }
  0x3b   : > { %5119 = vmatprep.subr.bf16.mxu0 %v5712_v0 }
  0x3e   : > { %5102 = vmatmul.mubr.msk.bf16.gmra.mrb[16].mxu0 %vm515_vm1, %v496_v52  ;;  %v483_v52 = vmax.f32 %v451_v34, 0.0  ;;  %v1507_v8 = vld [vmem:[#allocation2 + $0x8] sm:$0xff]  ;;  %v1508_v10 = vld [vmem:[#allocation2 + $0x10] sm:$0xff] }
  0x3f   : > { %5105 = vmatprep.mubr.msk.bf16.mxu0 %vm515_vm1, %v497_v54  ;;  %v500_v54 = vpack.c.bf16 %v482_v43, %v481_v41  ;;  %5120 = vmatpush3.bf16.msra.mxu0 %v5712_v0  ;;  %v1543_v21 = vpack.c.bf16 %v1508_v10, %v1507_v8  ;;  %v878_v43 = vlaneseq }
  0x40   : > { %v501_v57 = vpack.c.bf16 %v484_v53, %v483_v52  ;;  %5153 = vmatprep.subr.bf16.mxu0 %v6049_v23 }
  0x46   : > { %5106 = vmatmul.mubr.msk.bf16.gmra.mrb[20].mxu0 %vm515_vm1, %v498_v27  ;;  %v6060_v27 = vld [vmem:[%s7437_s5] ss:$0 sm:$0xff] }
  0x47   : > { %5109 = vmatprep.mubr.msk.bf16.mxu0 %vm515_vm1, %v499_v31 }
  0x4e   : > { %5110 = vmatmul.mubr.msk.bf16.gmra.mrb[24].mxu0 %vm515_vm1, %v500_v54 }
  0x4f   : > { %5113 = vmatprep.mubr.msk.bf16.mxu0 %vm515_vm1, %v501_v57  ;;  %v6071_v57 = vshrl.u32 %v878_v43, 7 }
  0x51   : > { %v882_v0 = vadd.s32 24, %v6071_v57  ;;  %v894_v14 = vadd.s32 120, %v6071_v57  ;;  %v6292_v36 = vadd.s32 64, %v6071_v57  ;;  %v898_v6 = vadd.s32 152, %v6071_v57 }
  0x53   : > { %v936_v43 = vand.u32 15, %v882_v0 }
  0x55   : > { %vm6107_vm4 = vcmp.le.s32.totalorder %v936_v43, 14 }
  0x56   : > { %5114 = vmatmul.mubr.msk.bf16.gmra.mrb[28].mxu0 %vm515_vm1, %v502_v62 }
  0x57   : > { %5121 = vmatprep.mubr.msk.bf16.mxu0 %vm7541_vm2, %v1543_v21  ;;  %v881_v21 = vadd.s32 16, %v6071_v57 }
  0xf1   : > { %v5087_v26 = vpop.f32.mrb[0].mxu0 }
  0xf2   : > { %v738_v28 = vmul.f32 %v5087_v26, %v6055_v24  ;;  %v602_v29 = vpop.f32.mrb[1].mxu0 }
  0xf3   : > { %v736_v30 = vmul.f32 %v6055_v24, %v602_v29  ;;  %v5088_v31 = vpop.f32.mrb[2].mxu0  ;;  %v915_v29 = vand.u32 15, %v6071_v57 }
  0xf4   : > { %v777_v34 = vadd.f32 %v6060_v27, %v738_v28  ;;  %v739_v40 = vmul.f32 %v5088_v31, %v6055_v24  ;;  %v605_v41 = vpop.f32.mrb[3].mxu0 }
  0xf5   : > { %v775_v44 = vadd.f32 %v6060_v27, %v736_v30  ;;  %v737_v45 = vmul.f32 %v6055_v24, %v605_v41  ;;  %v884_v30 = vadd.s32 40, %v6071_v57  ;;  %vm6090_vm3 = vcmp.ge.s32.totalorder %v915_v29, 1 }
  0xf6   : > { %v809_v52 = vmax.f32 %v777_v34, 0.0  ;;  %v778_v53 = vadd.f32 %v6060_v27, %v739_v40 }
  0xf7   : > { %v807_v54 = vmax.f32 %v775_v44, 0.0  ;;  %v776_v55 = vadd.f32 %v6060_v27, %v737_v45  ;;  %v929_v45 = vand.u32 15, %v881_v21  ;;  %v5715_v21 = vld [vmem:[%s7438_s6 + $0x58] sm:$0xff]  }
  0xf8   : > { %848 = vst.msk [vmem:[#allocation2 + $0x28] sm:$0xff] %vm7541_vm2, %v809_v52  ;;  %v810_v56 = vmax.f32 %v778_v53, 0.0 }
  0xf9   : > { %846 = vst.msk [vmem:[#allocation2 + $0x18] sm:$0xff] %vm7541_vm2, %v807_v54  ;;  %v808_v58 = vmax.f32 %v776_v55, 0.0  ;;  %v5091_v61 = vpop.f32.mrb[4].mxu0  ;;  %v7630_v55 = vmov 0  ;;  %vm6129_vm5 = vcmp.ge.s32.totalorder %v929_v45, 1 }
  0xfa   : > { %849 = vst.msk [vmem:[#allocation2 + $0x30] sm:$0xff] %vm7541_vm2, %v810_v56  ;;  %v742_v62 = vmul.f32 %v5091_v61, %v6055_v24  ;;  %v618_v3 = vpop.f32.mrb[5].mxu0  ;;  %v7631_v55 = vsel %vm6090_vm3, 4294967295, %v7630_v55 }
  0xfb   : > { %847 = vst.msk [vmem:[#allocation2 + $0x20] sm:$0xff] %vm7541_vm2, %v808_v58  ;;  %v740_v13 = vmul.f32 %v6055_v24, %v618_v3  ;;  %v5092_v63 = vpop.f32.mrb[6].mxu0  ;;  %7632 = vst [vmem:[#allocation35_spill] sm:$0xff] %v7631_v55  ;;  %v950_v58 = vand.u32 15, %v884_v30 }
  0xfc   : > { %v781_v2 = vadd.f32 %v6060_v27, %v742_v62  ;;  %v743_v8 = vmul.f32 %v5092_v63, %v6055_v24  ;;  %v621_v10 = vpop.f32.mrb[7].mxu0  ;;  %v886_v63 = vadd.s32 56, %v6071_v57 }
  0xfd   : > { %v779_v26 = vadd.f32 %v6060_v27, %v740_v13  ;;  %v741_v28 = vmul.f32 %v6055_v24, %v621_v10  ;;  %vm6135_vm6 = vcmp.le.s32.totalorder %v950_v58, 14 }
  0xfe   : > { %v813_v31 = vmax.f32 %v781_v2, 0.0  ;;  %v782_v34 = vadd.f32 %v6060_v27, %v743_v8 }
  0xff   : > { %v811_v40 = vmax.f32 %v779_v26, 0.0  ;;  %v780_v41 = vadd.f32 %v6060_v27, %v741_v28  ;;  %v1511_v10 = vld [vmem:[#allocation2 + $0x28] sm:$0xff]  ;;  %v6105_v26 = vadd.s32 32, %v6071_v57  ;;  %v7633_v28 = vmov 0 }
 0x100   : > { %852 = vst.msk [vmem:[#allocation2 + $0x48] sm:$0xff] %vm7541_vm2, %v813_v31  ;;  %v814_v44 = vmax.f32 %v782_v34, 0.0  ;;  %v6094_v56 = vld [vmem:[#allocation2 + $0x17] sm:$0xff]  ;;  %v7634_v28 = vsel %vm6107_vm4, 4294967295, %v7633_v28 }
 0x101   : > { %850 = vst.msk [vmem:[#allocation2 + $0x38] sm:$0xff] %vm7541_vm2, %v811_v40  ;;  %v812_v52 = vmax.f32 %v780_v41, 0.0  ;;  %v5095_v53 = vpop.f32.mrb[8].mxu0  ;;  %v1512_v54 = vld [vmem:[#allocation2 + $0x30] sm:$0xff]  ;;  %v1509_v3 = vld [vmem:[#allocation2 + $0x18] sm:$0xff]  ;;  %7635 = vst [vmem:[#allocation36_spill] sm:$0xff] %v7634_v28 }
 0x102   : > { %853 = vst.msk [vmem:[#allocation2 + $0x50] sm:$0xff] %vm7541_vm2, %v814_v44  ;;  %v746_v61 = vmul.f32 %v5095_v53, %v6055_v24  ;;  %v634_v62 = vpop.f32.mrb[9].mxu0  ;;  %v1510_v13 = vld [vmem:[#allocation2 + $0x20] sm:$0xff]  ;;  %v1545_v34 = vpack.c.bf16 %v1512_v54, %v1511_v10  ;;  %v5717_v41 = vld [vmem:[%s7438_s6 + $0x8] sm:$0xff]   ;;  %v2434_v43 = vsel %vm6090_vm3, %v6094_v56, 0.0 }
 0x103   : > { %851 = vst.msk [vmem:[#allocation2 + $0x40] sm:$0xff] %vm7541_vm2, %v812_v52  ;;  %v744_v0 = vmul.f32 %v6055_v24, %v634_v62  ;;  %v5096_v2 = vpop.f32.mrb[10].mxu0  ;;  %v1544_v8 = vpack.c.bf16 %v1510_v13, %v1509_v3  ;;  %v6113_v40 = vld [vmem:[#allocation2 + $0x21] sm:$0xff]  ;;  %v6127_v54 = vld [vmem:[#allocation2 + $0x19] sm:$0xff]  ;;  %v7639_v3 = vmov 0  ;;  %v6175_v49 = vld [vmem:[#allocation2 + $0x29] sm:$0xff] }
 0x104   : > { %v785_v29 = vadd.f32 %v6060_v27, %v746_v61  ;;  %v747_v30 = vmul.f32 %v5096_v2, %v6055_v24  ;;  %v637_v31 = vpop.f32.mrb[11].mxu0  ;;  %v6118_v44 = vld [vmem:[#allocation2 + $0x1f] sm:$0xff]  ;;  %v7636_v61 = vmov 0  ;;  %v6133_v62 = vld [vmem:[#allocation2 + $0x27] sm:$0xff]  ;;  %v7640_v3 = vsel %vm6135_vm6, 4294967295, %v7639_v3 }
 0x105   : > { %v783_v52 = vadd.f32 %v6060_v27, %v744_v0  ;;  %v745_v53 = vmul.f32 %v6055_v24, %v637_v31  ;;  %5122 = vmatmul.mubr.msk.bf16.vlgmr.msra.gmra.mrb[32].mxu0 %vm7541_vm2, %v1544_v8  ;;  %5265 = vmatprep.mubr.msk.bf16.mxu1 %vm7541_vm2, %v1544_v8  ;;  %v7637_v61 = vsel %vm6129_vm5, 4294967295, %v7636_v61  ;;  %7641 = vst [vmem:[#allocation38_spill] sm:$0xff] %v7640_v3  ;;  %v964_v2 = vand.u32 15, %v886_v63  ;;  %v6156_v63 = vld [vmem:[%s7438_s6 + $0x60] sm:$0xff]  }
 0x106   : > { %7638 = vst [vmem:[#allocation37_spill] sm:$0xff] %v7637_v61  ;;  %v817_v13 = vmax.f32 %v785_v29, 0.0  ;;  %v786_v0 = vadd.f32 %v6060_v27, %v747_v30  ;;  %5125 = vmatprep.mubr.msk.bf16.mxu0 %vm7541_vm2, %v1545_v34  ;;  %5266 = vmatmul.mubr.msk.bf16.vlgmr.msra.gmra.mrb[0].mxu1 %vm7541_vm2, %v1545_v34  ;;  %v888_v8 = vadd.s32 72, %v6071_v57  ;;  %v2100_v58 = vsel %vm6107_vm4, %v6113_v40, 0.0 }
 0x107   : > { %v815_v45 = vmax.f32 %v783_v52, 0.0  ;;  %v784_v10 = vadd.f32 %v6060_v27, %v745_v53  ;;  %5298 = vmatpush3.bf16.msra.mxu1 %v6043_v22  ;;  %5154 = vmatpush3.bf16.msra.mxu0 %v6049_v23  ;;  %v6150_v29 = vpack.c.bf16 %v6118_v44, %v2434_v43  ;;  %v6158_v22 = vld [vmem:[#allocation2 + $0x2f] sm:$0xff]  ;;  %v6163_v31 = vpack.c.bf16 %v2100_v58, %v6127_v54 }
 0x108   : > { %856 = vst.msk [vmem:[#allocation2 + $0x68] sm:$0xff] %vm7541_vm2, %v817_v13  ;;  %v818_v30 = vmax.f32 %v786_v0, 0.0  ;;  %5299 = vmatprep.subr.bf16.mxu1 %v5715_v21  ;;  %5155 = vmatprep.subr.bf16.mxu0 %v5717_v41  ;;  %7643 = vst [vmem:[#allocation40_spill] sm:$0xff] %v6158_v22  ;;  %v6160_v23 = vld [vmem:[#allocation2 + $0x31] sm:$0xff]  ;;  %v2436_v34 = vsel %vm6129_vm5, %v6133_v62, 0.0  ;;  %v943_v13 = vand.u32 15, %v6105_v26 }
 0x109   : > { %7642 = vst [vmem:[#allocation39_spill] sm:$0xff] %v6150_v29  ;;  %7644 = vst [vmem:[#allocation41_spill] sm:$0xff] %v6163_v31  ;;  %v816_v43 = vmax.f32 %v784_v10, 0.0  ;;  %v5099_v52 = vpop.f32.mrb[12].mxu0  ;;  %v1516_v53 = vld [vmem:[#allocation2 + $0x50] sm:$0xff]  ;;  %v6171_v0 = vpack.c.bf16 %v6158_v22, %v2436_v34  ;;  %v1513_v20 = vld [vmem:[#allocation2 + $0x38] sm:$0xff] }
 0x10a   : > { %854 = vst.msk [vmem:[#allocation2 + $0x58] sm:$0xff] %vm7541_vm2, %v815_v45  ;;  %857 = vst.msk [vmem:[#allocation2 + $0x70] sm:$0xff] %vm7541_vm2, %v818_v30  ;;  %v750_v25 = vmul.f32 %v5099_v52, %v6055_v24  ;;  %v650_v58 = vpop.f32.mrb[13].mxu0  ;;  %v1514_v50 = vld [vmem:[#allocation2 + $0x40] sm:$0xff]  ;;  %vm6177_vm7 = vcmp.le.s32.totalorder %v964_v2, 14  ;;  %v2102_v26 = vsel %vm6135_vm6, %v6160_v23, 0.0 }
 0x10b   : > { %7645 = vst [vmem:[#allocation42_spill] sm:$0xff] %v6171_v0  ;;  %v7647_v48 = vsel %vm6177_vm7, 4294967295, %v7646_v48  ;;  %855 = vst.msk [vmem:[#allocation2 + $0x60] sm:$0xff] %vm7541_vm2, %v816_v43  ;;  %v748_v45 = vmul.f32 %v6055_v24, %v650_v58  ;;  %v5100_v10 = vpop.f32.mrb[14].mxu0  ;;  %v1546_v30 = vpack.c.bf16 %v1514_v50, %v1513_v20  ;;  %v1515_v34 = vld [vmem:[#allocation2 + $0x48] sm:$0xff]  ;;  %5300 = vmatpush3.bf16.msra.mxu1 %v5715_v21  ;;  %5156 = vmatpush3.bf16.msra.mxu0 %v5717_v41  ;;  %v6189_v2 = vld [vmem:[%s7438_s6 + $0x20] sm:$0xff]  }
 0x10c   : > { %7648 = vst [vmem:[#allocation43_spill] sm:$0xff] %v7647_v48  ;;  %v978_v52 = vand.u32 15, %v888_v8  ;;  %7649 = vst [vmem:[#allocation44_spill] sm:$0xff] %v6189_v2  ;;  %v6192_v46 = vpack.c.bf16 %v2102_v26, %v6175_v49  ;;  %v789_v19 = vadd.f32 %v6060_v27, %v750_v25  ;;  %v751_v43 = vmul.f32 %v5100_v10, %v6055_v24  ;;  %v653_v16 = vpop.f32.mrb[15].mxu0  ;;  %v6197_v50 = vld [vmem:[#allocation2 + $0x41] sm:$0xff]  ;;  %v6204_v8 = vld [vmem:[#allocation2 + $0x39] sm:$0xff] }
 0x10d   : > { %v1547_v58 = vpack.c.bf16 %v1516_v53, %v1515_v34  ;;  %5333 = vmatprep.subr.bf16.mxu1 %v6156_v63  ;;  %v890_v20 = vadd.s32 88, %v6071_v57  ;;  %v787_v21 = vadd.f32 %v6060_v27, %v748_v45  ;;  %v749_v41 = vmul.f32 %v6055_v24, %v653_v16  ;;  %5126 = vmatmul.mubr.msk.bf16.gmra.mrb[36].mxu0 %vm7541_vm2, %v1546_v30  ;;  %v6206_v25 = vld [vmem:[#allocation2 + $0x37] sm:$0xff]  ;;  %v6216_v16 = vld [vmem:[#allocation2 + $0x3f] sm:$0xff]  ;;  %v6242_v32 = vld [vmem:[#allocation2 + $0x49] sm:$0xff] }
 0x10e   : > { %7650 = vst [vmem:[#allocation45_spill] sm:$0xff] %v6192_v46  ;;  %5269 = vmatprep.mubr.msk.bf16.mxu1 %vm7541_vm2, %v1546_v30  ;;  %7651 = vst [vmem:[#allocation46_spill] sm:$0xff] %v6206_v25  ;;  %v892_v53 = vadd.s32 104, %v6071_v57  ;;  %v821_v26 = vmax.f32 %v789_v19, 0.0  ;;  %v790_v10 = vadd.f32 %v6060_v27, %v751_v43  ;;  %vm6212_vm8 = vcmp.ge.s32.totalorder %v943_v13, 1  ;;  %5189 = vmatprep.subr.bf16.mxu0 %v6189_v2 }
 0x10f   : > { %5129 = vmatprep.mubr.msk.bf16.mxu0 %vm7541_vm2, %v1547_v58  ;;  %5270 = vmatmul.mubr.msk.bf16.gmra.mrb[4].mxu1 %vm7541_vm2, %v1547_v58  ;;  %v7652_v45 = vmov 0  ;;  %7655 = vst [vmem:[#allocation48_spill] sm:$0xff] %v6216_v16  ;;  %v819_v30 = vmax.f32 %v787_v21, 0.0  ;;  %v788_v34 = vadd.f32 %v6060_v27, %v749_v41  ;;  %vm6219_vm9 = vcmp.le.s32.totalorder %v978_v52, 14  ;;  %7661 = vst [vmem:[#allocation52_spill] sm:$0xff] %v6242_v32 }
 0x110   : > { %v7653_v45 = vsel %vm6212_vm8, 4294967295, %v7652_v45  ;;  %v7657_v15 = vsel %vm6219_vm9, 4294967295, %v7656_v15  ;;  %v2104_v19 = vsel %vm6177_vm7, %v6197_v50, 0.0  ;;  %860 = vst.msk [vmem:[#allocation2 + $0x88] sm:$0xff] %vm7541_vm2, %v821_v26  ;;  %v822_v13 = vmax.f32 %v790_v10, 0.0 }
 0x111   : > { %7654 = vst [vmem:[#allocation47_spill] sm:$0xff] %v7653_v45  ;;  %7658 = vst [vmem:[#allocation49_spill] sm:$0xff] %v7657_v15  ;;  %v6228_v43 = vld [vmem:[#allocation2 + $0x51] sm:$0xff]  ;;  %v992_v58 = vand.u32 15, %v890_v20  ;;  %v6231_v21 = vpack.c.bf16 %v2104_v19, %v6204_v8  ;;  %v2438_v52 = vsel %vm6212_vm8, %v6206_v25, 0.0  ;;  %v820_v41 = vmax.f32 %v788_v34, 0.0 }
 0x112   : > { %858 = vst.msk [vmem:[#allocation2 + $0x78] sm:$0xff] %vm7541_vm2, %v819_v30  ;;  %v5103_v7 = vpop.f32.mrb[16].mxu0  ;;  %v1520_v39 = vld [vmem:[#allocation2 + $0x70] sm:$0xff]  ;;  %v1006_v38 = vand.u32 15, %v892_v53  ;;  %v6238_v33 = vpack.c.bf16 %v6216_v16, %v2438_v52  ;;  %861 = vst.msk [vmem:[#allocation2 + $0x90] sm:$0xff] %vm7541_vm2, %v822_v13  ;;  %v1517_v10 = vld [vmem:[#allocation2 + $0x58] sm:$0xff] }
 0x113   : > { %7659 = vst [vmem:[#allocation50_spill] sm:$0xff] %v6231_v21  ;;  %v754_v20 = vmul.f32 %v5103_v7, %v6055_v24  ;;  %v666_v26 = vpop.f32.mrb[17].mxu0  ;;  %v1518_v19 = vld [vmem:[#allocation2 + $0x60] sm:$0xff]  ;;  %v2106_v30 = vsel %vm6219_vm9, %v6228_v43, 0.0  ;;  %859 = vst.msk [vmem:[#allocation2 + $0x80] sm:$0xff] %vm7541_vm2, %v820_v41  ;;  %v1519_v13 = vld [vmem:[#allocation2 + $0x68] sm:$0xff] }
 0x114   : > { %7660 = vst [vmem:[#allocation51_spill] sm:$0xff] %v6238_v33  ;;  %v752_v53 = vmul.f32 %v6055_v24, %v666_v26  ;;  %v5104_v34 = vpop.f32.mrb[18].mxu0  ;;  %v1548_v52 = vpack.c.bf16 %v1518_v19, %v1517_v10  ;;  %v6251_v7 = vpack.c.bf16 %v2106_v30, %v6242_v32  ;;  %v1549_v51 = vpack.c.bf16 %v1520_v39, %v1519_v13  ;;  %v6255_v47 = vld [vmem:[#allocation2 + $0x61] sm:$0xff]  ;;  %v6269_v39 = vld [vmem:[#allocation2 + $0x59] sm:$0xff] }
 0x115   : > { %v793_v1 = vadd.f32 %v6060_v27, %v754_v20  ;;  %v755_v60 = vmul.f32 %v5104_v34, %v6055_v24  ;;  %v669_v59 = vpop.f32.mrb[19].mxu0  ;;  %7663 = vst [vmem:[#allocation54_spill] sm:$0xff] %v6255_v47  ;;  %vm6257_vm10 = vcmp.le.s32.totalorder %v992_v58, 14  ;;  %v6266_v20 = vadd.s32 8, %v6071_v57  ;;  %7667 = vst [vmem:[#allocation56_spill] sm:$0xff] %v6269_v39 }
 0x116   : > { %7662 = vst [vmem:[#allocation53_spill] sm:$0xff] %v6251_v7  ;;  %v7665_v42 = vsel %vm6257_vm10, 4294967295, %v7664_v42  ;;  %v791_v41 = vadd.f32 %v6060_v27, %v752_v53  ;;  %v753_v26 = vmul.f32 %v6055_v24, %v669_v59  ;;  %5130 = vmatmul.mubr.msk.bf16.gmra.mrb[40].mxu0 %vm7541_vm2, %v1548_v52  ;;  %5273 = vmatprep.mubr.msk.bf16.mxu1 %vm7541_vm2, %v1548_v52  ;;  %v885_v10 = vadd.s32 48, %v6071_v57 }
 0x117   : > { %7666 = vst [vmem:[#allocation55_spill] sm:$0xff] %v7665_v42  ;;  %v825_v19 = vmax.f32 %v793_v1, 0.0  ;;  %v794_v58 = vadd.f32 %v6060_v27, %v755_v60  ;;  %5133 = vmatprep.mubr.msk.bf16.mxu0 %vm7541_vm2, %v1549_v51  ;;  %5274 = vmatmul.mubr.msk.bf16.gmra.mrb[8].mxu1 %vm7541_vm2, %v1549_v51  ;;  %vm6274_vm11 = vcmp.le.s32.totalorder %v1006_v38, 14  ;;  %v1020_v30 = vand.u32 15, %v894_v14 }
 0x118   : > { %v823_v53 = vmax.f32 %v791_v41, 0.0  ;;  %v792_v34 = vadd.f32 %v6060_v27, %v753_v26  ;;  %v896_v52 = vadd.s32 136, %v6071_v57  ;;  %v2108_v1 = vsel %vm6257_vm10, %v6255_v47, 0.0  ;;  %v1359_v47 = vld [vmem:[#allocation2 + $0x7] sm:$0xff] }
 0x119   : > { %864 = vst.msk [vmem:[#allocation2 + $0xa8] sm:$0xff] %vm7541_vm2, %v825_v19  ;;  %v826_v60 = vmax.f32 %v794_v58, 0.0  ;;  %v6284_v13 = vld [vmem:[#allocation2 + $0x71] sm:$0xff]  ;;  %v6287_v51 = vpack.c.bf16 %v2108_v1, %v6269_v39  ;;  %v5107_v38 = vpop.f32.mrb[20].mxu0  ;;  %v957_v37 = vand.u32 15, %v885_v10  ;;  %v6296_v1 = vld [vmem:[#allocation2 + $0x69] sm:$0xff] }
 0x11a   : > { %7670 = vst [vmem:[#allocation57_spill] sm:$0xff] %v6284_v13  ;;  %862 = vst.msk [vmem:[#allocation2 + $0x98] sm:$0xff] %vm7541_vm2, %v823_v53  ;;  %v824_v14 = vmax.f32 %v792_v34, 0.0  ;;  %v1524_v41 = vld [vmem:[#allocation2 + $0x90] sm:$0xff]  ;;  %v758_v19 = vmul.f32 %v5107_v38, %v6055_v24  ;;  %v682_v58 = vpop.f32.mrb[21].mxu0  ;;  %v1521_v35 = vld [vmem:[#allocation2 + $0x78] sm:$0xff] }
 0x11b   : > { %7671 = vst [vmem:[#allocation58_spill] sm:$0xff] %v6287_v51  ;;  %865 = vst.msk [vmem:[#allocation2 + $0xb0] sm:$0xff] %vm7541_vm2, %v826_v60  ;;  %v1522_v18 = vld [vmem:[#allocation2 + $0x80] sm:$0xff]  ;;  %vm6298_vm12 = vcmp.le.s32.totalorder %v1020_v30, 14  ;;  %v7673_v53 = vmov 0  ;;  %v2110_v10 = vsel %vm6274_vm11, %v6284_v13, 0.0  ;;  %v756_v34 = vmul.f32 %v6055_v24, %v682_v58 }
 0x11c   : > { %7672 = vst [vmem:[#allocation59_spill] sm:$0xff] %v6296_v1  ;;  %v7674_v53 = vsel %vm6298_vm12, 4294967295, %v7673_v53  ;;  %863 = vst.msk [vmem:[#allocation2 + $0xa0] sm:$0xff] %vm7541_vm2, %v824_v14  ;;  %v5108_v60 = vpop.f32.mrb[22].mxu0  ;;  %v1550_v26 = vpack.c.bf16 %v1522_v18, %v1521_v35  ;;  %v1523_v38 = vld [vmem:[#allocation2 + $0x88] sm:$0xff]  ;;  %v1034_v17 = vand.u32 15, %v896_v52  ;;  %v6308_v12 = vpack.c.bf16 %v2110_v10, %v6296_v1 }
 0x11d   : > { %v797_v30 = vadd.f32 %v6060_v27, %v758_v19  ;;  %v759_v11 = vmul.f32 %v5108_v60, %v6055_v24  ;;  %v685_v9 = vpop.f32.mrb[23].mxu0  ;;  %v1551_v5 = vpack.c.bf16 %v1524_v41, %v1523_v38  ;;  %v6312_v4 = vld [vmem:[#allocation2 + $0x81] sm:$0xff]  ;;  %v795_v14 = vadd.f32 %v6060_v27, %v756_v34  ;;  %v6325_v52 = vld [vmem:[#allocation2 + $0x79] sm:$0xff]  ;;  %v6363_v51 = vld [vmem:[#allocation2 + $0x89] sm:$0xff] }
 0x11e   : > { %7675 = vst [vmem:[#allocation60_spill] sm:$0xff] %v6308_v12  ;;  %7676 = vst [vmem:[#allocation61_spill] sm:$0xff] %v6312_v4  ;;  %v757_v58 = vmul.f32 %v6055_v24, %v685_v9  ;;  %5134 = vmatmul.mubr.msk.bf16.gmra.mrb[44].mxu0 %vm7541_vm2, %v1550_v26  ;;  %5277 = vmatprep.mubr.msk.bf16.mxu1 %vm7541_vm2, %v1550_v26  ;;  %vm6319_vm13 = vcmp.ge.s32.totalorder %v957_v37, 1  ;;  %v7677_v18 = vmov 0  ;;  %v6323_v35 = vld [vmem:[#allocation2 + $0x47] sm:$0xff]  ;;  %v900_v41 = vadd.s32 168, %v6071_v57 }
 0x11f   : > { %v7678_v18 = vsel %vm6319_vm13, 4294967295, %v7677_v18  ;;  %7680 = vst [vmem:[#allocation63_spill] sm:$0xff] %v6323_v35  ;;  %7681 = vst [vmem:[#allocation64_spill] sm:$0xff] %v6325_v52  ;;  %v829_v19 = vmax.f32 %v797_v30, 0.0  ;;  %v798_v10 = vadd.f32 %v6060_v27, %v759_v11  ;;  %5137 = vmatprep.mubr.msk.bf16.mxu0 %vm7541_vm2, %v1551_v5  ;;  %5278 = vmatmul.mubr.msk.bf16.gmra.mrb[12].mxu1 %vm7541_vm2, %v1551_v5  ;;  %v971_v9 = vand.u32 15, %v6292_v36  ;;  %v6344_v5 = vld [vmem:[#allocation2 + $0x4f] sm:$0xff] }
 0x120   : > { %7679 = vst [vmem:[#allocation62_spill] sm:$0xff] %v7678_v18  ;;  %v6333_v37 = vadd.s32 80, %v6071_v57  ;;  %v827_v26 = vmax.f32 %v795_v14, 0.0  ;;  %v796_v34 = vadd.f32 %v6060_v27, %v757_v58  ;;  %vm6336_vm14 = vcmp.le.s32.totalorder %v1034_v17, 14  ;;  %7684 = vst [vmem:[#allocation65_spill] sm:$0xff] %v6344_v5  ;;  %v7806_v18 = vld [vmem:[#allocation54_spill] sm:$0xff] }
 0x121   : > { %v7682_v60 = vmov 0  ;;  %v2112_v11 = vsel %vm6298_vm12, %v6312_v4, 0.0  ;;  %868 = vst.msk [vmem:[#allocation2 + $0xc8] sm:$0xff] %vm7541_vm2, %v829_v19  ;;  %v830_v38 = vmax.f32 %v798_v10, 0.0  ;;  %v6346_v36 = vld [vmem:[#allocation2 + $0x91] sm:$0xff]  ;;  %v1048_v30 = vand.u32 15, %v898_v6 }
 0x122   : > { %v7683_v60 = vsel %vm6336_vm14, 4294967295, %v7682_v60  ;;  %v6349_v14 = vpack.c.bf16 %v2112_v11, %v6325_v52  ;;  %v2440_v17 = vsel %vm6319_vm13, %v6323_v35, 0.0  ;;  %866 = vst.msk [vmem:[#allocation2 + $0xb8] sm:$0xff] %vm7541_vm2, %v827_v26  ;;  %v828_v58 = vmax.f32 %v796_v34, 0.0  ;;  %v5111_v33 = vpop.f32.mrb[24].mxu0  ;;  %v1528_v0 = vld [vmem:[#allocation2 + $0xb0] sm:$0xff] }
 0x123   : > { %v6356_v19 = vadd.s32 96, %v6071_v57  ;;  %v1062_v10 = vand.u32 15, %v900_v41  ;;  %v6359_v29 = vpack.c.bf16 %v6344_v5, %v2440_v17  ;;  %869 = vst.msk [vmem:[#allocation2 + $0xd0] sm:$0xff] %vm7541_vm2, %v830_v38  ;;  %v762_v6 = vmul.f32 %v5111_v33, %v6055_v24  ;;  %v698_v11 = vpop.f32.mrb[25].mxu0  ;;  %v1526_v12 = vld [vmem:[#allocation2 + $0xa0] sm:$0xff]  ;;  %v1527_v38 = vld [vmem:[#allocation2 + $0xa8] sm:$0xff] }
 0x124   : > { %7685 = vst [vmem:[#allocation66_spill] sm:$0xff] %v6349_v14  ;;  %v1525_v14 = vld [vmem:[#allocation2 + $0x98] sm:$0xff]  ;;  %v902_v26 = vadd.s32 184, %v6071_v57  ;;  %v2114_v34 = vsel %vm6336_vm14, %v6346_v36, 0.0  ;;  %867 = vst.msk [vmem:[#allocation2 + $0xc0] sm:$0xff] %vm7541_vm2, %v828_v58  ;;  %v760_v41 = vmul.f32 %v6055_v24, %v698_v11  ;;  %v5112_v17 = vpop.f32.mrb[26].mxu0  ;;  %v1553_v52 = vpack.c.bf16 %v1528_v0, %v1527_v38 }
 0x125   : > { %7686 = vst [vmem:[#allocation67_spill] sm:$0xff] %v6359_v29  ;;  %v1552_v29 = vpack.c.bf16 %v1526_v12, %v1525_v14  ;;  %vm6371_vm15 = vcmp.ge.s32.totalorder %v971_v9, 1  ;;  %v7687_v33 = vmov 0  ;;  %v6376_v7 = vpack.c.bf16 %v2114_v34, %v6363_v51  ;;  %v701_v31 = vpop.f32.mrb[27].mxu0  ;;  %v6380_v1 = vld [vmem:[#allocation2 + $0xa1] sm:$0xff]  ;;  %v6394_v11 = vld [vmem:[#allocation2 + $0x99] sm:$0xff] }
 0x126   : > { %v7688_v33 = vsel %vm6371_vm15, 4294967295, %v7687_v33  ;;  %v801_v21 = vadd.f32 %v6060_v27, %v762_v6  ;;  %v763_v46 = vmul.f32 %v5112_v17, %v6055_v24  ;;  %vm6382_vm0 = vcmp.le.s32.totalorder %v1048_v30, 14  ;;  %v6391_v6 = vld [vmem:[#allocation2 + $0x57] sm:$0xff]  ;;  %v7807_v45 = vld [vmem:[#allocation49_spill] sm:$0xff] }
 0x127   : > { %7689 = vst [vmem:[#allocation68_spill] sm:$0xff] %v7688_v33  ;;  %7690 = vst [vmem:[#allocation69_spill] sm:$0xff] %v6376_v7  ;;  %v7691_v58 = vmov 0  ;;  %v799_v12 = vadd.f32 %v6060_v27, %v760_v41  ;;  %v761_v9 = vmul.f32 %v6055_v24, %v701_v31  ;;  %5138 = vmatmul.mubr.msk.bf16.gmra.mrb[48].mxu0 %vm7541_vm2, %v1552_v29  ;;  %5281 = vmatprep.mubr.msk.bf16.mxu1 %vm7541_vm2, %v1552_v29  ;;  %v985_v14 = vand.u32 15, %v6333_v37  ;;  %v6399_v31 = vld [vmem:[#allocation2 + $0x5f] sm:$0xff] }
 0x128   : > { %v7692_v58 = vsel %vm6382_vm0, 4294967295, %v7691_v58  ;;  %7693 = vst [vmem:[#allocation70_spill] sm:$0xff] %v6391_v6  ;;  %v999_v0 = vand.u32 15, %v6356_v19  ;;  %v833_v30 = vmax.f32 %v801_v21, 0.0  ;;  %v802_v34 = vadd.f32 %v6060_v27, %v763_v46  ;;  %5141 = vmatprep.mubr.msk.bf16.mxu0 %vm7541_vm2, %v1553_v52  ;;  %5282 = vmatmul.mubr.msk.bf16.gmra.mrb[16].mxu1 %vm7541_vm2, %v1553_v52  ;;  %7694 = vst [vmem:[#allocation71_spill] sm:$0xff] %v6399_v31 }
 0x129   : > { %vm6401_vm1 = vcmp.le.s32.totalorder %v1062_v10, 14  ;;  %v7695_v41 = vmov 0  ;;  %v1076_v29 = vand.u32 15, %v902_v26  ;;  %v831_v37 = vmax.f32 %v799_v12, 0.0  ;;  %v6411_v52 = vld [vmem:[#allocation2 + $0xb1] sm:$0xff] }
 0x12a   : > { %v7696_v41 = vsel %vm6401_vm1, 4294967295, %v7695_v41  ;;  %v800_v17 = vadd.f32 %v6060_v27, %v761_v9  ;;  %v904_v19 = vadd.s32 200, %v6071_v57  ;;  %v2116_v46 = vsel %vm6382_vm0, %v6380_v1, 0.0  ;;  %872 = vst.msk [vmem:[#allocation2 + $0xe8] sm:$0xff] %vm7541_vm2, %v833_v30  ;;  %v5115_v9 = vpop.f32.mrb[28].mxu0  ;;  %v1532_v7 = vld [vmem:[#allocation2 + $0xd0] sm:$0xff] }
 0x12b   : > { %7697 = vst [vmem:[#allocation72_spill] sm:$0xff] %v7696_v41  ;;  %v834_v21 = vmax.f32 %v802_v34, 0.0  ;;  %v906_v10 = vadd.s32 216, %v6071_v57  ;;  %v6415_v38 = vpack.c.bf16 %v2116_v46, %v6394_v11  ;;  %v2442_v26 = vsel %vm6371_vm15, %v6391_v6, 0.0  ;;  %870 = vst.msk [vmem:[#allocation2 + $0xd8] sm:$0xff] %vm7541_vm2, %v831_v37  ;;  %v1529_v42 = vld [vmem:[#allocation2 + $0xb8] sm:$0xff] }
 0x12c   : > { %v832_v12 = vmax.f32 %v800_v17, 0.0  ;;  %v893_v4 = vadd.s32 112, %v6071_v57  ;;  %v895_v30 = vadd.s32 128, %v6071_v57  ;;  %v6424_v34 = vpack.c.bf16 %v6399_v31, %v2442_v26  ;;  %v1530_v13 = vld [vmem:[#allocation2 + $0xc0] sm:$0xff]  ;;  %v6428_v6 = vld [vmem:[#allocation2 + $0xa9] sm:$0xff] }
 0x12d   : > { %7698 = vst [vmem:[#allocation73_spill] sm:$0xff] %v6415_v38  ;;  %873 = vst.msk [vmem:[#allocation2 + $0xf0] sm:$0xff] %vm7541_vm2, %v834_v21  ;;  %v766_v46 = vmul.f32 %v5115_v9, %v6055_v24  ;;  %v714_v38 = vpop.f32.mrb[29].mxu0  ;;  %vm6430_vm10 = vcmp.le.s32.totalorder %v1076_v29, 14  ;;  %v7700_v37 = vmov 0  ;;  %v2118_v17 = vsel %vm6401_vm1, %v6411_v52, 0.0 }
 0x12e   : > { %7699 = vst [vmem:[#allocation74_spill] sm:$0xff] %v6424_v34  ;;  %v7701_v37 = vsel %vm6430_vm10, 4294967295, %v7700_v37  ;;  %871 = vst.msk [vmem:[#allocation2 + $0xe0] sm:$0xff] %vm7541_vm2, %v832_v12  ;;  %v764_v26 = vmul.f32 %v6055_v24, %v714_v38  ;;  %v5116_v21 = vpop.f32.mrb[30].mxu0  ;;  %v1554_v34 = vpack.c.bf16 %v1530_v13, %v1529_v42  ;;  %v1531_v9 = vld [vmem:[#allocation2 + $0xc8] sm:$0xff]  ;;  %v1090_v31 = vand.u32 15, %v904_v19 }
 0x12f   : > { %7702 = vst [vmem:[#allocation75_spill] sm:$0xff] %v7701_v37  ;;  %v6440_v39 = vpack.c.bf16 %v2118_v17, %v6428_v6  ;;  %v805_v29 = vadd.f32 %v6060_v27, %v766_v46  ;;  %v767_v32 = vmul.f32 %v5116_v21, %v6055_v24  ;;  %v717_v5 = vpop.f32.mrb[31].mxu0  ;;  %v1555_v16 = vpack.c.bf16 %v1532_v7, %v1531_v9  ;;  %v6448_v12 = vld [vmem:[#allocation2 + $0xc1] sm:$0xff]  ;;  %v6458_v46 = vld [vmem:[#allocation2 + $0xb9] sm:$0xff] }
 0x130   : > { %vm6444_vm9 = vcmp.ge.s32.totalorder %v985_v14, 1  ;;  %v7704_v15 = vmov 0  ;;  %v1104_v38 = vand.u32 15, %v906_v10  ;;  %v803_v42 = vadd.f32 %v6060_v27, %v764_v26  ;;  %5142 = vmatmul.mubr.msk.bf16.gmra.mrb[52].mxu0 %vm7541_vm2, %v1554_v34  ;;  %5285 = vmatprep.mubr.msk.bf16.mxu1 %vm7541_vm2, %v1554_v34  ;;  %7709 = vst [vmem:[#allocation78_spill] sm:$0xff] %v6458_v46  ;;  %v6517_v37 = vld [vmem:[#allocation2 + $0x77] sm:$0xff]  ;;  %v6526_v41 = vld [vmem:[#allocation2 + $0x7f] sm:$0xff] }
 0x131   : > { %7703 = vst [vmem:[#allocation76_spill] sm:$0xff] %v6440_v39  ;;  %v7705_v15 = vsel %vm6444_vm9, 4294967295, %v7704_v15  ;;  %v765_v13 = vmul.f32 %v6055_v24, %v717_v5  ;;  %vm6454_vm1 = vcmp.ge.s32.totalorder %v999_v0, 1  ;;  %v7707_v19 = vmov 0  ;;  %5145 = vmatprep.mubr.msk.bf16.mxu0 %vm7541_vm2, %v1555_v16  ;;  %5286 = vmatmul.mubr.msk.bf16.gmra.mrb[20].mxu1 %vm7541_vm2, %v1555_v16  ;;  %v6476_v16 = vld [vmem:[#allocation2 + $0x67] sm:$0xff]  ;;  %7730 = vst [vmem:[#allocation88_spill] sm:$0xff] %v6517_v37 }
 0x132   : > { %7706 = vst [vmem:[#allocation77_spill] sm:$0xff] %v7705_v15  ;;  %v7708_v19 = vsel %vm6454_vm1, 4294967295, %v7707_v19  ;;  %v1013_v7 = vand.u32 15, %v893_v4  ;;  %v1027_v14 = vand.u32 15, %v895_v30  ;;  %v837_v17 = vmax.f32 %v805_v29, 0.0  ;;  %7713 = vst [vmem:[#allocation80_spill] sm:$0xff] %v6476_v16 }
 0x133   : > { %v806_v21 = vadd.f32 %v6060_v27, %v767_v32  ;;  %v6464_v24 = vadd.s32 144, %v6071_v57  ;;  %v908_v5 = vadd.s32 232, %v6071_v57  ;;  %v835_v0 = vmax.f32 %v803_v42, 0.0  ;;  %v6481_v26 = vld [vmem:[#allocation2 + $0xd1] sm:$0xff]  ;;  %v1535_v39 = vld [vmem:[#allocation2 + $0xe8] sm:$0xff]  ;;  %7732 = vst [vmem:[#allocation90_spill] sm:$0xff] %v6526_v41 }
 0x134   : > { %v804_v10 = vadd.f32 %v6060_v27, %v765_v13  ;;  %vm6468_vm0 = vcmp.le.s32.totalorder %v1090_v31, 14  ;;  %v7710_v4 = vmov 0  ;;  %v2120_v32 = vsel %vm6430_vm10, %v6448_v12, 0.0  ;;  %876 = vst.msk [vmem:[#allocation2 + $0x108] sm:$0xff] %vm7541_vm2, %v837_v17  ;;  %v1533_v29 = vld [vmem:[#allocation2 + $0xd8] sm:$0xff]  ;;  %v1536_v42 = vld [vmem:[#allocation2 + $0xf0] sm:$0xff] }
 0x135   : > { %v7711_v4 = vsel %vm6468_vm0, 4294967295, %v7710_v4  ;;  %v838_v30 = vmax.f32 %v806_v21, 0.0  ;;  %v6479_v34 = vadd.s32 160, %v6071_v57  ;;  %vm6483_vm14 = vcmp.le.s32.totalorder %v1104_v38, 14  ;;  %874 = vst.msk [vmem:[#allocation2 + $0xf8] sm:$0xff] %vm7541_vm2, %v835_v0  ;;  %v1534_v0 = vld [vmem:[#allocation2 + $0xe0] sm:$0xff] }
 0x136   : > { %7712 = vst [vmem:[#allocation79_spill] sm:$0xff] %v7711_v4  ;;  %v7714_v27 = vmov 0  ;;  %v6488_v31 = vpack.c.bf16 %v2120_v32, %v6458_v46  ;;  %v836_v9 = vmax.f32 %v804_v10, 0.0  ;;  %v7718_v13 = vand.u32 15, %v6266_v20  ;;  %v6505_v32 = vld [vmem:[#allocation2 + $0xc9] sm:$0xff]  ;;  %v6508_v10 = vld [vmem:[#allocation2 + $0xd9] sm:$0xff] }
 0x137   : > { %v7715_v27 = vsel %vm6483_vm14, 4294967295, %v7714_v27  ;;  %v7719_v17 = vmov 0  ;;  %vm6497_vm12 = vcmp.ge.s32.totalorder %v1013_v7, 1  ;;  %v7722_v21 = vmov 0  ;;  %7728 = vst [vmem:[#allocation86_spill] sm:$0xff] %v6505_v32  ;;  %877 = vst.msk [vmem:[#allocation2 + $0x110] sm:$0xff] %vm7541_vm2, %v838_v30 }
 0x138   : > { %7716 = vst [vmem:[#allocation81_spill] sm:$0xff] %v7715_v27  ;;  %7717 = vst [vmem:[#allocation82_spill] sm:$0xff] %v6488_v31  ;;  %vm6493_vm10 = vcmp.le.s32.totalorder %v7718_v13, 14  ;;  %v7723_v21 = vsel %vm6497_vm12, 4294967295, %v7722_v21  ;;  %vm6501_vm7 = vcmp.ge.s32.totalorder %v1027_v14, 1  ;;  %v7725_v38 = vmov 0 }
 0x139   : > { %v7720_v17 = vsel %vm6493_vm10, 4294967295, %v7719_v17  ;;  %7724 = vst [vmem:[#allocation84_spill] sm:$0xff] %v7723_v21  ;;  %v7726_v38 = vsel %vm6501_vm7, 4294967295, %v7725_v38  ;;  %v6510_v20 = vld [vmem:[#allocation2 + $0xe1] sm:$0xff]  ;;  %v1118_v13 = vand.u32 15, %v908_v5  ;;  %v910_v31 = vadd.s32 248, %v6071_v57 }
 0x13a   : > { %7721 = vst [vmem:[#allocation83_spill] sm:$0xff] %v7720_v17  ;;  %7727 = vst [vmem:[#allocation85_spill] sm:$0xff] %v7726_v38  ;;  %v2122_v7 = vsel %vm6468_vm0, %v6481_v26, 0.0  ;;  %v1556_v14 = vpack.c.bf16 %v1534_v0, %v1533_v29  ;;  %v1041_v30 = vand.u32 15, %v6464_v24  ;;  %v2124_v5 = vsel %vm6483_vm14, %v6510_v20, 0.0  ;;  %v6528_v4 = vld [vmem:[#allocation2 + $0x87] sm:$0xff] }
 0x13b   : > { %7729 = vst [vmem:[#allocation87_spill] sm:$0xff] %v6510_v20  ;;  %875 = vst.msk [vmem:[#allocation2 + $0x100] sm:$0xff] %vm7541_vm2, %v836_v9  ;;  %v6521_v46 = vpack.c.bf16 %v2122_v7, %v6505_v32  ;;  %v1557_v2 = vpack.c.bf16 %v1536_v42, %v1535_v39  ;;  %v6530_v9 = vld [vmem:[#allocation2 + $0x97] sm:$0xff]  ;;  %v1055_v29 = vand.u32 15, %v6479_v34  ;;  %v901_v0 = vadd.s32 176, %v6071_v57  ;;  %v6537_v7 = vld [vmem:[#allocation2 + $0x6f] sm:$0xff] }
 0x13c   : > { %7733 = vst [vmem:[#allocation91_spill] sm:$0xff] %v6528_v4  ;;  %7734 = vst [vmem:[#allocation92_spill] sm:$0xff] %v6530_v9  ;;  %v903_v24 = vadd.s32 192, %v6071_v57  ;;  %5146 = vmatmul.mubr.msk.bf16.gmra.mrb[56].mxu0 %vm7541_vm2, %v1556_v14  ;;  %5289 = vmatprep.mubr.msk.bf16.mxu1 %vm7541_vm2, %v1556_v14  ;;  %v905_v39 = vadd.s32 208, %v6071_v57  ;;  %v6543_v42 = vadd.s32 224, %v6071_v57  ;;  %v6546_v27 = vpack.c.bf16 %v2124_v5, %v6508_v10  ;;  %v6565_v15 = vld [vmem:[#allocation2 + $0x8f] sm:$0xff] }
 0x13d   : > { %7731 = vst [vmem:[#allocation89_spill] sm:$0xff] %v6521_v46  ;;  %v6539_v46 = vld [vmem:[#allocation2 + $0x9f] sm:$0xff]  ;;  %v2444_v34 = vsel %vm6444_vm9, %v6476_v16, 0.0  ;;  %5149 = vmatprep.mubr.msk.bf16.mxu0 %vm7541_vm2, %v1557_v2  ;;  %5290 = vmatmul.mubr.msk.bf16.gmra.mrb[24].mxu1 %vm7541_vm2, %v1557_v2  ;;  %vm6553_vm14 = vcmp.le.s32.totalorder %v1118_v13, 14  ;;  %v7737_v14 = vmov 0  ;;  %v1132_v20 = vand.u32 15, %v910_v31 }
 0x13e   : > { %7735 = vst [vmem:[#allocation93_spill] sm:$0xff] %v6539_v46  ;;  %7736 = vst [vmem:[#allocation94_spill] sm:$0xff] %v6546_v27  ;;  %v7738_v14 = vsel %vm6553_vm14, 4294967295, %v7737_v14  ;;  %v6558_v32 = vpack.c.bf16 %v6537_v7, %v2444_v34  ;;  %v2446_v5 = vsel %vm6454_vm1, %v6517_v37, 0.0  ;;  %v1360_v27 = vld [vmem:[#allocation2 + $0xf] sm:$0xff]  ;;  %v1455_v16 = vsel %vm6090_vm3, %v1359_v47, 0.0 }
 0x13f   : > { %7740 = vst [vmem:[#allocation96_spill] sm:$0xff] %v6565_v15  ;;  %v6568_v2 = vpack.c.bf16 %v6526_v41, %v2446_v5  ;;  %v2448_v31 = vsel %vm6497_vm12, %v6528_v4, 0.0  ;;  %v2450_v13 = vsel %vm6501_vm7, %v6530_v9, 0.0  ;;  %v1069_v34 = vand.u32 15, %v901_v0  ;;  %v2770_v5 = vld [vmem:[#allocation2 + $0x110] sm:$0xff]  ;;  %v1537_v9 = vld [vmem:[#allocation2 + $0xf8] sm:$0xff] }
 0x140   : > { %7739 = vst [vmem:[#allocation95_spill] sm:$0xff] %v6558_v32  ;;  %v6576_v32 = vld [vmem:[#allocation2 + $0xf1] sm:$0xff]  ;;  %v909_v37 = vadd.s32 240, %v6071_v57  ;;  %v6580_v47 = vpack.c.bf16 %v6565_v15, %v2448_v31  ;;  %v6583_v55 = vpack.c.bf16 %v6539_v46, %v2450_v13  ;;  %v1083_v41 = vand.u32 15, %v903_v24  ;;  %v6587_v21 = vld [vmem:[#allocation2 + $0xe9] sm:$0xff] }
 0x141   : > { %7741 = vst [vmem:[#allocation97_spill] sm:$0xff] %v6568_v2  ;;  %v6585_v2 = vld [vmem:[#allocation2 + $0xa7] sm:$0xff]  ;;  %v1097_v4 = vand.u32 15, %v905_v39  ;;  %v2126_v0 = vsel %vm6553_vm14, %v6576_v32, 0.0  ;;  %v3077_v57 = vsel %vm6493_vm10, %v6113_v40, 0.0  ;;  %v1491_v31 = vpack.c.bf16 %v1360_v27, %v1455_v16  ;;  %v6608_v15 = vld [vmem:[#allocation2 + $0xb7] sm:$0xff] }
 0x142   : > { %7742 = vst [vmem:[#allocation98_spill] sm:$0xff] %v6580_v47  ;;  %7743 = vst [vmem:[#allocation99_spill] sm:$0xff] %v6583_v55  ;;  %v1538_v38 = vld [vmem:[#allocation2 + $0x100] sm:$0xff]  ;;  %vm6597_vm2 = vcmp.le.s32.totalorder %v1132_v20, 14  ;;  %v7745_v55 = vmov 0  ;;  %v6602_v24 = vpack.c.bf16 %v2126_v0, %v6587_v21  ;;  %v2769_v47 = vld [vmem:[#allocation2 + $0x108] sm:$0xff] }
 0x143   : > { %7744 = vst [vmem:[#allocation100_spill] sm:$0xff] %v6585_v2  ;;  %v6595_v13 = vld [vmem:[#allocation2 + $0x101] sm:$0xff]  ;;  %v7746_v55 = vsel %vm6597_vm2, 4294967295, %v7745_v55  ;;  %v1558_v39 = vpack.c.bf16 %v1538_v38, %v1537_v9  ;;  %vm6604_vm3 = vcmp.ge.s32.totalorder %v1041_v30, 1  ;;  %v1111_v40 = vand.u32 15, %v6543_v42  ;;  %v6611_v16 = vld [vmem:[#allocation2 + $0xf9] sm:$0xff] }
 0x144   : > { %7747 = vst [vmem:[#allocation101_spill] sm:$0xff] %v7746_v55  ;;  %7748 = vst [vmem:[#allocation102_spill] sm:$0xff] %v6602_v24  ;;  %v2790_v27 = vpack.c.bf16 %v2770_v5, %v2769_v47  ;;  %vm6613_vm10 = vcmp.ge.s32.totalorder %v1055_v29, 1  ;;  %vm6617_vm7 = vcmp.ge.s32.totalorder %v1069_v34, 1  ;;  %v6621_v38 = vld [vmem:[#allocation2 + $0xbf] sm:$0xff]  ;;  %v6623_v30 = vld [vmem:[#allocation2 + $0xc7] sm:$0xff]  ;;  %v3112_v29 = vpack.c.bf16 %v3077_v57, %v6127_v54 }
 0x145   : > { %v6625_v9 = vld [vmem:[#allocation2 + $0xd7] sm:$0xff]  ;;  %v1125_v24 = vand.u32 15, %v909_v37  ;;  %vm7756_vm12 = vcmask 261120   ;;  %v6630_v42 = vld [vmem:[#allocation2 + $0xaf] sm:$0xff]  ;;  %vm6632_vm9 = vcmp.ge.s32.totalorder %v1083_v41, 1  ;;  %v6636_v47 = vld [vmem:[#allocation2 + $0xdf] sm:$0xff] }
 0x146   : > { %7755 = vst [vmem:[#allocation103_spill] sm:$0xff] %v6625_v9  ;;  %5150 = vmatmul.mubr.msk.bf16.gmra.mrb[60].mxu0 %vm7756_vm12, %v1558_v39  ;;  %vm7757_vm1 = vmmov %vm7756_vm12  ;;  %v2128_v5 = vsel %vm6597_vm2, %v6595_v13, 0.0  ;;  %v2452_v37 = vsel %vm6604_vm3, %v6585_v2, 0.0  ;;  %vm6646_vm14 = vcmp.ge.s32.totalorder %v1097_v4, 1  ;;  %v7761_v54 = vmov 0  ;;  %v6650_v41 = vld [vmem:[#allocation2 + $0xe7] sm:$0xff] }
 0x147   : > { %5293 = vmatprep.mubr.msk.bf16.mxu1 %vm7757_vm1, %v1558_v39  ;;  %vm7760_vm12 = vmmov %vm7757_vm1  ;;  %5157 = vmatprep.mubr.msk.bf16.mxu0 %vm7757_vm1, %v1491_v31  ;;  %v7762_v54 = vsel %vm6646_vm14, 4294967295, %v7761_v54  ;;  %v6652_v57 = vld [vmem:[#allocation2 + $0xf7] sm:$0xff]  ;;  %v6655_v39 = vpack.c.bf16 %v2128_v5, %v6611_v16  ;;  %v6658_v55 = vpack.c.bf16 %v6630_v42, %v2452_v37  ;;  %v6664_v4 = vld [vmem:[#allocation2 + $0xcf] sm:$0xff]  ;;  %v7766_v31 = vmov 0 }
 0x148   : > { %5294 = vmatmul.mubr.msk.bf16.gmra.mrb[28].mxu1 %vm7760_vm12, %v2790_v27  ;;  %v2454_v27 = vsel %vm6613_vm10, %v6608_v15, 0.0  ;;  %vm7765_vm12 = vmmov %vm7757_vm1  ;;  %vm6666_vm1 = vcmp.ge.s32.totalorder %v1111_v40, 1  ;;  %v6670_v17 = vld [vmem:[#allocation2 + $0xff] sm:$0xff]  ;;  %v6672_v2 = vld [vmem:[#allocation2 + $0x107] sm:$0xff]  ;;  %v2456_v37 = vsel %vm6617_vm7, %v6623_v30, 0.0  ;;  %v1457_v40 = vsel %vm6129_vm5, %v6094_v56, 0.0 }
 0x149   : > { %7763 = vst [vmem:[#allocation104_spill] sm:$0xff] %v6655_v39  ;;  %7764 = vst [vmem:[#allocation105_spill] sm:$0xff] %v6658_v55  ;;  %5301 = vmatprep.mubr.msk.bf16.mxu1 %vm7765_vm12, %v3112_v29  ;;  %v7767_v31 = vsel %vm6666_vm1, 4294967295, %v7766_v31  ;;  %v6675_v5 = vpack.c.bf16 %v6621_v38, %v2454_v27  ;;  %v2458_v29 = vsel %vm6632_vm9, %v6625_v9, 0.0  ;;  %vm6686_vm12 = vcmp.ge.s32.totalorder %v1125_v24, 1  ;;  %v6702_v61 = vld [vmem:[#allocation2 + $0xef] sm:$0xff] }
 0x14a   : > { %7768 = vst [vmem:[#allocation106_spill] sm:$0xff] %v6670_v17  ;;  %7769 = vst [vmem:[#allocation107_spill] sm:$0xff] %v6672_v2  ;;  %v7771_v55 = vmov 0  ;;  %v6691_v39 = vpack.c.bf16 %v6664_v4, %v2456_v37  ;;  %v6694_v27 = vpack.c.bf16 %v6636_v47, %v2458_v29  ;;  %v3079_v9 = vsel %vm6107_vm4, %v6160_v23, 0.0  ;;  %v6713_v29 = vld [vmem:[#allocation2 + $0x10f] sm:$0xff] }
 0x14b   : > { %7770 = vst [vmem:[#allocation108_spill] sm:$0xff] %v6675_v5  ;;  %v7772_v55 = vsel %vm6686_vm12, 4294967295, %v7771_v55  ;;  %v1459_v5 = vsel %vm6212_vm8, %v6133_v62, 0.0  ;;  %v2460_v56 = vsel %vm6646_vm14, %v6650_v41, 0.0  ;;  %v2462_v24 = vsel %vm6666_vm1, %v6652_v57, 0.0  ;;  %7776 = vst [vmem:[#allocation112_spill] sm:$0xff] %v6713_v29 }
 0x14c   : > { %7773 = vst [vmem:[#allocation109_spill] sm:$0xff] %v7772_v55  ;;  %7774 = vst [vmem:[#allocation110_spill] sm:$0xff] %v6691_v39  ;;  %v3081_v37 = vsel %vm6135_vm6, %v6197_v50, 0.0  ;;  %v6716_v62 = vpack.c.bf16 %v6702_v61, %v2460_v56  ;;  %v6719_v23 = vpack.c.bf16 %v6670_v17, %v2462_v24  ;;  %v2464_v28 = vsel %vm6686_vm12, %v6672_v2, 0.0  ;;  %v5719_v56 = vld [vmem:[%s7438_s6 + $0x68] sm:$0xff]   ;;  %v7813_v17 = vld [vmem:[#allocation52_spill] sm:$0xff] }
 0x14d   : > { %7775 = vst [vmem:[#allocation111_spill] sm:$0xff] %v6694_v27  ;;  %v1492_v27 = vpack.c.bf16 %v6118_v44, %v1457_v40  ;;  %v6726_v39 = vpack.c.bf16 %v6713_v29, %v2464_v28  ;;  %v1493_v3 = vpack.c.bf16 %v6158_v22, %v1459_v5  ;;  %v3113_v50 = vpack.c.bf16 %v3079_v9, %v6175_v49  ;;  %v5721_v49 = vld [vmem:[%s7438_s6 + $0x28] sm:$0xff]   ;;  %v6752_v9 = vld [vmem:[#allocation2 + $0x111] sm:$0xff] }
 0x14e   : > { %7777 = vst [vmem:[#allocation113_spill] sm:$0xff] %v6716_v62  ;;  %7778 = vst [vmem:[#allocation114_spill] sm:$0xff] %v6719_v23  ;;  %vm7780_vm6 = vcmask 261120   ;;  %v3114_v24 = vpack.c.bf16 %v3081_v37, %v6204_v8  ;;  %v1461_v23 = vsel %vm6319_vm13, %v6206_v25, 0.0  ;;  %v1463_v28 = vsel %vm6371_vm15, %v6323_v35, 0.0  ;;  %v7800_v29 = vld [vmem:[#allocation79_spill] sm:$0xff] }
 0x14f   : > { %7779 = vst [vmem:[#allocation115_spill] sm:$0xff] %v6726_v39  ;;  %5158 = vmatmul.mubr.msk.bf16.vlgmr.msra.gmra.mrb[32].mxu0 %vm7780_vm6, %v1492_v27  ;;  %v4068_v44 = vsel %vm6274_vm11, %v6346_v36, 0.0  ;;  %vm7781_vm4 = vmmov %vm7780_vm6  ;;  %vm7783_vm8 = vnez %v7647_v48  ;;  %vm7785_vm15 = vnez %v7674_v53  ;;  %vm7786_vm13 = vnez %v7683_v60  ;;  %v7797_v48 = vld [vmem:[#allocation87_spill] sm:$0xff]  ;;  %v7845_v53 = vld [vmem:[#allocation92_spill] sm:$0xff] }
 0x150   : > { %5161 = vmatprep.mubr.msk.bf16.mxu0 %vm7781_vm4, %v1493_v3  ;;  %vm7782_vm6 = vmmov %vm7781_vm4  ;;  %v3083_v8 = vsel %vm7783_vm8, %v6228_v43, 0.0  ;;  %v6755_v5 = vpack.c.bf16 %v4068_v44, %v6363_v51  ;;  %v4070_v40 = vsel %vm7785_vm15, %v6380_v1, 0.0  ;;  %v4072_v27 = vsel %vm7786_vm13, %v6411_v52, 0.0  ;;  %v6765_v3 = vld [vmem:[#allocation2 + $0x109] sm:$0xff]  ;;  %v7790_v44 = vld [vmem:[#allocation72_spill] sm:$0xff] }
 0x151   : > { %5302 = vmatmul.mubr.msk.bf16.vlgmr.msra.gmra.mrb[0].mxu1 %vm7782_vm6, %v3113_v50  ;;  %v6768_v43 = vpack.c.bf16 %v4070_v40, %v6394_v11  ;;  %v6771_v37 = vpack.c.bf16 %v4072_v27, %v6428_v6  ;;  %vm7789_vm6 = vnez %v7692_v58  ;;  %vm7791_vm8 = vnez %v7790_v44  ;;  %v7793_v40 = vld [vmem:[#allocation78_spill] sm:$0xff]  ;;  %v7798_v39 = vld [vmem:[#allocation75_spill] sm:$0xff]  ;;  %v7846_v60 = vld [vmem:[#allocation100_spill] sm:$0xff] }
 0x152   : > { %7784 = vst [vmem:[#allocation116_spill] sm:$0xff] %v6755_v5  ;;  %5334 = vmatpush3.bf16.msra.mxu1 %v6156_v63  ;;  %5305 = vmatprep.mubr.msk.bf16.mxu1 %vm7781_vm4, %v3114_v24  ;;  %v4074_v50 = vsel %vm7789_vm6, %v6448_v12, 0.0  ;;  %v4076_v5 = vsel %vm7791_vm8, %v6481_v26, 0.0  ;;  %v7792_v63 = vld [vmem:[#allocation44_spill] sm:$0xff]  ;;  %v6783_v24 = vld [vmem:[%s7438_s6 + $0x70] sm:$0xff]   ;;  %v7795_v27 = vld [vmem:[#allocation86_spill] sm:$0xff]  ;;  %vm7799_vm4 = vnez %v7798_v39  ;;  %vm7805_vm2 = vnez %v7738_v14 }
 0x153   : > { %7787 = vst [vmem:[#allocation117_spill] sm:$0xff] %v6768_v43  ;;  %7788 = vst [vmem:[#allocation118_spill] sm:$0xff] %v6771_v37  ;;  %5335 = vmatprep.subr.bf16.mxu1 %v5719_v56  ;;  %5190 = vmatpush3.bf16.msra.mxu0 %v7792_v63  ;;  %v6786_v43 = vpack.c.bf16 %v4074_v50, %v7793_v40  ;;  %v6789_v37 = vpack.c.bf16 %v4076_v5, %v7795_v27  ;;  %v4078_v62 = vsel %vm7799_vm4, %v7797_v48, 0.0  ;;  %v6800_v63 = vld [vmem:[%s7438_s6 + $0x30] sm:$0xff]  }
 0x154   : > { %v4080_v2 = vsel %vm6468_vm0, %v6576_v32, 0.0  ;;  %5191 = vmatprep.subr.bf16.mxu0 %v5721_v49  ;;  %v6803_v50 = vpack.c.bf16 %v4078_v62, %v6508_v10  ;;  %v4084_v33 = vsel %vm7805_vm2, %v6752_v9, 0.0  ;;  %vm7808_vm12 = vnez %v7807_v45  ;;  %v7815_v45 = vld [vmem:[#allocation56_spill] sm:$0xff]  ;;  %v7921_v34 = vld [vmem:[#allocation107_spill] sm:$0xff] }
 0x155   : > { %7794 = vst [vmem:[#allocation72_spill] sm:$0xff] %v6786_v43  ;;  %7796 = vst [vmem:[#allocation44_spill] sm:$0xff] %v6789_v37  ;;  %v6806_v5 = vpack.c.bf16 %v4080_v2, %v6587_v21  ;;  %v7803_v37 = vld [vmem:[#allocation81_spill] sm:$0xff]  ;;  %v3085_v35 = vsel %vm7808_vm12, %v7806_v18, 0.0  ;;  %v6821_v62 = vpack.c.bf16 %v4084_v33, %v6765_v3  ;;  %v7811_v2 = vld [vmem:[#allocation48_spill] sm:$0xff]  ;;  %v3115_v55 = vpack.c.bf16 %v3083_v8, %v7813_v17 }
 0x156   : > { %7801 = vst [vmem:[#allocation78_spill] sm:$0xff] %v6803_v50  ;;  %vm7804_vm5 = vnez %v7803_v37  ;;  %5336 = vmatpush3.bf16.msra.mxu1 %v5719_v56  ;;  %v7812_v50 = vld [vmem:[#allocation65_spill] sm:$0xff]  ;;  %vm7814_vm2 = vcmask 261120   ;;  %v3116_v18 = vpack.c.bf16 %v3085_v35, %v7815_v45  ;;  %v7819_v33 = vld [vmem:[#allocation70_spill] sm:$0xff]  ;;  %v7822_v17 = vld [vmem:[#allocation80_spill] sm:$0xff]  ;;  %vm7823_vm0 = vnez %v7708_v19 }
 0x157   : > { %7802 = vst [vmem:[#allocation86_spill] sm:$0xff] %v6806_v5  ;;  %v4082_v43 = vsel %vm7804_vm5, %v6595_v13, 0.0  ;;  %7810 = vst [vmem:[#allocation75_spill] sm:$0xff] %v6821_v62  ;;  %v1494_v5 = vpack.c.bf16 %v7811_v2, %v1461_v23  ;;  %v1495_v22 = vpack.c.bf16 %v7812_v50, %v1463_v28  ;;  %5192 = vmatpush3.bf16.msra.mxu0 %v5721_v49  ;;  %5369 = vmatprep.subr.bf16.mxu1 %v6783_v24  ;;  %v7820_v23 = vld [vmem:[#allocation77_spill] sm:$0xff]  ;;  %v7825_v8 = vld [vmem:[#allocation55_spill] sm:$0xff] }
 0x158   : > { %v6818_v25 = vpack.c.bf16 %v4082_v43, %v6611_v16  ;;  %5225 = vmatprep.subr.bf16.mxu0 %v6800_v63  ;;  %vm7816_vm12 = vmmov %vm7814_vm2  ;;  %vm7821_vm14 = vnez %v7820_v23  ;;  %v1467_v28 = vsel %vm7823_vm0, %v7822_v17, 0.0  ;;  %v7824_v49 = vld [vmem:[#allocation57_spill] sm:$0xff]  ;;  %v7828_v43 = vld [vmem:[#allocation71_spill] sm:$0xff]  ;;  %v1477_v58 = vsel %vm6617_vm7, %v6608_v15, 0.0 }
 0x159   : > { %5162 = vmatmul.mubr.msk.bf16.gmra.mrb[36].mxu0 %vm7814_vm2, %v1494_v5  ;;  %vm7817_vm5 = vmmov %vm7814_vm2  ;;  %v1465_v56 = vsel %vm7821_vm14, %v7819_v33, 0.0  ;;  %v7827_v35 = vld [vmem:[#allocation61_spill] sm:$0xff]  ;;  %v1497_v5 = vpack.c.bf16 %v6537_v7, %v1467_v28  ;;  %v1502_v44 = vpack.c.bf16 %v6621_v38, %v1477_v58  ;;  %v3437_v46 = vsel %vm6632_vm9, %v6650_v41, 0.0 }
 0x15a   : > { %7809 = vst [vmem:[#allocation87_spill] sm:$0xff] %v6818_v25  ;;  %5165 = vmatprep.mubr.msk.bf16.mxu0 %vm7816_vm12, %v1495_v22  ;;  %5306 = vmatmul.mubr.msk.bf16.gmra.mrb[4].mxu1 %vm7817_vm5, %v3115_v55  ;;  %vm7818_vm1 = vmmov %vm7814_vm2  ;;  %vm7826_vm2 = vnez %v7825_v8  ;;  %v3089_v22 = vsel %vm6274_vm11, %v7827_v35, 0.0  ;;  %v1496_v55 = vpack.c.bf16 %v7828_v43, %v1465_v56  ;;  %v7831_v25 = vld [vmem:[#allocation64_spill] sm:$0xff]  ;;  %v7837_v35 = vld [vmem:[#allocation91_spill] sm:$0xff] }
 0x15b   : > { %5309 = vmatprep.mubr.msk.bf16.mxu1 %vm7818_vm1, %v3116_v18  ;;  %v3087_v45 = vsel %vm7826_vm2, %v7824_v49, 0.0  ;;  %v7829_v18 = vld [vmem:[#allocation59_spill] sm:$0xff]  ;;  %vm7830_vm5 = vmmov %vm7818_vm1  ;;  %v3118_v23 = vpack.c.bf16 %v3089_v22, %v7831_v25  ;;  %v7834_v49 = vld [vmem:[#allocation88_spill] sm:$0xff]  ;;  %v3093_v25 = vsel %vm7786_vm13, %v6380_v1, 0.0  ;;  %v1473_v1 = vsel %vm6604_vm3, %v7845_v53, 0.0 }
 0x15c   : > { %v3117_v62 = vpack.c.bf16 %v3087_v45, %v7829_v18  ;;  %vm7832_vm12 = vmmov %vm7818_vm1  ;;  %v7835_v8 = vld [vmem:[#allocation84_spill] sm:$0xff]  ;;  %v7838_v56 = vld [vmem:[#allocation85_spill] sm:$0xff]  ;;  %v3091_v45 = vsel %vm7785_vm15, %v6346_v36, 0.0  ;;  %v3120_v18 = vpack.c.bf16 %v3093_v25, %v6394_v11  ;;  %v1475_v36 = vsel %vm6613_vm10, %v7846_v60, 0.0 }
 0x15d   : > { %vm7833_vm0 = vmmov %vm7818_vm1  ;;  %vm7836_vm2 = vnez %v7835_v8  ;;  %vm7839_vm11 = vnez %v7838_v56  ;;  %v7840_v22 = vld [vmem:[#allocation90_spill] sm:$0xff]  ;;  %v3097_v11 = vsel %vm7791_vm8, %v6448_v12, 0.0  ;;  %vm7851_vm8 = vnez %v7800_v29 }
 0x15e   : > { %v1469_v59 = vsel %vm7836_vm2, %v7834_v49, 0.0  ;;  %v1471_v28 = vsel %vm7839_vm11, %v7837_v35, 0.0  ;;  %vm7848_vm13 = vmmov %vm7833_vm0  ;;  %v3101_v12 = vsel %vm7851_vm8, %v7797_v48, 0.0  ;;  %v3431_v8 = vsel %vm6604_vm3, %v6608_v15, 0.0 }
 0x15f   : > { %vm7849_vm15 = vmmov %vm7833_vm0  ;;  %v3433_v56 = vsel %vm6613_vm10, %v6623_v30, 0.0 }
 0x161   : > { %5166 = vmatmul.mubr.msk.bf16.gmra.mrb[40].mxu0 %vm7830_vm5, %v1496_v55  ;;  %v7841_v55 = vld [vmem:[#allocation96_spill] sm:$0xff]  ;;  %vm7842_vm5 = vmmov %vm7833_vm0 }
 0x162   : > { %5169 = vmatprep.mubr.msk.bf16.mxu0 %vm7818_vm1, %v1497_v5  ;;  %5310 = vmatmul.mubr.msk.bf16.gmra.mrb[8].mxu1 %vm7832_vm12, %v3117_v62  ;;  %v1498_v62 = vpack.c.bf16 %v7840_v22, %v1469_v59  ;;  %v3119_v5 = vpack.c.bf16 %v3091_v45, %v6363_v51  ;;  %vm7843_vm1 = vmmov %vm7833_vm0  ;;  %v3095_v51 = vsel %vm7789_vm6, %v6411_v52, 0.0  ;;  %v7847_v59 = vld [vmem:[#allocation93_spill] sm:$0xff]  ;;  %v1501_v45 = vpack.c.bf16 %v6630_v42, %v1475_v36 }
 0x163   : > { %5313 = vmatprep.mubr.msk.bf16.mxu1 %vm7833_vm0, %v3118_v23  ;;  %v1499_v23 = vpack.c.bf16 %v7841_v55, %v1471_v28  ;;  %vm7844_vm12 = vmmov %vm7833_vm0  ;;  %v1500_v28 = vpack.c.bf16 %v7847_v59, %v1473_v1  ;;  %v3121_v25 = vpack.c.bf16 %v3095_v51, %v6428_v6  ;;  %v1479_v52 = vsel %vm6632_vm9, %v6623_v30, 0.0  ;;  %v7866_v51 = vld [vmem:[#allocation83_spill] sm:$0xff] }
 0x164   : > { %v3099_v6 = vsel %vm7799_vm4, %v6481_v26, 0.0  ;;  %vm7852_vm6 = vmmov %vm7833_vm0  ;;  %v7856_v26 = vld [vmem:[#allocation103_spill] sm:$0xff]  ;;  %vm7857_vm4 = vnez %v7762_v54  ;;  %v3461_v30 = vpack.c.bf16 %v6702_v61, %v3437_v46  ;;  %v3412_v54 = vld [vmem:[#allocation2 + $0x11f] sm:$0xff] }
 0x165   : > { %v1481_v48 = vsel %vm7857_vm4, %v7856_v26, 0.0  ;;  %v3435_v15 = vsel %vm6617_vm7, %v7856_v26, 0.0  ;;  %v3439_v0 = vsel %vm7857_vm4, %v6652_v57, 0.0  ;;  %v7922_v26 = vld [vmem:[#allocation94_spill] sm:$0xff]  ;;  %v7960_v46 = vld [vmem:[#allocation108_spill] sm:$0xff] }
 0x166   : > { %v3460_v20 = vpack.c.bf16 %v6636_v47, %v3435_v15 }
 0x169   : > { %5170 = vmatmul.mubr.msk.bf16.gmra.mrb[44].mxu0 %vm7833_vm0, %v1498_v62  ;;  %v3122_v62 = vpack.c.bf16 %v3097_v11, %v7793_v40  ;;  %v1503_v40 = vpack.c.bf16 %v6664_v4, %v1479_v52 }
 0x16a   : > { %5173 = vmatprep.mubr.msk.bf16.mxu0 %vm7842_vm5, %v1499_v23  ;;  %5314 = vmatmul.mubr.msk.bf16.gmra.mrb[12].mxu1 %vm7843_vm1, %v3119_v5  ;;  %vm7850_vm5 = vmmov %vm7833_vm0  ;;  %v3123_v23 = vpack.c.bf16 %v3099_v6, %v7795_v27  ;;  %v3124_v5 = vpack.c.bf16 %v3101_v12, %v6508_v10  ;;  %v1504_v27 = vpack.c.bf16 %v6636_v47, %v1481_v48  ;;  %v7874_v12 = vld [vmem:[#allocation40_spill] sm:$0xff]  ;;  %v7881_v48 = vld [vmem:[#allocation47_spill] sm:$0xff] }
 0x16b   : > { %5317 = vmatprep.mubr.msk.bf16.mxu1 %vm7844_vm12, %v3120_v18  ;;  %vm7853_vm1 = vmmov %vm7833_vm0 }
 0x16c   : > { %vm7854_vm12 = vmmov %vm7833_vm0 }
 0x16d   : > { %vm7861_vm8 = vmmov %vm7853_vm1 }
 0x171   : > { %5174 = vmatmul.mubr.msk.bf16.gmra.mrb[48].mxu0 %vm7848_vm13, %v1500_v28  ;;  %vm7855_vm13 = vmmov %vm7833_vm0 }
 0x172   : > { %5177 = vmatprep.mubr.msk.bf16.mxu0 %vm7849_vm15, %v1501_v45  ;;  %5318 = vmatmul.mubr.msk.bf16.gmra.mrb[16].mxu1 %vm7833_vm0, %v3121_v25  ;;  %vm7858_vm15 = vnez %v7767_v31  ;;  %vm7859_vm0 = vnez %v7803_v37  ;;  %v2002_v37 = vld [vmem:[#allocation2 + $0x11] sm:$0xff] }
 0x173   : > { %5321 = vmatprep.mubr.msk.bf16.mxu1 %vm7850_vm5, %v3122_v62  ;;  %v1483_v39 = vsel %vm7858_vm15, %v6650_v41, 0.0  ;;  %v3103_v29 = vsel %vm7859_vm0, %v6576_v32, 0.0  ;;  %vm7860_vm5 = vnez %v7738_v14  ;;  %v7864_v32 = vld [vmem:[#allocation109_spill] sm:$0xff]  ;;  %vm7867_vm0 = vnez %v7866_v51  ;;  %v7870_v45 = vld [vmem:[#allocation35_spill] sm:$0xff]  ;;  %v7872_v62 = vld [vmem:[#allocation106_spill] sm:$0xff] }
 0x174   : > { %v3105_v10 = vsel %vm7860_vm5, %v6595_v13, 0.0  ;;  %v1505_v18 = vpack.c.bf16 %v6702_v61, %v1483_v39  ;;  %v3125_v1 = vpack.c.bf16 %v3103_v29, %v6587_v21  ;;  %v2001_v13 = vld [vmem:[#allocation2 + $0x9] sm:$0xff]  ;;  %v2098_v11 = vsel %vm7867_vm0, %v2002_v37, 0.0  ;;  %v7868_v21 = vld [vmem:[#allocation101_spill] sm:$0xff]  ;;  %vm7876_vm0 = vmmov %vm7853_vm1 }
 0x175   : > { %v3126_v36 = vpack.c.bf16 %v3105_v10, %v6611_v16  ;;  %vm7869_vm5 = vnez %v7868_v21  ;;  %v5728_v16 = vld [vmem:[#allocation2 + $0x27] sm:$0xff]  ;;  %v2133_v52 = vpack.c.bf16 %v2098_v11, %v2001_v13  ;;  %v5723_v29 = vld [vmem:[%s7438_s6 + $0x78] sm:$0xff]   ;;  %vm7916_vm3 = vmmov %vm7876_vm0  ;;  %v3441_v47 = vsel %vm7858_vm15, %v7921_v34, 0.0 }
 0x176   : > { %v3107_v28 = vsel %vm7869_vm5, %v6752_v9, 0.0  ;;  %v7877_v9 = vld [vmem:[#allocation46_spill] sm:$0xff]  ;;  %v7883_v10 = vld [vmem:[#allocation41_spill] sm:$0xff]  ;;  %v7890_v37 = vld [vmem:[#allocation68_spill] sm:$0xff]  ;;  %v3462_v41 = vpack.c.bf16 %v7872_v62, %v3439_v0 }
 0x177   : > { %v3127_v6 = vpack.c.bf16 %v3107_v28, %v6765_v3  ;;  %v7894_v11 = vld [vmem:[#allocation53_spill] sm:$0xff]  ;;  %vm7918_vm10 = vmmov %vm7876_vm0  ;;  %v7924_v61 = vld [vmem:[#allocation112_spill] sm:$0xff] }
 0x178   : > { %vm7923_vm7 = vmmov %vm7876_vm0  ;;  %v3719_v31 = vld [vmem:[#allocation2 + $0x30] sm:$0xff]  ;;  %v3742_v0 = vld [vmem:[#allocation2 + $0xe8] sm:$0xff] }
 0x179   : > { %5178 = vmatmul.mubr.msk.bf16.gmra.mrb[52].mxu0 %vm7852_vm6, %v1502_v44  ;;  %vm7862_vm6 = vmmov %vm7853_vm1  ;;  %v7963_v34 = vld [vmem:[#allocation110_spill] sm:$0xff] }
 0x17a   : > { %5181 = vmatprep.mubr.msk.bf16.mxu0 %vm7853_vm1, %v1503_v40  ;;  %5322 = vmatmul.mubr.msk.bf16.gmra.mrb[20].mxu1 %vm7854_vm12, %v3123_v23  ;;  %vm7863_vm12 = vmmov %vm7853_vm1  ;;  %v7878_v40 = vld [vmem:[#allocation37_spill] sm:$0xff] }
 0x17b   : > { %5325 = vmatprep.mubr.msk.bf16.mxu1 %vm7855_vm13, %v3124_v5  ;;  %vm7865_vm13 = vnez %v7864_v32  ;;  %vm7879_vm5 = vnez %v7878_v40  ;;  %v7880_v5 = vld [vmem:[#allocation63_spill] sm:$0xff]  ;;  %vm7926_vm9 = vmmov %vm7876_vm0  ;;  %v3722_v32 = vld [vmem:[#allocation2 + $0x48] sm:$0xff] }
 0x17c   : > { %v1485_v14 = vsel %vm7865_vm13, %v6652_v57, 0.0  ;;  %v3415_v23 = vsel %vm7879_vm5, %v7877_v9, 0.0  ;;  %vm7886_vm5 = vmmov %vm7876_vm0  ;;  %v7931_v40 = vld [vmem:[#allocation39_spill] sm:$0xff] }
 0x17d   : > { %v1506_v58 = vpack.c.bf16 %v7872_v62, %v1485_v14  ;;  %v3450_v3 = vpack.c.bf16 %v7811_v2, %v3415_v23  ;;  %v7888_v2 = vld [vmem:[#allocation62_spill] sm:$0xff]  ;;  %vm7930_vm4 = vmmov %vm7876_vm0  ;;  %v3721_v23 = vld [vmem:[#allocation2 + $0x40] sm:$0xff] }
 0x17e   : > { %v3718_v62 = vld [vmem:[#allocation2 + $0x28] sm:$0xff]  ;;  %vm7932_vm15 = vmmov %vm7876_vm0 }
 0x17f   : > { %v3754_v9 = vpack.c.bf16 %v3719_v31, %v3718_v62  ;;  %v7971_v31 = vld [vmem:[#allocation114_spill] sm:$0xff]  ;;  %v3749_v62 = vld [vmem:[#allocation2 + $0x120] sm:$0xff] }
 0x181   : > { %5182 = vmatmul.mubr.msk.bf16.gmra.mrb[56].mxu0 %vm7861_vm8, %v1504_v27  ;;  %vm7871_vm8 = vnez %v7870_v45  ;;  %v7901_v45 = vld [vmem:[#allocation60_spill] sm:$0xff] }
 0x182   : > { %5185 = vmatprep.mubr.msk.bf16.mxu0 %vm7862_vm6, %v1505_v18  ;;  %5326 = vmatmul.mubr.msk.bf16.gmra.mrb[24].mxu1 %vm7853_vm1, %v3125_v1  ;;  %v3413_v25 = vsel %vm7871_vm8, %v5728_v16, 0.0  ;;  %vm7873_vm6 = vmmov %vm7853_vm1  ;;  %vm7882_vm8 = vnez %v7881_v48  ;;  %v5725_v18 = vld [vmem:[%s7438_s6 + $0x38] sm:$0xff]   ;;  %v7885_v1 = vld [vmem:[#allocation45_spill] sm:$0xff] }
 0x183   : > { %5329 = vmatprep.mubr.msk.bf16.mxu1 %vm7863_vm12, %v3126_v36  ;;  %v3449_v44 = vpack.c.bf16 %v7874_v12, %v3413_v25  ;;  %vm7875_vm12 = vmmov %vm7853_vm1  ;;  %v3417_v39 = vsel %vm7882_vm8, %v7880_v5, 0.0  ;;  %vm7891_vm8 = vnez %v7890_v37  ;;  %v7899_v16 = vld [vmem:[#allocation58_spill] sm:$0xff]  ;;  %v7906_v25 = vld [vmem:[#allocation69_spill] sm:$0xff] }
 0x184   : > { %v3451_v27 = vpack.c.bf16 %v7812_v50, %v3417_v39  ;;  %v6975_v50 = vld [vmem:[%s7438_s6 + $0x80] sm:$0xff]   ;;  %v3421_v14 = vsel %vm7891_vm8, %v7822_v17, 0.0  ;;  %v3423_v17 = vsel %vm7821_vm14, %v7834_v49, 0.0  ;;  %vm7900_vm8 = vmmov %vm7876_vm0  ;;  %v3427_v49 = vsel %vm7836_vm2, %v7845_v53, 0.0  ;;  %v3723_v5 = vld [vmem:[#allocation2 + $0x50] sm:$0xff] }
 0x185   : > { %v3453_v13 = vpack.c.bf16 %v6537_v7, %v3421_v14  ;;  %v3454_v28 = vpack.c.bf16 %v7840_v22, %v3423_v17  ;;  %v7904_v22 = vld [vmem:[#allocation66_spill] sm:$0xff]  ;;  %vm7905_vm14 = vmmov %vm7876_vm0  ;;  %v3458_v53 = vpack.c.bf16 %v6621_v38, %v3431_v8  ;;  %v3720_v48 = vld [vmem:[#allocation2 + $0x38] sm:$0xff] }
 0x186   : > { %vm7911_vm2 = vmmov %vm7876_vm0  ;;  %v7915_v38 = vld [vmem:[#allocation82_spill] sm:$0xff]  ;;  %v3755_v39 = vpack.c.bf16 %v3721_v23, %v3720_v48  ;;  %v7940_v14 = vld [vmem:[#allocation67_spill] sm:$0xff] }
 0x187   : > { %v3726_v37 = vld [vmem:[#allocation2 + $0x68] sm:$0xff]  ;;  %v3737_v8 = vld [vmem:[#allocation2 + $0xc0] sm:$0xff] }
 0x188   : > { %v3730_v17 = vld [vmem:[#allocation2 + $0x88] sm:$0xff] }
 0x189   : > { %5186 = vmatmul.mubr.msk.bf16.gmra.mrb[60].mxu0 %vm7873_vm6, %v1506_v58  ;;  %vm7884_vm6 = vmmov %vm7876_vm0  ;;  %v3463_v58 = vpack.c.bf16 %v7924_v61, %v3441_v47  ;;  %v3747_v61 = vld [vmem:[#allocation2 + $0x110] sm:$0xff] }
 0x18a   : > { %5193 = vmatprep.mubr.msk.bf16.mxu0 %vm7853_vm1, %v2133_v52  ;;  %5330 = vmatmul.mubr.msk.bf16.gmra.mrb[28].mxu1 %vm7875_vm12, %v3127_v6  ;;  %vm7887_vm1 = vmmov %vm7876_vm0  ;;  %vm7889_vm12 = vnez %v7888_v2  ;;  %v7925_v52 = vld [vmem:[#allocation102_spill] sm:$0xff]  ;;  %v3411_v6 = vld [vmem:[#allocation2 + $0x117] sm:$0xff] }
 0x18b   : > { %5337 = vmatprep.mubr.msk.bf16.mxu1 %vm7876_vm0, %v3449_v44  ;;  %v3419_v36 = vsel %vm7889_vm12, %v7819_v33, 0.0  ;;  %vm7898_vm12 = vnez %v7708_v19  ;;  %v3429_v19 = vsel %vm7839_vm11, %v7846_v60, 0.0  ;;  %v7910_v60 = vld [vmem:[#allocation73_spill] sm:$0xff]  ;;  %vm7913_vm11 = vmmov %vm7876_vm0  ;;  %v3443_v57 = vsel %vm7865_vm13, %v3411_v6, 0.0  ;;  %v7929_v44 = vld [vmem:[#allocation104_spill] sm:$0xff] }
 0x18c   : > { %v3464_v12 = vpack.c.bf16 %v3412_v54, %v3443_v57  ;;  %vm7936_vm13 = vmmov %vm7876_vm0  ;;  %v3724_v2 = vld [vmem:[#allocation2 + $0x58] sm:$0xff]  ;;  %v3746_v6 = vld [vmem:[#allocation2 + $0x108] sm:$0xff] }
 0x18d   : > { %v7969_v54 = vld [vmem:[#allocation113_spill] sm:$0xff]  ;;  %v3768_v57 = vpack.c.bf16 %v3747_v61, %v3746_v6  ;;  %v4023_v23 = vld [vmem:[#allocation2 + $0x29] sm:$0xff] }
 0x18e   : > { %v8021_v61 = vld [vmem:[#allocation10_spill] sm:$0xff]  ;;  %v8024_v6 = vld [vmem:[#allocation13_spill] sm:$0xff] }
 0x191   : > { %5194 = vmatmul.mubr.msk.bf16.vlgmr.msra.gmra.mrb[32].mxu0 %vm7884_vm6, %v7883_v10  ;;  %vm7893_vm6 = vmmov %vm7876_vm0  ;;  %v3756_v10 = vpack.c.bf16 %v3723_v5, %v3722_v32  ;;  %v7976_v5 = vld [vmem:[#allocation115_spill] sm:$0xff] }
 0x192   : > { %5197 = vmatprep.mubr.msk.bf16.mxu0 %vm7876_vm0, %v7885_v1  ;;  %5338 = vmatmul.mubr.msk.bf16.vlgmr.msra.gmra.mrb[0].mxu1 %vm7886_vm5, %v3450_v3  ;;  %vm7895_vm5 = vmmov %vm7876_vm0  ;;  %v5727_v3 = vld [vmem:[%s7438_s6 + $0x88] sm:$0xff]   ;;  %v3727_v1 = vld [vmem:[#allocation2 + $0x70] sm:$0xff] }
 0x193   : > { %5370 = vmatpush3.bf16.msra.mxu1 %v6783_v24  ;;  %5341 = vmatprep.mubr.msk.bf16.mxu1 %vm7887_vm1, %v3451_v27  ;;  %v3452_v24 = vpack.c.bf16 %v7828_v43, %v3419_v36  ;;  %vm7896_vm1 = vmmov %vm7876_vm0  ;;  %v3425_v43 = vsel %vm7898_vm12, %v7837_v35, 0.0  ;;  %v3456_v35 = vpack.c.bf16 %v7847_v59, %v3427_v49  ;;  %v7912_v59 = vld [vmem:[#allocation76_spill] sm:$0xff]  ;;  %v7937_v27 = vld [vmem:[#allocation51_spill] sm:$0xff] }
 0x194   : > { %5371 = vmatprep.subr.bf16.mxu1 %v5723_v29  ;;  %5226 = vmatpush3.bf16.msra.mxu0 %v6800_v63  ;;  %v7892_v63 = vld [vmem:[#allocation50_spill] sm:$0xff]  ;;  %v3455_v7 = vpack.c.bf16 %v7841_v55, %v3425_v43  ;;  %v3457_v55 = vpack.c.bf16 %v6630_v42, %v3429_v19  ;;  %vm7908_vm12 = vmmov %vm7876_vm0  ;;  %v3459_v42 = vpack.c.bf16 %v6664_v4, %v3433_v56  ;;  %v7917_v4 = vld [vmem:[#allocation89_spill] sm:$0xff] }
 0x195   : > { %5227 = vmatprep.subr.bf16.mxu0 %v5725_v18  ;;  %v7946_v43 = vld [vmem:[#allocation95_spill] sm:$0xff]  ;;  %v3732_v49 = vld [vmem:[#allocation2 + $0x98] sm:$0xff] }
 0x196   : > { %v3739_v56 = vld [vmem:[#allocation2 + $0xd0] sm:$0xff] }
 0x197   : > { %5372 = vmatpush3.bf16.msra.mxu1 %v5723_v29  ;;  %v7935_v29 = vld [vmem:[#allocation42_spill] sm:$0xff]  ;;  %v4028_v32 = vld [vmem:[#allocation2 + $0x51] sm:$0xff] }
 0x198   : > { %5228 = vmatpush3.bf16.msra.mxu0 %v5725_v18  ;;  %5405 = vmatprep.subr.bf16.mxu1 %v6975_v50  ;;  %v3725_v18 = vld [vmem:[#allocation2 + $0x60] sm:$0xff] }
 0x199   : > { %5198 = vmatmul.mubr.msk.bf16.gmra.mrb[36].mxu0 %vm7893_vm6, %v7892_v63  ;;  %vm7902_vm6 = vmmov %vm7876_vm0  ;;  %v3757_v36 = vpack.c.bf16 %v3725_v18, %v3724_v2  ;;  %v7942_v63 = vld [vmem:[#allocation74_spill] sm:$0xff] }
 0x19a   : > { %5201 = vmatprep.mubr.msk.bf16.mxu0 %vm7876_vm0, %v7894_v11  ;;  %5342 = vmatmul.mubr.msk.bf16.gmra.mrb[4].mxu1 %vm7895_vm5, %v3452_v24  ;;  %vm7903_vm5 = vmmov %vm7876_vm0  ;;  %v3758_v24 = vpack.c.bf16 %v3727_v1, %v3726_v37  ;;  %v3728_v11 = vld [vmem:[#allocation2 + $0x78] sm:$0xff]  ;;  %v4027_v1 = vld [vmem:[#allocation2 + $0x49] sm:$0xff] }
 0x19b   : > { %5345 = vmatprep.mubr.msk.bf16.mxu1 %vm7896_vm1, %v3453_v13  ;;  %vm7907_vm1 = vmmov %vm7876_vm0  ;;  %v3731_v13 = vld [vmem:[#allocation2 + $0x90] sm:$0xff] }
 0x19c   : > { %v4032_v37 = vld [vmem:[#allocation2 + $0x71] sm:$0xff] }
 0x1a1   : > { %5202 = vmatmul.mubr.msk.bf16.gmra.mrb[40].mxu0 %vm7900_vm8, %v7899_v16  ;;  %vm7909_vm8 = vmmov %vm7876_vm0  ;;  %v7948_v16 = vld [vmem:[#allocation97_spill] sm:$0xff] }
 0x1a2   : > { %5205 = vmatprep.mubr.msk.bf16.mxu0 %vm7902_vm6, %v7901_v45  ;;  %5346 = vmatmul.mubr.msk.bf16.gmra.mrb[8].mxu1 %vm7876_vm0, %v3454_v28  ;;  %vm7914_vm6 = vmmov %vm7876_vm0  ;;  %v3760_v28 = vpack.c.bf16 %v3731_v13, %v3730_v17  ;;  %v3735_v45 = vld [vmem:[#allocation2 + $0xb0] sm:$0xff] }
 0x1a3   : > { %5349 = vmatprep.mubr.msk.bf16.mxu1 %vm7903_vm5, %v3455_v7  ;;  %vm7919_vm5 = vmmov %vm7876_vm0  ;;  %v3733_v7 = vld [vmem:[#allocation2 + $0xa0] sm:$0xff] }
 0x1a4   : > { %v3761_v19 = vpack.c.bf16 %v3733_v7, %v3732_v49  ;;  %v7994_v49 = vld [vmem:[#allocation116_spill] sm:$0xff] }
 0x1a9   : > { %5206 = vmatmul.mubr.msk.bf16.gmra.mrb[44].mxu0 %vm7905_vm14, %v7904_v22  ;;  %vm7920_vm14 = vmmov %vm7876_vm0  ;;  %v7952_v22 = vld [vmem:[#allocation98_spill] sm:$0xff] }
 0x1aa   : > { %5209 = vmatprep.mubr.msk.bf16.mxu0 %vm7907_vm1, %v7906_v25  ;;  %5350 = vmatmul.mubr.msk.bf16.gmra.mrb[12].mxu1 %vm7908_vm12, %v3456_v35  ;;  %vm7927_vm1 = vmmov %vm7876_vm0  ;;  %v3734_v35 = vld [vmem:[#allocation2 + $0xa8] sm:$0xff]  ;;  %v7954_v25 = vld [vmem:[#allocation99_spill] sm:$0xff] }
 0x1ab   : > { %5353 = vmatprep.mubr.msk.bf16.mxu1 %vm7909_vm8, %v3457_v55  ;;  %vm7928_vm12 = vmmov %vm7876_vm0  ;;  %v3762_v55 = vpack.c.bf16 %v3735_v45, %v3734_v35  ;;  %v7998_v35 = vld [vmem:[#allocation118_spill] sm:$0xff] }
 0x1ac   : > { %vm7933_vm8 = vmmov %vm7876_vm0 }
 0x1b1   : > { %5210 = vmatmul.mubr.msk.bf16.gmra.mrb[48].mxu0 %vm7911_vm2, %v7910_v60  ;;  %vm7934_vm2 = vmmov %vm7876_vm0 }
 0x1b2   : > { %5213 = vmatprep.mubr.msk.bf16.mxu0 %vm7913_vm11, %v7912_v59  ;;  %5354 = vmatmul.mubr.msk.bf16.gmra.mrb[16].mxu1 %vm7914_vm6, %v3458_v53  ;;  %vm7938_vm11 = vmmov %vm7876_vm0  ;;  %v3736_v53 = vld [vmem:[#allocation2 + $0xb8] sm:$0xff]  ;;  %v7958_v59 = vld [vmem:[#allocation105_spill] sm:$0xff] }
 0x1b3   : > { %5357 = vmatprep.mubr.msk.bf16.mxu1 %vm7876_vm0, %v3459_v42  ;;  %vm7939_vm6 = vmmov %vm7876_vm0  ;;  %v3763_v60 = vpack.c.bf16 %v3737_v8, %v3736_v53  ;;  %v3738_v42 = vld [vmem:[#allocation2 + $0xc8] sm:$0xff]  ;;  %v8008_v53 = vld [vmem:[#allocation87_spill] sm:$0xff] }
 0x1b4   : > { %v3764_v15 = vpack.c.bf16 %v3739_v56, %v3738_v42  ;;  %v8006_v8 = vld [vmem:[#allocation86_spill] sm:$0xff]  ;;  %v4053_v42 = vld [vmem:[#allocation2 + $0x119] sm:$0xff] }
 0x1b5   : > { %v4054_v56 = vld [vmem:[#allocation2 + $0x121] sm:$0xff] }
 0x1b9   : > { %5214 = vmatmul.mubr.msk.bf16.gmra.mrb[52].mxu0 %vm7916_vm3, %v7915_v38  ;;  %vm7941_vm3 = vmmov %vm7876_vm0  ;;  %v3743_v38 = vld [vmem:[#allocation2 + $0xf0] sm:$0xff] }
 0x1ba   : > { %5217 = vmatprep.mubr.msk.bf16.mxu0 %vm7918_vm10, %v7917_v4  ;;  %5358 = vmatmul.mubr.msk.bf16.gmra.mrb[20].mxu1 %vm7919_vm5, %v3460_v20  ;;  %vm7943_vm10 = vmmov %vm7876_vm0  ;;  %v3741_v20 = vld [vmem:[#allocation2 + $0xe0] sm:$0xff]  ;;  %v3766_v47 = vpack.c.bf16 %v3743_v38, %v3742_v0  ;;  %v8016_v0 = vld [vmem:[#allocation4_spill] sm:$0xff] }
 0x1bb   : > { %5361 = vmatprep.mubr.msk.bf16.mxu1 %vm7920_vm14, %v3461_v30  ;;  %vm7944_vm5 = vmmov %vm7876_vm0  ;;  %v3740_v30 = vld [vmem:[#allocation2 + $0xd8] sm:$0xff] }
 0x1bc   : > { %vm7945_vm14 = vmmov %vm7876_vm0  ;;  %v3765_v4 = vpack.c.bf16 %v3741_v20, %v3740_v30  ;;  %v8014_v30 = vld [vmem:[#allocation5_spill] sm:$0xff] }
 0x1c1   : > { %5218 = vmatmul.mubr.msk.bf16.gmra.mrb[56].mxu0 %vm7923_vm7, %v7922_v26  ;;  %vm7947_vm7 = vmmov %vm7876_vm0  ;;  %v3745_v26 = vld [vmem:[#allocation2 + $0x100] sm:$0xff] }
 0x1c2   : > { %5221 = vmatprep.mubr.msk.bf16.mxu0 %vm7926_vm9, %v7925_v52  ;;  %5362 = vmatmul.mubr.msk.bf16.gmra.mrb[24].mxu1 %vm7927_vm1, %v3462_v41  ;;  %vm7949_vm9 = vmmov %vm7876_vm0  ;;  %v7965_v41 = vld [vmem:[#allocation111_spill] sm:$0xff] }
 0x1c3   : > { %5365 = vmatprep.mubr.msk.bf16.mxu1 %vm7928_vm12, %v3463_v58  ;;  %vm7950_vm1 = vmmov %vm7876_vm0  ;;  %v3744_v58 = vld [vmem:[#allocation2 + $0xf8] sm:$0xff] }
 0x1c4   : > { %vm7951_vm12 = vmmov %vm7876_vm0  ;;  %v3767_v52 = vpack.c.bf16 %v3745_v26, %v3744_v58  ;;  %v8020_v26 = vld [vmem:[#allocation9_spill] sm:$0xff]  ;;  %v8022_v58 = vld [vmem:[#allocation11_spill] sm:$0xff] }
 0x1c9   : > { %5222 = vmatmul.mubr.msk.bf16.gmra.mrb[60].mxu0 %vm7930_vm4, %v7929_v44  ;;  %vm7953_vm4 = vmmov %vm7876_vm0  ;;  %v4024_v44 = vld [vmem:[#allocation2 + $0x31] sm:$0xff] }
 0x1ca   : > { %5229 = vmatprep.mubr.msk.bf16.mxu0 %vm7932_vm15, %v7931_v40  ;;  %5366 = vmatmul.mubr.msk.bf16.gmra.mrb[28].mxu1 %vm7933_vm8, %v3464_v12  ;;  %vm7955_vm15 = vmmov %vm7876_vm0  ;;  %v3748_v12 = vld [vmem:[#allocation2 + $0x118] sm:$0xff] }
 0x1cb   : > { %5373 = vmatprep.mubr.msk.bf16.mxu1 %vm7934_vm2, %v3754_v9  ;;  %vm7956_vm8 = vmmov %vm7876_vm0  ;;  %v3769_v9 = vpack.c.bf16 %v3749_v62, %v3748_v12  ;;  %v8028_v12 = vld [vmem:[#allocation17_spill] sm:$0xff]  ;;  %v8029_v62 = vld [vmem:[#allocation18_spill] sm:$0xff] }
 0x1cc   : > { %vm7957_vm2 = vmmov %vm7876_vm0 }
 0x1d1   : > { %5230 = vmatmul.mubr.msk.bf16.vlgmr.msra.gmra.mrb[32].mxu0 %vm7936_vm13, %v7935_v29  ;;  %vm7959_vm13 = vmmov %vm7876_vm0  ;;  %v7980_v29 = vld [vmem:[#allocation36_spill] sm:$0xff] }
 0x1d2   : > { %5233 = vmatprep.mubr.msk.bf16.mxu0 %vm7938_vm11, %v7937_v27  ;;  %5374 = vmatmul.mubr.msk.bf16.vlgmr.msra.gmra.mrb[0].mxu1 %vm7939_vm6, %v3755_v39  ;;  %vm7961_vm11 = vmmov %vm7876_vm0  ;;  %v4026_v39 = vld [vmem:[#allocation2 + $0x41] sm:$0xff] }
 0x1d3   : > { %5406 = vmatpush3.bf16.msra.mxu1 %v6975_v50  ;;  %5377 = vmatprep.mubr.msk.bf16.mxu1 %vm7876_vm0, %v3756_v10  ;;  %v3729_v50 = vld [vmem:[#allocation2 + $0x80] sm:$0xff]  ;;  %vm7962_vm6 = vmmov %vm7876_vm0  ;;  %v7982_v27 = vld [vmem:[#allocation38_spill] sm:$0xff] }
 0x1d4   : > { %5407 = vmatprep.subr.bf16.mxu1 %v5727_v3  ;;  %v3759_v33 = vpack.c.bf16 %v3729_v50, %v3728_v11  ;;  %v7987_v50 = vld [vmem:[#allocation49_spill] sm:$0xff] }
 0x1d7   : > { %5408 = vmatpush3.bf16.msra.mxu1 %v5727_v3  ;;  %v4025_v3 = vld [vmem:[#allocation2 + $0x39] sm:$0xff] }
 0x1d9   : > { %5234 = vmatmul.mubr.msk.bf16.gmra.mrb[36].mxu0 %vm7941_vm3, %v7940_v14  ;;  %vm7964_vm3 = vmmov %vm7876_vm0  ;;  %v4029_v14 = vld [vmem:[#allocation2 + $0x59] sm:$0xff] }
 0x1da   : > { %5237 = vmatprep.mubr.msk.bf16.mxu0 %vm7943_vm10, %v7942_v63  ;;  %5378 = vmatmul.mubr.msk.bf16.gmra.mrb[4].mxu1 %vm7944_vm5, %v3757_v36  ;;  %vm7966_vm10 = vmmov %vm7876_vm0  ;;  %v4030_v36 = vld [vmem:[#allocation2 + $0x61] sm:$0xff] }
 0x1db   : > { %5381 = vmatprep.mubr.msk.bf16.mxu1 %vm7945_vm14, %v3758_v24  ;;  %vm7967_vm5 = vmmov %vm7876_vm0  ;;  %v7985_v24 = vld [vmem:[#allocation43_spill] sm:$0xff] }
 0x1dc   : > { %vm7968_vm14 = vmmov %vm7876_vm0 }
 0x1e1   : > { %5238 = vmatmul.mubr.msk.bf16.gmra.mrb[40].mxu0 %vm7947_vm7, %v7946_v43  ;;  %vm7970_vm7 = vmmov %vm7876_vm0  ;;  %v4034_v43 = vld [vmem:[#allocation2 + $0x81] sm:$0xff] }
 0x1e2   : > { %5241 = vmatprep.mubr.msk.bf16.mxu0 %vm7949_vm9, %v7948_v16  ;;  %5382 = vmatmul.mubr.msk.bf16.gmra.mrb[8].mxu1 %vm7950_vm1, %v3759_v33  ;;  %vm7972_vm9 = vmmov %vm7876_vm0  ;;  %v4031_v33 = vld [vmem:[#allocation2 + $0x69] sm:$0xff] }
 0x1e3   : > { %5385 = vmatprep.mubr.msk.bf16.mxu1 %vm7951_vm12, %v3760_v28  ;;  %vm7973_vm1 = vmmov %vm7876_vm0  ;;  %v4033_v28 = vld [vmem:[#allocation2 + $0x79] sm:$0xff]  ;;  %v7991_v16 = vld [vmem:[#allocation55_spill] sm:$0xff] }
 0x1e4   : > { %vm7974_vm12 = vmmov %vm7876_vm0 }
 0x1e9   : > { %5242 = vmatmul.mubr.msk.bf16.gmra.mrb[44].mxu0 %vm7953_vm4, %v7952_v22  ;;  %vm7975_vm4 = vnez %v7866_v51  ;;  %v8000_v22 = vld [vmem:[#allocation72_spill] sm:$0xff] }
 0x1ea   : > { %5245 = vmatprep.mubr.msk.bf16.mxu0 %vm7955_vm15, %v7954_v25  ;;  %5386 = vmatmul.mubr.msk.bf16.gmra.mrb[12].mxu1 %vm7956_vm8, %v3761_v19  ;;  %v4056_v40 = vsel %vm7975_vm4, %v4024_v44, 0.0  ;;  %vm7977_vm15 = vmmov %vm7876_vm0  ;;  %v7996_v19 = vld [vmem:[#allocation117_spill] sm:$0xff]  ;;  %v8004_v25 = vld [vmem:[#allocation78_spill] sm:$0xff] }
 0x1eb   : > { %5389 = vmatprep.mubr.msk.bf16.mxu1 %vm7957_vm2, %v3762_v55  ;;  %v4091_v48 = vpack.c.bf16 %v4056_v40, %v4023_v23  ;;  %vm7978_vm8 = vmmov %vm7876_vm0  ;;  %v8002_v55 = vld [vmem:[#allocation44_spill] sm:$0xff]  ;;  %v8030_v44 = vld [vmem:[#allocation19_spill] sm:$0xff] }
 0x1ec   : > { %vm7979_vm2 = vmmov %vm7876_vm0  ;;  %v8032_v40 = vld [vmem:[#allocation21_spill] sm:$0xff]  ;;  %v8033_v23 = vld [vmem:[#allocation22_spill] sm:$0xff] }
 0x1ed   : > { %vm7999_vm4 = vmmov %vm7876_vm0 }
 0x1f1   : > { %5246 = vmatmul.mubr.msk.bf16.gmra.mrb[48].mxu0 %vm7959_vm13, %v7958_v59  ;;  %vm7981_vm13 = vnez %v7980_v29  ;;  %v8039_v29 = vld [vmem:[#allocation28_spill] sm:$0xff] }
 0x1f2   : > { %5249 = vmatprep.mubr.msk.bf16.mxu0 %vm7961_vm11, %v7960_v46  ;;  %5390 = vmatmul.mubr.msk.bf16.gmra.mrb[16].mxu1 %vm7962_vm6, %v3763_v60  ;;  %v4058_v10 = vsel %vm7981_vm13, %v4026_v39, 0.0  ;;  %vm7983_vm11 = vnez %v7982_v27  ;;  %vm7984_vm6 = vmmov %vm7876_vm0  ;;  %v8010_v60 = vld [vmem:[#allocation75_spill] sm:$0xff]  ;;  %v8036_v39 = vld [vmem:[#allocation25_spill] sm:$0xff] }
 0x1f3   : > { %5393 = vmatprep.mubr.msk.bf16.mxu1 %vm7876_vm0, %v3764_v15  ;;  %v4060_v18 = vsel %vm7983_vm11, %v4028_v32, 0.0  ;;  %v4092_v51 = vpack.c.bf16 %v4058_v10, %v4025_v3  ;;  %vm8007_vm13 = vmmov %vm7876_vm0  ;;  %v8037_v32 = vld [vmem:[#allocation26_spill] sm:$0xff]  ;;  %v8038_v3 = vld [vmem:[#allocation27_spill] sm:$0xff] }
 0x1f4   : > { %v4093_v2 = vpack.c.bf16 %v4060_v18, %v4027_v1  ;;  %vm8009_vm11 = vmmov %vm7876_vm0  ;;  %v8040_v10 = vld [vmem:[#allocation29_spill] sm:$0xff]  ;;  %v8041_v27 = vld [vmem:[#allocation30_spill] sm:$0xff] }
 0x1f5   : > { %v8042_v18 = vld [vmem:[#allocation31_spill] sm:$0xff]  ;;  %v8044_v1 = vld [vmem:[#allocation33_spill] sm:$0xff] }
 0x1f9   : > { %5250 = vmatmul.mubr.msk.bf16.gmra.mrb[52].mxu0 %vm7964_vm3, %v7963_v34  ;;  %vm7986_vm3 = vnez %v7985_v24  ;;  %v8017_v34 = vld [vmem:[#allocation6_spill] sm:$0xff] }
 0x1fa   : > { %5253 = vmatprep.mubr.msk.bf16.mxu0 %vm7966_vm10, %v7965_v41  ;;  %5394 = vmatmul.mubr.msk.bf16.gmra.mrb[20].mxu1 %vm7967_vm5, %v3765_v4  ;;  %v4062_v63 = vsel %vm7986_vm3, %v4030_v36, 0.0  ;;  %vm7988_vm10 = vnez %v7987_v50  ;;  %vm7989_vm5 = vmmov %vm7876_vm0  ;;  %v8015_v4 = vld [vmem:[#allocation3_spill] sm:$0xff]  ;;  %v8019_v41 = vld [vmem:[#allocation8_spill] sm:$0xff] }
 0x1fb   : > { %5397 = vmatprep.mubr.msk.bf16.mxu1 %vm7968_vm14, %v3766_v47  ;;  %v4064_v13 = vsel %vm7988_vm10, %v4032_v37, 0.0  ;;  %v4094_v11 = vpack.c.bf16 %v4062_v63, %v4029_v14  ;;  %vm7990_vm14 = vmmov %vm7876_vm0  ;;  %vm312_vm10 = vcmask 191488   ;;  %v8018_v47 = vld [vmem:[#allocation7_spill] sm:$0xff] }
 0x1fc   : > { %v4095_v17 = vpack.c.bf16 %v4064_v13, %v4031_v33  ;;  %315 = vst.msk [vmem:[%s7169_s17 + $0x8] sm:$0xf] %vm312_vm10, %v8014_v30  ;;  %313 = vst.msk [vmem:[%s7169_s17] sm:$0xf] %vm312_vm10, %v8015_v4 }
 0x1fd   : > { %314 = vst.msk [vmem:[%s7169_s17 + $0x4] sm:$0xf] %vm312_vm10, %v8016_v0  ;;  %316 = vst.msk [vmem:[%s7169_s17 + $0xc] sm:$0xf] %vm312_vm10, %v8017_v34 }
 0x1fe   : > { %317 = vst.msk [vmem:[%s7169_s17 + $0x10] sm:$0xf] %vm312_vm10, %v8018_v47  ;;  %318 = vst.msk [vmem:[%s7169_s17 + $0x14] sm:$0xf] %vm312_vm10, %v8019_v41 }
 0x1ff   : > { %319 = vst.msk [vmem:[%s7169_s17 + $0x18] sm:$0xf] %vm312_vm10, %v8020_v26  ;;  %320 = vst.msk [vmem:[%s7169_s17 + $0x1c] sm:$0xf] %vm312_vm10, %v8021_v61 }
 0x200   : > { %321 = vst.msk [vmem:[%s7169_s17 + $0x20] sm:$0xf] %vm312_vm10, %v8022_v58  ;;  %323 = vst.msk [vmem:[%s7169_s17 + $0x28] sm:$0xf] %vm312_vm10, %v8024_v6 }
 0x201   : > { %5254 = vmatmul.mubr.msk.bf16.gmra.mrb[56].mxu0 %vm7970_vm7, %v7969_v54  ;;  %vm7992_vm7 = vnez %v7991_v16  ;;  %v8025_v54 = vld [vmem:[#allocation14_spill] sm:$0xff]  ;;  %327 = vst.msk [vmem:[%s7169_s17 + $0x38] sm:$0xf] %vm312_vm10, %v8028_v12  ;;  %328 = vst.msk [vmem:[%s7169_s17 + $0x3c] sm:$0xf] %vm312_vm10, %v8029_v62 }
 0x202   : > { %5257 = vmatprep.mubr.msk.bf16.mxu0 %vm7972_vm9, %v7971_v31  ;;  %5398 = vmatmul.mubr.msk.bf16.gmra.mrb[24].mxu1 %vm7973_vm1, %v3767_v52  ;;  %v4066_v7 = vsel %vm7992_vm7, %v4034_v43, 0.0  ;;  %vm7993_vm9 = vmmov %vm7876_vm0  ;;  %v8023_v52 = vld [vmem:[#allocation12_spill] sm:$0xff]  ;;  %324 = vst.msk [vmem:[%s7169_s17 + $0x2c] sm:$0xf] %vm312_vm10, %v8025_v54 }
 0x203   : > { %5401 = vmatprep.mubr.msk.bf16.mxu1 %vm7974_vm12, %v3768_v57  ;;  %v4096_v45 = vpack.c.bf16 %v4066_v7, %v4033_v28  ;;  %vm7995_vm1 = vmmov %vm7876_vm0  ;;  %322 = vst.msk [vmem:[%s7169_s17 + $0x24] sm:$0xf] %vm312_vm10, %v8023_v52  ;;  %v8026_v57 = vld [vmem:[#allocation15_spill] sm:$0xff]  ;;  %v8027_v31 = vld [vmem:[#allocation16_spill] sm:$0xff] }
 0x204   : > { %vm7997_vm12 = vmmov %vm7876_vm0  ;;  %325 = vst.msk [vmem:[%s7169_s17 + $0x30] sm:$0xf] %vm312_vm10, %v8026_v57 }
 0x205   : > { %vm8013_vm3 = vmmov %vm7995_vm1  ;;  %326 = vst.msk [vmem:[%s7169_s17 + $0x34] sm:$0xf] %vm312_vm10, %v8027_v31 }
 0x206   : > { %329 = vst.msk [vmem:[%s7169_s17 + $0x40] sm:$0xf] %vm312_vm10, %v8030_v44  ;;  %331 = vst.msk [vmem:[%s7169_s17 + $0x48] sm:$0xf] %vm312_vm10, %v8032_v40 }
 0x207   : > { %332 = vst.msk [vmem:[%s7169_s17 + $0x4c] sm:$0xf] %vm312_vm10, %v8033_v23  ;;  %335 = vst.msk [vmem:[%s7169_s17 + $0x58] sm:$0xf] %vm312_vm10, %v8036_v39 }
 0x208   : > { %336 = vst.msk [vmem:[%s7169_s17 + $0x5c] sm:$0xf] %vm312_vm10, %v8037_v32  ;;  %337 = vst.msk [vmem:[%s7169_s17 + $0x60] sm:$0xf] %vm312_vm10, %v8038_v3 }
 0x209   : > { %5258 = vmatmul.mubr.msk.bf16.gmra.mrb[60].mxu0 %vm7977_vm15, %v7976_v5  ;;  %vm8001_vm15 = vmmov %vm7876_vm0  ;;  %v8034_v5 = vld [vmem:[#allocation23_spill] sm:$0xff]  ;;  %338 = vst.msk [vmem:[%s7169_s17 + $0x64] sm:$0xf] %vm312_vm10, %v8039_v29 }
 0x20a   : > { %5402 = vmatmul.mubr.msk.bf16.gmra.mrb[28].mxu1 %vm7978_vm8, %v3769_v9  ;;  %vm8003_vm8 = vmmov %vm7876_vm0  ;;  %v8031_v9 = vld [vmem:[#allocation20_spill] sm:$0xff]  ;;  %333 = vst.msk [vmem:[%s7169_s17 + $0x50] sm:$0xf] %vm312_vm10, %v8034_v5 }
 0x20b   : > { %5409 = vmatprep.mubr.msk.bf16.mxu1 %vm7979_vm2, %v4091_v48  ;;  %vm8005_vm2 = vmmov %vm7876_vm0  ;;  %330 = vst.msk [vmem:[%s7169_s17 + $0x44] sm:$0xf] %vm312_vm10, %v8031_v9  ;;  %v8035_v48 = vld [vmem:[#allocation24_spill] sm:$0xff] }
 0x20c   : > { %334 = vst.msk [vmem:[%s7169_s17 + $0x54] sm:$0xf] %vm312_vm10, %v8035_v48  ;;  %339 = vst.msk [vmem:[%s7169_s17 + $0x68] sm:$0xf] %vm312_vm10, %v8040_v10 }
 0x20d   : > { %340 = vst.msk [vmem:[%s7169_s17 + $0x6c] sm:$0xf] %vm312_vm10, %v8041_v27  ;;  %341 = vst.msk [vmem:[%s7169_s17 + $0x70] sm:$0xf] %vm312_vm10, %v8042_v18 }
 0x20e   : > { %343 = vst.msk [vmem:[%s7169_s17 + $0x78] sm:$0xf] %vm312_vm10, %v8044_v1 }
 0x212   : > { %5410 = vmatmul.mubr.msk.bf16.vlgmr.msra.gmra.mrb[0].mxu1 %vm7984_vm6, %v4092_v51  ;;  %vm8011_vm6 = vmmov %vm7876_vm0  ;;  %v8043_v51 = vld [vmem:[#allocation32_spill] sm:$0xff] }
 0x213   : > { %5413 = vmatprep.mubr.msk.bf16.mxu1 %vm7876_vm0, %v4093_v2  ;;  %vm8012_vm0 = vnez %v7868_v21  ;;  %342 = vst.msk [vmem:[%s7169_s17 + $0x74] sm:$0xf] %vm312_vm10, %v8043_v51  ;;  %v8045_v2 = vld [vmem:[#allocation34_spill] sm:$0xff] }
 0x214   : > { %v4086_v59 = vsel %vm8012_vm0, %v4054_v56, 0.0  ;;  %344 = vst.msk [vmem:[%s7169_s17 + $0x7c] sm:$0xf] %vm312_vm10, %v8045_v2 }
 0x215   : > { %v4106_v15 = vpack.c.bf16 %v4086_v59, %v4053_v42 }
 0x21a   : > { %5414 = vmatmul.mubr.msk.bf16.gmra.mrb[4].mxu1 %vm7989_vm5, %v4094_v11  ;;  %vm4552_vm5 = vcmask 257216  }
 0x21b   : > { %5417 = vmatprep.mubr.msk.bf16.mxu1 %vm7990_vm14, %v4095_v17 }
 0x222   : > { %5418 = vmatmul.mubr.msk.bf16.gmra.mrb[8].mxu1 %vm7993_vm9, %v4096_v45 }
 0x223   : > { %5421 = vmatprep.mubr.msk.bf16.mxu1 %vm7995_vm1, %v7994_v49 }
 0x22a   : > { %5422 = vmatmul.mubr.msk.bf16.gmra.mrb[12].mxu1 %vm7997_vm12, %v7996_v19 }
 0x22b   : > { %5425 = vmatprep.mubr.msk.bf16.mxu1 %vm7999_vm4, %v7998_v35 }
 0x232   : > { %5426 = vmatmul.mubr.msk.bf16.gmra.mrb[16].mxu1 %vm8001_vm15, %v8000_v22 }
 0x233   : > { %5429 = vmatprep.mubr.msk.bf16.mxu1 %vm8003_vm8, %v8002_v55 }
 0x23a   : > { %5430 = vmatmul.mubr.msk.bf16.gmra.mrb[20].mxu1 %vm8005_vm2, %v8004_v25 }
 0x23b   : > { %5433 = vmatprep.mubr.msk.bf16.mxu1 %vm8007_vm13, %v8006_v8 }
 0x242   : > { %5434 = vmatmul.mubr.msk.bf16.gmra.mrb[24].mxu1 %vm8009_vm11, %v8008_v53 }
 0x243   : > { %5437 = vmatprep.mubr.msk.bf16.mxu1 %vm8011_vm6, %v8010_v60 }
 0x24a   : > { %5438 = vmatmul.mubr.msk.bf16.gmra.mrb[28].mxu1 %vm8013_vm3, %v4106_v15 }
 0x2a4   : > { %v7158_v46 = vpop.f32.mrb[32].mxu0 }
 0x2a5   : > { %v7160_v20 = vpop.f32.mrb[33].mxu0 }
 0x2a6   : > { %v7162_v38 = vpop.f32.mrb[34].mxu0 }
 0x2a7   : > { %v7171_v21 = vpop.f32.mrb[35].mxu0 }
 0x2ac   : > { %v5235_v36 = vpop.f32.mrb[36].mxu0 }
 0x2ad   : > { %v2596_v37 = vpop.f32.mrb[37].mxu0 }
 0x2ae   : > { %v5236_v14 = vpop.f32.mrb[38].mxu0 }
 0x2af   : > { %v2599_v24 = vpop.f32.mrb[39].mxu0 }
 0x2b4   : > { %v5239_v63 = vpop.f32.mrb[40].mxu0 }
 0x2b5   : > { %v2612_v50 = vpop.f32.mrb[41].mxu0 }
 0x2b6   : > { %v5240_v13 = vpop.f32.mrb[42].mxu0 }
 0x2b7   : > { %v2615_v11 = vpop.f32.mrb[43].mxu0 }
 0x2bc   : > { %v7269_v33 = vpop.f32.mrb[44].mxu0 }
 0x2bd   : > { %v7271_v17 = vpop.f32.mrb[45].mxu0 }
 0x2be   : > { %v7273_v43 = vpop.f32.mrb[46].mxu0 }
 0x2bf   : > { %v7275_v28 = vpop.f32.mrb[47].mxu0 }
 0x2c4   : > { %v7277_v16 = vpop.f32.mrb[48].mxu0 }
 0x2c5   : > { %v7279_v7 = vpop.f32.mrb[49].mxu0 }
 0x2c6   : > { %v7281_v45 = vpop.f32.mrb[50].mxu0 }
 0x2c7   : > { %v7283_v49 = vpop.f32.mrb[51].mxu0 }
 0x2cc   : > { %v7285_v19 = vpop.f32.mrb[52].mxu0 }
 0x2cd   : > { %v7287_v35 = vpop.f32.mrb[53].mxu0 }
 0x2ce   : > { %v7289_v22 = vpop.f32.mrb[54].mxu0 }
 0x2cf   : > { %v7291_v55 = vpop.f32.mrb[55].mxu0 }
 0x2d4   : > { %v7293_v25 = vpop.f32.mrb[56].mxu0 }
 0x2d5   : > { %v7295_v8 = vpop.f32.mrb[57].mxu0 }
 0x2d6   : > { %v7297_v56 = vpop.f32.mrb[58].mxu0 }
 0x2d7   : > { %v7299_v53 = vpop.f32.mrb[59].mxu0 }
 0x2dc   : > { %v7301_v60 = vpop.f32.mrb[60].mxu0 }
 0x2dd   : > { %v7303_v42 = vpop.f32.mrb[61].mxu0 }
 0x2de   : > { %v7305_v59 = vpop.f32.mrb[62].mxu0 }
 0x2df   : > { %v7307_v15 = vpop.f32.mrb[63].mxu0 }
 0x2e5   : > { %v5411_v30 = vpop.f32.mrb[0].mxu1 }
 0x2e6   : > { %v5441_v4 = vadd.f32 %v5411_v30, %v7158_v46  ;;  %v4201_v0 = vpop.f32.mrb[1].mxu1 }
 0x2e7   : > { %v5442_v34 = vadd.f32 %v4201_v0, %v7160_v20  ;;  %v5412_v47 = vpop.f32.mrb[2].mxu1 }
 0x2e8   : > { %v4871_v41 = vpack.c.bf16 %v5441_v4, %v5441_v4  ;;  %v5443_v26 = vadd.f32 %v5412_v47, %v7162_v38  ;;  %v4204_v61 = vpop.f32.mrb[3].mxu1 }
 0x2e9   : > { %v4869_v58 = vpack.c.bf16 %v5442_v34, %v5442_v34  ;;  %v5444_v52 = vadd.f32 %v4204_v61, %v7171_v21 }
 0x2ea   : > { %4460 = vrot.lane.b32.xlu1 %v4871_v41, %s5738_s25  ;;  %v4872_v6 = vpack.c.bf16 %v5443_v26, %v5443_v26 }
 0x2eb   : > { %4456 = vrot.lane.b32.xlu0 %v4869_v58, %s5738_s25  ;;  %v4870_v54 = vpack.c.bf16 %v5444_v52, %v5444_v52 }
 0x2ed   : > { %v5415_v57 = vpop.f32.mrb[4].mxu1 }
 0x2ee   : > { %v5445_v46 = vadd.f32 %v5415_v57, %v5235_v36  ;;  %v4217_v31 = vpop.f32.mrb[5].mxu1  ;;  %4462 = vrot.lane.b32.xlu1 %v4872_v6, %s5738_s25 }
 0x2ef   : > { %v5446_v20 = vadd.f32 %v4217_v31, %v2596_v37  ;;  %v5416_v12 = vpop.f32.mrb[6].mxu1  ;;  %4458 = vrot.lane.b32.xlu0 %v4870_v54, %s5738_s25 }
 0x2f0   : > { %v4875_v38 = vpack.c.bf16 %v5445_v46, %v5445_v46  ;;  %v5447_v62 = vadd.f32 %v5416_v12, %v5236_v14  ;;  %v4220_v44 = vpop.f32.mrb[7].mxu1 }
 0x2f1   : > { %v5448_v21 = vadd.f32 %v4220_v44, %v2599_v24  ;;  %v4873_v40 = vpack.c.bf16 %v5446_v20, %v5446_v20 }
 0x2f2   : > { %v4876_v9 = vpack.c.bf16 %v5447_v62, %v5447_v62 }
 0x2f3   : > { %4468 = vrot.lane.b32.xlu0 %v4875_v38, %s5738_s25  ;;  %v4874_v5 = vpack.c.bf16 %v5448_v21, %v5448_v21 }
 0x2f4   : > { %4470 = vrot.lane.b32.xlu1 %v4876_v9, %s5738_s25 }
 0x2f5   : > { %v5419_v23 = vpop.f32.mrb[8].mxu1 }
 0x2f6   : > { %v5449_v48 = vadd.f32 %v5419_v23, %v5239_v63  ;;  %v4233_v39 = vpop.f32.mrb[9].mxu1 }
 0x2f7   : > { %v5450_v32 = vadd.f32 %v4233_v39, %v2612_v50  ;;  %v5420_v3 = vpop.f32.mrb[10].mxu1  ;;  %4464 = vrot.lane.b32.xlu0 %v4873_v40, %s5738_s25 }
 0x2f8   : > { %v4879_v29 = vpack.c.bf16 %v5449_v48, %v5449_v48  ;;  %v5451_v10 = vadd.f32 %v5420_v3, %v5240_v13  ;;  %v4236_v27 = vpop.f32.mrb[11].mxu1  ;;  %4466 = vrot.lane.b32.xlu1 %v4874_v5, %s5738_s25 }
 0x2f9   : > { %v5452_v18 = vadd.f32 %v4236_v27, %v2615_v11  ;;  %v4877_v1 = vpack.c.bf16 %v5450_v32, %v5450_v32 }
 0x2fa   : > { %v4880_v51 = vpack.c.bf16 %v5451_v10, %v5451_v10 }
 0x2fb   : > { %4476 = vrot.lane.b32.xlu0 %v4879_v29, %s5738_s25  ;;  %v4878_v36 = vpack.c.bf16 %v5452_v18, %v5452_v18 }
 0x2fc   : > { %4478 = vrot.lane.b32.xlu1 %v4880_v51, %s5738_s25 }
 0x2fd   : > { %v5423_v2 = vpop.f32.mrb[12].mxu1 }
 0x2fe   : > { %v5453_v37 = vadd.f32 %v5423_v2, %v7269_v33  ;;  %v4249_v14 = vpop.f32.mrb[13].mxu1 }
 0x2ff   : > { %v5454_v24 = vadd.f32 %v4249_v14, %v7271_v17  ;;  %v5424_v63 = vpop.f32.mrb[14].mxu1  ;;  %4472 = vrot.lane.b32.xlu0 %v4877_v1, %s5738_s25 }
 0x300   : > { %v4883_v50 = vpack.c.bf16 %v5453_v37, %v5453_v37  ;;  %v5455_v13 = vadd.f32 %v5424_v63, %v7273_v43  ;;  %v4252_v11 = vpop.f32.mrb[15].mxu1  ;;  %4474 = vrot.lane.b32.xlu1 %v4878_v36, %s5738_s25 }
 0x301   : > { %v5456_v30 = vadd.f32 %v4252_v11, %v7275_v28  ;;  %v4881_v33 = vpack.c.bf16 %v5454_v24, %v5454_v24 }
 0x302   : > { %v4884_v4 = vpack.c.bf16 %v5455_v13, %v5455_v13 }
 0x303   : > { %4484 = vrot.lane.b32.xlu0 %v4883_v50, %s5738_s25  ;;  %v4882_v34 = vpack.c.bf16 %v5456_v30, %v5456_v30 }
 0x304   : > { %4486 = vrot.lane.b32.xlu1 %v4884_v4, %s5738_s25 }
 0x305   : > { %v5427_v0 = vpop.f32.mrb[16].mxu1 }
 0x306   : > { %v5457_v17 = vadd.f32 %v5427_v0, %v7277_v16  ;;  %v4265_v47 = vpop.f32.mrb[17].mxu1 }
 0x307   : > { %v5458_v41 = vadd.f32 %v4265_v47, %v7279_v7  ;;  %v5428_v26 = vpop.f32.mrb[18].mxu1  ;;  %4480 = vrot.lane.b32.xlu0 %v4881_v33, %s5738_s25 }
 0x308   : > { %v4887_v43 = vpack.c.bf16 %v5457_v17, %v5457_v17  ;;  %v5459_v61 = vadd.f32 %v5428_v26, %v7281_v45  ;;  %v4268_v28 = vpop.f32.mrb[19].mxu1  ;;  %4482 = vrot.lane.b32.xlu1 %v4882_v34, %s5738_s25 }
 0x309   : > { %v5460_v58 = vadd.f32 %v4268_v28, %v7283_v49  ;;  %v4885_v16 = vpack.c.bf16 %v5458_v41, %v5458_v41 }
 0x30a   : > { %v4888_v52 = vpack.c.bf16 %v5459_v61, %v5459_v61 }
 0x30b   : > { %4492 = vrot.lane.b32.xlu0 %v4887_v43, %s5738_s25  ;;  %v4886_v54 = vpack.c.bf16 %v5460_v58, %v5460_v58 }
 0x30c   : > { %4494 = vrot.lane.b32.xlu1 %v4888_v52, %s5738_s25 }
 0x30d   : > { %v5431_v6 = vpop.f32.mrb[20].mxu1 }
 0x30e   : > { %v5461_v7 = vadd.f32 %v5431_v6, %v7285_v19  ;;  %v4281_v57 = vpop.f32.mrb[21].mxu1 }
 0x30f   : > { %v5462_v46 = vadd.f32 %v4281_v57, %v7287_v35  ;;  %v5432_v31 = vpop.f32.mrb[22].mxu1  ;;  %4488 = vrot.lane.b32.xlu0 %v4885_v16, %s5738_s25 }
 0x310   : > { %v4891_v45 = vpack.c.bf16 %v5461_v7, %v5461_v7  ;;  %v5463_v20 = vadd.f32 %v5432_v31, %v7289_v22  ;;  %v4284_v49 = vpop.f32.mrb[23].mxu1  ;;  %4490 = vrot.lane.b32.xlu1 %v4886_v54, %s5738_s25 }
 0x311   : > { %v5464_v12 = vadd.f32 %v4284_v49, %v7291_v55  ;;  %v4889_v19 = vpack.c.bf16 %v5462_v46, %v5462_v46 }
 0x312   : > { %v4892_v38 = vpack.c.bf16 %v5463_v20, %v5463_v20 }
 0x313   : > { %4500 = vrot.lane.b32.xlu0 %v4891_v45, %s5738_s25  ;;  %v4890_v44 = vpack.c.bf16 %v5464_v12, %v5464_v12 }
 0x314   : > { %4502 = vrot.lane.b32.xlu1 %v4892_v38, %s5738_s25 }
 0x315   : > { %v5435_v62 = vpop.f32.mrb[24].mxu1 }
 0x316   : > { %v5465_v35 = vadd.f32 %v5435_v62, %v7293_v25  ;;  %v4297_v21 = vpop.f32.mrb[25].mxu1 }
 0x317   : > { %v5466_v9 = vadd.f32 %v4297_v21, %v7295_v8  ;;  %v5436_v40 = vpop.f32.mrb[26].mxu1  ;;  %4496 = vrot.lane.b32.xlu0 %v4889_v19, %s5738_s25 }
 0x318   : > { %v4895_v22 = vpack.c.bf16 %v5465_v35, %v5465_v35  ;;  %v5467_v23 = vadd.f32 %v5436_v40, %v7297_v56  ;;  %v4300_v55 = vpop.f32.mrb[27].mxu1  ;;  %4498 = vrot.lane.b32.xlu1 %v4890_v44, %s5738_s25 }
 0x319   : > { %v5468_v5 = vadd.f32 %v4300_v55, %v7299_v53  ;;  %v4893_v25 = vpack.c.bf16 %v5466_v9, %v5466_v9 }
 0x31a   : > { %v4896_v48 = vpack.c.bf16 %v5467_v23, %v5467_v23 }
 0x31b   : > { %4508 = vrot.lane.b32.xlu0 %v4895_v22, %s5738_s25  ;;  %v4894_v32 = vpack.c.bf16 %v5468_v5, %v5468_v5 }
 0x31c   : > { %4510 = vrot.lane.b32.xlu1 %v4896_v48, %s5738_s25 }
 0x31d   : > { %v5439_v39 = vpop.f32.mrb[28].mxu1 }
 0x31e   : > { %v5469_v8 = vadd.f32 %v5439_v39, %v7301_v60  ;;  %v4313_v3 = vpop.f32.mrb[29].mxu1 }
 0x31f   : > { %v5470_v29 = vadd.f32 %v4313_v3, %v7303_v42  ;;  %v5440_v10 = vpop.f32.mrb[30].mxu1  ;;  %4504 = vrot.lane.b32.xlu0 %v4893_v25, %s5738_s25 }
 0x320   : > { %v5471_v56 = vadd.f32 %v5440_v10, %v7305_v59  ;;  %v4316_v53 = vpop.f32.mrb[31].mxu1  ;;  %4506 = vrot.lane.b32.xlu1 %v4894_v32, %s5738_s25  ;;  %v4899_v60 = vpack.c.bf16 %v5469_v8, %v5469_v8 }
 0x321   : > { %v4897_v27 = vpack.c.bf16 %v5470_v29, %v5470_v29  ;;  %v5472_v18 = vadd.f32 %v4316_v53, %v7307_v15 }
 0x322   : > { %v4900_v42 = vpack.c.bf16 %v5471_v56, %v5471_v56 }
 0x323   : > { %v4898_v51 = vpack.c.bf16 %v5472_v18, %v5472_v18  ;;  %4512 = vrot.lane.b32.xlu0 %v4897_v27, %s5738_s25 }
 0x325   : > { %4514 = vrot.lane.b32.xlu1 %v4898_v51, %s5738_s25 }
 0x327   : > { %4516 = vrot.lane.b32.xlu0 %v4899_v60, %s5738_s25 }
 0x329   : > { %4518 = vrot.lane.b32.xlu1 %v4900_v42, %s5738_s25 }
 0x35c   : > { %v4461_v59 = vpop.permute.xlu1 %4460 }
 0x35d   : > { %4555 = vst.msk [vmem:[%s7169_s17 + $0x8] sm:$0xf] %vm4552_vm5, %v4461_v59  ;;  %v4457_v15 = vpop.permute.xlu0 %4456 }
 0x35e   : > { %4553 = vst.msk [vmem:[%s7169_s17] sm:$0xf] %vm4552_vm5, %v4457_v15 }
 0x360   : > { %v4463_v1 = vpop.permute.xlu1 %4462 }
 0x361   : > { %4556 = vst.msk [vmem:[%s7169_s17 + $0xc] sm:$0xf] %vm4552_vm5, %v4463_v1  ;;  %v4459_v2 = vpop.permute.xlu0 %4458 }
 0x362   : > { %4554 = vst.msk [vmem:[%s7169_s17 + $0x4] sm:$0xf] %vm4552_vm5, %v4459_v2 }
 0x365   : > { %v4469_v36 = vpop.permute.xlu0 %4468 }
 0x366   : > { %4559 = vst.msk [vmem:[%s7169_s17 + $0x18] sm:$0xf] %vm4552_vm5, %v4469_v36  ;;  %v4471_v37 = vpop.permute.xlu1 %4470 }
 0x367   : > { %4560 = vst.msk [vmem:[%s7169_s17 + $0x1c] sm:$0xf] %vm4552_vm5, %v4471_v37 }
 0x369   : > { %v4465_v14 = vpop.permute.xlu0 %4464 }
 0x36a   : > { %4557 = vst.msk [vmem:[%s7169_s17 + $0x10] sm:$0xf] %vm4552_vm5, %v4465_v14  ;;  %v4467_v24 = vpop.permute.xlu1 %4466 }
 0x36b   : > { %4558 = vst.msk [vmem:[%s7169_s17 + $0x14] sm:$0xf] %vm4552_vm5, %v4467_v24 }
 0x36d   : > { %v4477_v63 = vpop.permute.xlu0 %4476 }
 0x36e   : > { %4563 = vst.msk [vmem:[%s7169_s17 + $0x28] sm:$0xf] %vm4552_vm5, %v4477_v63  ;;  %v4479_v50 = vpop.permute.xlu1 %4478 }
 0x36f   : > { %4564 = vst.msk [vmem:[%s7169_s17 + $0x2c] sm:$0xf] %vm4552_vm5, %v4479_v50 }
 0x371   : > { %v4473_v13 = vpop.permute.xlu0 %4472 }
 0x372   : > { %4561 = vst.msk [vmem:[%s7169_s17 + $0x20] sm:$0xf] %vm4552_vm5, %v4473_v13  ;;  %v4475_v11 = vpop.permute.xlu1 %4474 }
 0x373   : > { %4562 = vst.msk [vmem:[%s7169_s17 + $0x24] sm:$0xf] %vm4552_vm5, %v4475_v11 }
 0x375   : > { %v4485_v30 = vpop.permute.xlu0 %4484 }
 0x376   : > { %4567 = vst.msk [vmem:[%s7169_s17 + $0x38] sm:$0xf] %vm4552_vm5, %v4485_v30  ;;  %v4487_v4 = vpop.permute.xlu1 %4486 }
 0x377   : > { %4568 = vst.msk [vmem:[%s7169_s17 + $0x3c] sm:$0xf] %vm4552_vm5, %v4487_v4 }
 0x379   : > { %v4481_v33 = vpop.permute.xlu0 %4480 }
 0x37a   : > { %4565 = vst.msk [vmem:[%s7169_s17 + $0x30] sm:$0xf] %vm4552_vm5, %v4481_v33  ;;  %v4483_v0 = vpop.permute.xlu1 %4482 }
 0x37b   : > { %4566 = vst.msk [vmem:[%s7169_s17 + $0x34] sm:$0xf] %vm4552_vm5, %v4483_v0 }
 0x37d   : > { %v4493_v34 = vpop.permute.xlu0 %4492 }
 0x37e   : > { %4571 = vst.msk [vmem:[%s7169_s17 + $0x48] sm:$0xf] %vm4552_vm5, %v4493_v34  ;;  %v4495_v17 = vpop.permute.xlu1 %4494 }
 0x37f   : > { %4572 = vst.msk [vmem:[%s7169_s17 + $0x4c] sm:$0xf] %vm4552_vm5, %v4495_v17 }
 0x381   : > { %v4489_v47 = vpop.permute.xlu0 %4488 }
 0x382   : > { %4569 = vst.msk [vmem:[%s7169_s17 + $0x40] sm:$0xf] %vm4552_vm5, %v4489_v47  ;;  %v4491_v41 = vpop.permute.xlu1 %4490 }
 0x383   : > { %4570 = vst.msk [vmem:[%s7169_s17 + $0x44] sm:$0xf] %vm4552_vm5, %v4491_v41 }
 0x385   : > { %v4501_v26 = vpop.permute.xlu0 %4500 }
 0x386   : > { %4575 = vst.msk [vmem:[%s7169_s17 + $0x58] sm:$0xf] %vm4552_vm5, %v4501_v26  ;;  %v4503_v43 = vpop.permute.xlu1 %4502 }
 0x387   : > { %4576 = vst.msk [vmem:[%s7169_s17 + $0x5c] sm:$0xf] %vm4552_vm5, %v4503_v43 }
 0x389   : > { %v4497_v61 = vpop.permute.xlu0 %4496 }
 0x38a   : > { %4573 = vst.msk [vmem:[%s7169_s17 + $0x50] sm:$0xf] %vm4552_vm5, %v4497_v61  ;;  %v4499_v28 = vpop.permute.xlu1 %4498 }
 0x38b   : > { %4574 = vst.msk [vmem:[%s7169_s17 + $0x54] sm:$0xf] %vm4552_vm5, %v4499_v28 }
 0x38d   : > { %v4509_v58 = vpop.permute.xlu0 %4508 }
 0x38e   : > { %4579 = vst.msk [vmem:[%s7169_s17 + $0x68] sm:$0xf] %vm4552_vm5, %v4509_v58  ;;  %v4511_v52 = vpop.permute.xlu1 %4510 }
 0x38f   : > { %4580 = vst.msk [vmem:[%s7169_s17 + $0x6c] sm:$0xf] %vm4552_vm5, %v4511_v52 }
 0x391   : > { %v4505_v16 = vpop.permute.xlu0 %4504 }
 0x392   : > { %4577 = vst.msk [vmem:[%s7169_s17 + $0x60] sm:$0xf] %vm4552_vm5, %v4505_v16  ;;  %v4507_v6 = vpop.permute.xlu1 %4506 }
 0x393   : > { %4578 = vst.msk [vmem:[%s7169_s17 + $0x64] sm:$0xf] %vm4552_vm5, %v4507_v6 }
 0x395   : > { %v4513_v54 = vpop.permute.xlu0 %4512 }
 0x396   : > { %4581 = vst.msk [vmem:[%s7169_s17 + $0x70] sm:$0xf] %vm4552_vm5, %v4513_v54 }
 0x397   : > { %v4515_v7 = vpop.permute.xlu1 %4514 }
 0x398   : > { %4582 = vst.msk [vmem:[%s7169_s17 + $0x74] sm:$0xf] %vm4552_vm5, %v4515_v7 }
 0x399   : > { %v4517_v57 = vpop.permute.xlu0 %4516 }
 0x39a   : > { %4583 = vst.msk [vmem:[%s7169_s17 + $0x78] sm:$0xf] %vm4552_vm5, %v4517_v57 }
 0x39b   : > { %v4519_v46 = vpop.permute.xlu1 %4518 }
 0x39c   : > { %4584 = vst.msk [vmem:[%s7169_s17 + $0x7c] sm:$0xf] %vm4552_vm5, %v4519_v46 }
 0x39d PF: > { %s17_s24 = sadd.s32 1, %s5735_s24  }
 0x39e   : > { %p14_p4 = scmp.ge.s32.totalorder %s17_s24, 4  }
 0x3a0   :  { %16 = sbr.rel (!%p14_p4) target bundleno = 1 (0x1), region = 78 }

// kernel: dense_block_forward.5
= control target key start
LH: loop header
LB: loop body
LE: loop exit
PB: predicated region body
PF: predicated region fallthrough
CT: control target
= control target key end

     0   :  { %s5777_s24 = smov 0   ;;  %s7430_s0 = inlined_call_operand.vmem [shape: bf16[2,256,32], index: 0, kind: input, shape index: {}]   ;;  %s7431_s1 = inlined_call_operand.vmem [shape: f32[1,32], index: 1, kind: input, shape index: {}]   ;;  %s7432_s2 = inlined_call_operand.vmem [shape: f32[1,32], index: 2, kind: input, shape index: {}]   ;;  %s7433_s3 = inlined_call_operand.vmem [shape: bf16[32,32], index: 3, kind: input, shape index: {}]   ;;  %s7434_s4 = inlined_call_operand.vmem [shape: f32[1,32], index: 4, kind: input, shape index: {}]   ;;  %s7435_s5 = inlined_call_operand.vmem [shape: f32[1,32], index: 5, kind: input, shape index: {}]   ;;  %s7436_s6 = inlined_call_operand.vmem [shape: bf16[288,8], index: 6, kind: input, shape index: {}]   ;;  %s7437_s7 = inlined_call_operand.vmem [shape: bf16[2,256,40], index: 7, kind: output, shape index: {}]  }
   0x1 LB: > { %s4639_s25 = sadd.s32 4294967295, %s5733_s24   ;;  %p4643_p0 = scmp.ge.s32.totalorder %s5733_s24, 1  ;;  %s5733_s24 = sphi %s5777_s24, %s17_s24  }
   0x2   : > { %p237_p1 = scmp.lt.s32.totalorder %s5733_s24, 3 }
   0x4   : > { %p238_p2 = pnand %p4643_p0, %p237_p1 }
   0x6   : > { %241 = sbr.rel (%p238_p2) target bundleno = 925 (0x39d), region = 48 }
   0xd   : > { %v5706_v0 = vld [vmem:[%s7433_s3] sm:$0xff]   ;;  %p269_p3 = scmp.lt.s32.totalorder %s4639_s25, 1  ;;  %v5707_v1 = vld [vmem:[%s7433_s3 + $0x8] sm:$0xff]   ;;  %vm7539_vm0 = vcmask 261120  }
   0xe   : > { %5080 = vmatprep.subr.bf16.mxu0 %v5706_v0  ;;  %v5797_v2 = vld [vmem:[%s7431_s1] ss:$0 sm:$0xff] }
   0xf   : > { %s8044_s25 = smov (!%p269_p3, %s4639_s25), 1  ;;  %5081 = vmatpush3.bf16.msra.mxu0 %v5706_v0  ;;  %v5830_v12 = vld [vmem:[%s7432_s2] ss:$0 sm:$0xff] }
  0x10   : > { %5082 = vmatprep.subr.bf16.mxu0 %v5707_v1  ;;  %s4866_s30 = sshll.u32 %s8044_s25, 7  ;;  %s5736_s25 = smov 32  }
  0x11   : > { %s5804_s12 = scalar_lea.vmem %s7430_s0, %s4866_s30  ;;  %s7167_s17 = scalar_lea.vmem %s7437_s7, %s4866_s30 }
  0x12   : > { %v5807_v3 = vld [vmem:[%s5804_s12] sm:$0xf]  ;;  %v5810_v4 = vld [vmem:[%s5804_s12 + $0x4] sm:$0xf]  ;;  %v5813_v5 = vld [vmem:[%s5804_s12 + $0x8] sm:$0xf] }
  0x13   : > { %7596 = vst [vmem:[#allocation3_spill] sm:$0xff] %v5807_v3  ;;  %7597 = vst [vmem:[#allocation4_spill] sm:$0xff] %v5810_v4  ;;  %5083 = vmatpush3.bf16.msra.mxu0 %v5707_v1  ;;  %v345_v6 = vunpack.c.l.bf16 %v5807_v3  ;;  %v346_v7 = vunpack.c.l.bf16 %v5810_v4  ;;  %v5818_v8 = vld [vmem:[%s5804_s12 + $0xc] sm:$0xf]  ;;  %v347_v9 = vunpack.c.l.bf16 %v5813_v5  ;;  %v5822_v10 = vld [vmem:[%s5804_s12 + $0x10] sm:$0xf] }
  0x14   : > { %7598 = vst [vmem:[#allocation5_spill] sm:$0xff] %v5813_v5  ;;  %7599 = vst [vmem:[#allocation6_spill] sm:$0xff] %v5818_v8  ;;  %v5825_v11 = vld [vmem:[%s5804_s12 + $0x14] sm:$0xf]  ;;  %v348_v13 = vunpack.c.l.bf16 %v5818_v8  ;;  %v349_v14 = vunpack.c.l.bf16 %v5822_v10  ;;  %v5836_v16 = vld [vmem:[%s5804_s12 + $0x18] sm:$0xf] }
  0x15   : > { %7600 = vst [vmem:[#allocation7_spill] sm:$0xff] %v5822_v10  ;;  %7601 = vst [vmem:[#allocation8_spill] sm:$0xff] %v5825_v11  ;;  %v350_v15 = vunpack.c.l.bf16 %v5825_v11  ;;  %v5839_v17 = vld [vmem:[%s5804_s12 + $0x1c] sm:$0xf]  ;;  %v384_v18 = vmul.f32 %v5797_v2, %v345_v6  ;;  %v385_v19 = vmul.f32 %v5797_v2, %v346_v7  ;;  %v386_v20 = vmul.f32 %v5797_v2, %v347_v9  ;;  %v5858_v34 = vld [vmem:[%s5804_s12 + $0x20] sm:$0xf] }
  0x16   : > { %7602 = vst [vmem:[#allocation9_spill] sm:$0xff] %v5836_v16  ;;  %7603 = vst [vmem:[#allocation10_spill] sm:$0xff] %v5839_v17  ;;  %v351_v21 = vunpack.c.l.bf16 %v5836_v16  ;;  %v387_v22 = vmul.f32 %v5797_v2, %v348_v13  ;;  %v388_v23 = vmul.f32 %v5797_v2, %v349_v14  ;;  %v352_v25 = vunpack.c.l.bf16 %v5839_v17  ;;  %v5861_v35 = vld [vmem:[%s5804_s12 + $0x24] sm:$0xf]  ;;  %v5864_v36 = vld [vmem:[%s5804_s12 + $0x28] sm:$0xf] }
  0x17   : > { %v389_v24 = vmul.f32 %v5797_v2, %v350_v15  ;;  %v423_v26 = vadd.f32 %v5830_v12, %v384_v18  ;;  %v424_v27 = vadd.f32 %v5830_v12, %v385_v19  ;;  %v425_v28 = vadd.f32 %v5830_v12, %v386_v20  ;;  %7604 = vst [vmem:[#allocation11_spill] sm:$0xff] %v5858_v34  ;;  %v5868_v41 = vld [vmem:[%s5804_s12 + $0x2c] sm:$0xf]  ;;  %v5872_v46 = vld [vmem:[%s5804_s12 + $0x30] sm:$0xf] }
  0x18   : > { %v390_v29 = vmul.f32 %v5797_v2, %v351_v21  ;;  %v426_v30 = vadd.f32 %v5830_v12, %v387_v22  ;;  %v427_v31 = vadd.f32 %v5830_v12, %v388_v23  ;;  %v391_v33 = vmul.f32 %v5797_v2, %v352_v25  ;;  %7605 = vst [vmem:[#allocation12_spill] sm:$0xff] %v5861_v35  ;;  %v5877_v50 = vld [vmem:[%s5804_s12 + $0x34] sm:$0xf]  ;;  %v5886_v58 = vld [vmem:[%s5804_s12 + $0x38] sm:$0xf] }
  0x19   : > { %v428_v32 = vadd.f32 %v5830_v12, %v389_v24  ;;  %7606 = vst [vmem:[#allocation13_spill] sm:$0xff] %v5864_v36  ;;  %v455_v37 = vmax.f32 %v423_v26, 0.0  ;;  %v456_v38 = vmax.f32 %v424_v27, 0.0  ;;  %v457_v39 = vmax.f32 %v425_v28, 0.0  ;;  %7607 = vst [vmem:[#allocation14_spill] sm:$0xff] %v5868_v41 }
  0x1a   : > { %v429_v40 = vadd.f32 %v5830_v12, %v390_v29  ;;  %v458_v42 = vmax.f32 %v426_v30, 0.0  ;;  %v459_v43 = vmax.f32 %v427_v31, 0.0  ;;  %v430_v45 = vadd.f32 %v5830_v12, %v391_v33  ;;  %7608 = vst [vmem:[#allocation15_spill] sm:$0xff] %v5872_v46  ;;  %7609 = vst [vmem:[#allocation16_spill] sm:$0xff] %v5877_v50  ;;  %v5889_v59 = vld [vmem:[%s5804_s12 + $0x3c] sm:$0xf] }
  0x1b   : > { %v460_v44 = vmax.f32 %v428_v32, 0.0  ;;  %v487_v47 = vpack.c.bf16 %v456_v38, %v455_v37  ;;  %v353_v48 = vunpack.c.l.bf16 %v5858_v34  ;;  %v354_v49 = vunpack.c.l.bf16 %v5861_v35  ;;  %7610 = vst [vmem:[#allocation17_spill] sm:$0xff] %v5886_v58  ;;  %7611 = vst [vmem:[#allocation18_spill] sm:$0xff] %v5889_v59  ;;  %v5895_v0 = vld [vmem:[%s5804_s12 + $0x40] sm:$0xf] }
  0x1c   : > { %v488_v51 = vpack.c.bf16 %v458_v42, %v457_v39  ;;  %v355_v53 = vunpack.c.l.bf16 %v5864_v36  ;;  %v356_v56 = vunpack.c.l.bf16 %v5868_v41  ;;  %v357_v57 = vunpack.c.l.bf16 %v5872_v46  ;;  %7612 = vst [vmem:[#allocation19_spill] sm:$0xff] %v5895_v0  ;;  %v5903_v13 = vld [vmem:[%s5804_s12 + $0x44] sm:$0xf]  ;;  %v5915_v31 = vld [vmem:[%s5804_s12 + $0x48] sm:$0xf] }
  0x1d   : > { %v489_v52 = vpack.c.bf16 %v460_v44, %v459_v43  ;;  %5084 = vmatprep.mubr.msk.bf16.mxu0 %vm7539_vm0, %v487_v47  ;;  %v392_v54 = vmul.f32 %v5797_v2, %v353_v48  ;;  %v393_v55 = vmul.f32 %v5797_v2, %v354_v49  ;;  %v461_v60 = vmax.f32 %v429_v40, 0.0  ;;  %7613 = vst [vmem:[#allocation20_spill] sm:$0xff] %v5903_v13  ;;  %v5918_v32 = vld [vmem:[%s5804_s12 + $0x4c] sm:$0xf]  ;;  %v5922_v37 = vld [vmem:[%s5804_s12 + $0x50] sm:$0xf] }
  0x1e   : > { %5085 = vmatmul.mubr.msk.bf16.vlgmr.msra.gmra.mrb[0].mxu0 %vm7539_vm0, %v488_v51  ;;  %v462_v61 = vmax.f32 %v430_v45, 0.0  ;;  %v394_v62 = vmul.f32 %v5797_v2, %v355_v53  ;;  %v358_v63 = vunpack.c.l.bf16 %v5877_v50  ;;  %v395_v7 = vmul.f32 %v5797_v2, %v356_v56  ;;  %7614 = vst [vmem:[#allocation21_spill] sm:$0xff] %v5915_v31  ;;  %7615 = vst [vmem:[#allocation22_spill] sm:$0xff] %v5918_v32  ;;  %v5925_v38 = vld [vmem:[%s5804_s12 + $0x54] sm:$0xf] }
  0x1f   : > { %5088 = vmatprep.mubr.msk.bf16.mxu0 %vm7539_vm0, %v489_v52  ;;  %v431_v1 = vadd.f32 %v5830_v12, %v392_v54  ;;  %v432_v6 = vadd.f32 %v5830_v12, %v393_v55  ;;  %v396_v9 = vmul.f32 %v5797_v2, %v357_v57  ;;  %v359_v21 = vunpack.c.l.bf16 %v5886_v58  ;;  %7616 = vst [vmem:[#allocation23_spill] sm:$0xff] %v5922_v37 }
  0x20   : > { %v433_v14 = vadd.f32 %v5830_v12, %v394_v62  ;;  %v397_v15 = vmul.f32 %v5797_v2, %v358_v63  ;;  %v434_v20 = vadd.f32 %v5830_v12, %v395_v7  ;;  %v490_v22 = vpack.c.bf16 %v462_v61, %v461_v60  ;;  %7617 = vst [vmem:[#allocation24_spill] sm:$0xff] %v5925_v38 }
  0x21   : > { %v463_v18 = vmax.f32 %v431_v1, 0.0  ;;  %v464_v19 = vmax.f32 %v432_v6, 0.0  ;;  %v435_v23 = vadd.f32 %v5830_v12, %v396_v9  ;;  %v360_v25 = vunpack.c.l.bf16 %v5889_v59  ;;  %v5946_v6 = vld [vmem:[%s5804_s12 + $0x58] sm:$0xf] }
  0x22   : > { %v436_v24 = vadd.f32 %v5830_v12, %v397_v15  ;;  %v361_v27 = vunpack.c.l.bf16 %v5895_v0  ;;  %v465_v28 = vmax.f32 %v433_v14, 0.0  ;;  %v466_v29 = vmax.f32 %v434_v20, 0.0  ;;  %7618 = vst [vmem:[#allocation25_spill] sm:$0xff] %v5946_v6  ;;  %v5950_v14 = vld [vmem:[%s5804_s12 + $0x5c] sm:$0xf] }
  0x23   : > { %v491_v26 = vpack.c.bf16 %v464_v19, %v463_v18  ;;  %v362_v30 = vunpack.c.l.bf16 %v5903_v13  ;;  %v398_v33 = vmul.f32 %v5797_v2, %v359_v21  ;;  %v467_v39 = vmax.f32 %v435_v23, 0.0  ;;  %7619 = vst [vmem:[#allocation26_spill] sm:$0xff] %v5950_v14  ;;  %v5953_v15 = vld [vmem:[%s5804_s12 + $0x60] sm:$0xf]  ;;  %v5956_v18 = vld [vmem:[%s5804_s12 + $0x64] sm:$0xf] }
  0x24   : > { %v468_v40 = vmax.f32 %v436_v24, 0.0  ;;  %v399_v42 = vmul.f32 %v5797_v2, %v360_v25  ;;  %v400_v43 = vmul.f32 %v5797_v2, %v361_v27  ;;  %v363_v47 = vunpack.c.l.bf16 %v5915_v31  ;;  %7620 = vst [vmem:[#allocation27_spill] sm:$0xff] %v5953_v15  ;;  %7621 = vst [vmem:[#allocation28_spill] sm:$0xff] %v5956_v18 }
  0x25   : > { %v401_v44 = vmul.f32 %v5797_v2, %v362_v30  ;;  %v437_v45 = vadd.f32 %v5830_v12, %v398_v33  ;;  %v364_v48 = vunpack.c.l.bf16 %v5918_v32  ;;  %v492_v49 = vpack.c.bf16 %v466_v29, %v465_v28 }
  0x26   : > { %5089 = vmatmul.mubr.msk.bf16.gmra.mrb[4].mxu0 %vm7539_vm0, %v490_v22  ;;  %v438_v51 = vadd.f32 %v5830_v12, %v399_v42  ;;  %v365_v52 = vunpack.c.l.bf16 %v5922_v37  ;;  %v366_v53 = vunpack.c.l.bf16 %v5925_v38  ;;  %v493_v54 = vpack.c.bf16 %v468_v40, %v467_v39 }
  0x27   : > { %5092 = vmatprep.mubr.msk.bf16.mxu0 %vm7539_vm0, %v491_v26  ;;  %v439_v55 = vadd.f32 %v5830_v12, %v400_v43  ;;  %v440_v56 = vadd.f32 %v5830_v12, %v401_v44  ;;  %v402_v57 = vmul.f32 %v5797_v2, %v363_v47  ;;  %v403_v60 = vmul.f32 %v5797_v2, %v364_v48  ;;  %v5976_v47 = vld [vmem:[%s5804_s12 + $0x6c] sm:$0xf]  ;;  %v5979_v48 = vld [vmem:[%s5804_s12 + $0x70] sm:$0xf] }
  0x28   : > { %v469_v61 = vmax.f32 %v437_v45, 0.0  ;;  %v470_v62 = vmax.f32 %v438_v51, 0.0  ;;  %v404_v63 = vmul.f32 %v5797_v2, %v365_v52  ;;  %v405_v1 = vmul.f32 %v5797_v2, %v366_v53  ;;  %v5973_v45 = vld [vmem:[%s5804_s12 + $0x68] sm:$0xf]  ;;  %7623 = vst [vmem:[#allocation30_spill] sm:$0xff] %v5976_v47  ;;  %7624 = vst [vmem:[#allocation31_spill] sm:$0xff] %v5979_v48 }
  0x29   : > { %v471_v7 = vmax.f32 %v439_v55, 0.0  ;;  %v472_v9 = vmax.f32 %v440_v56, 0.0  ;;  %v441_v19 = vadd.f32 %v5830_v12, %v402_v57  ;;  %v442_v20 = vadd.f32 %v5830_v12, %v403_v60  ;;  %7622 = vst [vmem:[#allocation29_spill] sm:$0xff] %v5973_v45 }
  0x2a   : > { %v367_v21 = vunpack.c.l.bf16 %v5946_v6  ;;  %v494_v22 = vpack.c.bf16 %v470_v62, %v469_v61  ;;  %v443_v23 = vadd.f32 %v5830_v12, %v404_v63  ;;  %v444_v24 = vadd.f32 %v5830_v12, %v405_v1 }
  0x2b   : > { %v368_v25 = vunpack.c.l.bf16 %v5950_v14  ;;  %v495_v26 = vpack.c.bf16 %v472_v9, %v471_v7  ;;  %v369_v27 = vunpack.c.l.bf16 %v5953_v15  ;;  %v370_v28 = vunpack.c.l.bf16 %v5956_v18 }
  0x2c   : > { %v473_v29 = vmax.f32 %v441_v19, 0.0  ;;  %v474_v30 = vmax.f32 %v442_v20, 0.0  ;;  %v406_v33 = vmul.f32 %v5797_v2, %v367_v21  ;;  %v475_v39 = vmax.f32 %v443_v23, 0.0  ;;  %v5996_v19 = vld [vmem:[%s5804_s12 + $0x78] sm:$0xf] }
  0x2d   : > { %v476_v40 = vmax.f32 %v444_v24, 0.0  ;;  %v407_v42 = vmul.f32 %v5797_v2, %v368_v25  ;;  %v408_v43 = vmul.f32 %v5797_v2, %v369_v27  ;;  %v409_v44 = vmul.f32 %v5797_v2, %v370_v28  ;;  %7626 = vst [vmem:[#allocation33_spill] sm:$0xff] %v5996_v19  ;;  %v6002_v24 = vld [vmem:[%s5804_s12 + $0x7c] sm:$0xf] }
  0x2e   : > { %5093 = vmatmul.mubr.msk.bf16.gmra.mrb[8].mxu0 %vm7539_vm0, %v492_v49  ;;  %v5982_v49 = vld [vmem:[%s5804_s12 + $0x74] sm:$0xf]  ;;  %v496_v51 = vpack.c.bf16 %v474_v30, %v473_v29  ;;  %v445_v52 = vadd.f32 %v5830_v12, %v406_v33  ;;  %v371_v55 = vunpack.c.l.bf16 %v5973_v45  ;;  %v372_v56 = vunpack.c.l.bf16 %v5976_v47  ;;  %7627 = vst [vmem:[#allocation34_spill] sm:$0xff] %v6002_v24 }
  0x2f   : > { %5096 = vmatprep.mubr.msk.bf16.mxu0 %vm7539_vm0, %v493_v54  ;;  %7625 = vst [vmem:[#allocation32_spill] sm:$0xff] %v5982_v49  ;;  %v497_v53 = vpack.c.bf16 %v476_v40, %v475_v39  ;;  %v446_v54 = vadd.f32 %v5830_v12, %v407_v42  ;;  %v447_v57 = vadd.f32 %v5830_v12, %v408_v43  ;;  %v373_v61 = vunpack.c.l.bf16 %v5979_v48 }
  0x30   : > { %v448_v60 = vadd.f32 %v5830_v12, %v409_v44  ;;  %v374_v62 = vunpack.c.l.bf16 %v5982_v49  ;;  %v477_v63 = vmax.f32 %v445_v52, 0.0  ;;  %v410_v7 = vmul.f32 %v5797_v2, %v371_v55 }
  0x31   : > { %v478_v1 = vmax.f32 %v446_v54, 0.0  ;;  %v411_v9 = vmul.f32 %v5797_v2, %v372_v56  ;;  %v479_v20 = vmax.f32 %v447_v57, 0.0  ;;  %v375_v25 = vunpack.c.l.bf16 %v5996_v19 }
  0x32   : > { %v480_v21 = vmax.f32 %v448_v60, 0.0  ;;  %v413_v23 = vmul.f32 %v5797_v2, %v374_v62  ;;  %v449_v27 = vadd.f32 %v5830_v12, %v410_v7  ;;  %v376_v29 = vunpack.c.l.bf16 %v6002_v24  ;;  %v5709_v62 = vld [vmem:[%s7436_s6 + $0x40] sm:$0xff]  }
  0x33   : > { %v450_v28 = vadd.f32 %v5830_v12, %v411_v9  ;;  %v414_v43 = vmul.f32 %v5797_v2, %v375_v25  ;;  %5260 = vmatprep.subr.bf16.mxu1 %v5709_v62  ;;  %v7644_v47 = vmov 0  ;;  %v7654_v14 = vmov 0 }
  0x34   : > { %v499_v30 = vpack.c.bf16 %v480_v21, %v479_v20  ;;  %v452_v39 = vadd.f32 %v5830_v12, %v413_v23  ;;  %v481_v40 = vmax.f32 %v449_v27, 0.0  ;;  %v415_v44 = vmul.f32 %v5797_v2, %v376_v29  ;;  %5261 = vmatpush3.bf16.msra.mxu1 %v5709_v62  ;;  %v6041_v21 = vld [vmem:[%s7436_s6 + $0x50] sm:$0xff]   ;;  %v6053_v23 = vld [vmem:[%s7434_s4] ss:$0 sm:$0xff] }
  0x35   : > { %v482_v42 = vmax.f32 %v450_v28, 0.0  ;;  %v453_v54 = vadd.f32 %v5830_v12, %v414_v43  ;;  %v7662_v41 = vmov 0 }
  0x36   : > { %5097 = vmatmul.mubr.msk.bf16.gmra.mrb[12].mxu0 %vm7539_vm0, %v494_v22  ;;  %v412_v22 = vmul.f32 %v5797_v2, %v373_v61  ;;  %v484_v52 = vmax.f32 %v452_v39, 0.0  ;;  %v454_v55 = vadd.f32 %v5830_v12, %v415_v44  ;;  %v5735_v2 = vmov 0.0  }
  0x37   : > { %5100 = vmatprep.mubr.msk.bf16.mxu0 %vm7539_vm0, %v495_v26  ;;  %v498_v26 = vpack.c.bf16 %v478_v1, %v477_v63  ;;  %v485_v57 = vmax.f32 %v453_v54, 0.0  ;;  %840 = vst.msk [vmem:[#allocation2 + $0x8] sm:$0xff] %vm7539_vm0, %v5735_v2  ;;  %841 = vst.msk [vmem:[#allocation2 + $0x10] sm:$0xff] %vm7539_vm0, %v5735_v2  ;;  %v5710_v63 = vld [vmem:[%s7436_s6 + $0x18] sm:$0xff]   ;;  %v5711_v1 = vld [vmem:[%s7436_s6 + $0x48] sm:$0xff]  }
  0x38   : > { %v451_v33 = vadd.f32 %v5830_v12, %v412_v22  ;;  %v486_v60 = vmax.f32 %v454_v55, 0.0  ;;  %839 = vst.msk [vmem:[#allocation2] sm:$0xff] %vm7539_vm0, %v5735_v2  ;;  %842 = vst.msk [vmem:[#allocation2 + $0x118] sm:$0xff] %vm7539_vm0, %v5735_v2  ;;  %v5708_v12 = vld [vmem:[%s7436_s6 + $0x10] sm:$0xff]   ;;  %5262 = vmatprep.subr.bf16.mxu1 %v5711_v1  ;;  %v6047_v22 = vld [vmem:[%s7436_s6] sm:$0xff]  }
  0x39   : > { %843 = vst.msk [vmem:[#allocation2 + $0x120] sm:$0xff] %vm7539_vm0, %v5735_v2  ;;  %844 = vst.msk [vmem:[#allocation2 + $0x128] sm:$0xff] %vm7539_vm0, %v5735_v2  ;;  %5116 = vmatprep.subr.bf16.mxu0 %v5708_v12  ;;  %5263 = vmatpush3.bf16.msra.mxu1 %v5711_v1 }
  0x3a   : > { %v502_v61 = vpack.c.bf16 %v486_v60, %v485_v57  ;;  %5117 = vmatpush3.bf16.msra.mxu0 %v5708_v12  ;;  %5296 = vmatprep.subr.bf16.mxu1 %v6041_v21 }
  0x3b   : > { %5118 = vmatprep.subr.bf16.mxu0 %v5710_v63 }
  0x3e   : > { %5101 = vmatmul.mubr.msk.bf16.gmra.mrb[16].mxu0 %vm7539_vm0, %v496_v51  ;;  %v483_v51 = vmax.f32 %v451_v33, 0.0  ;;  %v1506_v7 = vld [vmem:[#allocation2 + $0x8] sm:$0xff]  ;;  %v1507_v9 = vld [vmem:[#allocation2 + $0x10] sm:$0xff] }
  0x3f   : > { %5104 = vmatprep.mubr.msk.bf16.mxu0 %vm7539_vm0, %v497_v53  ;;  %v500_v53 = vpack.c.bf16 %v482_v42, %v481_v40  ;;  %5119 = vmatpush3.bf16.msra.mxu0 %v5710_v63  ;;  %v1542_v20 = vpack.c.bf16 %v1507_v9, %v1506_v7  ;;  %v877_v42 = vlaneseq }
  0x40   : > { %v501_v56 = vpack.c.bf16 %v484_v52, %v483_v51  ;;  %5152 = vmatprep.subr.bf16.mxu0 %v6047_v22 }
  0x46   : > { %5105 = vmatmul.mubr.msk.bf16.gmra.mrb[20].mxu0 %vm7539_vm0, %v498_v26  ;;  %v6058_v26 = vld [vmem:[%s7435_s5] ss:$0 sm:$0xff] }
  0x47   : > { %5108 = vmatprep.mubr.msk.bf16.mxu0 %vm7539_vm0, %v499_v30 }
  0x4e   : > { %5109 = vmatmul.mubr.msk.bf16.gmra.mrb[24].mxu0 %vm7539_vm0, %v500_v53 }
  0x4f   : > { %5112 = vmatprep.mubr.msk.bf16.mxu0 %vm7539_vm0, %v501_v56  ;;  %v6069_v56 = vshrl.u32 %v877_v42, 7 }
  0x51   : > { %v881_v63 = vadd.s32 24, %v6069_v56  ;;  %v893_v13 = vadd.s32 120, %v6069_v56  ;;  %v6290_v35 = vadd.s32 64, %v6069_v56  ;;  %v897_v5 = vadd.s32 152, %v6069_v56 }
  0x53   : > { %v935_v42 = vand.u32 15, %v881_v63 }
  0x55   : > { %vm6105_vm2 = vcmp.le.s32.totalorder %v935_v42, 14 }
  0x56   : > { %5113 = vmatmul.mubr.msk.bf16.gmra.mrb[28].mxu0 %vm7539_vm0, %v502_v61 }
  0x57   : > { %5120 = vmatprep.mubr.msk.bf16.mxu0 %vm7539_vm0, %v1542_v20  ;;  %v880_v20 = vadd.s32 16, %v6069_v56 }
  0xf1   : > { %v5086_v25 = vpop.f32.mrb[0].mxu0 }
  0xf2   : > { %v738_v27 = vmul.f32 %v5086_v25, %v6053_v23  ;;  %v602_v28 = vpop.f32.mrb[1].mxu0 }
  0xf3   : > { %v736_v29 = vmul.f32 %v6053_v23, %v602_v28  ;;  %v5087_v30 = vpop.f32.mrb[2].mxu0  ;;  %v914_v28 = vand.u32 15, %v6069_v56 }
  0xf4   : > { %v777_v33 = vadd.f32 %v6058_v26, %v738_v27  ;;  %v739_v39 = vmul.f32 %v5087_v30, %v6053_v23  ;;  %v605_v40 = vpop.f32.mrb[3].mxu0 }
  0xf5   : > { %v775_v43 = vadd.f32 %v6058_v26, %v736_v29  ;;  %v737_v44 = vmul.f32 %v6053_v23, %v605_v40  ;;  %v883_v29 = vadd.s32 40, %v6069_v56  ;;  %vm6088_vm1 = vcmp.ge.s32.totalorder %v914_v28, 1 }
  0xf6   : > { %v809_v51 = vmax.f32 %v777_v33, 0.0  ;;  %v778_v52 = vadd.f32 %v6058_v26, %v739_v39 }
  0xf7   : > { %v807_v53 = vmax.f32 %v775_v43, 0.0  ;;  %v776_v54 = vadd.f32 %v6058_v26, %v737_v44  ;;  %v928_v44 = vand.u32 15, %v880_v20  ;;  %v5713_v20 = vld [vmem:[%s7436_s6 + $0x58] sm:$0xff]  }
  0xf8   : > { %847 = vst.msk [vmem:[#allocation2 + $0x28] sm:$0xff] %vm7539_vm0, %v809_v51  ;;  %v810_v55 = vmax.f32 %v778_v52, 0.0 }
  0xf9   : > { %845 = vst.msk [vmem:[#allocation2 + $0x18] sm:$0xff] %vm7539_vm0, %v807_v53  ;;  %v808_v57 = vmax.f32 %v776_v54, 0.0  ;;  %v5090_v60 = vpop.f32.mrb[4].mxu0  ;;  %v7628_v54 = vmov 0  ;;  %vm6127_vm3 = vcmp.ge.s32.totalorder %v928_v44, 1 }
  0xfa   : > { %848 = vst.msk [vmem:[#allocation2 + $0x30] sm:$0xff] %vm7539_vm0, %v810_v55  ;;  %v742_v61 = vmul.f32 %v5090_v60, %v6053_v23  ;;  %v618_v2 = vpop.f32.mrb[5].mxu0  ;;  %v7629_v54 = vsel %vm6088_vm1, 4294967295, %v7628_v54 }
  0xfb   : > { %846 = vst.msk [vmem:[#allocation2 + $0x20] sm:$0xff] %vm7539_vm0, %v808_v57  ;;  %v740_v12 = vmul.f32 %v6053_v23, %v618_v2  ;;  %v5091_v62 = vpop.f32.mrb[6].mxu0  ;;  %7630 = vst [vmem:[#allocation35_spill] sm:$0xff] %v7629_v54  ;;  %v949_v57 = vand.u32 15, %v883_v29 }
  0xfc   : > { %v781_v1 = vadd.f32 %v6058_v26, %v742_v61  ;;  %v743_v7 = vmul.f32 %v5091_v62, %v6053_v23  ;;  %v621_v9 = vpop.f32.mrb[7].mxu0  ;;  %v885_v62 = vadd.s32 56, %v6069_v56 }
  0xfd   : > { %v779_v25 = vadd.f32 %v6058_v26, %v740_v12  ;;  %v741_v27 = vmul.f32 %v6053_v23, %v621_v9  ;;  %vm6133_vm4 = vcmp.le.s32.totalorder %v949_v57, 14 }
  0xfe   : > { %v813_v30 = vmax.f32 %v781_v1, 0.0  ;;  %v782_v33 = vadd.f32 %v6058_v26, %v743_v7 }
  0xff   : > { %v811_v39 = vmax.f32 %v779_v25, 0.0  ;;  %v780_v40 = vadd.f32 %v6058_v26, %v741_v27  ;;  %v1510_v9 = vld [vmem:[#allocation2 + $0x28] sm:$0xff]  ;;  %v6103_v25 = vadd.s32 32, %v6069_v56  ;;  %v7631_v27 = vmov 0 }
 0x100   : > { %851 = vst.msk [vmem:[#allocation2 + $0x48] sm:$0xff] %vm7539_vm0, %v813_v30  ;;  %v814_v43 = vmax.f32 %v782_v33, 0.0  ;;  %v6092_v55 = vld [vmem:[#allocation2 + $0x17] sm:$0xff]  ;;  %v7632_v27 = vsel %vm6105_vm2, 4294967295, %v7631_v27 }
 0x101   : > { %849 = vst.msk [vmem:[#allocation2 + $0x38] sm:$0xff] %vm7539_vm0, %v811_v39  ;;  %v812_v51 = vmax.f32 %v780_v40, 0.0  ;;  %v5094_v52 = vpop.f32.mrb[8].mxu0  ;;  %v1511_v53 = vld [vmem:[#allocation2 + $0x30] sm:$0xff]  ;;  %v1508_v2 = vld [vmem:[#allocation2 + $0x18] sm:$0xff]  ;;  %7633 = vst [vmem:[#allocation36_spill] sm:$0xff] %v7632_v27 }
 0x102   : > { %852 = vst.msk [vmem:[#allocation2 + $0x50] sm:$0xff] %vm7539_vm0, %v814_v43  ;;  %v746_v60 = vmul.f32 %v5094_v52, %v6053_v23  ;;  %v634_v61 = vpop.f32.mrb[9].mxu0  ;;  %v1509_v12 = vld [vmem:[#allocation2 + $0x20] sm:$0xff]  ;;  %v1544_v33 = vpack.c.bf16 %v1511_v53, %v1510_v9  ;;  %v5715_v40 = vld [vmem:[%s7436_s6 + $0x8] sm:$0xff]   ;;  %v2433_v42 = vsel %vm6088_vm1, %v6092_v55, 0.0 }
 0x103   : > { %850 = vst.msk [vmem:[#allocation2 + $0x40] sm:$0xff] %vm7539_vm0, %v812_v51  ;;  %v744_v63 = vmul.f32 %v6053_v23, %v634_v61  ;;  %v5095_v1 = vpop.f32.mrb[10].mxu0  ;;  %v1543_v7 = vpack.c.bf16 %v1509_v12, %v1508_v2  ;;  %v6111_v39 = vld [vmem:[#allocation2 + $0x21] sm:$0xff]  ;;  %v6125_v53 = vld [vmem:[#allocation2 + $0x19] sm:$0xff]  ;;  %v7637_v2 = vmov 0  ;;  %v6173_v48 = vld [vmem:[#allocation2 + $0x29] sm:$0xff] }
 0x104   : > { %v785_v28 = vadd.f32 %v6058_v26, %v746_v60  ;;  %v747_v29 = vmul.f32 %v5095_v1, %v6053_v23  ;;  %v637_v30 = vpop.f32.mrb[11].mxu0  ;;  %v6116_v43 = vld [vmem:[#allocation2 + $0x1f] sm:$0xff]  ;;  %v7634_v60 = vmov 0  ;;  %v6131_v61 = vld [vmem:[#allocation2 + $0x27] sm:$0xff]  ;;  %v7638_v2 = vsel %vm6133_vm4, 4294967295, %v7637_v2 }
 0x105   : > { %v783_v51 = vadd.f32 %v6058_v26, %v744_v63  ;;  %v745_v52 = vmul.f32 %v6053_v23, %v637_v30  ;;  %5121 = vmatmul.mubr.msk.bf16.vlgmr.msra.gmra.mrb[32].mxu0 %vm7539_vm0, %v1543_v7  ;;  %5264 = vmatprep.mubr.msk.bf16.mxu1 %vm7539_vm0, %v1543_v7  ;;  %v7635_v60 = vsel %vm6127_vm3, 4294967295, %v7634_v60  ;;  %7639 = vst [vmem:[#allocation38_spill] sm:$0xff] %v7638_v2  ;;  %v963_v1 = vand.u32 15, %v885_v62  ;;  %v6154_v62 = vld [vmem:[%s7436_s6 + $0x60] sm:$0xff]  }
 0x106   : > { %7636 = vst [vmem:[#allocation37_spill] sm:$0xff] %v7635_v60  ;;  %v817_v12 = vmax.f32 %v785_v28, 0.0  ;;  %v786_v63 = vadd.f32 %v6058_v26, %v747_v29  ;;  %5124 = vmatprep.mubr.msk.bf16.mxu0 %vm7539_vm0, %v1544_v33  ;;  %5265 = vmatmul.mubr.msk.bf16.vlgmr.msra.gmra.mrb[0].mxu1 %vm7539_vm0, %v1544_v33  ;;  %v887_v7 = vadd.s32 72, %v6069_v56  ;;  %v2099_v57 = vsel %vm6105_vm2, %v6111_v39, 0.0 }
 0x107   : > { %v815_v44 = vmax.f32 %v783_v51, 0.0  ;;  %v784_v9 = vadd.f32 %v6058_v26, %v745_v52  ;;  %5297 = vmatpush3.bf16.msra.mxu1 %v6041_v21  ;;  %5153 = vmatpush3.bf16.msra.mxu0 %v6047_v22  ;;  %v6148_v28 = vpack.c.bf16 %v6116_v43, %v2433_v42  ;;  %v6156_v21 = vld [vmem:[#allocation2 + $0x2f] sm:$0xff]  ;;  %v6161_v30 = vpack.c.bf16 %v2099_v57, %v6125_v53 }
 0x108   : > { %855 = vst.msk [vmem:[#allocation2 + $0x68] sm:$0xff] %vm7539_vm0, %v817_v12  ;;  %v818_v29 = vmax.f32 %v786_v63, 0.0  ;;  %5298 = vmatprep.subr.bf16.mxu1 %v5713_v20  ;;  %5154 = vmatprep.subr.bf16.mxu0 %v5715_v40  ;;  %7641 = vst [vmem:[#allocation40_spill] sm:$0xff] %v6156_v21  ;;  %v6158_v22 = vld [vmem:[#allocation2 + $0x31] sm:$0xff]  ;;  %v2435_v33 = vsel %vm6127_vm3, %v6131_v61, 0.0  ;;  %v942_v12 = vand.u32 15, %v6103_v25 }
 0x109   : > { %7640 = vst [vmem:[#allocation39_spill] sm:$0xff] %v6148_v28  ;;  %7642 = vst [vmem:[#allocation41_spill] sm:$0xff] %v6161_v30  ;;  %v816_v42 = vmax.f32 %v784_v9, 0.0  ;;  %v5098_v51 = vpop.f32.mrb[12].mxu0  ;;  %v1515_v52 = vld [vmem:[#allocation2 + $0x50] sm:$0xff]  ;;  %v6169_v63 = vpack.c.bf16 %v6156_v21, %v2435_v33  ;;  %v1512_v19 = vld [vmem:[#allocation2 + $0x38] sm:$0xff] }
 0x10a   : > { %853 = vst.msk [vmem:[#allocation2 + $0x58] sm:$0xff] %vm7539_vm0, %v815_v44  ;;  %856 = vst.msk [vmem:[#allocation2 + $0x70] sm:$0xff] %vm7539_vm0, %v818_v29  ;;  %v750_v24 = vmul.f32 %v5098_v51, %v6053_v23  ;;  %v650_v57 = vpop.f32.mrb[13].mxu0  ;;  %v1513_v49 = vld [vmem:[#allocation2 + $0x40] sm:$0xff]  ;;  %vm6175_vm5 = vcmp.le.s32.totalorder %v963_v1, 14  ;;  %v2101_v25 = vsel %vm6133_vm4, %v6158_v22, 0.0 }
 0x10b   : > { %7643 = vst [vmem:[#allocation42_spill] sm:$0xff] %v6169_v63  ;;  %v7645_v47 = vsel %vm6175_vm5, 4294967295, %v7644_v47  ;;  %854 = vst.msk [vmem:[#allocation2 + $0x60] sm:$0xff] %vm7539_vm0, %v816_v42  ;;  %v748_v44 = vmul.f32 %v6053_v23, %v650_v57  ;;  %v5099_v9 = vpop.f32.mrb[14].mxu0  ;;  %v1545_v29 = vpack.c.bf16 %v1513_v49, %v1512_v19  ;;  %v1514_v33 = vld [vmem:[#allocation2 + $0x48] sm:$0xff]  ;;  %5299 = vmatpush3.bf16.msra.mxu1 %v5713_v20  ;;  %5155 = vmatpush3.bf16.msra.mxu0 %v5715_v40  ;;  %v6187_v1 = vld [vmem:[%s7436_s6 + $0x20] sm:$0xff]  }
 0x10c   : > { %7646 = vst [vmem:[#allocation43_spill] sm:$0xff] %v7645_v47  ;;  %v977_v51 = vand.u32 15, %v887_v7  ;;  %7647 = vst [vmem:[#allocation44_spill] sm:$0xff] %v6187_v1  ;;  %v6190_v45 = vpack.c.bf16 %v2101_v25, %v6173_v48  ;;  %v789_v18 = vadd.f32 %v6058_v26, %v750_v24  ;;  %v751_v42 = vmul.f32 %v5099_v9, %v6053_v23  ;;  %v653_v15 = vpop.f32.mrb[15].mxu0  ;;  %v6195_v49 = vld [vmem:[#allocation2 + $0x41] sm:$0xff]  ;;  %v6202_v7 = vld [vmem:[#allocation2 + $0x39] sm:$0xff] }
 0x10d   : > { %v1546_v57 = vpack.c.bf16 %v1515_v52, %v1514_v33  ;;  %5332 = vmatprep.subr.bf16.mxu1 %v6154_v62  ;;  %v889_v19 = vadd.s32 88, %v6069_v56  ;;  %v787_v20 = vadd.f32 %v6058_v26, %v748_v44  ;;  %v749_v40 = vmul.f32 %v6053_v23, %v653_v15  ;;  %5125 = vmatmul.mubr.msk.bf16.gmra.mrb[36].mxu0 %vm7539_vm0, %v1545_v29  ;;  %v6204_v24 = vld [vmem:[#allocation2 + $0x37] sm:$0xff]  ;;  %v6214_v15 = vld [vmem:[#allocation2 + $0x3f] sm:$0xff]  ;;  %v6240_v31 = vld [vmem:[#allocation2 + $0x49] sm:$0xff] }
 0x10e   : > { %7648 = vst [vmem:[#allocation45_spill] sm:$0xff] %v6190_v45  ;;  %5268 = vmatprep.mubr.msk.bf16.mxu1 %vm7539_vm0, %v1545_v29  ;;  %7649 = vst [vmem:[#allocation46_spill] sm:$0xff] %v6204_v24  ;;  %v891_v52 = vadd.s32 104, %v6069_v56  ;;  %v821_v25 = vmax.f32 %v789_v18, 0.0  ;;  %v790_v9 = vadd.f32 %v6058_v26, %v751_v42  ;;  %vm6210_vm6 = vcmp.ge.s32.totalorder %v942_v12, 1  ;;  %5188 = vmatprep.subr.bf16.mxu0 %v6187_v1 }
 0x10f   : > { %5128 = vmatprep.mubr.msk.bf16.mxu0 %vm7539_vm0, %v1546_v57  ;;  %5269 = vmatmul.mubr.msk.bf16.gmra.mrb[4].mxu1 %vm7539_vm0, %v1546_v57  ;;  %v7650_v44 = vmov 0  ;;  %7653 = vst [vmem:[#allocation48_spill] sm:$0xff] %v6214_v15  ;;  %v819_v29 = vmax.f32 %v787_v20, 0.0  ;;  %v788_v33 = vadd.f32 %v6058_v26, %v749_v40  ;;  %vm6217_vm7 = vcmp.le.s32.totalorder %v977_v51, 14  ;;  %7659 = vst [vmem:[#allocation52_spill] sm:$0xff] %v6240_v31 }
 0x110   : > { %v7651_v44 = vsel %vm6210_vm6, 4294967295, %v7650_v44  ;;  %v7655_v14 = vsel %vm6217_vm7, 4294967295, %v7654_v14  ;;  %v2103_v18 = vsel %vm6175_vm5, %v6195_v49, 0.0  ;;  %859 = vst.msk [vmem:[#allocation2 + $0x88] sm:$0xff] %vm7539_vm0, %v821_v25  ;;  %v822_v12 = vmax.f32 %v790_v9, 0.0 }
 0x111   : > { %7652 = vst [vmem:[#allocation47_spill] sm:$0xff] %v7651_v44  ;;  %7656 = vst [vmem:[#allocation49_spill] sm:$0xff] %v7655_v14  ;;  %v6226_v42 = vld [vmem:[#allocation2 + $0x51] sm:$0xff]  ;;  %v991_v57 = vand.u32 15, %v889_v19  ;;  %v6229_v20 = vpack.c.bf16 %v2103_v18, %v6202_v7  ;;  %v2437_v51 = vsel %vm6210_vm6, %v6204_v24, 0.0  ;;  %v820_v40 = vmax.f32 %v788_v33, 0.0 }
 0x112   : > { %857 = vst.msk [vmem:[#allocation2 + $0x78] sm:$0xff] %vm7539_vm0, %v819_v29  ;;  %v5102_v6 = vpop.f32.mrb[16].mxu0  ;;  %v1519_v38 = vld [vmem:[#allocation2 + $0x70] sm:$0xff]  ;;  %v1005_v37 = vand.u32 15, %v891_v52  ;;  %v6236_v32 = vpack.c.bf16 %v6214_v15, %v2437_v51  ;;  %860 = vst.msk [vmem:[#allocation2 + $0x90] sm:$0xff] %vm7539_vm0, %v822_v12  ;;  %v1516_v9 = vld [vmem:[#allocation2 + $0x58] sm:$0xff] }
 0x113   : > { %7657 = vst [vmem:[#allocation50_spill] sm:$0xff] %v6229_v20  ;;  %v754_v19 = vmul.f32 %v5102_v6, %v6053_v23  ;;  %v666_v25 = vpop.f32.mrb[17].mxu0  ;;  %v1517_v18 = vld [vmem:[#allocation2 + $0x60] sm:$0xff]  ;;  %v2105_v29 = vsel %vm6217_vm7, %v6226_v42, 0.0  ;;  %858 = vst.msk [vmem:[#allocation2 + $0x80] sm:$0xff] %vm7539_vm0, %v820_v40  ;;  %v1518_v12 = vld [vmem:[#allocation2 + $0x68] sm:$0xff] }
 0x114   : > { %7658 = vst [vmem:[#allocation51_spill] sm:$0xff] %v6236_v32  ;;  %v752_v52 = vmul.f32 %v6053_v23, %v666_v25  ;;  %v5103_v33 = vpop.f32.mrb[18].mxu0  ;;  %v1547_v51 = vpack.c.bf16 %v1517_v18, %v1516_v9  ;;  %v6249_v6 = vpack.c.bf16 %v2105_v29, %v6240_v31  ;;  %v1548_v50 = vpack.c.bf16 %v1519_v38, %v1518_v12  ;;  %v6253_v46 = vld [vmem:[#allocation2 + $0x61] sm:$0xff]  ;;  %v6267_v38 = vld [vmem:[#allocation2 + $0x59] sm:$0xff] }
 0x115   : > { %v793_v0 = vadd.f32 %v6058_v26, %v754_v19  ;;  %v755_v59 = vmul.f32 %v5103_v33, %v6053_v23  ;;  %v669_v58 = vpop.f32.mrb[19].mxu0  ;;  %7661 = vst [vmem:[#allocation54_spill] sm:$0xff] %v6253_v46  ;;  %vm6255_vm8 = vcmp.le.s32.totalorder %v991_v57, 14  ;;  %v6264_v19 = vadd.s32 8, %v6069_v56  ;;  %7665 = vst [vmem:[#allocation56_spill] sm:$0xff] %v6267_v38 }
 0x116   : > { %7660 = vst [vmem:[#allocation53_spill] sm:$0xff] %v6249_v6  ;;  %v7663_v41 = vsel %vm6255_vm8, 4294967295, %v7662_v41  ;;  %v791_v40 = vadd.f32 %v6058_v26, %v752_v52  ;;  %v753_v25 = vmul.f32 %v6053_v23, %v669_v58  ;;  %5129 = vmatmul.mubr.msk.bf16.gmra.mrb[40].mxu0 %vm7539_vm0, %v1547_v51  ;;  %5272 = vmatprep.mubr.msk.bf16.mxu1 %vm7539_vm0, %v1547_v51  ;;  %v884_v9 = vadd.s32 48, %v6069_v56 }
 0x117   : > { %7664 = vst [vmem:[#allocation55_spill] sm:$0xff] %v7663_v41  ;;  %v825_v18 = vmax.f32 %v793_v0, 0.0  ;;  %v794_v57 = vadd.f32 %v6058_v26, %v755_v59  ;;  %5132 = vmatprep.mubr.msk.bf16.mxu0 %vm7539_vm0, %v1548_v50  ;;  %5273 = vmatmul.mubr.msk.bf16.gmra.mrb[8].mxu1 %vm7539_vm0, %v1548_v50  ;;  %vm6272_vm9 = vcmp.le.s32.totalorder %v1005_v37, 14  ;;  %v1019_v29 = vand.u32 15, %v893_v13 }
 0x118   : > { %v823_v52 = vmax.f32 %v791_v40, 0.0  ;;  %v792_v33 = vadd.f32 %v6058_v26, %v753_v25  ;;  %v895_v51 = vadd.s32 136, %v6069_v56  ;;  %v2107_v0 = vsel %vm6255_vm8, %v6253_v46, 0.0  ;;  %v1358_v46 = vld [vmem:[#allocation2 + $0x7] sm:$0xff] }
 0x119   : > { %863 = vst.msk [vmem:[#allocation2 + $0xa8] sm:$0xff] %vm7539_vm0, %v825_v18  ;;  %v826_v59 = vmax.f32 %v794_v57, 0.0  ;;  %v6282_v12 = vld [vmem:[#allocation2 + $0x71] sm:$0xff]  ;;  %v6285_v50 = vpack.c.bf16 %v2107_v0, %v6267_v38  ;;  %v5106_v37 = vpop.f32.mrb[20].mxu0  ;;  %v956_v36 = vand.u32 15, %v884_v9  ;;  %v6294_v0 = vld [vmem:[#allocation2 + $0x69] sm:$0xff] }
 0x11a   : > { %7668 = vst [vmem:[#allocation57_spill] sm:$0xff] %v6282_v12  ;;  %861 = vst.msk [vmem:[#allocation2 + $0x98] sm:$0xff] %vm7539_vm0, %v823_v52  ;;  %v824_v13 = vmax.f32 %v792_v33, 0.0  ;;  %v1523_v40 = vld [vmem:[#allocation2 + $0x90] sm:$0xff]  ;;  %v758_v18 = vmul.f32 %v5106_v37, %v6053_v23  ;;  %v682_v57 = vpop.f32.mrb[21].mxu0  ;;  %v1520_v34 = vld [vmem:[#allocation2 + $0x78] sm:$0xff] }
 0x11b   : > { %7669 = vst [vmem:[#allocation58_spill] sm:$0xff] %v6285_v50  ;;  %864 = vst.msk [vmem:[#allocation2 + $0xb0] sm:$0xff] %vm7539_vm0, %v826_v59  ;;  %v1521_v17 = vld [vmem:[#allocation2 + $0x80] sm:$0xff]  ;;  %vm6296_vm10 = vcmp.le.s32.totalorder %v1019_v29, 14  ;;  %v7671_v52 = vmov 0  ;;  %v2109_v9 = vsel %vm6272_vm9, %v6282_v12, 0.0  ;;  %v756_v33 = vmul.f32 %v6053_v23, %v682_v57 }
 0x11c   : > { %7670 = vst [vmem:[#allocation59_spill] sm:$0xff] %v6294_v0  ;;  %v7672_v52 = vsel %vm6296_vm10, 4294967295, %v7671_v52  ;;  %862 = vst.msk [vmem:[#allocation2 + $0xa0] sm:$0xff] %vm7539_vm0, %v824_v13  ;;  %v5107_v59 = vpop.f32.mrb[22].mxu0  ;;  %v1549_v25 = vpack.c.bf16 %v1521_v17, %v1520_v34  ;;  %v1522_v37 = vld [vmem:[#allocation2 + $0x88] sm:$0xff]  ;;  %v1033_v16 = vand.u32 15, %v895_v51  ;;  %v6306_v11 = vpack.c.bf16 %v2109_v9, %v6294_v0 }
 0x11d   : > { %v797_v29 = vadd.f32 %v6058_v26, %v758_v18  ;;  %v759_v10 = vmul.f32 %v5107_v59, %v6053_v23  ;;  %v685_v8 = vpop.f32.mrb[23].mxu0  ;;  %v1550_v4 = vpack.c.bf16 %v1523_v40, %v1522_v37  ;;  %v6310_v3 = vld [vmem:[#allocation2 + $0x81] sm:$0xff]  ;;  %v795_v13 = vadd.f32 %v6058_v26, %v756_v33  ;;  %v6323_v51 = vld [vmem:[#allocation2 + $0x79] sm:$0xff]  ;;  %v6361_v50 = vld [vmem:[#allocation2 + $0x89] sm:$0xff] }
 0x11e   : > { %7673 = vst [vmem:[#allocation60_spill] sm:$0xff] %v6306_v11  ;;  %7674 = vst [vmem:[#allocation61_spill] sm:$0xff] %v6310_v3  ;;  %v757_v57 = vmul.f32 %v6053_v23, %v685_v8  ;;  %5133 = vmatmul.mubr.msk.bf16.gmra.mrb[44].mxu0 %vm7539_vm0, %v1549_v25  ;;  %5276 = vmatprep.mubr.msk.bf16.mxu1 %vm7539_vm0, %v1549_v25  ;;  %vm6317_vm11 = vcmp.ge.s32.totalorder %v956_v36, 1  ;;  %v7675_v17 = vmov 0  ;;  %v6321_v34 = vld [vmem:[#allocation2 + $0x47] sm:$0xff]  ;;  %v899_v40 = vadd.s32 168, %v6069_v56 }
 0x11f   : > { %v7676_v17 = vsel %vm6317_vm11, 4294967295, %v7675_v17  ;;  %7678 = vst [vmem:[#allocation63_spill] sm:$0xff] %v6321_v34  ;;  %7679 = vst [vmem:[#allocation64_spill] sm:$0xff] %v6323_v51  ;;  %v829_v18 = vmax.f32 %v797_v29, 0.0  ;;  %v798_v9 = vadd.f32 %v6058_v26, %v759_v10  ;;  %5136 = vmatprep.mubr.msk.bf16.mxu0 %vm7539_vm0, %v1550_v4  ;;  %5277 = vmatmul.mubr.msk.bf16.gmra.mrb[12].mxu1 %vm7539_vm0, %v1550_v4  ;;  %v970_v8 = vand.u32 15, %v6290_v35  ;;  %v6342_v4 = vld [vmem:[#allocation2 + $0x4f] sm:$0xff] }
 0x120   : > { %7677 = vst [vmem:[#allocation62_spill] sm:$0xff] %v7676_v17  ;;  %v6331_v36 = vadd.s32 80, %v6069_v56  ;;  %v827_v25 = vmax.f32 %v795_v13, 0.0  ;;  %v796_v33 = vadd.f32 %v6058_v26, %v757_v57  ;;  %vm6334_vm12 = vcmp.le.s32.totalorder %v1033_v16, 14  ;;  %7682 = vst [vmem:[#allocation65_spill] sm:$0xff] %v6342_v4  ;;  %v7803_v17 = vld [vmem:[#allocation54_spill] sm:$0xff] }
 0x121   : > { %v7680_v59 = vmov 0  ;;  %v2111_v10 = vsel %vm6296_vm10, %v6310_v3, 0.0  ;;  %867 = vst.msk [vmem:[#allocation2 + $0xc8] sm:$0xff] %vm7539_vm0, %v829_v18  ;;  %v830_v37 = vmax.f32 %v798_v9, 0.0  ;;  %v6344_v35 = vld [vmem:[#allocation2 + $0x91] sm:$0xff]  ;;  %v1047_v29 = vand.u32 15, %v897_v5 }
 0x122   : > { %v7681_v59 = vsel %vm6334_vm12, 4294967295, %v7680_v59  ;;  %v6347_v13 = vpack.c.bf16 %v2111_v10, %v6323_v51  ;;  %v2439_v16 = vsel %vm6317_vm11, %v6321_v34, 0.0  ;;  %865 = vst.msk [vmem:[#allocation2 + $0xb8] sm:$0xff] %vm7539_vm0, %v827_v25  ;;  %v828_v57 = vmax.f32 %v796_v33, 0.0  ;;  %v5110_v32 = vpop.f32.mrb[24].mxu0  ;;  %v1527_v63 = vld [vmem:[#allocation2 + $0xb0] sm:$0xff] }
 0x123   : > { %v6354_v18 = vadd.s32 96, %v6069_v56  ;;  %v1061_v9 = vand.u32 15, %v899_v40  ;;  %v6357_v28 = vpack.c.bf16 %v6342_v4, %v2439_v16  ;;  %868 = vst.msk [vmem:[#allocation2 + $0xd0] sm:$0xff] %vm7539_vm0, %v830_v37  ;;  %v762_v5 = vmul.f32 %v5110_v32, %v6053_v23  ;;  %v698_v10 = vpop.f32.mrb[25].mxu0  ;;  %v1525_v11 = vld [vmem:[#allocation2 + $0xa0] sm:$0xff]  ;;  %v1526_v37 = vld [vmem:[#allocation2 + $0xa8] sm:$0xff] }
 0x124   : > { %7683 = vst [vmem:[#allocation66_spill] sm:$0xff] %v6347_v13  ;;  %v1524_v13 = vld [vmem:[#allocation2 + $0x98] sm:$0xff]  ;;  %v901_v25 = vadd.s32 184, %v6069_v56  ;;  %v2113_v33 = vsel %vm6334_vm12, %v6344_v35, 0.0  ;;  %866 = vst.msk [vmem:[#allocation2 + $0xc0] sm:$0xff] %vm7539_vm0, %v828_v57  ;;  %v760_v40 = vmul.f32 %v6053_v23, %v698_v10  ;;  %v5111_v16 = vpop.f32.mrb[26].mxu0  ;;  %v1552_v51 = vpack.c.bf16 %v1527_v63, %v1526_v37 }
 0x125   : > { %7684 = vst [vmem:[#allocation67_spill] sm:$0xff] %v6357_v28  ;;  %v1551_v28 = vpack.c.bf16 %v1525_v11, %v1524_v13  ;;  %vm6369_vm13 = vcmp.ge.s32.totalorder %v970_v8, 1  ;;  %v7685_v32 = vmov 0  ;;  %v6374_v6 = vpack.c.bf16 %v2113_v33, %v6361_v50  ;;  %v701_v30 = vpop.f32.mrb[27].mxu0  ;;  %v6378_v0 = vld [vmem:[#allocation2 + $0xa1] sm:$0xff]  ;;  %v6392_v10 = vld [vmem:[#allocation2 + $0x99] sm:$0xff] }
 0x126   : > { %v7686_v32 = vsel %vm6369_vm13, 4294967295, %v7685_v32  ;;  %v801_v20 = vadd.f32 %v6058_v26, %v762_v5  ;;  %v763_v45 = vmul.f32 %v5111_v16, %v6053_v23  ;;  %vm6380_vm14 = vcmp.le.s32.totalorder %v1047_v29, 14  ;;  %v6389_v5 = vld [vmem:[#allocation2 + $0x57] sm:$0xff]  ;;  %v7804_v44 = vld [vmem:[#allocation49_spill] sm:$0xff] }
 0x127   : > { %7687 = vst [vmem:[#allocation68_spill] sm:$0xff] %v7686_v32  ;;  %7688 = vst [vmem:[#allocation69_spill] sm:$0xff] %v6374_v6  ;;  %v7689_v57 = vmov 0  ;;  %v799_v11 = vadd.f32 %v6058_v26, %v760_v40  ;;  %v761_v8 = vmul.f32 %v6053_v23, %v701_v30  ;;  %5137 = vmatmul.mubr.msk.bf16.gmra.mrb[48].mxu0 %vm7539_vm0, %v1551_v28  ;;  %5280 = vmatprep.mubr.msk.bf16.mxu1 %vm7539_vm0, %v1551_v28  ;;  %v984_v13 = vand.u32 15, %v6331_v36  ;;  %v6397_v30 = vld [vmem:[#allocation2 + $0x5f] sm:$0xff] }
 0x128   : > { %v7690_v57 = vsel %vm6380_vm14, 4294967295, %v7689_v57  ;;  %7691 = vst [vmem:[#allocation70_spill] sm:$0xff] %v6389_v5  ;;  %v998_v63 = vand.u32 15, %v6354_v18  ;;  %v833_v29 = vmax.f32 %v801_v20, 0.0  ;;  %v802_v33 = vadd.f32 %v6058_v26, %v763_v45  ;;  %5140 = vmatprep.mubr.msk.bf16.mxu0 %vm7539_vm0, %v1552_v51  ;;  %5281 = vmatmul.mubr.msk.bf16.gmra.mrb[16].mxu1 %vm7539_vm0, %v1552_v51  ;;  %7692 = vst [vmem:[#allocation71_spill] sm:$0xff] %v6397_v30 }
 0x129   : > { %vm6399_vm15 = vcmp.le.s32.totalorder %v1061_v9, 14  ;;  %v7693_v40 = vmov 0  ;;  %v1075_v28 = vand.u32 15, %v901_v25  ;;  %v831_v36 = vmax.f32 %v799_v11, 0.0  ;;  %v6409_v51 = vld [vmem:[#allocation2 + $0xb1] sm:$0xff] }
 0x12a   : > { %v7694_v40 = vsel %vm6399_vm15, 4294967295, %v7693_v40  ;;  %v800_v16 = vadd.f32 %v6058_v26, %v761_v8  ;;  %v903_v18 = vadd.s32 200, %v6069_v56  ;;  %v2115_v45 = vsel %vm6380_vm14, %v6378_v0, 0.0  ;;  %871 = vst.msk [vmem:[#allocation2 + $0xe8] sm:$0xff] %vm7539_vm0, %v833_v29  ;;  %v5114_v8 = vpop.f32.mrb[28].mxu0  ;;  %v1531_v6 = vld [vmem:[#allocation2 + $0xd0] sm:$0xff] }
 0x12b   : > { %7695 = vst [vmem:[#allocation72_spill] sm:$0xff] %v7694_v40  ;;  %v834_v20 = vmax.f32 %v802_v33, 0.0  ;;  %v905_v9 = vadd.s32 216, %v6069_v56  ;;  %v6413_v37 = vpack.c.bf16 %v2115_v45, %v6392_v10  ;;  %v2441_v25 = vsel %vm6369_vm13, %v6389_v5, 0.0  ;;  %869 = vst.msk [vmem:[#allocation2 + $0xd8] sm:$0xff] %vm7539_vm0, %v831_v36  ;;  %v1528_v41 = vld [vmem:[#allocation2 + $0xb8] sm:$0xff] }
 0x12c   : > { %v832_v11 = vmax.f32 %v800_v16, 0.0  ;;  %v892_v3 = vadd.s32 112, %v6069_v56  ;;  %v894_v29 = vadd.s32 128, %v6069_v56  ;;  %v6422_v33 = vpack.c.bf16 %v6397_v30, %v2441_v25  ;;  %v1529_v12 = vld [vmem:[#allocation2 + $0xc0] sm:$0xff]  ;;  %v6426_v5 = vld [vmem:[#allocation2 + $0xa9] sm:$0xff] }
 0x12d   : > { %7696 = vst [vmem:[#allocation73_spill] sm:$0xff] %v6413_v37  ;;  %872 = vst.msk [vmem:[#allocation2 + $0xf0] sm:$0xff] %vm7539_vm0, %v834_v20  ;;  %v766_v45 = vmul.f32 %v5114_v8, %v6053_v23  ;;  %v714_v37 = vpop.f32.mrb[29].mxu0  ;;  %vm6428_vm8 = vcmp.le.s32.totalorder %v1075_v28, 14  ;;  %v7698_v36 = vmov 0  ;;  %v2117_v16 = vsel %vm6399_vm15, %v6409_v51, 0.0 }
 0x12e   : > { %7697 = vst [vmem:[#allocation74_spill] sm:$0xff] %v6422_v33  ;;  %v7699_v36 = vsel %vm6428_vm8, 4294967295, %v7698_v36  ;;  %870 = vst.msk [vmem:[#allocation2 + $0xe0] sm:$0xff] %vm7539_vm0, %v832_v11  ;;  %v764_v25 = vmul.f32 %v6053_v23, %v714_v37  ;;  %v5115_v20 = vpop.f32.mrb[30].mxu0  ;;  %v1553_v33 = vpack.c.bf16 %v1529_v12, %v1528_v41  ;;  %v1530_v8 = vld [vmem:[#allocation2 + $0xc8] sm:$0xff]  ;;  %v1089_v30 = vand.u32 15, %v903_v18 }
 0x12f   : > { %7700 = vst [vmem:[#allocation75_spill] sm:$0xff] %v7699_v36  ;;  %v6438_v38 = vpack.c.bf16 %v2117_v16, %v6426_v5  ;;  %v805_v28 = vadd.f32 %v6058_v26, %v766_v45  ;;  %v767_v31 = vmul.f32 %v5115_v20, %v6053_v23  ;;  %v717_v4 = vpop.f32.mrb[31].mxu0  ;;  %v1554_v15 = vpack.c.bf16 %v1531_v6, %v1530_v8  ;;  %v6446_v11 = vld [vmem:[#allocation2 + $0xc1] sm:$0xff]  ;;  %v6456_v45 = vld [vmem:[#allocation2 + $0xb9] sm:$0xff] }
 0x130   : > { %vm6442_vm7 = vcmp.ge.s32.totalorder %v984_v13, 1  ;;  %v7702_v14 = vmov 0  ;;  %v1103_v37 = vand.u32 15, %v905_v9  ;;  %v803_v41 = vadd.f32 %v6058_v26, %v764_v25  ;;  %5141 = vmatmul.mubr.msk.bf16.gmra.mrb[52].mxu0 %vm7539_vm0, %v1553_v33  ;;  %5284 = vmatprep.mubr.msk.bf16.mxu1 %vm7539_vm0, %v1553_v33  ;;  %7707 = vst [vmem:[#allocation78_spill] sm:$0xff] %v6456_v45  ;;  %v6515_v36 = vld [vmem:[#allocation2 + $0x77] sm:$0xff]  ;;  %v6524_v40 = vld [vmem:[#allocation2 + $0x7f] sm:$0xff] }
 0x131   : > { %7701 = vst [vmem:[#allocation76_spill] sm:$0xff] %v6438_v38  ;;  %v7703_v14 = vsel %vm6442_vm7, 4294967295, %v7702_v14  ;;  %v765_v12 = vmul.f32 %v6053_v23, %v717_v4  ;;  %vm6452_vm15 = vcmp.ge.s32.totalorder %v998_v63, 1  ;;  %v7705_v18 = vmov 0  ;;  %5144 = vmatprep.mubr.msk.bf16.mxu0 %vm7539_vm0, %v1554_v15  ;;  %5285 = vmatmul.mubr.msk.bf16.gmra.mrb[20].mxu1 %vm7539_vm0, %v1554_v15  ;;  %v6474_v15 = vld [vmem:[#allocation2 + $0x67] sm:$0xff]  ;;  %7728 = vst [vmem:[#allocation88_spill] sm:$0xff] %v6515_v36 }
 0x132   : > { %7704 = vst [vmem:[#allocation77_spill] sm:$0xff] %v7703_v14  ;;  %v7706_v18 = vsel %vm6452_vm15, 4294967295, %v7705_v18  ;;  %v1012_v6 = vand.u32 15, %v892_v3  ;;  %v1026_v13 = vand.u32 15, %v894_v29  ;;  %v837_v16 = vmax.f32 %v805_v28, 0.0  ;;  %7711 = vst [vmem:[#allocation80_spill] sm:$0xff] %v6474_v15 }
 0x133   : > { %v806_v20 = vadd.f32 %v6058_v26, %v767_v31  ;;  %v6462_v23 = vadd.s32 144, %v6069_v56  ;;  %v907_v4 = vadd.s32 232, %v6069_v56  ;;  %v835_v63 = vmax.f32 %v803_v41, 0.0  ;;  %v6479_v25 = vld [vmem:[#allocation2 + $0xd1] sm:$0xff]  ;;  %v1534_v38 = vld [vmem:[#allocation2 + $0xe8] sm:$0xff]  ;;  %7730 = vst [vmem:[#allocation90_spill] sm:$0xff] %v6524_v40 }
 0x134   : > { %v804_v9 = vadd.f32 %v6058_v26, %v765_v12  ;;  %vm6466_vm14 = vcmp.le.s32.totalorder %v1089_v30, 14  ;;  %v7708_v3 = vmov 0  ;;  %v2119_v31 = vsel %vm6428_vm8, %v6446_v11, 0.0  ;;  %875 = vst.msk [vmem:[#allocation2 + $0x108] sm:$0xff] %vm7539_vm0, %v837_v16  ;;  %v1532_v28 = vld [vmem:[#allocation2 + $0xd8] sm:$0xff]  ;;  %v1535_v41 = vld [vmem:[#allocation2 + $0xf0] sm:$0xff] }
 0x135   : > { %v7709_v3 = vsel %vm6466_vm14, 4294967295, %v7708_v3  ;;  %v838_v29 = vmax.f32 %v806_v20, 0.0  ;;  %v6477_v33 = vadd.s32 160, %v6069_v56  ;;  %vm6481_vm12 = vcmp.le.s32.totalorder %v1103_v37, 14  ;;  %873 = vst.msk [vmem:[#allocation2 + $0xf8] sm:$0xff] %vm7539_vm0, %v835_v63  ;;  %v1533_v63 = vld [vmem:[#allocation2 + $0xe0] sm:$0xff] }
 0x136   : > { %7710 = vst [vmem:[#allocation79_spill] sm:$0xff] %v7709_v3  ;;  %v7712_v26 = vmov 0  ;;  %v6486_v30 = vpack.c.bf16 %v2119_v31, %v6456_v45  ;;  %v836_v8 = vmax.f32 %v804_v9, 0.0  ;;  %v7716_v12 = vand.u32 15, %v6264_v19  ;;  %v6503_v31 = vld [vmem:[#allocation2 + $0xc9] sm:$0xff]  ;;  %v6506_v9 = vld [vmem:[#allocation2 + $0xd9] sm:$0xff] }
 0x137   : > { %v7713_v26 = vsel %vm6481_vm12, 4294967295, %v7712_v26  ;;  %v7717_v16 = vmov 0  ;;  %vm6495_vm10 = vcmp.ge.s32.totalorder %v1012_v6, 1  ;;  %v7720_v20 = vmov 0  ;;  %7726 = vst [vmem:[#allocation86_spill] sm:$0xff] %v6503_v31  ;;  %876 = vst.msk [vmem:[#allocation2 + $0x110] sm:$0xff] %vm7539_vm0, %v838_v29 }
 0x138   : > { %7714 = vst [vmem:[#allocation81_spill] sm:$0xff] %v7713_v26  ;;  %7715 = vst [vmem:[#allocation82_spill] sm:$0xff] %v6486_v30  ;;  %vm6491_vm8 = vcmp.le.s32.totalorder %v7716_v12, 14  ;;  %v7721_v20 = vsel %vm6495_vm10, 4294967295, %v7720_v20  ;;  %vm6499_vm5 = vcmp.ge.s32.totalorder %v1026_v13, 1  ;;  %v7723_v37 = vmov 0 }
 0x139   : > { %v7718_v16 = vsel %vm6491_vm8, 4294967295, %v7717_v16  ;;  %7722 = vst [vmem:[#allocation84_spill] sm:$0xff] %v7721_v20  ;;  %v7724_v37 = vsel %vm6499_vm5, 4294967295, %v7723_v37  ;;  %v6508_v19 = vld [vmem:[#allocation2 + $0xe1] sm:$0xff]  ;;  %v1117_v12 = vand.u32 15, %v907_v4  ;;  %v909_v30 = vadd.s32 248, %v6069_v56 }
 0x13a   : > { %7719 = vst [vmem:[#allocation83_spill] sm:$0xff] %v7718_v16  ;;  %7725 = vst [vmem:[#allocation85_spill] sm:$0xff] %v7724_v37  ;;  %v2121_v6 = vsel %vm6466_vm14, %v6479_v25, 0.0  ;;  %v1555_v13 = vpack.c.bf16 %v1533_v63, %v1532_v28  ;;  %v1040_v29 = vand.u32 15, %v6462_v23  ;;  %v2123_v4 = vsel %vm6481_vm12, %v6508_v19, 0.0  ;;  %v6526_v3 = vld [vmem:[#allocation2 + $0x87] sm:$0xff] }
 0x13b   : > { %7727 = vst [vmem:[#allocation87_spill] sm:$0xff] %v6508_v19  ;;  %874 = vst.msk [vmem:[#allocation2 + $0x100] sm:$0xff] %vm7539_vm0, %v836_v8  ;;  %v6519_v45 = vpack.c.bf16 %v2121_v6, %v6503_v31  ;;  %v1556_v1 = vpack.c.bf16 %v1535_v41, %v1534_v38  ;;  %v6528_v8 = vld [vmem:[#allocation2 + $0x97] sm:$0xff]  ;;  %v1054_v28 = vand.u32 15, %v6477_v33  ;;  %v900_v63 = vadd.s32 176, %v6069_v56  ;;  %v6535_v6 = vld [vmem:[#allocation2 + $0x6f] sm:$0xff] }
 0x13c   : > { %7731 = vst [vmem:[#allocation91_spill] sm:$0xff] %v6526_v3  ;;  %7732 = vst [vmem:[#allocation92_spill] sm:$0xff] %v6528_v8  ;;  %v902_v23 = vadd.s32 192, %v6069_v56  ;;  %5145 = vmatmul.mubr.msk.bf16.gmra.mrb[56].mxu0 %vm7539_vm0, %v1555_v13  ;;  %5288 = vmatprep.mubr.msk.bf16.mxu1 %vm7539_vm0, %v1555_v13  ;;  %v904_v38 = vadd.s32 208, %v6069_v56  ;;  %v6541_v41 = vadd.s32 224, %v6069_v56  ;;  %v6544_v26 = vpack.c.bf16 %v2123_v4, %v6506_v9  ;;  %v6563_v14 = vld [vmem:[#allocation2 + $0x8f] sm:$0xff] }
 0x13d   : > { %7729 = vst [vmem:[#allocation89_spill] sm:$0xff] %v6519_v45  ;;  %v6537_v45 = vld [vmem:[#allocation2 + $0x9f] sm:$0xff]  ;;  %v2443_v33 = vsel %vm6442_vm7, %v6474_v15, 0.0  ;;  %5148 = vmatprep.mubr.msk.bf16.mxu0 %vm7539_vm0, %v1556_v1  ;;  %5289 = vmatmul.mubr.msk.bf16.gmra.mrb[24].mxu1 %vm7539_vm0, %v1556_v1  ;;  %vm6551_vm12 = vcmp.le.s32.totalorder %v1117_v12, 14  ;;  %v7735_v13 = vmov 0  ;;  %v1131_v19 = vand.u32 15, %v909_v30 }
 0x13e   : > { %7733 = vst [vmem:[#allocation93_spill] sm:$0xff] %v6537_v45  ;;  %7734 = vst [vmem:[#allocation94_spill] sm:$0xff] %v6544_v26  ;;  %v7736_v13 = vsel %vm6551_vm12, 4294967295, %v7735_v13  ;;  %v6556_v31 = vpack.c.bf16 %v6535_v6, %v2443_v33  ;;  %v2445_v4 = vsel %vm6452_vm15, %v6515_v36, 0.0  ;;  %v1359_v26 = vld [vmem:[#allocation2 + $0xf] sm:$0xff]  ;;  %v1454_v15 = vsel %vm6088_vm1, %v1358_v46, 0.0 }
 0x13f   : > { %7738 = vst [vmem:[#allocation96_spill] sm:$0xff] %v6563_v14  ;;  %v6566_v1 = vpack.c.bf16 %v6524_v40, %v2445_v4  ;;  %v2447_v30 = vsel %vm6495_vm10, %v6526_v3, 0.0  ;;  %v2449_v12 = vsel %vm6499_vm5, %v6528_v8, 0.0  ;;  %v1068_v33 = vand.u32 15, %v900_v63  ;;  %v2769_v4 = vld [vmem:[#allocation2 + $0x110] sm:$0xff]  ;;  %v1536_v8 = vld [vmem:[#allocation2 + $0xf8] sm:$0xff] }
 0x140   : > { %7737 = vst [vmem:[#allocation95_spill] sm:$0xff] %v6556_v31  ;;  %v6574_v31 = vld [vmem:[#allocation2 + $0xf1] sm:$0xff]  ;;  %v908_v36 = vadd.s32 240, %v6069_v56  ;;  %v6578_v46 = vpack.c.bf16 %v6563_v14, %v2447_v30  ;;  %v6581_v54 = vpack.c.bf16 %v6537_v45, %v2449_v12  ;;  %v1082_v40 = vand.u32 15, %v902_v23  ;;  %v6585_v20 = vld [vmem:[#allocation2 + $0xe9] sm:$0xff] }
 0x141   : > { %7739 = vst [vmem:[#allocation97_spill] sm:$0xff] %v6566_v1  ;;  %v6583_v1 = vld [vmem:[#allocation2 + $0xa7] sm:$0xff]  ;;  %v1096_v3 = vand.u32 15, %v904_v38  ;;  %v2125_v63 = vsel %vm6551_vm12, %v6574_v31, 0.0  ;;  %v3076_v56 = vsel %vm6491_vm8, %v6111_v39, 0.0  ;;  %v1490_v30 = vpack.c.bf16 %v1359_v26, %v1454_v15  ;;  %v6606_v14 = vld [vmem:[#allocation2 + $0xb7] sm:$0xff] }
 0x142   : > { %7740 = vst [vmem:[#allocation98_spill] sm:$0xff] %v6578_v46  ;;  %7741 = vst [vmem:[#allocation99_spill] sm:$0xff] %v6581_v54  ;;  %v1537_v37 = vld [vmem:[#allocation2 + $0x100] sm:$0xff]  ;;  %vm6595_vm0 = vcmp.le.s32.totalorder %v1131_v19, 14  ;;  %v7743_v54 = vmov 0  ;;  %v6600_v23 = vpack.c.bf16 %v2125_v63, %v6585_v20  ;;  %v2768_v46 = vld [vmem:[#allocation2 + $0x108] sm:$0xff] }
 0x143   : > { %7742 = vst [vmem:[#allocation100_spill] sm:$0xff] %v6583_v1  ;;  %v6593_v12 = vld [vmem:[#allocation2 + $0x101] sm:$0xff]  ;;  %v7744_v54 = vsel %vm6595_vm0, 4294967295, %v7743_v54  ;;  %v1557_v38 = vpack.c.bf16 %v1537_v37, %v1536_v8  ;;  %vm6602_vm1 = vcmp.ge.s32.totalorder %v1040_v29, 1  ;;  %v1110_v39 = vand.u32 15, %v6541_v41  ;;  %v6609_v15 = vld [vmem:[#allocation2 + $0xf9] sm:$0xff] }
 0x144   : > { %7745 = vst [vmem:[#allocation101_spill] sm:$0xff] %v7744_v54  ;;  %7746 = vst [vmem:[#allocation102_spill] sm:$0xff] %v6600_v23  ;;  %v2789_v26 = vpack.c.bf16 %v2769_v4, %v2768_v46  ;;  %vm6611_vm8 = vcmp.ge.s32.totalorder %v1054_v28, 1  ;;  %vm6615_vm5 = vcmp.ge.s32.totalorder %v1068_v33, 1  ;;  %v6619_v37 = vld [vmem:[#allocation2 + $0xbf] sm:$0xff]  ;;  %v6621_v29 = vld [vmem:[#allocation2 + $0xc7] sm:$0xff]  ;;  %v3111_v28 = vpack.c.bf16 %v3076_v56, %v6125_v53 }
 0x145   : > { %v6623_v8 = vld [vmem:[#allocation2 + $0xd7] sm:$0xff]  ;;  %v1124_v23 = vand.u32 15, %v908_v36  ;;  %vm7754_vm10 = vcmask 261120   ;;  %v6628_v41 = vld [vmem:[#allocation2 + $0xaf] sm:$0xff]  ;;  %vm6630_vm7 = vcmp.ge.s32.totalorder %v1082_v40, 1  ;;  %v6634_v46 = vld [vmem:[#allocation2 + $0xdf] sm:$0xff] }
 0x146   : > { %7753 = vst [vmem:[#allocation103_spill] sm:$0xff] %v6623_v8  ;;  %5149 = vmatmul.mubr.msk.bf16.gmra.mrb[60].mxu0 %vm7754_vm10, %v1557_v38  ;;  %vm7755_vm15 = vmmov %vm7754_vm10  ;;  %v2127_v4 = vsel %vm6595_vm0, %v6593_v12, 0.0  ;;  %v2451_v36 = vsel %vm6602_vm1, %v6583_v1, 0.0  ;;  %vm6644_vm12 = vcmp.ge.s32.totalorder %v1096_v3, 1  ;;  %v7759_v53 = vmov 0  ;;  %v6648_v40 = vld [vmem:[#allocation2 + $0xe7] sm:$0xff] }
 0x147   : > { %5292 = vmatprep.mubr.msk.bf16.mxu1 %vm7755_vm15, %v1557_v38  ;;  %vm7758_vm15 = vmmov %vm7754_vm10  ;;  %v7760_v53 = vsel %vm6644_vm12, 4294967295, %v7759_v53  ;;  %v6650_v56 = vld [vmem:[#allocation2 + $0xf7] sm:$0xff]  ;;  %v6653_v38 = vpack.c.bf16 %v2127_v4, %v6609_v15  ;;  %v6656_v54 = vpack.c.bf16 %v6628_v41, %v2451_v36  ;;  %v6662_v3 = vld [vmem:[#allocation2 + $0xcf] sm:$0xff]  ;;  %v2455_v36 = vsel %vm6615_vm5, %v6621_v29, 0.0 }
 0x148   : > { %5293 = vmatmul.mubr.msk.bf16.gmra.mrb[28].mxu1 %vm7754_vm10, %v2789_v26  ;;  %5156 = vmatprep.mubr.msk.bf16.mxu0 %vm7758_vm15, %v1490_v30  ;;  %v2453_v26 = vsel %vm6611_vm8, %v6606_v14, 0.0  ;;  %vm6664_vm15 = vcmp.ge.s32.totalorder %v1110_v39, 1  ;;  %v7763_v30 = vmov 0  ;;  %v6668_v16 = vld [vmem:[#allocation2 + $0xff] sm:$0xff]  ;;  %v6670_v1 = vld [vmem:[#allocation2 + $0x107] sm:$0xff]  ;;  %v1456_v39 = vsel %vm6127_vm3, %v6092_v55, 0.0 }
 0x149   : > { %7761 = vst [vmem:[#allocation104_spill] sm:$0xff] %v6653_v38  ;;  %7762 = vst [vmem:[#allocation105_spill] sm:$0xff] %v6656_v54  ;;  %5300 = vmatprep.mubr.msk.bf16.mxu1 %vm7754_vm10, %v3111_v28  ;;  %v7764_v30 = vsel %vm6664_vm15, 4294967295, %v7763_v30  ;;  %v6673_v4 = vpack.c.bf16 %v6619_v37, %v2453_v26  ;;  %v2457_v28 = vsel %vm6630_vm7, %v6623_v8, 0.0  ;;  %vm6684_vm10 = vcmp.ge.s32.totalorder %v1124_v23, 1  ;;  %v6700_v60 = vld [vmem:[#allocation2 + $0xef] sm:$0xff] }
 0x14a   : > { %7765 = vst [vmem:[#allocation106_spill] sm:$0xff] %v6668_v16  ;;  %7766 = vst [vmem:[#allocation107_spill] sm:$0xff] %v6670_v1  ;;  %v7768_v54 = vmov 0  ;;  %v6689_v38 = vpack.c.bf16 %v6662_v3, %v2455_v36  ;;  %v6692_v26 = vpack.c.bf16 %v6634_v46, %v2457_v28  ;;  %v3078_v8 = vsel %vm6105_vm2, %v6158_v22, 0.0  ;;  %v6711_v28 = vld [vmem:[#allocation2 + $0x10f] sm:$0xff] }
 0x14b   : > { %7767 = vst [vmem:[#allocation108_spill] sm:$0xff] %v6673_v4  ;;  %v7769_v54 = vsel %vm6684_vm10, 4294967295, %v7768_v54  ;;  %v1458_v4 = vsel %vm6210_vm6, %v6131_v61, 0.0  ;;  %v2459_v55 = vsel %vm6644_vm12, %v6648_v40, 0.0  ;;  %v2461_v23 = vsel %vm6664_vm15, %v6650_v56, 0.0  ;;  %7773 = vst [vmem:[#allocation112_spill] sm:$0xff] %v6711_v28 }
 0x14c   : > { %7770 = vst [vmem:[#allocation109_spill] sm:$0xff] %v7769_v54  ;;  %7771 = vst [vmem:[#allocation110_spill] sm:$0xff] %v6689_v38  ;;  %v3080_v36 = vsel %vm6133_vm4, %v6195_v49, 0.0  ;;  %v6714_v61 = vpack.c.bf16 %v6700_v60, %v2459_v55  ;;  %v6717_v22 = vpack.c.bf16 %v6668_v16, %v2461_v23  ;;  %v2463_v27 = vsel %vm6684_vm10, %v6670_v1, 0.0  ;;  %v5717_v55 = vld [vmem:[%s7436_s6 + $0x68] sm:$0xff]   ;;  %v7810_v16 = vld [vmem:[#allocation52_spill] sm:$0xff] }
 0x14d   : > { %7772 = vst [vmem:[#allocation111_spill] sm:$0xff] %v6692_v26  ;;  %v1491_v26 = vpack.c.bf16 %v6116_v43, %v1456_v39  ;;  %v6724_v38 = vpack.c.bf16 %v6711_v28, %v2463_v27  ;;  %v1492_v2 = vpack.c.bf16 %v6156_v21, %v1458_v4  ;;  %v3112_v49 = vpack.c.bf16 %v3078_v8, %v6173_v48  ;;  %v5719_v48 = vld [vmem:[%s7436_s6 + $0x28] sm:$0xff]   ;;  %v6750_v8 = vld [vmem:[#allocation2 + $0x111] sm:$0xff] }
 0x14e   : > { %7774 = vst [vmem:[#allocation113_spill] sm:$0xff] %v6714_v61  ;;  %7775 = vst [vmem:[#allocation114_spill] sm:$0xff] %v6717_v22  ;;  %vm7777_vm4 = vcmask 261120   ;;  %v3113_v23 = vpack.c.bf16 %v3080_v36, %v6202_v7  ;;  %v1460_v22 = vsel %vm6317_vm11, %v6204_v24, 0.0  ;;  %v1462_v27 = vsel %vm6369_vm13, %v6321_v34, 0.0  ;;  %v7797_v28 = vld [vmem:[#allocation79_spill] sm:$0xff] }
 0x14f   : > { %7776 = vst [vmem:[#allocation115_spill] sm:$0xff] %v6724_v38  ;;  %5157 = vmatmul.mubr.msk.bf16.vlgmr.msra.gmra.mrb[32].mxu0 %vm7777_vm4, %v1491_v26  ;;  %v4067_v43 = vsel %vm6272_vm9, %v6344_v35, 0.0  ;;  %vm7778_vm2 = vmmov %vm7777_vm4  ;;  %vm7780_vm6 = vnez %v7645_v47  ;;  %vm7782_vm13 = vnez %v7672_v52  ;;  %vm7783_vm11 = vnez %v7681_v59  ;;  %v7794_v47 = vld [vmem:[#allocation87_spill] sm:$0xff]  ;;  %v7842_v52 = vld [vmem:[#allocation92_spill] sm:$0xff] }
 0x150   : > { %5160 = vmatprep.mubr.msk.bf16.mxu0 %vm7778_vm2, %v1492_v2  ;;  %vm7779_vm4 = vmmov %vm7778_vm2  ;;  %v3082_v7 = vsel %vm7780_vm6, %v6226_v42, 0.0  ;;  %v6753_v4 = vpack.c.bf16 %v4067_v43, %v6361_v50  ;;  %v4069_v39 = vsel %vm7782_vm13, %v6378_v0, 0.0  ;;  %v4071_v26 = vsel %vm7783_vm11, %v6409_v51, 0.0  ;;  %v6763_v2 = vld [vmem:[#allocation2 + $0x109] sm:$0xff]  ;;  %v7787_v43 = vld [vmem:[#allocation72_spill] sm:$0xff] }
 0x151   : > { %5301 = vmatmul.mubr.msk.bf16.vlgmr.msra.gmra.mrb[0].mxu1 %vm7779_vm4, %v3112_v49  ;;  %v6766_v42 = vpack.c.bf16 %v4069_v39, %v6392_v10  ;;  %v6769_v36 = vpack.c.bf16 %v4071_v26, %v6426_v5  ;;  %vm7786_vm4 = vnez %v7690_v57  ;;  %vm7788_vm6 = vnez %v7787_v43  ;;  %v7790_v39 = vld [vmem:[#allocation78_spill] sm:$0xff]  ;;  %v7795_v38 = vld [vmem:[#allocation75_spill] sm:$0xff]  ;;  %v7843_v59 = vld [vmem:[#allocation100_spill] sm:$0xff] }
 0x152   : > { %7781 = vst [vmem:[#allocation116_spill] sm:$0xff] %v6753_v4  ;;  %5333 = vmatpush3.bf16.msra.mxu1 %v6154_v62  ;;  %5304 = vmatprep.mubr.msk.bf16.mxu1 %vm7778_vm2, %v3113_v23  ;;  %v4073_v49 = vsel %vm7786_vm4, %v6446_v11, 0.0  ;;  %v4075_v4 = vsel %vm7788_vm6, %v6479_v25, 0.0  ;;  %v7789_v62 = vld [vmem:[#allocation44_spill] sm:$0xff]  ;;  %v6781_v23 = vld [vmem:[%s7436_s6 + $0x70] sm:$0xff]   ;;  %v7792_v26 = vld [vmem:[#allocation86_spill] sm:$0xff]  ;;  %vm7796_vm2 = vnez %v7795_v38  ;;  %vm7802_vm0 = vnez %v7736_v13 }
 0x153   : > { %7784 = vst [vmem:[#allocation117_spill] sm:$0xff] %v6766_v42  ;;  %7785 = vst [vmem:[#allocation118_spill] sm:$0xff] %v6769_v36  ;;  %5334 = vmatprep.subr.bf16.mxu1 %v5717_v55  ;;  %5189 = vmatpush3.bf16.msra.mxu0 %v7789_v62  ;;  %v6784_v42 = vpack.c.bf16 %v4073_v49, %v7790_v39  ;;  %v6787_v36 = vpack.c.bf16 %v4075_v4, %v7792_v26  ;;  %v4077_v61 = vsel %vm7796_vm2, %v7794_v47, 0.0  ;;  %v6798_v62 = vld [vmem:[%s7436_s6 + $0x30] sm:$0xff]  }
 0x154   : > { %v4079_v1 = vsel %vm6466_vm14, %v6574_v31, 0.0  ;;  %5190 = vmatprep.subr.bf16.mxu0 %v5719_v48  ;;  %v6801_v49 = vpack.c.bf16 %v4077_v61, %v6506_v9  ;;  %v4083_v32 = vsel %vm7802_vm0, %v6750_v8, 0.0  ;;  %vm7805_vm10 = vnez %v7804_v44  ;;  %v7812_v44 = vld [vmem:[#allocation56_spill] sm:$0xff]  ;;  %v7919_v33 = vld [vmem:[#allocation107_spill] sm:$0xff] }
 0x155   : > { %7791 = vst [vmem:[#allocation72_spill] sm:$0xff] %v6784_v42  ;;  %7793 = vst [vmem:[#allocation44_spill] sm:$0xff] %v6787_v36  ;;  %v6804_v4 = vpack.c.bf16 %v4079_v1, %v6585_v20  ;;  %v7800_v36 = vld [vmem:[#allocation81_spill] sm:$0xff]  ;;  %v3084_v34 = vsel %vm7805_vm10, %v7803_v17, 0.0  ;;  %v6819_v61 = vpack.c.bf16 %v4083_v32, %v6763_v2  ;;  %v7808_v1 = vld [vmem:[#allocation48_spill] sm:$0xff]  ;;  %v3114_v54 = vpack.c.bf16 %v3082_v7, %v7810_v16 }
 0x156   : > { %7798 = vst [vmem:[#allocation78_spill] sm:$0xff] %v6801_v49  ;;  %vm7801_vm3 = vnez %v7800_v36  ;;  %5335 = vmatpush3.bf16.msra.mxu1 %v5717_v55  ;;  %v7809_v49 = vld [vmem:[#allocation65_spill] sm:$0xff]  ;;  %vm7811_vm0 = vcmask 261120   ;;  %v3115_v17 = vpack.c.bf16 %v3084_v34, %v7812_v44  ;;  %v7816_v32 = vld [vmem:[#allocation70_spill] sm:$0xff]  ;;  %v7819_v16 = vld [vmem:[#allocation80_spill] sm:$0xff]  ;;  %vm7820_vm14 = vnez %v7706_v18 }
 0x157   : > { %7799 = vst [vmem:[#allocation86_spill] sm:$0xff] %v6804_v4  ;;  %v4081_v42 = vsel %vm7801_vm3, %v6593_v12, 0.0  ;;  %7807 = vst [vmem:[#allocation75_spill] sm:$0xff] %v6819_v61  ;;  %v1493_v4 = vpack.c.bf16 %v7808_v1, %v1460_v22  ;;  %v1494_v21 = vpack.c.bf16 %v7809_v49, %v1462_v27  ;;  %5191 = vmatpush3.bf16.msra.mxu0 %v5719_v48  ;;  %5368 = vmatprep.subr.bf16.mxu1 %v6781_v23  ;;  %v7817_v22 = vld [vmem:[#allocation77_spill] sm:$0xff]  ;;  %v7822_v7 = vld [vmem:[#allocation55_spill] sm:$0xff] }
 0x158   : > { %v6816_v24 = vpack.c.bf16 %v4081_v42, %v6609_v15  ;;  %5224 = vmatprep.subr.bf16.mxu0 %v6798_v62  ;;  %vm7813_vm10 = vmmov %vm7811_vm0  ;;  %vm7818_vm12 = vnez %v7817_v22  ;;  %v1466_v27 = vsel %vm7820_vm14, %v7819_v16, 0.0  ;;  %v7821_v48 = vld [vmem:[#allocation57_spill] sm:$0xff]  ;;  %v7825_v42 = vld [vmem:[#allocation71_spill] sm:$0xff]  ;;  %v1476_v57 = vsel %vm6615_vm5, %v6606_v14, 0.0 }
 0x159   : > { %5161 = vmatmul.mubr.msk.bf16.gmra.mrb[36].mxu0 %vm7811_vm0, %v1493_v4  ;;  %vm7814_vm3 = vmmov %vm7811_vm0  ;;  %v1464_v55 = vsel %vm7818_vm12, %v7816_v32, 0.0  ;;  %v7824_v34 = vld [vmem:[#allocation61_spill] sm:$0xff]  ;;  %v1496_v4 = vpack.c.bf16 %v6535_v6, %v1466_v27  ;;  %v1501_v43 = vpack.c.bf16 %v6619_v37, %v1476_v57  ;;  %v3436_v45 = vsel %vm6630_vm7, %v6648_v40, 0.0 }
 0x15a   : > { %7806 = vst [vmem:[#allocation87_spill] sm:$0xff] %v6816_v24  ;;  %5164 = vmatprep.mubr.msk.bf16.mxu0 %vm7813_vm10, %v1494_v21  ;;  %5305 = vmatmul.mubr.msk.bf16.gmra.mrb[4].mxu1 %vm7814_vm3, %v3114_v54  ;;  %vm7815_vm15 = vmmov %vm7811_vm0  ;;  %vm7823_vm0 = vnez %v7822_v7  ;;  %v3088_v21 = vsel %vm6272_vm9, %v7824_v34, 0.0  ;;  %v1495_v54 = vpack.c.bf16 %v7825_v42, %v1464_v55  ;;  %v7827_v24 = vld [vmem:[#allocation64_spill] sm:$0xff]  ;;  %v7834_v34 = vld [vmem:[#allocation91_spill] sm:$0xff] }
 0x15b   : > { %5308 = vmatprep.mubr.msk.bf16.mxu1 %vm7815_vm15, %v3115_v17  ;;  %v3086_v44 = vsel %vm7823_vm0, %v7821_v48, 0.0  ;;  %v7826_v17 = vld [vmem:[#allocation59_spill] sm:$0xff]  ;;  %v3117_v22 = vpack.c.bf16 %v3088_v21, %v7827_v24  ;;  %vm7828_vm15 = vmmov %vm7814_vm3  ;;  %v7831_v48 = vld [vmem:[#allocation88_spill] sm:$0xff]  ;;  %v3092_v24 = vsel %vm7783_vm11, %v6378_v0, 0.0  ;;  %v1472_v0 = vsel %vm6602_vm1, %v7842_v52, 0.0 }
 0x15c   : > { %v3116_v61 = vpack.c.bf16 %v3086_v44, %v7826_v17  ;;  %vm7829_vm10 = vmmov %vm7814_vm3  ;;  %v7832_v7 = vld [vmem:[#allocation84_spill] sm:$0xff]  ;;  %v7835_v55 = vld [vmem:[#allocation85_spill] sm:$0xff]  ;;  %v3090_v44 = vsel %vm7782_vm13, %v6344_v35, 0.0  ;;  %v3119_v17 = vpack.c.bf16 %v3092_v24, %v6392_v10  ;;  %v1474_v35 = vsel %vm6611_vm8, %v7843_v59, 0.0 }
 0x15d   : > { %vm7830_vm14 = vmmov %vm7814_vm3  ;;  %vm7833_vm0 = vnez %v7832_v7  ;;  %vm7836_vm9 = vnez %v7835_v55  ;;  %v7837_v21 = vld [vmem:[#allocation90_spill] sm:$0xff]  ;;  %v3096_v10 = vsel %vm7788_vm6, %v6446_v11, 0.0  ;;  %vm7848_vm6 = vnez %v7797_v28 }
 0x15e   : > { %v1468_v58 = vsel %vm7833_vm0, %v7831_v48, 0.0  ;;  %v1470_v27 = vsel %vm7836_vm9, %v7834_v34, 0.0  ;;  %vm7845_vm11 = vmmov %vm7814_vm3  ;;  %v3100_v11 = vsel %vm7848_vm6, %v7794_v47, 0.0  ;;  %v3430_v7 = vsel %vm6602_vm1, %v6606_v14, 0.0 }
 0x15f   : > { %vm7846_vm13 = vmmov %vm7814_vm3  ;;  %v3432_v55 = vsel %vm6611_vm8, %v6621_v29, 0.0 }
 0x161   : > { %5165 = vmatmul.mubr.msk.bf16.gmra.mrb[40].mxu0 %vm7814_vm3, %v1495_v54  ;;  %v7838_v54 = vld [vmem:[#allocation96_spill] sm:$0xff] }
 0x162   : > { %5168 = vmatprep.mubr.msk.bf16.mxu0 %vm7828_vm15, %v1496_v4  ;;  %5309 = vmatmul.mubr.msk.bf16.gmra.mrb[8].mxu1 %vm7829_vm10, %v3116_v61  ;;  %v1497_v61 = vpack.c.bf16 %v7837_v21, %v1468_v58  ;;  %v3118_v4 = vpack.c.bf16 %v3090_v44, %v6361_v50  ;;  %vm7840_vm15 = vmmov %vm7814_vm3  ;;  %v3094_v50 = vsel %vm7786_vm4, %v6409_v51, 0.0  ;;  %v7844_v58 = vld [vmem:[#allocation93_spill] sm:$0xff]  ;;  %v1500_v44 = vpack.c.bf16 %v6628_v41, %v1474_v35 }
 0x163   : > { %5312 = vmatprep.mubr.msk.bf16.mxu1 %vm7830_vm14, %v3117_v22  ;;  %v1498_v22 = vpack.c.bf16 %v7838_v54, %v1470_v27  ;;  %vm7839_vm14 = vmmov %vm7814_vm3  ;;  %v1499_v27 = vpack.c.bf16 %v7844_v58, %v1472_v0  ;;  %v3120_v24 = vpack.c.bf16 %v3094_v50, %v6426_v5  ;;  %v1478_v51 = vsel %vm6630_vm7, %v6621_v29, 0.0  ;;  %v7863_v50 = vld [vmem:[#allocation83_spill] sm:$0xff] }
 0x164   : > { %vm7841_vm10 = vmmov %vm7814_vm3  ;;  %v3098_v5 = vsel %vm7796_vm2, %v6479_v25, 0.0  ;;  %v7853_v25 = vld [vmem:[#allocation103_spill] sm:$0xff]  ;;  %vm7854_vm2 = vnez %v7760_v53  ;;  %v3460_v29 = vpack.c.bf16 %v6700_v60, %v3436_v45  ;;  %v3411_v53 = vld [vmem:[#allocation2 + $0x11f] sm:$0xff] }
 0x165   : > { %vm7849_vm4 = vmmov %vm7814_vm3  ;;  %v1480_v47 = vsel %vm7854_vm2, %v7853_v25, 0.0  ;;  %v3434_v14 = vsel %vm6615_vm5, %v7853_v25, 0.0  ;;  %v3438_v63 = vsel %vm7854_vm2, %v6650_v56, 0.0  ;;  %v7920_v25 = vld [vmem:[#allocation94_spill] sm:$0xff]  ;;  %v7957_v45 = vld [vmem:[#allocation108_spill] sm:$0xff] }
 0x166   : > { %vm7858_vm6 = vmmov %vm7849_vm4  ;;  %v3459_v19 = vpack.c.bf16 %v6634_v46, %v3434_v14 }
 0x169   : > { %5169 = vmatmul.mubr.msk.bf16.gmra.mrb[44].mxu0 %vm7839_vm14, %v1497_v61  ;;  %v3121_v61 = vpack.c.bf16 %v3096_v10, %v7790_v39  ;;  %vm7847_vm14 = vmmov %vm7814_vm3  ;;  %v1502_v39 = vpack.c.bf16 %v6662_v3, %v1478_v51 }
 0x16a   : > { %5172 = vmatprep.mubr.msk.bf16.mxu0 %vm7814_vm3, %v1498_v22  ;;  %5313 = vmatmul.mubr.msk.bf16.gmra.mrb[12].mxu1 %vm7840_vm15, %v3118_v4  ;;  %v3122_v22 = vpack.c.bf16 %v3098_v5, %v7792_v26  ;;  %v3123_v4 = vpack.c.bf16 %v3100_v11, %v6506_v9  ;;  %vm7850_vm15 = vmmov %vm7814_vm3  ;;  %v1503_v26 = vpack.c.bf16 %v6634_v46, %v1480_v47  ;;  %v7870_v11 = vld [vmem:[#allocation40_spill] sm:$0xff]  ;;  %v7878_v47 = vld [vmem:[#allocation47_spill] sm:$0xff] }
 0x16b   : > { %5316 = vmatprep.mubr.msk.bf16.mxu1 %vm7841_vm10, %v3119_v17  ;;  %vm7851_vm10 = vmmov %vm7814_vm3 }
 0x171   : > { %5173 = vmatmul.mubr.msk.bf16.gmra.mrb[48].mxu0 %vm7845_vm11, %v1499_v27  ;;  %vm7852_vm11 = vmmov %vm7814_vm3 }
 0x172   : > { %5176 = vmatprep.mubr.msk.bf16.mxu0 %vm7846_vm13, %v1500_v44  ;;  %5317 = vmatmul.mubr.msk.bf16.gmra.mrb[16].mxu1 %vm7847_vm14, %v3120_v24  ;;  %vm7855_vm13 = vnez %v7764_v30  ;;  %vm7856_vm14 = vnez %v7800_v36  ;;  %v2001_v36 = vld [vmem:[#allocation2 + $0x11] sm:$0xff] }
 0x173   : > { %5320 = vmatprep.mubr.msk.bf16.mxu1 %vm7814_vm3, %v3121_v61  ;;  %v1482_v38 = vsel %vm7855_vm13, %v6648_v40, 0.0  ;;  %v3102_v28 = vsel %vm7856_vm14, %v6574_v31, 0.0  ;;  %vm7857_vm3 = vnez %v7736_v13  ;;  %v7861_v31 = vld [vmem:[#allocation109_spill] sm:$0xff]  ;;  %vm7864_vm14 = vnez %v7863_v50  ;;  %v7867_v44 = vld [vmem:[#allocation35_spill] sm:$0xff]  ;;  %v7869_v61 = vld [vmem:[#allocation106_spill] sm:$0xff] }
 0x174   : > { %v3104_v9 = vsel %vm7857_vm3, %v6593_v12, 0.0  ;;  %v1504_v17 = vpack.c.bf16 %v6700_v60, %v1482_v38  ;;  %v3124_v0 = vpack.c.bf16 %v3102_v28, %v6585_v20  ;;  %v2000_v12 = vld [vmem:[#allocation2 + $0x9] sm:$0xff]  ;;  %v2097_v10 = vsel %vm7864_vm14, %v2001_v36, 0.0  ;;  %v7865_v20 = vld [vmem:[#allocation101_spill] sm:$0xff]  ;;  %vm7873_vm14 = vmmov %vm7849_vm4 }
 0x175   : > { %v3125_v35 = vpack.c.bf16 %v3104_v9, %v6609_v15  ;;  %vm7866_vm3 = vnez %v7865_v20  ;;  %v5726_v15 = vld [vmem:[#allocation2 + $0x27] sm:$0xff]  ;;  %v2132_v51 = vpack.c.bf16 %v2097_v10, %v2000_v12  ;;  %v5721_v28 = vld [vmem:[%s7436_s6 + $0x78] sm:$0xff]   ;;  %v3440_v46 = vsel %vm7855_vm13, %v7919_v33, 0.0  ;;  %v3718_v30 = vld [vmem:[#allocation2 + $0x30] sm:$0xff] }
 0x176   : > { %v3106_v27 = vsel %vm7866_vm3, %v6750_v8, 0.0  ;;  %v7874_v8 = vld [vmem:[#allocation46_spill] sm:$0xff]  ;;  %v7880_v9 = vld [vmem:[#allocation41_spill] sm:$0xff]  ;;  %v7887_v36 = vld [vmem:[#allocation68_spill] sm:$0xff]  ;;  %v3461_v40 = vpack.c.bf16 %v7869_v61, %v3438_v63 }
 0x177   : > { %v3126_v5 = vpack.c.bf16 %v3106_v27, %v6763_v2  ;;  %v7891_v10 = vld [vmem:[#allocation53_spill] sm:$0xff]  ;;  %v7922_v60 = vld [vmem:[#allocation112_spill] sm:$0xff]  ;;  %v3741_v63 = vld [vmem:[#allocation2 + $0xe8] sm:$0xff] }
 0x178   : > { %v7961_v33 = vld [vmem:[#allocation110_spill] sm:$0xff] }
 0x179   : > { %5177 = vmatmul.mubr.msk.bf16.gmra.mrb[52].mxu0 %vm7849_vm4, %v1501_v43 }
 0x17a   : > { %5180 = vmatprep.mubr.msk.bf16.mxu0 %vm7850_vm15, %v1502_v39  ;;  %5321 = vmatmul.mubr.msk.bf16.gmra.mrb[20].mxu1 %vm7851_vm10, %v3122_v22  ;;  %vm7859_vm15 = vmmov %vm7849_vm4  ;;  %v7875_v39 = vld [vmem:[#allocation37_spill] sm:$0xff] }
 0x17b   : > { %5324 = vmatprep.mubr.msk.bf16.mxu1 %vm7852_vm11, %v3123_v4  ;;  %vm7860_vm10 = vmmov %vm7849_vm4  ;;  %vm7862_vm11 = vnez %v7861_v31  ;;  %vm7876_vm3 = vnez %v7875_v39  ;;  %v7877_v4 = vld [vmem:[#allocation63_spill] sm:$0xff]  ;;  %v3721_v31 = vld [vmem:[#allocation2 + $0x48] sm:$0xff] }
 0x17c   : > { %v1484_v13 = vsel %vm7862_vm11, %v6650_v56, 0.0  ;;  %v3414_v22 = vsel %vm7876_vm3, %v7874_v8, 0.0  ;;  %vm7883_vm3 = vmmov %vm7849_vm4  ;;  %v7929_v39 = vld [vmem:[#allocation39_spill] sm:$0xff] }
 0x17d   : > { %v1505_v57 = vpack.c.bf16 %v7869_v61, %v1484_v13  ;;  %v3449_v2 = vpack.c.bf16 %v7808_v1, %v3414_v22  ;;  %v7885_v1 = vld [vmem:[#allocation62_spill] sm:$0xff]  ;;  %v3720_v22 = vld [vmem:[#allocation2 + $0x40] sm:$0xff] }
 0x17e   : > { %v3717_v61 = vld [vmem:[#allocation2 + $0x28] sm:$0xff] }
 0x17f   : > { %v3753_v8 = vpack.c.bf16 %v3718_v30, %v3717_v61  ;;  %v7969_v30 = vld [vmem:[#allocation114_spill] sm:$0xff]  ;;  %v3748_v61 = vld [vmem:[#allocation2 + $0x120] sm:$0xff] }
 0x181   : > { %5181 = vmatmul.mubr.msk.bf16.gmra.mrb[56].mxu0 %vm7858_vm6, %v1503_v26  ;;  %vm7868_vm6 = vnez %v7867_v44  ;;  %v7898_v44 = vld [vmem:[#allocation60_spill] sm:$0xff] }
 0x182   : > { %5184 = vmatprep.mubr.msk.bf16.mxu0 %vm7849_vm4, %v1504_v17  ;;  %5325 = vmatmul.mubr.msk.bf16.gmra.mrb[24].mxu1 %vm7859_vm15, %v3124_v0  ;;  %v3412_v24 = vsel %vm7868_vm6, %v5726_v15, 0.0  ;;  %vm7871_vm15 = vmmov %vm7849_vm4  ;;  %vm7879_vm6 = vnez %v7878_v47  ;;  %v5723_v17 = vld [vmem:[%s7436_s6 + $0x38] sm:$0xff]   ;;  %v7881_v0 = vld [vmem:[#allocation45_spill] sm:$0xff] }
 0x183   : > { %5328 = vmatprep.mubr.msk.bf16.mxu1 %vm7860_vm10, %v3125_v35  ;;  %v3448_v43 = vpack.c.bf16 %v7870_v11, %v3412_v24  ;;  %vm7872_vm10 = vmmov %vm7849_vm4  ;;  %v3416_v38 = vsel %vm7879_vm6, %v7877_v4, 0.0  ;;  %vm7888_vm6 = vnez %v7887_v36  ;;  %v7896_v15 = vld [vmem:[#allocation58_spill] sm:$0xff]  ;;  %v7903_v24 = vld [vmem:[#allocation69_spill] sm:$0xff] }
 0x184   : > { %v3450_v26 = vpack.c.bf16 %v7809_v49, %v3416_v38  ;;  %v6973_v49 = vld [vmem:[%s7436_s6 + $0x80] sm:$0xff]   ;;  %v3420_v13 = vsel %vm7888_vm6, %v7819_v16, 0.0  ;;  %v3422_v16 = vsel %vm7818_vm12, %v7831_v48, 0.0  ;;  %vm7897_vm6 = vmmov %vm7883_vm3  ;;  %v3426_v48 = vsel %vm7833_vm0, %v7842_v52, 0.0  ;;  %v3722_v4 = vld [vmem:[#allocation2 + $0x50] sm:$0xff] }
 0x185   : > { %v3452_v12 = vpack.c.bf16 %v6535_v6, %v3420_v13  ;;  %v3453_v27 = vpack.c.bf16 %v7837_v21, %v3422_v16  ;;  %v7901_v21 = vld [vmem:[#allocation66_spill] sm:$0xff]  ;;  %vm7902_vm12 = vmmov %vm7883_vm3  ;;  %v3457_v52 = vpack.c.bf16 %v6619_v37, %v3430_v7  ;;  %v3719_v47 = vld [vmem:[#allocation2 + $0x38] sm:$0xff] }
 0x186   : > { %vm7908_vm0 = vmmov %vm7883_vm3  ;;  %v7913_v37 = vld [vmem:[#allocation82_spill] sm:$0xff]  ;;  %v3754_v38 = vpack.c.bf16 %v3720_v22, %v3719_v47  ;;  %v7938_v13 = vld [vmem:[#allocation67_spill] sm:$0xff] }
 0x187   : > { %vm7914_vm1 = vmmov %vm7908_vm0  ;;  %v3725_v36 = vld [vmem:[#allocation2 + $0x68] sm:$0xff]  ;;  %v3736_v7 = vld [vmem:[#allocation2 + $0xc0] sm:$0xff] }
 0x188   : > { %vm7916_vm8 = vmmov %vm7908_vm0  ;;  %v3729_v16 = vld [vmem:[#allocation2 + $0x88] sm:$0xff] }
 0x189   : > { %5185 = vmatmul.mubr.msk.bf16.gmra.mrb[60].mxu0 %vm7849_vm4, %v1505_v57  ;;  %vm7921_vm5 = vmmov %vm7908_vm0  ;;  %v3462_v57 = vpack.c.bf16 %v7922_v60, %v3440_v46  ;;  %v3746_v60 = vld [vmem:[#allocation2 + $0x110] sm:$0xff] }
 0x18a   : > { %5192 = vmatprep.mubr.msk.bf16.mxu0 %vm7871_vm15, %v2132_v51  ;;  %5329 = vmatmul.mubr.msk.bf16.gmra.mrb[28].mxu1 %vm7872_vm10, %v3126_v5  ;;  %vm7884_vm15 = vmmov %vm7883_vm3  ;;  %vm7886_vm10 = vnez %v7885_v1  ;;  %v7923_v51 = vld [vmem:[#allocation102_spill] sm:$0xff]  ;;  %v3410_v5 = vld [vmem:[#allocation2 + $0x117] sm:$0xff] }
 0x18b   : > { %5336 = vmatprep.mubr.msk.bf16.mxu1 %vm7873_vm14, %v3448_v43  ;;  %vm7882_vm14 = vmmov %vm7849_vm4  ;;  %v3418_v35 = vsel %vm7886_vm10, %v7816_v32, 0.0  ;;  %vm7895_vm10 = vnez %v7706_v18  ;;  %v3428_v18 = vsel %vm7836_vm9, %v7843_v59, 0.0  ;;  %v7907_v59 = vld [vmem:[#allocation73_spill] sm:$0xff]  ;;  %v3442_v56 = vsel %vm7862_vm11, %v3410_v5, 0.0  ;;  %v7927_v43 = vld [vmem:[#allocation104_spill] sm:$0xff] }
 0x18c   : > { %vm7910_vm9 = vmmov %vm7908_vm0  ;;  %v3463_v11 = vpack.c.bf16 %v3411_v53, %v3442_v56  ;;  %v3723_v1 = vld [vmem:[#allocation2 + $0x58] sm:$0xff]  ;;  %v3745_v5 = vld [vmem:[#allocation2 + $0x108] sm:$0xff] }
 0x18d   : > { %vm7924_vm7 = vmmov %vm7908_vm0  ;;  %v7967_v53 = vld [vmem:[#allocation113_spill] sm:$0xff]  ;;  %v3767_v56 = vpack.c.bf16 %v3746_v60, %v3745_v5  ;;  %v4022_v22 = vld [vmem:[#allocation2 + $0x29] sm:$0xff] }
 0x18e   : > { %vm7928_vm2 = vmmov %vm7908_vm0  ;;  %v8018_v60 = vld [vmem:[#allocation10_spill] sm:$0xff]  ;;  %v8021_v5 = vld [vmem:[#allocation13_spill] sm:$0xff] }
 0x18f   : > { %vm7930_vm13 = vmmov %vm7908_vm0 }
 0x190   : > { %vm7933_vm11 = vmmov %vm7908_vm0 }
 0x191   : > { %5193 = vmatmul.mubr.msk.bf16.vlgmr.msra.gmra.mrb[32].mxu0 %vm7849_vm4, %v7880_v9  ;;  %vm7890_vm4 = vmmov %vm7883_vm3  ;;  %v3755_v9 = vpack.c.bf16 %v3722_v4, %v3721_v31  ;;  %v7974_v4 = vld [vmem:[#allocation115_spill] sm:$0xff] }
 0x192   : > { %5196 = vmatprep.mubr.msk.bf16.mxu0 %vm7882_vm14, %v7881_v0  ;;  %5337 = vmatmul.mubr.msk.bf16.vlgmr.msra.gmra.mrb[0].mxu1 %vm7883_vm3, %v3449_v2  ;;  %vm7892_vm14 = vmmov %vm7883_vm3  ;;  %v5725_v2 = vld [vmem:[%s7436_s6 + $0x88] sm:$0xff]   ;;  %v3726_v0 = vld [vmem:[#allocation2 + $0x70] sm:$0xff] }
 0x193   : > { %5369 = vmatpush3.bf16.msra.mxu1 %v6781_v23  ;;  %5340 = vmatprep.mubr.msk.bf16.mxu1 %vm7884_vm15, %v3450_v26  ;;  %v3451_v23 = vpack.c.bf16 %v7825_v42, %v3418_v35  ;;  %vm7893_vm15 = vmmov %vm7883_vm3  ;;  %v3424_v42 = vsel %vm7895_vm10, %v7834_v34, 0.0  ;;  %v3455_v34 = vpack.c.bf16 %v7844_v58, %v3426_v48  ;;  %v7909_v58 = vld [vmem:[#allocation76_spill] sm:$0xff]  ;;  %v7934_v26 = vld [vmem:[#allocation51_spill] sm:$0xff] }
 0x194   : > { %5370 = vmatprep.subr.bf16.mxu1 %v5721_v28  ;;  %5225 = vmatpush3.bf16.msra.mxu0 %v6798_v62  ;;  %v7889_v62 = vld [vmem:[#allocation50_spill] sm:$0xff]  ;;  %v3454_v6 = vpack.c.bf16 %v7838_v54, %v3424_v42  ;;  %v3456_v54 = vpack.c.bf16 %v6628_v41, %v3428_v18  ;;  %vm7905_vm10 = vmmov %vm7883_vm3  ;;  %v3458_v41 = vpack.c.bf16 %v6662_v3, %v3432_v55  ;;  %v7915_v3 = vld [vmem:[#allocation89_spill] sm:$0xff] }
 0x195   : > { %5226 = vmatprep.subr.bf16.mxu0 %v5723_v17  ;;  %v7944_v42 = vld [vmem:[#allocation95_spill] sm:$0xff]  ;;  %v3731_v48 = vld [vmem:[#allocation2 + $0x98] sm:$0xff] }
 0x196   : > { %v3738_v55 = vld [vmem:[#allocation2 + $0xd0] sm:$0xff] }
 0x197   : > { %5371 = vmatpush3.bf16.msra.mxu1 %v5721_v28  ;;  %v7932_v28 = vld [vmem:[#allocation42_spill] sm:$0xff]  ;;  %v4027_v31 = vld [vmem:[#allocation2 + $0x51] sm:$0xff] }
 0x198   : > { %5227 = vmatpush3.bf16.msra.mxu0 %v5723_v17  ;;  %5404 = vmatprep.subr.bf16.mxu1 %v6973_v49  ;;  %v3724_v17 = vld [vmem:[#allocation2 + $0x60] sm:$0xff] }
 0x199   : > { %5197 = vmatmul.mubr.msk.bf16.gmra.mrb[36].mxu0 %vm7890_vm4, %v7889_v62  ;;  %vm7899_vm4 = vmmov %vm7883_vm3  ;;  %v3756_v35 = vpack.c.bf16 %v3724_v17, %v3723_v1  ;;  %v7940_v62 = vld [vmem:[#allocation74_spill] sm:$0xff] }
 0x19a   : > { %5200 = vmatprep.mubr.msk.bf16.mxu0 %vm7892_vm14, %v7891_v10  ;;  %5341 = vmatmul.mubr.msk.bf16.gmra.mrb[4].mxu1 %vm7883_vm3, %v3451_v23  ;;  %vm7900_vm14 = vmmov %vm7883_vm3  ;;  %v3757_v23 = vpack.c.bf16 %v3726_v0, %v3725_v36  ;;  %v3727_v10 = vld [vmem:[#allocation2 + $0x78] sm:$0xff]  ;;  %v4026_v0 = vld [vmem:[#allocation2 + $0x49] sm:$0xff] }
 0x19b   : > { %5344 = vmatprep.mubr.msk.bf16.mxu1 %vm7893_vm15, %v3452_v12  ;;  %vm7904_vm15 = vmmov %vm7883_vm3  ;;  %v3730_v12 = vld [vmem:[#allocation2 + $0x90] sm:$0xff] }
 0x19c   : > { %v4031_v36 = vld [vmem:[#allocation2 + $0x71] sm:$0xff] }
 0x1a1   : > { %5201 = vmatmul.mubr.msk.bf16.gmra.mrb[40].mxu0 %vm7897_vm6, %v7896_v15  ;;  %vm7906_vm6 = vmmov %vm7883_vm3  ;;  %v7946_v15 = vld [vmem:[#allocation97_spill] sm:$0xff] }
 0x1a2   : > { %5204 = vmatprep.mubr.msk.bf16.mxu0 %vm7899_vm4, %v7898_v44  ;;  %5345 = vmatmul.mubr.msk.bf16.gmra.mrb[8].mxu1 %vm7900_vm14, %v3453_v27  ;;  %vm7911_vm4 = vmmov %vm7908_vm0  ;;  %v3759_v27 = vpack.c.bf16 %v3730_v12, %v3729_v16  ;;  %v3734_v44 = vld [vmem:[#allocation2 + $0xb0] sm:$0xff] }
 0x1a3   : > { %5348 = vmatprep.mubr.msk.bf16.mxu1 %vm7883_vm3, %v3454_v6  ;;  %vm7912_vm14 = vmmov %vm7908_vm0  ;;  %v3732_v6 = vld [vmem:[#allocation2 + $0xa0] sm:$0xff] }
 0x1a4   : > { %vm7917_vm3 = vmmov %vm7908_vm0  ;;  %v3760_v18 = vpack.c.bf16 %v3732_v6, %v3731_v48  ;;  %v7992_v48 = vld [vmem:[#allocation116_spill] sm:$0xff] }
 0x1a9   : > { %5205 = vmatmul.mubr.msk.bf16.gmra.mrb[44].mxu0 %vm7902_vm12, %v7901_v21  ;;  %vm7918_vm12 = vmmov %vm7908_vm0  ;;  %v7950_v21 = vld [vmem:[#allocation98_spill] sm:$0xff] }
 0x1aa   : > { %5208 = vmatprep.mubr.msk.bf16.mxu0 %vm7904_vm15, %v7903_v24  ;;  %5349 = vmatmul.mubr.msk.bf16.gmra.mrb[12].mxu1 %vm7905_vm10, %v3455_v34  ;;  %vm7925_vm15 = vmmov %vm7908_vm0  ;;  %v3733_v34 = vld [vmem:[#allocation2 + $0xa8] sm:$0xff]  ;;  %v7952_v24 = vld [vmem:[#allocation99_spill] sm:$0xff] }
 0x1ab   : > { %5352 = vmatprep.mubr.msk.bf16.mxu1 %vm7906_vm6, %v3456_v54  ;;  %vm7926_vm10 = vmmov %vm7908_vm0  ;;  %v3761_v54 = vpack.c.bf16 %v3734_v44, %v3733_v34  ;;  %v7996_v34 = vld [vmem:[#allocation118_spill] sm:$0xff] }
 0x1ac   : > { %vm7931_vm6 = vmmov %vm7908_vm0 }
 0x1b1   : > { %5209 = vmatmul.mubr.msk.bf16.gmra.mrb[48].mxu0 %vm7908_vm0, %v7907_v59 }
 0x1b2   : > { %5212 = vmatprep.mubr.msk.bf16.mxu0 %vm7910_vm9, %v7909_v58  ;;  %5353 = vmatmul.mubr.msk.bf16.gmra.mrb[16].mxu1 %vm7911_vm4, %v3457_v52  ;;  %vm7935_vm9 = vmmov %vm7908_vm0  ;;  %v3735_v52 = vld [vmem:[#allocation2 + $0xb8] sm:$0xff]  ;;  %v7955_v58 = vld [vmem:[#allocation105_spill] sm:$0xff] }
 0x1b3   : > { %5356 = vmatprep.mubr.msk.bf16.mxu1 %vm7912_vm14, %v3458_v41  ;;  %vm7936_vm4 = vmmov %vm7908_vm0  ;;  %v3762_v59 = vpack.c.bf16 %v3736_v7, %v3735_v52  ;;  %v3737_v41 = vld [vmem:[#allocation2 + $0xc8] sm:$0xff]  ;;  %v8005_v52 = vld [vmem:[#allocation87_spill] sm:$0xff] }
 0x1b4   : > { %vm7937_vm14 = vmmov %vm7908_vm0  ;;  %v3763_v14 = vpack.c.bf16 %v3738_v55, %v3737_v41  ;;  %v8003_v7 = vld [vmem:[#allocation86_spill] sm:$0xff]  ;;  %v4052_v41 = vld [vmem:[#allocation2 + $0x119] sm:$0xff] }
 0x1b5   : > { %v4053_v55 = vld [vmem:[#allocation2 + $0x121] sm:$0xff] }
 0x1b9   : > { %5213 = vmatmul.mubr.msk.bf16.gmra.mrb[52].mxu0 %vm7914_vm1, %v7913_v37  ;;  %vm7939_vm1 = vmmov %vm7908_vm0  ;;  %v3742_v37 = vld [vmem:[#allocation2 + $0xf0] sm:$0xff] }
 0x1ba   : > { %5216 = vmatprep.mubr.msk.bf16.mxu0 %vm7916_vm8, %v7915_v3  ;;  %5357 = vmatmul.mubr.msk.bf16.gmra.mrb[20].mxu1 %vm7917_vm3, %v3459_v19  ;;  %vm7941_vm8 = vmmov %vm7908_vm0  ;;  %v3740_v19 = vld [vmem:[#allocation2 + $0xe0] sm:$0xff]  ;;  %v3765_v46 = vpack.c.bf16 %v3742_v37, %v3741_v63  ;;  %v8013_v63 = vld [vmem:[#allocation4_spill] sm:$0xff] }
 0x1bb   : > { %5360 = vmatprep.mubr.msk.bf16.mxu1 %vm7918_vm12, %v3460_v29  ;;  %vm7942_vm3 = vmmov %vm7908_vm0  ;;  %v3739_v29 = vld [vmem:[#allocation2 + $0xd8] sm:$0xff] }
 0x1bc   : > { %vm7943_vm12 = vmmov %vm7908_vm0  ;;  %v3764_v3 = vpack.c.bf16 %v3740_v19, %v3739_v29  ;;  %v8011_v29 = vld [vmem:[#allocation5_spill] sm:$0xff] }
 0x1c1   : > { %5217 = vmatmul.mubr.msk.bf16.gmra.mrb[56].mxu0 %vm7921_vm5, %v7920_v25  ;;  %vm7945_vm5 = vmmov %vm7908_vm0  ;;  %v3744_v25 = vld [vmem:[#allocation2 + $0x100] sm:$0xff] }
 0x1c2   : > { %5220 = vmatprep.mubr.msk.bf16.mxu0 %vm7924_vm7, %v7923_v51  ;;  %5361 = vmatmul.mubr.msk.bf16.gmra.mrb[24].mxu1 %vm7925_vm15, %v3461_v40  ;;  %vm7947_vm7 = vmmov %vm7908_vm0  ;;  %v7963_v40 = vld [vmem:[#allocation111_spill] sm:$0xff] }
 0x1c3   : > { %5364 = vmatprep.mubr.msk.bf16.mxu1 %vm7926_vm10, %v3462_v57  ;;  %vm7948_vm15 = vmmov %vm7908_vm0  ;;  %v3743_v57 = vld [vmem:[#allocation2 + $0xf8] sm:$0xff] }
 0x1c4   : > { %vm7949_vm10 = vmmov %vm7908_vm0  ;;  %v3766_v51 = vpack.c.bf16 %v3744_v25, %v3743_v57  ;;  %v8017_v25 = vld [vmem:[#allocation9_spill] sm:$0xff]  ;;  %v8019_v57 = vld [vmem:[#allocation11_spill] sm:$0xff] }
 0x1c9   : > { %5221 = vmatmul.mubr.msk.bf16.gmra.mrb[60].mxu0 %vm7928_vm2, %v7927_v43  ;;  %vm7951_vm2 = vmmov %vm7908_vm0  ;;  %v4023_v43 = vld [vmem:[#allocation2 + $0x31] sm:$0xff] }
 0x1ca   : > { %5228 = vmatprep.mubr.msk.bf16.mxu0 %vm7930_vm13, %v7929_v39  ;;  %5365 = vmatmul.mubr.msk.bf16.gmra.mrb[28].mxu1 %vm7931_vm6, %v3463_v11  ;;  %vm7953_vm13 = vmmov %vm7908_vm0  ;;  %v3747_v11 = vld [vmem:[#allocation2 + $0x118] sm:$0xff] }
 0x1cb   : > { %5372 = vmatprep.mubr.msk.bf16.mxu1 %vm7908_vm0, %v3753_v8  ;;  %vm7954_vm6 = vmmov %vm7908_vm0  ;;  %v3768_v8 = vpack.c.bf16 %v3748_v61, %v3747_v11  ;;  %v8025_v11 = vld [vmem:[#allocation17_spill] sm:$0xff]  ;;  %v8026_v61 = vld [vmem:[#allocation18_spill] sm:$0xff] }
 0x1d1   : > { %5229 = vmatmul.mubr.msk.bf16.vlgmr.msra.gmra.mrb[32].mxu0 %vm7933_vm11, %v7932_v28  ;;  %vm7956_vm11 = vmmov %vm7908_vm0  ;;  %v7977_v28 = vld [vmem:[#allocation36_spill] sm:$0xff] }
 0x1d2   : > { %5232 = vmatprep.mubr.msk.bf16.mxu0 %vm7935_vm9, %v7934_v26  ;;  %5373 = vmatmul.mubr.msk.bf16.vlgmr.msra.gmra.mrb[0].mxu1 %vm7936_vm4, %v3754_v38  ;;  %vm7958_vm9 = vmmov %vm7908_vm0  ;;  %v4025_v38 = vld [vmem:[#allocation2 + $0x41] sm:$0xff] }
 0x1d3   : > { %5405 = vmatpush3.bf16.msra.mxu1 %v6973_v49  ;;  %5376 = vmatprep.mubr.msk.bf16.mxu1 %vm7937_vm14, %v3755_v9  ;;  %v3728_v49 = vld [vmem:[#allocation2 + $0x80] sm:$0xff]  ;;  %vm7959_vm4 = vmmov %vm7908_vm0  ;;  %v7979_v26 = vld [vmem:[#allocation38_spill] sm:$0xff] }
 0x1d4   : > { %5406 = vmatprep.subr.bf16.mxu1 %v5725_v2  ;;  %v3758_v32 = vpack.c.bf16 %v3728_v49, %v3727_v10  ;;  %vm7960_vm14 = vmmov %vm7908_vm0  ;;  %v7985_v49 = vld [vmem:[#allocation49_spill] sm:$0xff] }
 0x1d7   : > { %5407 = vmatpush3.bf16.msra.mxu1 %v5725_v2  ;;  %v4024_v2 = vld [vmem:[#allocation2 + $0x39] sm:$0xff] }
 0x1d9   : > { %5233 = vmatmul.mubr.msk.bf16.gmra.mrb[36].mxu0 %vm7939_vm1, %v7938_v13  ;;  %vm7962_vm1 = vmmov %vm7908_vm0  ;;  %v4028_v13 = vld [vmem:[#allocation2 + $0x59] sm:$0xff] }
 0x1da   : > { %5236 = vmatprep.mubr.msk.bf16.mxu0 %vm7941_vm8, %v7940_v62  ;;  %5377 = vmatmul.mubr.msk.bf16.gmra.mrb[4].mxu1 %vm7942_vm3, %v3756_v35  ;;  %vm7964_vm8 = vmmov %vm7908_vm0  ;;  %v4029_v35 = vld [vmem:[#allocation2 + $0x61] sm:$0xff] }
 0x1db   : > { %5380 = vmatprep.mubr.msk.bf16.mxu1 %vm7943_vm12, %v3757_v23  ;;  %vm7965_vm3 = vmmov %vm7908_vm0  ;;  %v7983_v23 = vld [vmem:[#allocation43_spill] sm:$0xff] }
 0x1dc   : > { %vm7966_vm12 = vmmov %vm7908_vm0 }
 0x1e1   : > { %5237 = vmatmul.mubr.msk.bf16.gmra.mrb[40].mxu0 %vm7945_vm5, %v7944_v42  ;;  %vm7968_vm5 = vmmov %vm7908_vm0  ;;  %v4033_v42 = vld [vmem:[#allocation2 + $0x81] sm:$0xff] }
 0x1e2   : > { %5240 = vmatprep.mubr.msk.bf16.mxu0 %vm7947_vm7, %v7946_v15  ;;  %5381 = vmatmul.mubr.msk.bf16.gmra.mrb[8].mxu1 %vm7948_vm15, %v3758_v32  ;;  %vm7970_vm7 = vmmov %vm7908_vm0  ;;  %v4030_v32 = vld [vmem:[#allocation2 + $0x69] sm:$0xff] }
 0x1e3   : > { %5384 = vmatprep.mubr.msk.bf16.mxu1 %vm7949_vm10, %v3759_v27  ;;  %vm7971_vm15 = vmmov %vm7908_vm0  ;;  %v4032_v27 = vld [vmem:[#allocation2 + $0x79] sm:$0xff]  ;;  %v7989_v15 = vld [vmem:[#allocation55_spill] sm:$0xff] }
 0x1e4   : > { %vm7972_vm10 = vmmov %vm7908_vm0 }
 0x1e9   : > { %5241 = vmatmul.mubr.msk.bf16.gmra.mrb[44].mxu0 %vm7951_vm2, %v7950_v21  ;;  %vm7973_vm2 = vnez %v7863_v50  ;;  %v7998_v21 = vld [vmem:[#allocation72_spill] sm:$0xff] }
 0x1ea   : > { %5244 = vmatprep.mubr.msk.bf16.mxu0 %vm7953_vm13, %v7952_v24  ;;  %5385 = vmatmul.mubr.msk.bf16.gmra.mrb[12].mxu1 %vm7954_vm6, %v3760_v18  ;;  %v4055_v39 = vsel %vm7973_vm2, %v4023_v43, 0.0  ;;  %vm7975_vm13 = vmmov %vm7908_vm0  ;;  %v7994_v18 = vld [vmem:[#allocation117_spill] sm:$0xff]  ;;  %v8002_v24 = vld [vmem:[#allocation78_spill] sm:$0xff] }
 0x1eb   : > { %5388 = vmatprep.mubr.msk.bf16.mxu1 %vm7908_vm0, %v3761_v54  ;;  %v4090_v47 = vpack.c.bf16 %v4055_v39, %v4022_v22  ;;  %vm7976_vm6 = vmmov %vm7908_vm0  ;;  %v8000_v54 = vld [vmem:[#allocation44_spill] sm:$0xff]  ;;  %v8027_v43 = vld [vmem:[#allocation19_spill] sm:$0xff] }
 0x1ec   : > { %vm7997_vm2 = vmmov %vm7908_vm0  ;;  %v8029_v39 = vld [vmem:[#allocation21_spill] sm:$0xff]  ;;  %v8030_v22 = vld [vmem:[#allocation22_spill] sm:$0xff] }
 0x1f1   : > { %5245 = vmatmul.mubr.msk.bf16.gmra.mrb[48].mxu0 %vm7956_vm11, %v7955_v58  ;;  %vm7978_vm11 = vnez %v7977_v28  ;;  %v8036_v28 = vld [vmem:[#allocation28_spill] sm:$0xff] }
 0x1f2   : > { %5248 = vmatprep.mubr.msk.bf16.mxu0 %vm7958_vm9, %v7957_v45  ;;  %5389 = vmatmul.mubr.msk.bf16.gmra.mrb[16].mxu1 %vm7959_vm4, %v3762_v59  ;;  %v4057_v9 = vsel %vm7978_vm11, %v4025_v38, 0.0  ;;  %vm7980_vm9 = vnez %v7979_v26  ;;  %vm7981_vm4 = vmmov %vm7908_vm0  ;;  %v8007_v59 = vld [vmem:[#allocation75_spill] sm:$0xff]  ;;  %v8033_v38 = vld [vmem:[#allocation25_spill] sm:$0xff] }
 0x1f3   : > { %5392 = vmatprep.mubr.msk.bf16.mxu1 %vm7960_vm14, %v3763_v14  ;;  %v4059_v17 = vsel %vm7980_vm9, %v4027_v31, 0.0  ;;  %v4091_v50 = vpack.c.bf16 %v4057_v9, %v4024_v2  ;;  %vm7982_vm14 = vmmov %vm7908_vm0  ;;  %v8034_v31 = vld [vmem:[#allocation26_spill] sm:$0xff]  ;;  %v8035_v2 = vld [vmem:[#allocation27_spill] sm:$0xff] }
 0x1f4   : > { %v4092_v1 = vpack.c.bf16 %v4059_v17, %v4026_v0  ;;  %vm8004_vm11 = vmmov %vm7908_vm0  ;;  %v8037_v9 = vld [vmem:[#allocation29_spill] sm:$0xff]  ;;  %v8038_v26 = vld [vmem:[#allocation30_spill] sm:$0xff] }
 0x1f5   : > { %vm8006_vm9 = vmmov %vm7908_vm0  ;;  %v8039_v17 = vld [vmem:[#allocation31_spill] sm:$0xff]  ;;  %v8041_v0 = vld [vmem:[#allocation33_spill] sm:$0xff] }
 0x1f9   : > { %5249 = vmatmul.mubr.msk.bf16.gmra.mrb[52].mxu0 %vm7962_vm1, %v7961_v33  ;;  %vm7984_vm1 = vnez %v7983_v23  ;;  %v8014_v33 = vld [vmem:[#allocation6_spill] sm:$0xff] }
 0x1fa   : > { %5252 = vmatprep.mubr.msk.bf16.mxu0 %vm7964_vm8, %v7963_v40  ;;  %5393 = vmatmul.mubr.msk.bf16.gmra.mrb[20].mxu1 %vm7965_vm3, %v3764_v3  ;;  %v4061_v62 = vsel %vm7984_vm1, %v4029_v35, 0.0  ;;  %vm7986_vm8 = vnez %v7985_v49  ;;  %vm7987_vm3 = vmmov %vm7908_vm0  ;;  %v8012_v3 = vld [vmem:[#allocation3_spill] sm:$0xff]  ;;  %v8016_v40 = vld [vmem:[#allocation8_spill] sm:$0xff] }
 0x1fb   : > { %5396 = vmatprep.mubr.msk.bf16.mxu1 %vm7966_vm12, %v3765_v46  ;;  %v4063_v12 = vsel %vm7986_vm8, %v4031_v36, 0.0  ;;  %v4093_v10 = vpack.c.bf16 %v4061_v62, %v4028_v13  ;;  %vm7988_vm12 = vmmov %vm7908_vm0  ;;  %vm312_vm8 = vcmask 257024   ;;  %v8015_v46 = vld [vmem:[#allocation7_spill] sm:$0xff] }
 0x1fc   : > { %v4094_v16 = vpack.c.bf16 %v4063_v12, %v4030_v32  ;;  %vm8010_vm1 = vmmov %vm7908_vm0  ;;  %315 = vst.msk [vmem:[%s7167_s17 + $0x8] sm:$0xf] %vm312_vm8, %v8011_v29 }
 0x1fd   : > { %313 = vst.msk [vmem:[%s7167_s17] sm:$0xf] %vm312_vm8, %v8012_v3  ;;  %314 = vst.msk [vmem:[%s7167_s17 + $0x4] sm:$0xf] %vm312_vm8, %v8013_v63 }
 0x1fe   : > { %316 = vst.msk [vmem:[%s7167_s17 + $0xc] sm:$0xf] %vm312_vm8, %v8014_v33  ;;  %317 = vst.msk [vmem:[%s7167_s17 + $0x10] sm:$0xf] %vm312_vm8, %v8015_v46 }
 0x1ff   : > { %318 = vst.msk [vmem:[%s7167_s17 + $0x14] sm:$0xf] %vm312_vm8, %v8016_v40  ;;  %319 = vst.msk [vmem:[%s7167_s17 + $0x18] sm:$0xf] %vm312_vm8, %v8017_v25 }
 0x200   : > { %320 = vst.msk [vmem:[%s7167_s17 + $0x1c] sm:$0xf] %vm312_vm8, %v8018_v60  ;;  %321 = vst.msk [vmem:[%s7167_s17 + $0x20] sm:$0xf] %vm312_vm8, %v8019_v57 }
 0x201   : > { %5253 = vmatmul.mubr.msk.bf16.gmra.mrb[56].mxu0 %vm7968_vm5, %v7967_v53  ;;  %vm7990_vm5 = vnez %v7989_v15  ;;  %323 = vst.msk [vmem:[%s7167_s17 + $0x28] sm:$0xf] %vm312_vm8, %v8021_v5  ;;  %v8022_v53 = vld [vmem:[#allocation14_spill] sm:$0xff]  ;;  %327 = vst.msk [vmem:[%s7167_s17 + $0x38] sm:$0xf] %vm312_vm8, %v8025_v11 }
 0x202   : > { %5256 = vmatprep.mubr.msk.bf16.mxu0 %vm7970_vm7, %v7969_v30  ;;  %5397 = vmatmul.mubr.msk.bf16.gmra.mrb[24].mxu1 %vm7971_vm15, %v3766_v51  ;;  %v4065_v6 = vsel %vm7990_vm5, %v4033_v42, 0.0  ;;  %vm7991_vm7 = vmmov %vm7908_vm0  ;;  %v8020_v51 = vld [vmem:[#allocation12_spill] sm:$0xff]  ;;  %324 = vst.msk [vmem:[%s7167_s17 + $0x2c] sm:$0xf] %vm312_vm8, %v8022_v53 }
 0x203   : > { %5400 = vmatprep.mubr.msk.bf16.mxu1 %vm7972_vm10, %v3767_v56  ;;  %v4095_v44 = vpack.c.bf16 %v4065_v6, %v4032_v27  ;;  %vm7993_vm15 = vmmov %vm7908_vm0  ;;  %322 = vst.msk [vmem:[%s7167_s17 + $0x24] sm:$0xf] %vm312_vm8, %v8020_v51  ;;  %v8023_v56 = vld [vmem:[#allocation15_spill] sm:$0xff]  ;;  %v8024_v30 = vld [vmem:[#allocation16_spill] sm:$0xff] }
 0x204   : > { %vm7995_vm10 = vmmov %vm7908_vm0  ;;  %325 = vst.msk [vmem:[%s7167_s17 + $0x30] sm:$0xf] %vm312_vm8, %v8023_v56 }
 0x205   : > { %326 = vst.msk [vmem:[%s7167_s17 + $0x34] sm:$0xf] %vm312_vm8, %v8024_v30  ;;  %328 = vst.msk [vmem:[%s7167_s17 + $0x3c] sm:$0xf] %vm312_vm8, %v8026_v61 }
 0x206   : > { %329 = vst.msk [vmem:[%s7167_s17 + $0x40] sm:$0xf] %vm312_vm8, %v8027_v43  ;;  %331 = vst.msk [vmem:[%s7167_s17 + $0x48] sm:$0xf] %vm312_vm8, %v8029_v39 }
 0x207   : > { %332 = vst.msk [vmem:[%s7167_s17 + $0x4c] sm:$0xf] %vm312_vm8, %v8030_v22  ;;  %335 = vst.msk [vmem:[%s7167_s17 + $0x58] sm:$0xf] %vm312_vm8, %v8033_v38 }
 0x208   : > { %336 = vst.msk [vmem:[%s7167_s17 + $0x5c] sm:$0xf] %vm312_vm8, %v8034_v31  ;;  %337 = vst.msk [vmem:[%s7167_s17 + $0x60] sm:$0xf] %vm312_vm8, %v8035_v2 }
 0x209   : > { %5257 = vmatmul.mubr.msk.bf16.gmra.mrb[60].mxu0 %vm7975_vm13, %v7974_v4  ;;  %vm7999_vm13 = vmmov %vm7908_vm0  ;;  %v8031_v4 = vld [vmem:[#allocation23_spill] sm:$0xff]  ;;  %338 = vst.msk [vmem:[%s7167_s17 + $0x64] sm:$0xf] %vm312_vm8, %v8036_v28 }
 0x20a   : > { %5401 = vmatmul.mubr.msk.bf16.gmra.mrb[28].mxu1 %vm7976_vm6, %v3768_v8  ;;  %vm8001_vm6 = vmmov %vm7908_vm0  ;;  %v8028_v8 = vld [vmem:[#allocation20_spill] sm:$0xff]  ;;  %333 = vst.msk [vmem:[%s7167_s17 + $0x50] sm:$0xf] %vm312_vm8, %v8031_v4 }
 0x20b   : > { %5408 = vmatprep.mubr.msk.bf16.mxu1 %vm7908_vm0, %v4090_v47  ;;  %330 = vst.msk [vmem:[%s7167_s17 + $0x44] sm:$0xf] %vm312_vm8, %v8028_v8  ;;  %v8032_v47 = vld [vmem:[#allocation24_spill] sm:$0xff]  ;;  %339 = vst.msk [vmem:[%s7167_s17 + $0x68] sm:$0xf] %vm312_vm8, %v8037_v9 }
 0x20c   : > { %334 = vst.msk [vmem:[%s7167_s17 + $0x54] sm:$0xf] %vm312_vm8, %v8032_v47  ;;  %340 = vst.msk [vmem:[%s7167_s17 + $0x6c] sm:$0xf] %vm312_vm8, %v8038_v26 }
 0x20d   : > { %341 = vst.msk [vmem:[%s7167_s17 + $0x70] sm:$0xf] %vm312_vm8, %v8039_v17  ;;  %343 = vst.msk [vmem:[%s7167_s17 + $0x78] sm:$0xf] %vm312_vm8, %v8041_v0 }
 0x212   : > { %5409 = vmatmul.mubr.msk.bf16.vlgmr.msra.gmra.mrb[0].mxu1 %vm7981_vm4, %v4091_v50  ;;  %vm8008_vm4 = vmmov %vm7908_vm0  ;;  %v8040_v50 = vld [vmem:[#allocation32_spill] sm:$0xff] }
 0x213   : > { %5412 = vmatprep.mubr.msk.bf16.mxu1 %vm7982_vm14, %v4092_v1  ;;  %vm8009_vm14 = vnez %v7865_v20  ;;  %342 = vst.msk [vmem:[%s7167_s17 + $0x74] sm:$0xf] %vm312_vm8, %v8040_v50  ;;  %v8042_v1 = vld [vmem:[#allocation34_spill] sm:$0xff] }
 0x214   : > { %v4085_v58 = vsel %vm8009_vm14, %v4053_v55, 0.0  ;;  %344 = vst.msk [vmem:[%s7167_s17 + $0x7c] sm:$0xf] %vm312_vm8, %v8042_v1 }
 0x215   : > { %v4105_v14 = vpack.c.bf16 %v4085_v58, %v4052_v41 }
 0x21a   : > { %5413 = vmatmul.mubr.msk.bf16.gmra.mrb[4].mxu1 %vm7987_vm3, %v4093_v10  ;;  %vm4551_vm3 = vcmask 322816  }
 0x21b   : > { %5416 = vmatprep.mubr.msk.bf16.mxu1 %vm7988_vm12, %v4094_v16 }
 0x222   : > { %5417 = vmatmul.mubr.msk.bf16.gmra.mrb[8].mxu1 %vm7991_vm7, %v4095_v44 }
 0x223   : > { %5420 = vmatprep.mubr.msk.bf16.mxu1 %vm7993_vm15, %v7992_v48 }
 0x22a   : > { %5421 = vmatmul.mubr.msk.bf16.gmra.mrb[12].mxu1 %vm7995_vm10, %v7994_v18 }
 0x22b   : > { %5424 = vmatprep.mubr.msk.bf16.mxu1 %vm7997_vm2, %v7996_v34 }
 0x232   : > { %5425 = vmatmul.mubr.msk.bf16.gmra.mrb[16].mxu1 %vm7999_vm13, %v7998_v21 }
 0x233   : > { %5428 = vmatprep.mubr.msk.bf16.mxu1 %vm8001_vm6, %v8000_v54 }
 0x23a   : > { %5429 = vmatmul.mubr.msk.bf16.gmra.mrb[20].mxu1 %vm7908_vm0, %v8002_v24 }
 0x23b   : > { %5432 = vmatprep.mubr.msk.bf16.mxu1 %vm8004_vm11, %v8003_v7 }
 0x242   : > { %5433 = vmatmul.mubr.msk.bf16.gmra.mrb[24].mxu1 %vm8006_vm9, %v8005_v52 }
 0x243   : > { %5436 = vmatprep.mubr.msk.bf16.mxu1 %vm8008_vm4, %v8007_v59 }
 0x24a   : > { %5437 = vmatmul.mubr.msk.bf16.gmra.mrb[28].mxu1 %vm8010_vm1, %v4105_v14 }
 0x2a4   : > { %v7156_v45 = vpop.f32.mrb[32].mxu0 }
 0x2a5   : > { %v7158_v19 = vpop.f32.mrb[33].mxu0 }
 0x2a6   : > { %v7160_v37 = vpop.f32.mrb[34].mxu0 }
 0x2a7   : > { %v7169_v20 = vpop.f32.mrb[35].mxu0 }
 0x2ac   : > { %v5234_v35 = vpop.f32.mrb[36].mxu0 }
 0x2ad   : > { %v2595_v36 = vpop.f32.mrb[37].mxu0 }
 0x2ae   : > { %v5235_v13 = vpop.f32.mrb[38].mxu0 }
 0x2af   : > { %v2598_v23 = vpop.f32.mrb[39].mxu0 }
 0x2b4   : > { %v5238_v62 = vpop.f32.mrb[40].mxu0 }
 0x2b5   : > { %v2611_v49 = vpop.f32.mrb[41].mxu0 }
 0x2b6   : > { %v5239_v12 = vpop.f32.mrb[42].mxu0 }
 0x2b7   : > { %v2614_v10 = vpop.f32.mrb[43].mxu0 }
 0x2bc   : > { %v7267_v32 = vpop.f32.mrb[44].mxu0 }
 0x2bd   : > { %v7269_v16 = vpop.f32.mrb[45].mxu0 }
 0x2be   : > { %v7271_v42 = vpop.f32.mrb[46].mxu0 }
 0x2bf   : > { %v7273_v27 = vpop.f32.mrb[47].mxu0 }
 0x2c4   : > { %v7275_v15 = vpop.f32.mrb[48].mxu0 }
 0x2c5   : > { %v7277_v6 = vpop.f32.mrb[49].mxu0 }
 0x2c6   : > { %v7279_v44 = vpop.f32.mrb[50].mxu0 }
 0x2c7   : > { %v7281_v48 = vpop.f32.mrb[51].mxu0 }
 0x2cc   : > { %v7283_v18 = vpop.f32.mrb[52].mxu0 }
 0x2cd   : > { %v7285_v34 = vpop.f32.mrb[53].mxu0 }
 0x2ce   : > { %v7287_v21 = vpop.f32.mrb[54].mxu0 }
 0x2cf   : > { %v7289_v54 = vpop.f32.mrb[55].mxu0 }
 0x2d4   : > { %v7291_v24 = vpop.f32.mrb[56].mxu0 }
 0x2d5   : > { %v7293_v7 = vpop.f32.mrb[57].mxu0 }
 0x2d6   : > { %v7295_v55 = vpop.f32.mrb[58].mxu0 }
 0x2d7   : > { %v7297_v52 = vpop.f32.mrb[59].mxu0 }
 0x2dc   : > { %v7299_v59 = vpop.f32.mrb[60].mxu0 }
 0x2dd   : > { %v7301_v41 = vpop.f32.mrb[61].mxu0 }
 0x2de   : > { %v7303_v58 = vpop.f32.mrb[62].mxu0 }
 0x2df   : > { %v7305_v14 = vpop.f32.mrb[63].mxu0 }
 0x2e5   : > { %v5410_v29 = vpop.f32.mrb[0].mxu1 }
 0x2e6   : > { %v5440_v3 = vadd.f32 %v5410_v29, %v7156_v45  ;;  %v4200_v63 = vpop.f32.mrb[1].mxu1 }
 0x2e7   : > { %v5441_v33 = vadd.f32 %v4200_v63, %v7158_v19  ;;  %v5411_v46 = vpop.f32.mrb[2].mxu1 }
 0x2e8   : > { %v4870_v40 = vpack.c.bf16 %v5440_v3, %v5440_v3  ;;  %v5442_v25 = vadd.f32 %v5411_v46, %v7160_v37  ;;  %v4203_v60 = vpop.f32.mrb[3].mxu1 }
 0x2e9   : > { %v4868_v57 = vpack.c.bf16 %v5441_v33, %v5441_v33  ;;  %v5443_v51 = vadd.f32 %v4203_v60, %v7169_v20 }
 0x2ea   : > { %4459 = vrot.lane.b32.xlu1 %v4870_v40, %s5736_s25  ;;  %v4871_v5 = vpack.c.bf16 %v5442_v25, %v5442_v25 }
 0x2eb   : > { %4455 = vrot.lane.b32.xlu0 %v4868_v57, %s5736_s25  ;;  %v4869_v53 = vpack.c.bf16 %v5443_v51, %v5443_v51 }
 0x2ed   : > { %v5414_v56 = vpop.f32.mrb[4].mxu1 }
 0x2ee   : > { %v5444_v45 = vadd.f32 %v5414_v56, %v5234_v35  ;;  %v4216_v30 = vpop.f32.mrb[5].mxu1  ;;  %4461 = vrot.lane.b32.xlu1 %v4871_v5, %s5736_s25 }
 0x2ef   : > { %v5445_v19 = vadd.f32 %v4216_v30, %v2595_v36  ;;  %v5415_v11 = vpop.f32.mrb[6].mxu1  ;;  %4457 = vrot.lane.b32.xlu0 %v4869_v53, %s5736_s25 }
 0x2f0   : > { %v4874_v37 = vpack.c.bf16 %v5444_v45, %v5444_v45  ;;  %v5446_v61 = vadd.f32 %v5415_v11, %v5235_v13  ;;  %v4219_v43 = vpop.f32.mrb[7].mxu1 }
 0x2f1   : > { %v5447_v20 = vadd.f32 %v4219_v43, %v2598_v23  ;;  %v4872_v39 = vpack.c.bf16 %v5445_v19, %v5445_v19 }
 0x2f2   : > { %v4875_v8 = vpack.c.bf16 %v5446_v61, %v5446_v61 }
 0x2f3   : > { %4467 = vrot.lane.b32.xlu0 %v4874_v37, %s5736_s25  ;;  %v4873_v4 = vpack.c.bf16 %v5447_v20, %v5447_v20 }
 0x2f4   : > { %4469 = vrot.lane.b32.xlu1 %v4875_v8, %s5736_s25 }
 0x2f5   : > { %v5418_v22 = vpop.f32.mrb[8].mxu1 }
 0x2f6   : > { %v5448_v47 = vadd.f32 %v5418_v22, %v5238_v62  ;;  %v4232_v38 = vpop.f32.mrb[9].mxu1 }
 0x2f7   : > { %v5449_v31 = vadd.f32 %v4232_v38, %v2611_v49  ;;  %v5419_v2 = vpop.f32.mrb[10].mxu1  ;;  %4463 = vrot.lane.b32.xlu0 %v4872_v39, %s5736_s25 }
 0x2f8   : > { %v4878_v28 = vpack.c.bf16 %v5448_v47, %v5448_v47  ;;  %v5450_v9 = vadd.f32 %v5419_v2, %v5239_v12  ;;  %v4235_v26 = vpop.f32.mrb[11].mxu1  ;;  %4465 = vrot.lane.b32.xlu1 %v4873_v4, %s5736_s25 }
 0x2f9   : > { %v5451_v17 = vadd.f32 %v4235_v26, %v2614_v10  ;;  %v4876_v0 = vpack.c.bf16 %v5449_v31, %v5449_v31 }
 0x2fa   : > { %v4879_v50 = vpack.c.bf16 %v5450_v9, %v5450_v9 }
 0x2fb   : > { %4475 = vrot.lane.b32.xlu0 %v4878_v28, %s5736_s25  ;;  %v4877_v35 = vpack.c.bf16 %v5451_v17, %v5451_v17 }
 0x2fc   : > { %4477 = vrot.lane.b32.xlu1 %v4879_v50, %s5736_s25 }
 0x2fd   : > { %v5422_v1 = vpop.f32.mrb[12].mxu1 }
 0x2fe   : > { %v5452_v36 = vadd.f32 %v5422_v1, %v7267_v32  ;;  %v4248_v13 = vpop.f32.mrb[13].mxu1 }
 0x2ff   : > { %v5453_v23 = vadd.f32 %v4248_v13, %v7269_v16  ;;  %v5423_v62 = vpop.f32.mrb[14].mxu1  ;;  %4471 = vrot.lane.b32.xlu0 %v4876_v0, %s5736_s25 }
 0x300   : > { %v4882_v49 = vpack.c.bf16 %v5452_v36, %v5452_v36  ;;  %v5454_v12 = vadd.f32 %v5423_v62, %v7271_v42  ;;  %v4251_v10 = vpop.f32.mrb[15].mxu1  ;;  %4473 = vrot.lane.b32.xlu1 %v4877_v35, %s5736_s25 }
 0x301   : > { %v5455_v29 = vadd.f32 %v4251_v10, %v7273_v27  ;;  %v4880_v32 = vpack.c.bf16 %v5453_v23, %v5453_v23 }
 0x302   : > { %v4883_v3 = vpack.c.bf16 %v5454_v12, %v5454_v12 }
 0x303   : > { %4483 = vrot.lane.b32.xlu0 %v4882_v49, %s5736_s25  ;;  %v4881_v33 = vpack.c.bf16 %v5455_v29, %v5455_v29 }
 0x304   : > { %4485 = vrot.lane.b32.xlu1 %v4883_v3, %s5736_s25 }
 0x305   : > { %v5426_v63 = vpop.f32.mrb[16].mxu1 }
 0x306   : > { %v5456_v16 = vadd.f32 %v5426_v63, %v7275_v15  ;;  %v4264_v46 = vpop.f32.mrb[17].mxu1 }
 0x307   : > { %v5457_v40 = vadd.f32 %v4264_v46, %v7277_v6  ;;  %v5427_v25 = vpop.f32.mrb[18].mxu1  ;;  %4479 = vrot.lane.b32.xlu0 %v4880_v32, %s5736_s25 }
 0x308   : > { %v4886_v42 = vpack.c.bf16 %v5456_v16, %v5456_v16  ;;  %v5458_v60 = vadd.f32 %v5427_v25, %v7279_v44  ;;  %v4267_v27 = vpop.f32.mrb[19].mxu1  ;;  %4481 = vrot.lane.b32.xlu1 %v4881_v33, %s5736_s25 }
 0x309   : > { %v5459_v57 = vadd.f32 %v4267_v27, %v7281_v48  ;;  %v4884_v15 = vpack.c.bf16 %v5457_v40, %v5457_v40 }
 0x30a   : > { %v4887_v51 = vpack.c.bf16 %v5458_v60, %v5458_v60 }
 0x30b   : > { %4491 = vrot.lane.b32.xlu0 %v4886_v42, %s5736_s25  ;;  %v4885_v53 = vpack.c.bf16 %v5459_v57, %v5459_v57 }
 0x30c   : > { %4493 = vrot.lane.b32.xlu1 %v4887_v51, %s5736_s25 }
 0x30d   : > { %v5430_v5 = vpop.f32.mrb[20].mxu1 }
 0x30e   : > { %v5460_v6 = vadd.f32 %v5430_v5, %v7283_v18  ;;  %v4280_v56 = vpop.f32.mrb[21].mxu1 }
 0x30f   : > { %v5461_v45 = vadd.f32 %v4280_v56, %v7285_v34  ;;  %v5431_v30 = vpop.f32.mrb[22].mxu1  ;;  %4487 = vrot.lane.b32.xlu0 %v4884_v15, %s5736_s25 }
 0x310   : > { %v4890_v44 = vpack.c.bf16 %v5460_v6, %v5460_v6  ;;  %v5462_v19 = vadd.f32 %v5431_v30, %v7287_v21  ;;  %v4283_v48 = vpop.f32.mrb[23].mxu1  ;;  %4489 = vrot.lane.b32.xlu1 %v4885_v53, %s5736_s25 }
 0x311   : > { %v5463_v11 = vadd.f32 %v4283_v48, %v7289_v54  ;;  %v4888_v18 = vpack.c.bf16 %v5461_v45, %v5461_v45 }
 0x312   : > { %v4891_v37 = vpack.c.bf16 %v5462_v19, %v5462_v19 }
 0x313   : > { %4499 = vrot.lane.b32.xlu0 %v4890_v44, %s5736_s25  ;;  %v4889_v43 = vpack.c.bf16 %v5463_v11, %v5463_v11 }
 0x314   : > { %4501 = vrot.lane.b32.xlu1 %v4891_v37, %s5736_s25 }
 0x315   : > { %v5434_v61 = vpop.f32.mrb[24].mxu1 }
 0x316   : > { %v5464_v34 = vadd.f32 %v5434_v61, %v7291_v24  ;;  %v4296_v20 = vpop.f32.mrb[25].mxu1 }
 0x317   : > { %v5465_v8 = vadd.f32 %v4296_v20, %v7293_v7  ;;  %v5435_v39 = vpop.f32.mrb[26].mxu1  ;;  %4495 = vrot.lane.b32.xlu0 %v4888_v18, %s5736_s25 }
 0x318   : > { %v4894_v21 = vpack.c.bf16 %v5464_v34, %v5464_v34  ;;  %v5466_v22 = vadd.f32 %v5435_v39, %v7295_v55  ;;  %v4299_v54 = vpop.f32.mrb[27].mxu1  ;;  %4497 = vrot.lane.b32.xlu1 %v4889_v43, %s5736_s25 }
 0x319   : > { %v5467_v4 = vadd.f32 %v4299_v54, %v7297_v52  ;;  %v4892_v24 = vpack.c.bf16 %v5465_v8, %v5465_v8 }
 0x31a   : > { %v4895_v47 = vpack.c.bf16 %v5466_v22, %v5466_v22 }
 0x31b   : > { %4507 = vrot.lane.b32.xlu0 %v4894_v21, %s5736_s25  ;;  %v4893_v31 = vpack.c.bf16 %v5467_v4, %v5467_v4 }
 0x31c   : > { %4509 = vrot.lane.b32.xlu1 %v4895_v47, %s5736_s25 }
 0x31d   : > { %v5438_v38 = vpop.f32.mrb[28].mxu1 }
 0x31e   : > { %v5468_v7 = vadd.f32 %v5438_v38, %v7299_v59  ;;  %v4312_v2 = vpop.f32.mrb[29].mxu1 }
 0x31f   : > { %v5469_v28 = vadd.f32 %v4312_v2, %v7301_v41  ;;  %v5439_v9 = vpop.f32.mrb[30].mxu1  ;;  %4503 = vrot.lane.b32.xlu0 %v4892_v24, %s5736_s25 }
 0x320   : > { %v5470_v55 = vadd.f32 %v5439_v9, %v7303_v58  ;;  %v4315_v52 = vpop.f32.mrb[31].mxu1  ;;  %4505 = vrot.lane.b32.xlu1 %v4893_v31, %s5736_s25  ;;  %v4898_v59 = vpack.c.bf16 %v5468_v7, %v5468_v7 }
 0x321   : > { %v4896_v26 = vpack.c.bf16 %v5469_v28, %v5469_v28  ;;  %v5471_v17 = vadd.f32 %v4315_v52, %v7305_v14 }
 0x322   : > { %v4899_v41 = vpack.c.bf16 %v5470_v55, %v5470_v55 }
 0x323   : > { %v4897_v50 = vpack.c.bf16 %v5471_v17, %v5471_v17  ;;  %4511 = vrot.lane.b32.xlu0 %v4896_v26, %s5736_s25 }
 0x325   : > { %4513 = vrot.lane.b32.xlu1 %v4897_v50, %s5736_s25 }
 0x327   : > { %4515 = vrot.lane.b32.xlu0 %v4898_v59, %s5736_s25 }
 0x329   : > { %4517 = vrot.lane.b32.xlu1 %v4899_v41, %s5736_s25 }
 0x35c   : > { %v4460_v58 = vpop.permute.xlu1 %4459 }
 0x35d   : > { %4554 = vst.msk [vmem:[%s7167_s17 + $0x8] sm:$0xf] %vm4551_vm3, %v4460_v58  ;;  %v4456_v14 = vpop.permute.xlu0 %4455 }
 0x35e   : > { %4552 = vst.msk [vmem:[%s7167_s17] sm:$0xf] %vm4551_vm3, %v4456_v14 }
 0x360   : > { %v4462_v0 = vpop.permute.xlu1 %4461 }
 0x361   : > { %4555 = vst.msk [vmem:[%s7167_s17 + $0xc] sm:$0xf] %vm4551_vm3, %v4462_v0  ;;  %v4458_v1 = vpop.permute.xlu0 %4457 }
 0x362   : > { %4553 = vst.msk [vmem:[%s7167_s17 + $0x4] sm:$0xf] %vm4551_vm3, %v4458_v1 }
 0x365   : > { %v4468_v35 = vpop.permute.xlu0 %4467 }
 0x366   : > { %4558 = vst.msk [vmem:[%s7167_s17 + $0x18] sm:$0xf] %vm4551_vm3, %v4468_v35  ;;  %v4470_v36 = vpop.permute.xlu1 %4469 }
 0x367   : > { %4559 = vst.msk [vmem:[%s7167_s17 + $0x1c] sm:$0xf] %vm4551_vm3, %v4470_v36 }
 0x369   : > { %v4464_v13 = vpop.permute.xlu0 %4463 }
 0x36a   : > { %4556 = vst.msk [vmem:[%s7167_s17 + $0x10] sm:$0xf] %vm4551_vm3, %v4464_v13  ;;  %v4466_v23 = vpop.permute.xlu1 %4465 }
 0x36b   : > { %4557 = vst.msk [vmem:[%s7167_s17 + $0x14] sm:$0xf] %vm4551_vm3, %v4466_v23 }
 0x36d   : > { %v4476_v62 = vpop.permute.xlu0 %4475 }
 0x36e   : > { %4562 = vst.msk [vmem:[%s7167_s17 + $0x28] sm:$0xf] %vm4551_vm3, %v4476_v62  ;;  %v4478_v49 = vpop.permute.xlu1 %4477 }
 0x36f   : > { %4563 = vst.msk [vmem:[%s7167_s17 + $0x2c] sm:$0xf] %vm4551_vm3, %v4478_v49 }
 0x371   : > { %v4472_v12 = vpop.permute.xlu0 %4471 }
 0x372   : > { %4560 = vst.msk [vmem:[%s7167_s17 + $0x20] sm:$0xf] %vm4551_vm3, %v4472_v12  ;;  %v4474_v10 = vpop.permute.xlu1 %4473 }
 0x373   : > { %4561 = vst.msk [vmem:[%s7167_s17 + $0x24] sm:$0xf] %vm4551_vm3, %v4474_v10 }
 0x375   : > { %v4484_v29 = vpop.permute.xlu0 %4483 }
 0x376   : > { %4566 = vst.msk [vmem:[%s7167_s17 + $0x38] sm:$0xf] %vm4551_vm3, %v4484_v29  ;;  %v4486_v3 = vpop.permute.xlu1 %4485 }
 0x377   : > { %4567 = vst.msk [vmem:[%s7167_s17 + $0x3c] sm:$0xf] %vm4551_vm3, %v4486_v3 }
 0x379   : > { %v4480_v32 = vpop.permute.xlu0 %4479 }
 0x37a   : > { %4564 = vst.msk [vmem:[%s7167_s17 + $0x30] sm:$0xf] %vm4551_vm3, %v4480_v32  ;;  %v4482_v63 = vpop.permute.xlu1 %4481 }
 0x37b   : > { %4565 = vst.msk [vmem:[%s7167_s17 + $0x34] sm:$0xf] %vm4551_vm3, %v4482_v63 }
 0x37d   : > { %v4492_v33 = vpop.permute.xlu0 %4491 }
 0x37e   : > { %4570 = vst.msk [vmem:[%s7167_s17 + $0x48] sm:$0xf] %vm4551_vm3, %v4492_v33  ;;  %v4494_v16 = vpop.permute.xlu1 %4493 }
 0x37f   : > { %4571 = vst.msk [vmem:[%s7167_s17 + $0x4c] sm:$0xf] %vm4551_vm3, %v4494_v16 }
 0x381   : > { %v4488_v46 = vpop.permute.xlu0 %4487 }
 0x382   : > { %4568 = vst.msk [vmem:[%s7167_s17 + $0x40] sm:$0xf] %vm4551_vm3, %v4488_v46  ;;  %v4490_v40 = vpop.permute.xlu1 %4489 }
 0x383   : > { %4569 = vst.msk [vmem:[%s7167_s17 + $0x44] sm:$0xf] %vm4551_vm3, %v4490_v40 }
 0x385   : > { %v4500_v25 = vpop.permute.xlu0 %4499 }
 0x386   : > { %4574 = vst.msk [vmem:[%s7167_s17 + $0x58] sm:$0xf] %vm4551_vm3, %v4500_v25  ;;  %v4502_v42 = vpop.permute.xlu1 %4501 }
 0x387   : > { %4575 = vst.msk [vmem:[%s7167_s17 + $0x5c] sm:$0xf] %vm4551_vm3, %v4502_v42 }
 0x389   : > { %v4496_v60 = vpop.permute.xlu0 %4495 }
 0x38a   : > { %4572 = vst.msk [vmem:[%s7167_s17 + $0x50] sm:$0xf] %vm4551_vm3, %v4496_v60  ;;  %v4498_v27 = vpop.permute.xlu1 %4497 }
 0x38b   : > { %4573 = vst.msk [vmem:[%s7167_s17 + $0x54] sm:$0xf] %vm4551_vm3, %v4498_v27 }
 0x38d   : > { %v4508_v57 = vpop.permute.xlu0 %4507 }
 0x38e   : > { %4578 = vst.msk [vmem:[%s7167_s17 + $0x68] sm:$0xf] %vm4551_vm3, %v4508_v57  ;;  %v4510_v51 = vpop.permute.xlu1 %4509 }
 0x38f   : > { %4579 = vst.msk [vmem:[%s7167_s17 + $0x6c] sm:$0xf] %vm4551_vm3, %v4510_v51 }
 0x391   : > { %v4504_v15 = vpop.permute.xlu0 %4503 }
 0x392   : > { %4576 = vst.msk [vmem:[%s7167_s17 + $0x60] sm:$0xf] %vm4551_vm3, %v4504_v15  ;;  %v4506_v5 = vpop.permute.xlu1 %4505 }
 0x393   : > { %4577 = vst.msk [vmem:[%s7167_s17 + $0x64] sm:$0xf] %vm4551_vm3, %v4506_v5 }
 0x395   : > { %v4512_v53 = vpop.permute.xlu0 %4511 }
 0x396   : > { %4580 = vst.msk [vmem:[%s7167_s17 + $0x70] sm:$0xf] %vm4551_vm3, %v4512_v53 }
 0x397   : > { %v4514_v6 = vpop.permute.xlu1 %4513 }
 0x398   : > { %4581 = vst.msk [vmem:[%s7167_s17 + $0x74] sm:$0xf] %vm4551_vm3, %v4514_v6 }
 0x399   : > { %v4516_v56 = vpop.permute.xlu0 %4515 }
 0x39a   : > { %4582 = vst.msk [vmem:[%s7167_s17 + $0x78] sm:$0xf] %vm4551_vm3, %v4516_v56 }
 0x39b   : > { %v4518_v45 = vpop.permute.xlu1 %4517 }
 0x39c   : > { %4583 = vst.msk [vmem:[%s7167_s17 + $0x7c] sm:$0xf] %vm4551_vm3, %v4518_v45 }
 0x39d PF: > { %s17_s24 = sadd.s32 1, %s5733_s24  }
 0x39e   : > { %p14_p4 = scmp.ge.s32.totalorder %s17_s24, 4  }
 0x3a0   :  { %16 = sbr.rel (!%p14_p4) target bundleno = 1 (0x1), region = 78 }

// kernel: dense_block_forward.3
= control target key start
LH: loop header
LB: loop body
LE: loop exit
PB: predicated region body
PF: predicated region fallthrough
CT: control target
= control target key end

     0   :  { %s5765_s24 = smov 0   ;;  %s7415_s0 = inlined_call_operand.vmem [shape: bf16[2,256,16], index: 0, kind: input, shape index: {}]   ;;  %s7416_s1 = inlined_call_operand.vmem [shape: f32[1,16], index: 1, kind: input, shape index: {}]   ;;  %s7417_s2 = inlined_call_operand.vmem [shape: f32[1,16], index: 2, kind: input, shape index: {}]   ;;  %s7418_s3 = inlined_call_operand.vmem [shape: bf16[16,32], index: 3, kind: input, shape index: {}]   ;;  %s7419_s4 = inlined_call_operand.vmem [shape: f32[1,32], index: 4, kind: input, shape index: {}]   ;;  %s7420_s5 = inlined_call_operand.vmem [shape: f32[1,32], index: 5, kind: input, shape index: {}]   ;;  %s7421_s6 = inlined_call_operand.vmem [shape: bf16[288,8], index: 6, kind: input, shape index: {}]   ;;  %s7422_s7 = inlined_call_operand.vmem [shape: bf16[2,256,24], index: 7, kind: output, shape index: {}]  }
   0x1 LB: > { %s4632_s25 = sadd.s32 4294967295, %s5721_s24   ;;  %p4636_p0 = scmp.ge.s32.totalorder %s5721_s24, 1  ;;  %s5721_s24 = sphi %s5765_s24, %s17_s24  }
   0x2   : > { %p237_p1 = scmp.lt.s32.totalorder %s5721_s24, 3 }
   0x4   : > { %p238_p2 = pnand %p4636_p0, %p237_p1 }
   0x6   : > { %241 = sbr.rel (%p238_p2) target bundleno = 925 (0x39d), region = 48 }
   0xd   : > { %v5695_v0 = vld [vmem:[%s7418_s3] sm:$0xff]   ;;  %p269_p3 = scmp.lt.s32.totalorder %s4632_s25, 1  ;;  %vm511_vm0 = vcmask 130048   ;;  %vm7524_vm1 = vcmask 261120  }
   0xe   : > { %5071 = vmatprep.subr.bf16.mxu0 %v5695_v0  ;;  %v5782_v1 = vld [vmem:[%s7416_s1] ss:$0 sm:$0xff] }
   0xf   : > { %s8030_s25 = smov (!%p269_p3, %s4632_s25), 1  ;;  %5072 = vmatpush3.bf16.msra.mxu0 %v5695_v0  ;;  %v5800_v4 = vld [vmem:[%s7417_s2] ss:$0 sm:$0xff] }
  0x10   : > { %s4858_s28 = sshll.u32 %s8030_s25, 7  ;;  %s5724_s25 = smov 16  }
  0x11   : > { %s5789_s10 = scalar_lea.vmem %s7415_s0, %s4858_s28  ;;  %s7152_s15 = scalar_lea.vmem %s7422_s7, %s4858_s28 }
  0x12   : > { %v5792_v2 = vld [vmem:[%s5789_s10] sm:$0xf]  ;;  %v5795_v3 = vld [vmem:[%s5789_s10 + $0x4] sm:$0xf]  ;;  %v5803_v5 = vld [vmem:[%s5789_s10 + $0x8] sm:$0xf] }
  0x13   : > { %7581 = vst [vmem:[#allocation3_spill] sm:$0xff] %v5792_v2  ;;  %7582 = vst [vmem:[#allocation4_spill] sm:$0xff] %v5795_v3  ;;  %v345_v6 = vunpack.c.l.bf16 %v5792_v2  ;;  %v346_v7 = vunpack.c.l.bf16 %v5795_v3  ;;  %v5808_v8 = vld [vmem:[%s5789_s10 + $0xc] sm:$0xf]  ;;  %v347_v9 = vunpack.c.l.bf16 %v5803_v5  ;;  %v5812_v10 = vld [vmem:[%s5789_s10 + $0x10] sm:$0xf] }
  0x14   : > { %7583 = vst [vmem:[#allocation5_spill] sm:$0xff] %v5803_v5  ;;  %7584 = vst [vmem:[#allocation6_spill] sm:$0xff] %v5808_v8  ;;  %v5815_v11 = vld [vmem:[%s5789_s10 + $0x14] sm:$0xf]  ;;  %v348_v12 = vunpack.c.l.bf16 %v5808_v8  ;;  %v349_v13 = vunpack.c.l.bf16 %v5812_v10  ;;  %v5821_v15 = vld [vmem:[%s5789_s10 + $0x18] sm:$0xf] }
  0x15   : > { %7585 = vst [vmem:[#allocation7_spill] sm:$0xff] %v5812_v10  ;;  %7586 = vst [vmem:[#allocation8_spill] sm:$0xff] %v5815_v11  ;;  %v350_v14 = vunpack.c.l.bf16 %v5815_v11  ;;  %v5824_v16 = vld [vmem:[%s5789_s10 + $0x1c] sm:$0xf]  ;;  %v384_v17 = vmul.f32 %v5782_v1, %v345_v6  ;;  %v385_v18 = vmul.f32 %v5782_v1, %v346_v7  ;;  %v386_v19 = vmul.f32 %v5782_v1, %v347_v9  ;;  %v5843_v33 = vld [vmem:[%s5789_s10 + $0x20] sm:$0xf] }
  0x16   : > { %7587 = vst [vmem:[#allocation9_spill] sm:$0xff] %v5821_v15  ;;  %7588 = vst [vmem:[#allocation10_spill] sm:$0xff] %v5824_v16  ;;  %v351_v20 = vunpack.c.l.bf16 %v5821_v15  ;;  %v387_v21 = vmul.f32 %v5782_v1, %v348_v12  ;;  %v388_v22 = vmul.f32 %v5782_v1, %v349_v13  ;;  %v352_v24 = vunpack.c.l.bf16 %v5824_v16  ;;  %v5846_v34 = vld [vmem:[%s5789_s10 + $0x24] sm:$0xf]  ;;  %v5849_v35 = vld [vmem:[%s5789_s10 + $0x28] sm:$0xf] }
  0x17   : > { %v389_v23 = vmul.f32 %v5782_v1, %v350_v14  ;;  %v423_v25 = vadd.f32 %v5800_v4, %v384_v17  ;;  %v424_v26 = vadd.f32 %v5800_v4, %v385_v18  ;;  %v425_v27 = vadd.f32 %v5800_v4, %v386_v19  ;;  %7589 = vst [vmem:[#allocation11_spill] sm:$0xff] %v5843_v33  ;;  %v5853_v40 = vld [vmem:[%s5789_s10 + $0x2c] sm:$0xf]  ;;  %v5857_v45 = vld [vmem:[%s5789_s10 + $0x30] sm:$0xf] }
  0x18   : > { %v390_v28 = vmul.f32 %v5782_v1, %v351_v20  ;;  %v426_v29 = vadd.f32 %v5800_v4, %v387_v21  ;;  %v427_v30 = vadd.f32 %v5800_v4, %v388_v22  ;;  %v391_v32 = vmul.f32 %v5782_v1, %v352_v24  ;;  %7590 = vst [vmem:[#allocation12_spill] sm:$0xff] %v5846_v34  ;;  %v5862_v49 = vld [vmem:[%s5789_s10 + $0x34] sm:$0xf]  ;;  %v5871_v57 = vld [vmem:[%s5789_s10 + $0x38] sm:$0xf] }
  0x19   : > { %v428_v31 = vadd.f32 %v5800_v4, %v389_v23  ;;  %7591 = vst [vmem:[#allocation13_spill] sm:$0xff] %v5849_v35  ;;  %v455_v36 = vmax.f32 %v423_v25, 0.0  ;;  %v456_v37 = vmax.f32 %v424_v26, 0.0  ;;  %v457_v38 = vmax.f32 %v425_v27, 0.0  ;;  %7592 = vst [vmem:[#allocation14_spill] sm:$0xff] %v5853_v40 }
  0x1a   : > { %v429_v39 = vadd.f32 %v5800_v4, %v390_v28  ;;  %v458_v41 = vmax.f32 %v426_v29, 0.0  ;;  %v459_v42 = vmax.f32 %v427_v30, 0.0  ;;  %v430_v44 = vadd.f32 %v5800_v4, %v391_v32  ;;  %7593 = vst [vmem:[#allocation15_spill] sm:$0xff] %v5857_v45  ;;  %7594 = vst [vmem:[#allocation16_spill] sm:$0xff] %v5862_v49  ;;  %v5874_v58 = vld [vmem:[%s5789_s10 + $0x3c] sm:$0xf] }
  0x1b   : > { %v460_v43 = vmax.f32 %v428_v31, 0.0  ;;  %v487_v46 = vpack.c.bf16 %v456_v37, %v455_v36  ;;  %v353_v47 = vunpack.c.l.bf16 %v5843_v33  ;;  %v354_v48 = vunpack.c.l.bf16 %v5846_v34  ;;  %7595 = vst [vmem:[#allocation17_spill] sm:$0xff] %v5871_v57  ;;  %7596 = vst [vmem:[#allocation18_spill] sm:$0xff] %v5874_v58  ;;  %v5880_v63 = vld [vmem:[%s5789_s10 + $0x40] sm:$0xf] }
  0x1c   : > { %v488_v50 = vpack.c.bf16 %v458_v41, %v457_v38  ;;  %v355_v52 = vunpack.c.l.bf16 %v5849_v35  ;;  %v356_v55 = vunpack.c.l.bf16 %v5853_v40  ;;  %v357_v56 = vunpack.c.l.bf16 %v5857_v45  ;;  %7597 = vst [vmem:[#allocation19_spill] sm:$0xff] %v5880_v63  ;;  %v5888_v12 = vld [vmem:[%s5789_s10 + $0x44] sm:$0xf]  ;;  %v5900_v30 = vld [vmem:[%s5789_s10 + $0x48] sm:$0xf] }
  0x1d   : > { %v489_v51 = vpack.c.bf16 %v460_v43, %v459_v42  ;;  %5073 = vmatprep.mubr.msk.bf16.mxu0 %vm511_vm0, %v487_v46  ;;  %v392_v53 = vmul.f32 %v5782_v1, %v353_v47  ;;  %v393_v54 = vmul.f32 %v5782_v1, %v354_v48  ;;  %v461_v59 = vmax.f32 %v429_v39, 0.0  ;;  %7598 = vst [vmem:[#allocation20_spill] sm:$0xff] %v5888_v12  ;;  %v5903_v31 = vld [vmem:[%s5789_s10 + $0x4c] sm:$0xf]  ;;  %v5907_v36 = vld [vmem:[%s5789_s10 + $0x50] sm:$0xf] }
  0x1e   : > { %5074 = vmatmul.mubr.msk.bf16.vlgmr.msra.gmra.mrb[0].mxu0 %vm511_vm0, %v488_v50  ;;  %v462_v60 = vmax.f32 %v430_v44, 0.0  ;;  %v394_v61 = vmul.f32 %v5782_v1, %v355_v52  ;;  %v358_v62 = vunpack.c.l.bf16 %v5862_v49  ;;  %v395_v7 = vmul.f32 %v5782_v1, %v356_v55  ;;  %7599 = vst [vmem:[#allocation21_spill] sm:$0xff] %v5900_v30  ;;  %7600 = vst [vmem:[#allocation22_spill] sm:$0xff] %v5903_v31  ;;  %v5910_v37 = vld [vmem:[%s5789_s10 + $0x54] sm:$0xf] }
  0x1f   : > { %5077 = vmatprep.mubr.msk.bf16.mxu0 %vm511_vm0, %v489_v51  ;;  %v431_v0 = vadd.f32 %v5800_v4, %v392_v53  ;;  %v432_v6 = vadd.f32 %v5800_v4, %v393_v54  ;;  %v396_v9 = vmul.f32 %v5782_v1, %v357_v56  ;;  %v359_v20 = vunpack.c.l.bf16 %v5871_v57  ;;  %7601 = vst [vmem:[#allocation23_spill] sm:$0xff] %v5907_v36 }
  0x20   : > { %v433_v13 = vadd.f32 %v5800_v4, %v394_v61  ;;  %v397_v14 = vmul.f32 %v5782_v1, %v358_v62  ;;  %v434_v19 = vadd.f32 %v5800_v4, %v395_v7  ;;  %v490_v21 = vpack.c.bf16 %v462_v60, %v461_v59  ;;  %7602 = vst [vmem:[#allocation24_spill] sm:$0xff] %v5910_v37 }
  0x21   : > { %v463_v17 = vmax.f32 %v431_v0, 0.0  ;;  %v464_v18 = vmax.f32 %v432_v6, 0.0  ;;  %v435_v22 = vadd.f32 %v5800_v4, %v396_v9  ;;  %v360_v24 = vunpack.c.l.bf16 %v5874_v58  ;;  %v5931_v6 = vld [vmem:[%s5789_s10 + $0x58] sm:$0xf] }
  0x22   : > { %v436_v23 = vadd.f32 %v5800_v4, %v397_v14  ;;  %v361_v26 = vunpack.c.l.bf16 %v5880_v63  ;;  %v465_v27 = vmax.f32 %v433_v13, 0.0  ;;  %v466_v28 = vmax.f32 %v434_v19, 0.0  ;;  %7603 = vst [vmem:[#allocation25_spill] sm:$0xff] %v5931_v6  ;;  %v5935_v13 = vld [vmem:[%s5789_s10 + $0x5c] sm:$0xf] }
  0x23   : > { %v491_v25 = vpack.c.bf16 %v464_v18, %v463_v17  ;;  %v362_v29 = vunpack.c.l.bf16 %v5888_v12  ;;  %v398_v32 = vmul.f32 %v5782_v1, %v359_v20  ;;  %v467_v38 = vmax.f32 %v435_v22, 0.0  ;;  %7604 = vst [vmem:[#allocation26_spill] sm:$0xff] %v5935_v13  ;;  %v5938_v14 = vld [vmem:[%s5789_s10 + $0x60] sm:$0xf]  ;;  %v5941_v17 = vld [vmem:[%s5789_s10 + $0x64] sm:$0xf] }
  0x24   : > { %v468_v39 = vmax.f32 %v436_v23, 0.0  ;;  %v399_v41 = vmul.f32 %v5782_v1, %v360_v24  ;;  %v400_v42 = vmul.f32 %v5782_v1, %v361_v26  ;;  %v363_v46 = vunpack.c.l.bf16 %v5900_v30  ;;  %7605 = vst [vmem:[#allocation27_spill] sm:$0xff] %v5938_v14  ;;  %7606 = vst [vmem:[#allocation28_spill] sm:$0xff] %v5941_v17 }
  0x25   : > { %v401_v43 = vmul.f32 %v5782_v1, %v362_v29  ;;  %v437_v44 = vadd.f32 %v5800_v4, %v398_v32  ;;  %v364_v47 = vunpack.c.l.bf16 %v5903_v31  ;;  %v492_v48 = vpack.c.bf16 %v466_v28, %v465_v27 }
  0x26   : > { %5078 = vmatmul.mubr.msk.bf16.gmra.mrb[4].mxu0 %vm511_vm0, %v490_v21  ;;  %v438_v50 = vadd.f32 %v5800_v4, %v399_v41  ;;  %v365_v51 = vunpack.c.l.bf16 %v5907_v36  ;;  %v366_v52 = vunpack.c.l.bf16 %v5910_v37  ;;  %v493_v53 = vpack.c.bf16 %v468_v39, %v467_v38 }
  0x27   : > { %5081 = vmatprep.mubr.msk.bf16.mxu0 %vm511_vm0, %v491_v25  ;;  %v439_v54 = vadd.f32 %v5800_v4, %v400_v42  ;;  %v440_v55 = vadd.f32 %v5800_v4, %v401_v43  ;;  %v402_v56 = vmul.f32 %v5782_v1, %v363_v46  ;;  %v403_v59 = vmul.f32 %v5782_v1, %v364_v47  ;;  %v5961_v46 = vld [vmem:[%s5789_s10 + $0x6c] sm:$0xf]  ;;  %v5964_v47 = vld [vmem:[%s5789_s10 + $0x70] sm:$0xf] }
  0x28   : > { %v469_v60 = vmax.f32 %v437_v44, 0.0  ;;  %v470_v61 = vmax.f32 %v438_v50, 0.0  ;;  %v404_v62 = vmul.f32 %v5782_v1, %v365_v51  ;;  %v405_v0 = vmul.f32 %v5782_v1, %v366_v52  ;;  %v5958_v44 = vld [vmem:[%s5789_s10 + $0x68] sm:$0xf]  ;;  %7608 = vst [vmem:[#allocation30_spill] sm:$0xff] %v5961_v46  ;;  %7609 = vst [vmem:[#allocation31_spill] sm:$0xff] %v5964_v47 }
  0x29   : > { %v471_v7 = vmax.f32 %v439_v54, 0.0  ;;  %v472_v9 = vmax.f32 %v440_v55, 0.0  ;;  %v441_v18 = vadd.f32 %v5800_v4, %v402_v56  ;;  %v442_v19 = vadd.f32 %v5800_v4, %v403_v59  ;;  %7607 = vst [vmem:[#allocation29_spill] sm:$0xff] %v5958_v44 }
  0x2a   : > { %v367_v20 = vunpack.c.l.bf16 %v5931_v6  ;;  %v494_v21 = vpack.c.bf16 %v470_v61, %v469_v60  ;;  %v443_v22 = vadd.f32 %v5800_v4, %v404_v62  ;;  %v444_v23 = vadd.f32 %v5800_v4, %v405_v0 }
  0x2b   : > { %v368_v24 = vunpack.c.l.bf16 %v5935_v13  ;;  %v495_v25 = vpack.c.bf16 %v472_v9, %v471_v7  ;;  %v369_v26 = vunpack.c.l.bf16 %v5938_v14  ;;  %v370_v27 = vunpack.c.l.bf16 %v5941_v17 }
  0x2c   : > { %v473_v28 = vmax.f32 %v441_v18, 0.0  ;;  %v474_v29 = vmax.f32 %v442_v19, 0.0  ;;  %v406_v32 = vmul.f32 %v5782_v1, %v367_v20  ;;  %v475_v38 = vmax.f32 %v443_v22, 0.0  ;;  %v5981_v18 = vld [vmem:[%s5789_s10 + $0x78] sm:$0xf] }
  0x2d   : > { %v476_v39 = vmax.f32 %v444_v23, 0.0  ;;  %v407_v41 = vmul.f32 %v5782_v1, %v368_v24  ;;  %v408_v42 = vmul.f32 %v5782_v1, %v369_v26  ;;  %v409_v43 = vmul.f32 %v5782_v1, %v370_v27  ;;  %7611 = vst [vmem:[#allocation33_spill] sm:$0xff] %v5981_v18  ;;  %v5987_v23 = vld [vmem:[%s5789_s10 + $0x7c] sm:$0xf] }
  0x2e   : > { %5082 = vmatmul.mubr.msk.bf16.gmra.mrb[8].mxu0 %vm511_vm0, %v492_v48  ;;  %v5967_v48 = vld [vmem:[%s5789_s10 + $0x74] sm:$0xf]  ;;  %v496_v50 = vpack.c.bf16 %v474_v29, %v473_v28  ;;  %v445_v51 = vadd.f32 %v5800_v4, %v406_v32  ;;  %v371_v54 = vunpack.c.l.bf16 %v5958_v44  ;;  %v372_v55 = vunpack.c.l.bf16 %v5961_v46  ;;  %7612 = vst [vmem:[#allocation34_spill] sm:$0xff] %v5987_v23 }
  0x2f   : > { %5085 = vmatprep.mubr.msk.bf16.mxu0 %vm511_vm0, %v493_v53  ;;  %7610 = vst [vmem:[#allocation32_spill] sm:$0xff] %v5967_v48  ;;  %v497_v52 = vpack.c.bf16 %v476_v39, %v475_v38  ;;  %v446_v53 = vadd.f32 %v5800_v4, %v407_v41  ;;  %v447_v56 = vadd.f32 %v5800_v4, %v408_v42  ;;  %v373_v60 = vunpack.c.l.bf16 %v5964_v47 }
  0x30   : > { %v448_v59 = vadd.f32 %v5800_v4, %v409_v43  ;;  %v374_v61 = vunpack.c.l.bf16 %v5967_v48  ;;  %v477_v62 = vmax.f32 %v445_v51, 0.0  ;;  %v410_v7 = vmul.f32 %v5782_v1, %v371_v54 }
  0x31   : > { %v478_v0 = vmax.f32 %v446_v53, 0.0  ;;  %v411_v9 = vmul.f32 %v5782_v1, %v372_v55  ;;  %v479_v19 = vmax.f32 %v447_v56, 0.0  ;;  %v375_v24 = vunpack.c.l.bf16 %v5981_v18 }
  0x32   : > { %v480_v20 = vmax.f32 %v448_v59, 0.0  ;;  %v413_v22 = vmul.f32 %v5782_v1, %v374_v61  ;;  %v449_v26 = vadd.f32 %v5800_v4, %v410_v7  ;;  %v376_v28 = vunpack.c.l.bf16 %v5987_v23  ;;  %v5697_v61 = vld [vmem:[%s7421_s6 + $0x40] sm:$0xff]  }
  0x33   : > { %v450_v27 = vadd.f32 %v5800_v4, %v411_v9  ;;  %v414_v42 = vmul.f32 %v5782_v1, %v375_v24  ;;  %5249 = vmatprep.subr.bf16.mxu1 %v5697_v61  ;;  %v7629_v46 = vmov 0  ;;  %v7639_v13 = vmov 0 }
  0x34   : > { %v499_v29 = vpack.c.bf16 %v480_v20, %v479_v19  ;;  %v452_v38 = vadd.f32 %v5800_v4, %v413_v22  ;;  %v481_v39 = vmax.f32 %v449_v26, 0.0  ;;  %v415_v43 = vmul.f32 %v5782_v1, %v376_v28  ;;  %5250 = vmatpush3.bf16.msra.mxu1 %v5697_v61  ;;  %v6026_v20 = vld [vmem:[%s7421_s6 + $0x50] sm:$0xff]   ;;  %v6038_v22 = vld [vmem:[%s7419_s4] ss:$0 sm:$0xff] }
  0x35   : > { %v482_v41 = vmax.f32 %v450_v27, 0.0  ;;  %v453_v53 = vadd.f32 %v5800_v4, %v414_v42  ;;  %v7647_v40 = vmov 0 }
  0x36   : > { %5086 = vmatmul.mubr.msk.bf16.gmra.mrb[12].mxu0 %vm511_vm0, %v494_v21  ;;  %v412_v21 = vmul.f32 %v5782_v1, %v373_v60  ;;  %v484_v51 = vmax.f32 %v452_v38, 0.0  ;;  %v454_v54 = vadd.f32 %v5800_v4, %v415_v43  ;;  %v5723_v1 = vmov 0.0  }
  0x37   : > { %5089 = vmatprep.mubr.msk.bf16.mxu0 %vm511_vm0, %v495_v25  ;;  %v498_v25 = vpack.c.bf16 %v478_v0, %v477_v62  ;;  %v485_v56 = vmax.f32 %v453_v53, 0.0  ;;  %833 = vst.msk [vmem:[#allocation2 + $0x8] sm:$0xff] %vm7524_vm1, %v5723_v1  ;;  %834 = vst.msk [vmem:[#allocation2 + $0x10] sm:$0xff] %vm7524_vm1, %v5723_v1  ;;  %v5698_v62 = vld [vmem:[%s7421_s6 + $0x18] sm:$0xff]   ;;  %v5699_v0 = vld [vmem:[%s7421_s6 + $0x48] sm:$0xff]  }
  0x38   : > { %v451_v32 = vadd.f32 %v5800_v4, %v412_v21  ;;  %v486_v59 = vmax.f32 %v454_v54, 0.0  ;;  %832 = vst.msk [vmem:[#allocation2] sm:$0xff] %vm7524_vm1, %v5723_v1  ;;  %835 = vst.msk [vmem:[#allocation2 + $0x118] sm:$0xff] %vm7524_vm1, %v5723_v1  ;;  %v5696_v4 = vld [vmem:[%s7421_s6 + $0x10] sm:$0xff]   ;;  %5251 = vmatprep.subr.bf16.mxu1 %v5699_v0  ;;  %v6032_v21 = vld [vmem:[%s7421_s6] sm:$0xff]  }
  0x39   : > { %836 = vst.msk [vmem:[#allocation2 + $0x120] sm:$0xff] %vm7524_vm1, %v5723_v1  ;;  %837 = vst.msk [vmem:[#allocation2 + $0x128] sm:$0xff] %vm7524_vm1, %v5723_v1  ;;  %5105 = vmatprep.subr.bf16.mxu0 %v5696_v4  ;;  %5252 = vmatpush3.bf16.msra.mxu1 %v5699_v0 }
  0x3a   : > { %v502_v60 = vpack.c.bf16 %v486_v59, %v485_v56  ;;  %5106 = vmatpush3.bf16.msra.mxu0 %v5696_v4  ;;  %5285 = vmatprep.subr.bf16.mxu1 %v6026_v20 }
  0x3b   : > { %5107 = vmatprep.subr.bf16.mxu0 %v5698_v62 }
  0x3e   : > { %5090 = vmatmul.mubr.msk.bf16.gmra.mrb[16].mxu0 %vm511_vm0, %v496_v50  ;;  %v483_v50 = vmax.f32 %v451_v32, 0.0  ;;  %v1499_v7 = vld [vmem:[#allocation2 + $0x8] sm:$0xff]  ;;  %v1500_v9 = vld [vmem:[#allocation2 + $0x10] sm:$0xff] }
  0x3f   : > { %5093 = vmatprep.mubr.msk.bf16.mxu0 %vm511_vm0, %v497_v52  ;;  %v500_v52 = vpack.c.bf16 %v482_v41, %v481_v39  ;;  %5108 = vmatpush3.bf16.msra.mxu0 %v5698_v62  ;;  %v1535_v19 = vpack.c.bf16 %v1500_v9, %v1499_v7  ;;  %v870_v41 = vlaneseq }
  0x40   : > { %v501_v55 = vpack.c.bf16 %v484_v51, %v483_v50  ;;  %5141 = vmatprep.subr.bf16.mxu0 %v6032_v21 }
  0x46   : > { %5094 = vmatmul.mubr.msk.bf16.gmra.mrb[20].mxu0 %vm511_vm0, %v498_v25  ;;  %v6043_v25 = vld [vmem:[%s7420_s5] ss:$0 sm:$0xff] }
  0x47   : > { %5097 = vmatprep.mubr.msk.bf16.mxu0 %vm511_vm0, %v499_v29 }
  0x4e   : > { %5098 = vmatmul.mubr.msk.bf16.gmra.mrb[24].mxu0 %vm511_vm0, %v500_v52 }
  0x4f   : > { %5101 = vmatprep.mubr.msk.bf16.mxu0 %vm511_vm0, %v501_v55  ;;  %v6054_v55 = vshrl.u32 %v870_v41, 7 }
  0x51   : > { %v874_v62 = vadd.s32 24, %v6054_v55  ;;  %v886_v12 = vadd.s32 120, %v6054_v55  ;;  %v6275_v34 = vadd.s32 64, %v6054_v55  ;;  %v890_v5 = vadd.s32 152, %v6054_v55 }
  0x53   : > { %v928_v41 = vand.u32 15, %v874_v62 }
  0x55   : > { %vm6090_vm3 = vcmp.le.s32.totalorder %v928_v41, 14 }
  0x56   : > { %5102 = vmatmul.mubr.msk.bf16.gmra.mrb[28].mxu0 %vm511_vm0, %v502_v60 }
  0x57   : > { %5109 = vmatprep.mubr.msk.bf16.mxu0 %vm7524_vm1, %v1535_v19  ;;  %v873_v19 = vadd.s32 16, %v6054_v55 }
  0xf1   : > { %v5075_v24 = vpop.f32.mrb[0].mxu0 }
  0xf2   : > { %v730_v26 = vmul.f32 %v5075_v24, %v6038_v22  ;;  %v594_v27 = vpop.f32.mrb[1].mxu0 }
  0xf3   : > { %v728_v28 = vmul.f32 %v6038_v22, %v594_v27  ;;  %v5076_v29 = vpop.f32.mrb[2].mxu0  ;;  %v907_v27 = vand.u32 15, %v6054_v55 }
  0xf4   : > { %v769_v32 = vadd.f32 %v6043_v25, %v730_v26  ;;  %v731_v38 = vmul.f32 %v5076_v29, %v6038_v22  ;;  %v597_v39 = vpop.f32.mrb[3].mxu0 }
  0xf5   : > { %v767_v42 = vadd.f32 %v6043_v25, %v728_v28  ;;  %v729_v43 = vmul.f32 %v6038_v22, %v597_v39  ;;  %v876_v28 = vadd.s32 40, %v6054_v55  ;;  %vm6073_vm2 = vcmp.ge.s32.totalorder %v907_v27, 1 }
  0xf6   : > { %v801_v50 = vmax.f32 %v769_v32, 0.0  ;;  %v770_v51 = vadd.f32 %v6043_v25, %v731_v38 }
  0xf7   : > { %v799_v52 = vmax.f32 %v767_v42, 0.0  ;;  %v768_v53 = vadd.f32 %v6043_v25, %v729_v43  ;;  %v921_v43 = vand.u32 15, %v873_v19  ;;  %v5701_v19 = vld [vmem:[%s7421_s6 + $0x58] sm:$0xff]  }
  0xf8   : > { %840 = vst.msk [vmem:[#allocation2 + $0x28] sm:$0xff] %vm7524_vm1, %v801_v50  ;;  %v802_v54 = vmax.f32 %v770_v51, 0.0 }
  0xf9   : > { %838 = vst.msk [vmem:[#allocation2 + $0x18] sm:$0xff] %vm7524_vm1, %v799_v52  ;;  %v800_v56 = vmax.f32 %v768_v53, 0.0  ;;  %v5079_v59 = vpop.f32.mrb[4].mxu0  ;;  %v7613_v53 = vmov 0  ;;  %vm6112_vm4 = vcmp.ge.s32.totalorder %v921_v43, 1 }
  0xfa   : > { %841 = vst.msk [vmem:[#allocation2 + $0x30] sm:$0xff] %vm7524_vm1, %v802_v54  ;;  %v734_v60 = vmul.f32 %v5079_v59, %v6038_v22  ;;  %v610_v1 = vpop.f32.mrb[5].mxu0  ;;  %v7614_v53 = vsel %vm6073_vm2, 4294967295, %v7613_v53 }
  0xfb   : > { %839 = vst.msk [vmem:[#allocation2 + $0x20] sm:$0xff] %vm7524_vm1, %v800_v56  ;;  %v732_v4 = vmul.f32 %v6038_v22, %v610_v1  ;;  %v5080_v61 = vpop.f32.mrb[6].mxu0  ;;  %7615 = vst [vmem:[#allocation35_spill] sm:$0xff] %v7614_v53  ;;  %v942_v56 = vand.u32 15, %v876_v28 }
  0xfc   : > { %v773_v0 = vadd.f32 %v6043_v25, %v734_v60  ;;  %v735_v7 = vmul.f32 %v5080_v61, %v6038_v22  ;;  %v613_v9 = vpop.f32.mrb[7].mxu0  ;;  %v878_v61 = vadd.s32 56, %v6054_v55 }
  0xfd   : > { %v771_v24 = vadd.f32 %v6043_v25, %v732_v4  ;;  %v733_v26 = vmul.f32 %v6038_v22, %v613_v9  ;;  %vm6118_vm5 = vcmp.le.s32.totalorder %v942_v56, 14 }
  0xfe   : > { %v805_v29 = vmax.f32 %v773_v0, 0.0  ;;  %v774_v32 = vadd.f32 %v6043_v25, %v735_v7 }
  0xff   : > { %v803_v38 = vmax.f32 %v771_v24, 0.0  ;;  %v772_v39 = vadd.f32 %v6043_v25, %v733_v26  ;;  %v1503_v9 = vld [vmem:[#allocation2 + $0x28] sm:$0xff]  ;;  %v6088_v24 = vadd.s32 32, %v6054_v55  ;;  %v7616_v26 = vmov 0 }
 0x100   : > { %844 = vst.msk [vmem:[#allocation2 + $0x48] sm:$0xff] %vm7524_vm1, %v805_v29  ;;  %v806_v42 = vmax.f32 %v774_v32, 0.0  ;;  %v6077_v54 = vld [vmem:[#allocation2 + $0x17] sm:$0xff]  ;;  %v7617_v26 = vsel %vm6090_vm3, 4294967295, %v7616_v26 }
 0x101   : > { %842 = vst.msk [vmem:[#allocation2 + $0x38] sm:$0xff] %vm7524_vm1, %v803_v38  ;;  %v804_v50 = vmax.f32 %v772_v39, 0.0  ;;  %v5083_v51 = vpop.f32.mrb[8].mxu0  ;;  %v1504_v52 = vld [vmem:[#allocation2 + $0x30] sm:$0xff]  ;;  %v1501_v1 = vld [vmem:[#allocation2 + $0x18] sm:$0xff]  ;;  %7618 = vst [vmem:[#allocation36_spill] sm:$0xff] %v7617_v26 }
 0x102   : > { %845 = vst.msk [vmem:[#allocation2 + $0x50] sm:$0xff] %vm7524_vm1, %v806_v42  ;;  %v738_v59 = vmul.f32 %v5083_v51, %v6038_v22  ;;  %v626_v60 = vpop.f32.mrb[9].mxu0  ;;  %v1502_v4 = vld [vmem:[#allocation2 + $0x20] sm:$0xff]  ;;  %v1537_v32 = vpack.c.bf16 %v1504_v52, %v1503_v9  ;;  %v5703_v39 = vld [vmem:[%s7421_s6 + $0x8] sm:$0xff]   ;;  %v2426_v41 = vsel %vm6073_vm2, %v6077_v54, 0.0 }
 0x103   : > { %843 = vst.msk [vmem:[#allocation2 + $0x40] sm:$0xff] %vm7524_vm1, %v804_v50  ;;  %v736_v62 = vmul.f32 %v6038_v22, %v626_v60  ;;  %v5084_v0 = vpop.f32.mrb[10].mxu0  ;;  %v1536_v7 = vpack.c.bf16 %v1502_v4, %v1501_v1  ;;  %v6096_v38 = vld [vmem:[#allocation2 + $0x21] sm:$0xff]  ;;  %v6110_v52 = vld [vmem:[#allocation2 + $0x19] sm:$0xff]  ;;  %v7622_v1 = vmov 0  ;;  %v6158_v47 = vld [vmem:[#allocation2 + $0x29] sm:$0xff] }
 0x104   : > { %v777_v27 = vadd.f32 %v6043_v25, %v738_v59  ;;  %v739_v28 = vmul.f32 %v5084_v0, %v6038_v22  ;;  %v629_v29 = vpop.f32.mrb[11].mxu0  ;;  %v6101_v42 = vld [vmem:[#allocation2 + $0x1f] sm:$0xff]  ;;  %v7619_v59 = vmov 0  ;;  %v6116_v60 = vld [vmem:[#allocation2 + $0x27] sm:$0xff]  ;;  %v7623_v1 = vsel %vm6118_vm5, 4294967295, %v7622_v1 }
 0x105   : > { %v775_v50 = vadd.f32 %v6043_v25, %v736_v62  ;;  %v737_v51 = vmul.f32 %v6038_v22, %v629_v29  ;;  %5110 = vmatmul.mubr.msk.bf16.vlgmr.msra.gmra.mrb[32].mxu0 %vm7524_vm1, %v1536_v7  ;;  %5253 = vmatprep.mubr.msk.bf16.mxu1 %vm7524_vm1, %v1536_v7  ;;  %v7620_v59 = vsel %vm6112_vm4, 4294967295, %v7619_v59  ;;  %7624 = vst [vmem:[#allocation38_spill] sm:$0xff] %v7623_v1  ;;  %v956_v0 = vand.u32 15, %v878_v61  ;;  %v6139_v61 = vld [vmem:[%s7421_s6 + $0x60] sm:$0xff]  }
 0x106   : > { %7621 = vst [vmem:[#allocation37_spill] sm:$0xff] %v7620_v59  ;;  %v809_v4 = vmax.f32 %v777_v27, 0.0  ;;  %v778_v62 = vadd.f32 %v6043_v25, %v739_v28  ;;  %5113 = vmatprep.mubr.msk.bf16.mxu0 %vm7524_vm1, %v1537_v32  ;;  %5254 = vmatmul.mubr.msk.bf16.vlgmr.msra.gmra.mrb[0].mxu1 %vm7524_vm1, %v1537_v32  ;;  %v880_v7 = vadd.s32 72, %v6054_v55  ;;  %v2092_v56 = vsel %vm6090_vm3, %v6096_v38, 0.0 }
 0x107   : > { %v807_v43 = vmax.f32 %v775_v50, 0.0  ;;  %v776_v9 = vadd.f32 %v6043_v25, %v737_v51  ;;  %5286 = vmatpush3.bf16.msra.mxu1 %v6026_v20  ;;  %5142 = vmatpush3.bf16.msra.mxu0 %v6032_v21  ;;  %v6133_v27 = vpack.c.bf16 %v6101_v42, %v2426_v41  ;;  %v6141_v20 = vld [vmem:[#allocation2 + $0x2f] sm:$0xff]  ;;  %v6146_v29 = vpack.c.bf16 %v2092_v56, %v6110_v52 }
 0x108   : > { %848 = vst.msk [vmem:[#allocation2 + $0x68] sm:$0xff] %vm7524_vm1, %v809_v4  ;;  %v810_v28 = vmax.f32 %v778_v62, 0.0  ;;  %5287 = vmatprep.subr.bf16.mxu1 %v5701_v19  ;;  %5143 = vmatprep.subr.bf16.mxu0 %v5703_v39  ;;  %7626 = vst [vmem:[#allocation40_spill] sm:$0xff] %v6141_v20  ;;  %v6143_v21 = vld [vmem:[#allocation2 + $0x31] sm:$0xff]  ;;  %v2428_v32 = vsel %vm6112_vm4, %v6116_v60, 0.0  ;;  %v935_v4 = vand.u32 15, %v6088_v24 }
 0x109   : > { %7625 = vst [vmem:[#allocation39_spill] sm:$0xff] %v6133_v27  ;;  %7627 = vst [vmem:[#allocation41_spill] sm:$0xff] %v6146_v29  ;;  %v808_v41 = vmax.f32 %v776_v9, 0.0  ;;  %v5087_v50 = vpop.f32.mrb[12].mxu0  ;;  %v1508_v51 = vld [vmem:[#allocation2 + $0x50] sm:$0xff]  ;;  %v6154_v62 = vpack.c.bf16 %v6141_v20, %v2428_v32  ;;  %v1505_v18 = vld [vmem:[#allocation2 + $0x38] sm:$0xff] }
 0x10a   : > { %846 = vst.msk [vmem:[#allocation2 + $0x58] sm:$0xff] %vm7524_vm1, %v807_v43  ;;  %849 = vst.msk [vmem:[#allocation2 + $0x70] sm:$0xff] %vm7524_vm1, %v810_v28  ;;  %v742_v23 = vmul.f32 %v5087_v50, %v6038_v22  ;;  %v642_v56 = vpop.f32.mrb[13].mxu0  ;;  %v1506_v48 = vld [vmem:[#allocation2 + $0x40] sm:$0xff]  ;;  %vm6160_vm6 = vcmp.le.s32.totalorder %v956_v0, 14  ;;  %v2094_v24 = vsel %vm6118_vm5, %v6143_v21, 0.0 }
 0x10b   : > { %7628 = vst [vmem:[#allocation42_spill] sm:$0xff] %v6154_v62  ;;  %v7630_v46 = vsel %vm6160_vm6, 4294967295, %v7629_v46  ;;  %847 = vst.msk [vmem:[#allocation2 + $0x60] sm:$0xff] %vm7524_vm1, %v808_v41  ;;  %v740_v43 = vmul.f32 %v6038_v22, %v642_v56  ;;  %v5088_v9 = vpop.f32.mrb[14].mxu0  ;;  %v1538_v28 = vpack.c.bf16 %v1506_v48, %v1505_v18  ;;  %v1507_v32 = vld [vmem:[#allocation2 + $0x48] sm:$0xff]  ;;  %5288 = vmatpush3.bf16.msra.mxu1 %v5701_v19  ;;  %5144 = vmatpush3.bf16.msra.mxu0 %v5703_v39  ;;  %v6172_v0 = vld [vmem:[%s7421_s6 + $0x20] sm:$0xff]  }
 0x10c   : > { %7631 = vst [vmem:[#allocation43_spill] sm:$0xff] %v7630_v46  ;;  %v970_v50 = vand.u32 15, %v880_v7  ;;  %7632 = vst [vmem:[#allocation44_spill] sm:$0xff] %v6172_v0  ;;  %v6175_v44 = vpack.c.bf16 %v2094_v24, %v6158_v47  ;;  %v781_v17 = vadd.f32 %v6043_v25, %v742_v23  ;;  %v743_v41 = vmul.f32 %v5088_v9, %v6038_v22  ;;  %v645_v14 = vpop.f32.mrb[15].mxu0  ;;  %v6180_v48 = vld [vmem:[#allocation2 + $0x41] sm:$0xff]  ;;  %v6187_v7 = vld [vmem:[#allocation2 + $0x39] sm:$0xff] }
 0x10d   : > { %v1539_v56 = vpack.c.bf16 %v1508_v51, %v1507_v32  ;;  %5321 = vmatprep.subr.bf16.mxu1 %v6139_v61  ;;  %v882_v18 = vadd.s32 88, %v6054_v55  ;;  %v779_v19 = vadd.f32 %v6043_v25, %v740_v43  ;;  %v741_v39 = vmul.f32 %v6038_v22, %v645_v14  ;;  %5114 = vmatmul.mubr.msk.bf16.gmra.mrb[36].mxu0 %vm7524_vm1, %v1538_v28  ;;  %v6189_v23 = vld [vmem:[#allocation2 + $0x37] sm:$0xff]  ;;  %v6199_v14 = vld [vmem:[#allocation2 + $0x3f] sm:$0xff]  ;;  %v6225_v30 = vld [vmem:[#allocation2 + $0x49] sm:$0xff] }
 0x10e   : > { %7633 = vst [vmem:[#allocation45_spill] sm:$0xff] %v6175_v44  ;;  %5257 = vmatprep.mubr.msk.bf16.mxu1 %vm7524_vm1, %v1538_v28  ;;  %7634 = vst [vmem:[#allocation46_spill] sm:$0xff] %v6189_v23  ;;  %v884_v51 = vadd.s32 104, %v6054_v55  ;;  %v813_v24 = vmax.f32 %v781_v17, 0.0  ;;  %v782_v9 = vadd.f32 %v6043_v25, %v743_v41  ;;  %vm6195_vm7 = vcmp.ge.s32.totalorder %v935_v4, 1  ;;  %5177 = vmatprep.subr.bf16.mxu0 %v6172_v0 }
 0x10f   : > { %5117 = vmatprep.mubr.msk.bf16.mxu0 %vm7524_vm1, %v1539_v56  ;;  %5258 = vmatmul.mubr.msk.bf16.gmra.mrb[4].mxu1 %vm7524_vm1, %v1539_v56  ;;  %v7635_v43 = vmov 0  ;;  %7638 = vst [vmem:[#allocation48_spill] sm:$0xff] %v6199_v14  ;;  %v811_v28 = vmax.f32 %v779_v19, 0.0  ;;  %v780_v32 = vadd.f32 %v6043_v25, %v741_v39  ;;  %vm6202_vm8 = vcmp.le.s32.totalorder %v970_v50, 14  ;;  %7644 = vst [vmem:[#allocation52_spill] sm:$0xff] %v6225_v30 }
 0x110   : > { %v7636_v43 = vsel %vm6195_vm7, 4294967295, %v7635_v43  ;;  %v7640_v13 = vsel %vm6202_vm8, 4294967295, %v7639_v13  ;;  %v2096_v17 = vsel %vm6160_vm6, %v6180_v48, 0.0  ;;  %852 = vst.msk [vmem:[#allocation2 + $0x88] sm:$0xff] %vm7524_vm1, %v813_v24  ;;  %v814_v4 = vmax.f32 %v782_v9, 0.0 }
 0x111   : > { %7637 = vst [vmem:[#allocation47_spill] sm:$0xff] %v7636_v43  ;;  %7641 = vst [vmem:[#allocation49_spill] sm:$0xff] %v7640_v13  ;;  %v6211_v41 = vld [vmem:[#allocation2 + $0x51] sm:$0xff]  ;;  %v984_v56 = vand.u32 15, %v882_v18  ;;  %v6214_v19 = vpack.c.bf16 %v2096_v17, %v6187_v7  ;;  %v2430_v50 = vsel %vm6195_vm7, %v6189_v23, 0.0  ;;  %v812_v39 = vmax.f32 %v780_v32, 0.0 }
 0x112   : > { %850 = vst.msk [vmem:[#allocation2 + $0x78] sm:$0xff] %vm7524_vm1, %v811_v28  ;;  %v5091_v6 = vpop.f32.mrb[16].mxu0  ;;  %v1512_v37 = vld [vmem:[#allocation2 + $0x70] sm:$0xff]  ;;  %v998_v36 = vand.u32 15, %v884_v51  ;;  %v6221_v31 = vpack.c.bf16 %v6199_v14, %v2430_v50  ;;  %853 = vst.msk [vmem:[#allocation2 + $0x90] sm:$0xff] %vm7524_vm1, %v814_v4  ;;  %v1509_v9 = vld [vmem:[#allocation2 + $0x58] sm:$0xff] }
 0x113   : > { %7642 = vst [vmem:[#allocation50_spill] sm:$0xff] %v6214_v19  ;;  %v746_v18 = vmul.f32 %v5091_v6, %v6038_v22  ;;  %v658_v24 = vpop.f32.mrb[17].mxu0  ;;  %v1510_v17 = vld [vmem:[#allocation2 + $0x60] sm:$0xff]  ;;  %v2098_v28 = vsel %vm6202_vm8, %v6211_v41, 0.0  ;;  %851 = vst.msk [vmem:[#allocation2 + $0x80] sm:$0xff] %vm7524_vm1, %v812_v39  ;;  %v1511_v4 = vld [vmem:[#allocation2 + $0x68] sm:$0xff] }
 0x114   : > { %7643 = vst [vmem:[#allocation51_spill] sm:$0xff] %v6221_v31  ;;  %v744_v51 = vmul.f32 %v6038_v22, %v658_v24  ;;  %v5092_v32 = vpop.f32.mrb[18].mxu0  ;;  %v1540_v50 = vpack.c.bf16 %v1510_v17, %v1509_v9  ;;  %v6234_v6 = vpack.c.bf16 %v2098_v28, %v6225_v30  ;;  %v1541_v49 = vpack.c.bf16 %v1512_v37, %v1511_v4  ;;  %v6238_v45 = vld [vmem:[#allocation2 + $0x61] sm:$0xff]  ;;  %v6252_v37 = vld [vmem:[#allocation2 + $0x59] sm:$0xff] }
 0x115   : > { %v785_v63 = vadd.f32 %v6043_v25, %v746_v18  ;;  %v747_v58 = vmul.f32 %v5092_v32, %v6038_v22  ;;  %v661_v57 = vpop.f32.mrb[19].mxu0  ;;  %7646 = vst [vmem:[#allocation54_spill] sm:$0xff] %v6238_v45  ;;  %vm6240_vm9 = vcmp.le.s32.totalorder %v984_v56, 14  ;;  %v6249_v18 = vadd.s32 8, %v6054_v55  ;;  %7650 = vst [vmem:[#allocation56_spill] sm:$0xff] %v6252_v37 }
 0x116   : > { %7645 = vst [vmem:[#allocation53_spill] sm:$0xff] %v6234_v6  ;;  %v7648_v40 = vsel %vm6240_vm9, 4294967295, %v7647_v40  ;;  %v783_v39 = vadd.f32 %v6043_v25, %v744_v51  ;;  %v745_v24 = vmul.f32 %v6038_v22, %v661_v57  ;;  %5118 = vmatmul.mubr.msk.bf16.gmra.mrb[40].mxu0 %vm7524_vm1, %v1540_v50  ;;  %5261 = vmatprep.mubr.msk.bf16.mxu1 %vm7524_vm1, %v1540_v50  ;;  %v877_v9 = vadd.s32 48, %v6054_v55 }
 0x117   : > { %7649 = vst [vmem:[#allocation55_spill] sm:$0xff] %v7648_v40  ;;  %v817_v17 = vmax.f32 %v785_v63, 0.0  ;;  %v786_v56 = vadd.f32 %v6043_v25, %v747_v58  ;;  %5121 = vmatprep.mubr.msk.bf16.mxu0 %vm7524_vm1, %v1541_v49  ;;  %5262 = vmatmul.mubr.msk.bf16.gmra.mrb[8].mxu1 %vm7524_vm1, %v1541_v49  ;;  %vm6257_vm10 = vcmp.le.s32.totalorder %v998_v36, 14  ;;  %v1012_v28 = vand.u32 15, %v886_v12 }
 0x118   : > { %v815_v51 = vmax.f32 %v783_v39, 0.0  ;;  %v784_v32 = vadd.f32 %v6043_v25, %v745_v24  ;;  %v888_v50 = vadd.s32 136, %v6054_v55  ;;  %v2100_v63 = vsel %vm6240_vm9, %v6238_v45, 0.0  ;;  %v1351_v45 = vld [vmem:[#allocation2 + $0x7] sm:$0xff] }
 0x119   : > { %856 = vst.msk [vmem:[#allocation2 + $0xa8] sm:$0xff] %vm7524_vm1, %v817_v17  ;;  %v818_v58 = vmax.f32 %v786_v56, 0.0  ;;  %v6267_v4 = vld [vmem:[#allocation2 + $0x71] sm:$0xff]  ;;  %v6270_v49 = vpack.c.bf16 %v2100_v63, %v6252_v37  ;;  %v5095_v36 = vpop.f32.mrb[20].mxu0  ;;  %v949_v35 = vand.u32 15, %v877_v9  ;;  %v6279_v63 = vld [vmem:[#allocation2 + $0x69] sm:$0xff] }
 0x11a   : > { %7653 = vst [vmem:[#allocation57_spill] sm:$0xff] %v6267_v4  ;;  %854 = vst.msk [vmem:[#allocation2 + $0x98] sm:$0xff] %vm7524_vm1, %v815_v51  ;;  %v816_v12 = vmax.f32 %v784_v32, 0.0  ;;  %v1516_v39 = vld [vmem:[#allocation2 + $0x90] sm:$0xff]  ;;  %v750_v17 = vmul.f32 %v5095_v36, %v6038_v22  ;;  %v674_v56 = vpop.f32.mrb[21].mxu0  ;;  %v1513_v33 = vld [vmem:[#allocation2 + $0x78] sm:$0xff] }
 0x11b   : > { %7654 = vst [vmem:[#allocation58_spill] sm:$0xff] %v6270_v49  ;;  %857 = vst.msk [vmem:[#allocation2 + $0xb0] sm:$0xff] %vm7524_vm1, %v818_v58  ;;  %v1514_v16 = vld [vmem:[#allocation2 + $0x80] sm:$0xff]  ;;  %vm6281_vm11 = vcmp.le.s32.totalorder %v1012_v28, 14  ;;  %v7656_v51 = vmov 0  ;;  %v2102_v9 = vsel %vm6257_vm10, %v6267_v4, 0.0  ;;  %v748_v32 = vmul.f32 %v6038_v22, %v674_v56 }
 0x11c   : > { %7655 = vst [vmem:[#allocation59_spill] sm:$0xff] %v6279_v63  ;;  %v7657_v51 = vsel %vm6281_vm11, 4294967295, %v7656_v51  ;;  %855 = vst.msk [vmem:[#allocation2 + $0xa0] sm:$0xff] %vm7524_vm1, %v816_v12  ;;  %v5096_v58 = vpop.f32.mrb[22].mxu0  ;;  %v1542_v24 = vpack.c.bf16 %v1514_v16, %v1513_v33  ;;  %v1515_v36 = vld [vmem:[#allocation2 + $0x88] sm:$0xff]  ;;  %v1026_v15 = vand.u32 15, %v888_v50  ;;  %v6291_v11 = vpack.c.bf16 %v2102_v9, %v6279_v63 }
 0x11d   : > { %v789_v28 = vadd.f32 %v6043_v25, %v750_v17  ;;  %v751_v10 = vmul.f32 %v5096_v58, %v6038_v22  ;;  %v677_v8 = vpop.f32.mrb[23].mxu0  ;;  %v1543_v3 = vpack.c.bf16 %v1516_v39, %v1515_v36  ;;  %v6295_v2 = vld [vmem:[#allocation2 + $0x81] sm:$0xff]  ;;  %v787_v12 = vadd.f32 %v6043_v25, %v748_v32  ;;  %v6308_v50 = vld [vmem:[#allocation2 + $0x79] sm:$0xff]  ;;  %v6346_v49 = vld [vmem:[#allocation2 + $0x89] sm:$0xff] }
 0x11e   : > { %7658 = vst [vmem:[#allocation60_spill] sm:$0xff] %v6291_v11  ;;  %7659 = vst [vmem:[#allocation61_spill] sm:$0xff] %v6295_v2  ;;  %v749_v56 = vmul.f32 %v6038_v22, %v677_v8  ;;  %5122 = vmatmul.mubr.msk.bf16.gmra.mrb[44].mxu0 %vm7524_vm1, %v1542_v24  ;;  %5265 = vmatprep.mubr.msk.bf16.mxu1 %vm7524_vm1, %v1542_v24  ;;  %vm6302_vm12 = vcmp.ge.s32.totalorder %v949_v35, 1  ;;  %v7660_v16 = vmov 0  ;;  %v6306_v33 = vld [vmem:[#allocation2 + $0x47] sm:$0xff]  ;;  %v892_v39 = vadd.s32 168, %v6054_v55 }
 0x11f   : > { %v7661_v16 = vsel %vm6302_vm12, 4294967295, %v7660_v16  ;;  %7663 = vst [vmem:[#allocation63_spill] sm:$0xff] %v6306_v33  ;;  %7664 = vst [vmem:[#allocation64_spill] sm:$0xff] %v6308_v50  ;;  %v821_v17 = vmax.f32 %v789_v28, 0.0  ;;  %v790_v9 = vadd.f32 %v6043_v25, %v751_v10  ;;  %5125 = vmatprep.mubr.msk.bf16.mxu0 %vm7524_vm1, %v1543_v3  ;;  %5266 = vmatmul.mubr.msk.bf16.gmra.mrb[12].mxu1 %vm7524_vm1, %v1543_v3  ;;  %v963_v8 = vand.u32 15, %v6275_v34  ;;  %v6327_v3 = vld [vmem:[#allocation2 + $0x4f] sm:$0xff] }
 0x120   : > { %7662 = vst [vmem:[#allocation62_spill] sm:$0xff] %v7661_v16  ;;  %v6316_v35 = vadd.s32 80, %v6054_v55  ;;  %v819_v24 = vmax.f32 %v787_v12, 0.0  ;;  %v788_v32 = vadd.f32 %v6043_v25, %v749_v56  ;;  %vm6319_vm13 = vcmp.le.s32.totalorder %v1026_v15, 14  ;;  %7667 = vst [vmem:[#allocation65_spill] sm:$0xff] %v6327_v3  ;;  %v7789_v16 = vld [vmem:[#allocation54_spill] sm:$0xff] }
 0x121   : > { %v7665_v58 = vmov 0  ;;  %v2104_v10 = vsel %vm6281_vm11, %v6295_v2, 0.0  ;;  %860 = vst.msk [vmem:[#allocation2 + $0xc8] sm:$0xff] %vm7524_vm1, %v821_v17  ;;  %v822_v36 = vmax.f32 %v790_v9, 0.0  ;;  %v6329_v34 = vld [vmem:[#allocation2 + $0x91] sm:$0xff]  ;;  %v1040_v28 = vand.u32 15, %v890_v5 }
 0x122   : > { %v7666_v58 = vsel %vm6319_vm13, 4294967295, %v7665_v58  ;;  %v6332_v12 = vpack.c.bf16 %v2104_v10, %v6308_v50  ;;  %v2432_v15 = vsel %vm6302_vm12, %v6306_v33, 0.0  ;;  %858 = vst.msk [vmem:[#allocation2 + $0xb8] sm:$0xff] %vm7524_vm1, %v819_v24  ;;  %v820_v56 = vmax.f32 %v788_v32, 0.0  ;;  %v5099_v31 = vpop.f32.mrb[24].mxu0  ;;  %v1520_v62 = vld [vmem:[#allocation2 + $0xb0] sm:$0xff] }
 0x123   : > { %v6339_v17 = vadd.s32 96, %v6054_v55  ;;  %v1054_v9 = vand.u32 15, %v892_v39  ;;  %v6342_v27 = vpack.c.bf16 %v6327_v3, %v2432_v15  ;;  %861 = vst.msk [vmem:[#allocation2 + $0xd0] sm:$0xff] %vm7524_vm1, %v822_v36  ;;  %v754_v5 = vmul.f32 %v5099_v31, %v6038_v22  ;;  %v690_v10 = vpop.f32.mrb[25].mxu0  ;;  %v1518_v11 = vld [vmem:[#allocation2 + $0xa0] sm:$0xff]  ;;  %v1519_v36 = vld [vmem:[#allocation2 + $0xa8] sm:$0xff] }
 0x124   : > { %7668 = vst [vmem:[#allocation66_spill] sm:$0xff] %v6332_v12  ;;  %v1517_v12 = vld [vmem:[#allocation2 + $0x98] sm:$0xff]  ;;  %v894_v24 = vadd.s32 184, %v6054_v55  ;;  %v2106_v32 = vsel %vm6319_vm13, %v6329_v34, 0.0  ;;  %859 = vst.msk [vmem:[#allocation2 + $0xc0] sm:$0xff] %vm7524_vm1, %v820_v56  ;;  %v752_v39 = vmul.f32 %v6038_v22, %v690_v10  ;;  %v5100_v15 = vpop.f32.mrb[26].mxu0  ;;  %v1545_v50 = vpack.c.bf16 %v1520_v62, %v1519_v36 }
 0x125   : > { %7669 = vst [vmem:[#allocation67_spill] sm:$0xff] %v6342_v27  ;;  %v1544_v27 = vpack.c.bf16 %v1518_v11, %v1517_v12  ;;  %vm6354_vm14 = vcmp.ge.s32.totalorder %v963_v8, 1  ;;  %v7670_v31 = vmov 0  ;;  %v6359_v6 = vpack.c.bf16 %v2106_v32, %v6346_v49  ;;  %v693_v29 = vpop.f32.mrb[27].mxu0  ;;  %v6363_v63 = vld [vmem:[#allocation2 + $0xa1] sm:$0xff]  ;;  %v6377_v10 = vld [vmem:[#allocation2 + $0x99] sm:$0xff] }
 0x126   : > { %v7671_v31 = vsel %vm6354_vm14, 4294967295, %v7670_v31  ;;  %v793_v19 = vadd.f32 %v6043_v25, %v754_v5  ;;  %v755_v44 = vmul.f32 %v5100_v15, %v6038_v22  ;;  %vm6365_vm15 = vcmp.le.s32.totalorder %v1040_v28, 14  ;;  %v6374_v5 = vld [vmem:[#allocation2 + $0x57] sm:$0xff]  ;;  %v7790_v43 = vld [vmem:[#allocation49_spill] sm:$0xff] }
 0x127   : > { %7672 = vst [vmem:[#allocation68_spill] sm:$0xff] %v7671_v31  ;;  %7673 = vst [vmem:[#allocation69_spill] sm:$0xff] %v6359_v6  ;;  %v7674_v56 = vmov 0  ;;  %v791_v11 = vadd.f32 %v6043_v25, %v752_v39  ;;  %v753_v8 = vmul.f32 %v6038_v22, %v693_v29  ;;  %5126 = vmatmul.mubr.msk.bf16.gmra.mrb[48].mxu0 %vm7524_vm1, %v1544_v27  ;;  %5269 = vmatprep.mubr.msk.bf16.mxu1 %vm7524_vm1, %v1544_v27  ;;  %v977_v12 = vand.u32 15, %v6316_v35  ;;  %v6382_v29 = vld [vmem:[#allocation2 + $0x5f] sm:$0xff] }
 0x128   : > { %v7675_v56 = vsel %vm6365_vm15, 4294967295, %v7674_v56  ;;  %7676 = vst [vmem:[#allocation70_spill] sm:$0xff] %v6374_v5  ;;  %v991_v62 = vand.u32 15, %v6339_v17  ;;  %v825_v28 = vmax.f32 %v793_v19, 0.0  ;;  %v794_v32 = vadd.f32 %v6043_v25, %v755_v44  ;;  %5129 = vmatprep.mubr.msk.bf16.mxu0 %vm7524_vm1, %v1545_v50  ;;  %5270 = vmatmul.mubr.msk.bf16.gmra.mrb[16].mxu1 %vm7524_vm1, %v1545_v50  ;;  %7677 = vst [vmem:[#allocation71_spill] sm:$0xff] %v6382_v29 }
 0x129   : > { %vm6384_vm0 = vcmp.le.s32.totalorder %v1054_v9, 14  ;;  %v7678_v39 = vmov 0  ;;  %v1068_v27 = vand.u32 15, %v894_v24  ;;  %v823_v35 = vmax.f32 %v791_v11, 0.0  ;;  %v6394_v50 = vld [vmem:[#allocation2 + $0xb1] sm:$0xff] }
 0x12a   : > { %v7679_v39 = vsel %vm6384_vm0, 4294967295, %v7678_v39  ;;  %v792_v15 = vadd.f32 %v6043_v25, %v753_v8  ;;  %v896_v17 = vadd.s32 200, %v6054_v55  ;;  %v2108_v44 = vsel %vm6365_vm15, %v6363_v63, 0.0  ;;  %864 = vst.msk [vmem:[#allocation2 + $0xe8] sm:$0xff] %vm7524_vm1, %v825_v28  ;;  %v5103_v8 = vpop.f32.mrb[28].mxu0  ;;  %v1524_v6 = vld [vmem:[#allocation2 + $0xd0] sm:$0xff] }
 0x12b   : > { %7680 = vst [vmem:[#allocation72_spill] sm:$0xff] %v7679_v39  ;;  %v826_v19 = vmax.f32 %v794_v32, 0.0  ;;  %v898_v9 = vadd.s32 216, %v6054_v55  ;;  %v6398_v36 = vpack.c.bf16 %v2108_v44, %v6377_v10  ;;  %v2434_v24 = vsel %vm6354_vm14, %v6374_v5, 0.0  ;;  %862 = vst.msk [vmem:[#allocation2 + $0xd8] sm:$0xff] %vm7524_vm1, %v823_v35  ;;  %v1521_v40 = vld [vmem:[#allocation2 + $0xb8] sm:$0xff] }
 0x12c   : > { %v824_v11 = vmax.f32 %v792_v15, 0.0  ;;  %v885_v2 = vadd.s32 112, %v6054_v55  ;;  %v887_v28 = vadd.s32 128, %v6054_v55  ;;  %v6407_v32 = vpack.c.bf16 %v6382_v29, %v2434_v24  ;;  %v1522_v4 = vld [vmem:[#allocation2 + $0xc0] sm:$0xff]  ;;  %v6411_v5 = vld [vmem:[#allocation2 + $0xa9] sm:$0xff] }
 0x12d   : > { %7681 = vst [vmem:[#allocation73_spill] sm:$0xff] %v6398_v36  ;;  %865 = vst.msk [vmem:[#allocation2 + $0xf0] sm:$0xff] %vm7524_vm1, %v826_v19  ;;  %v758_v44 = vmul.f32 %v5103_v8, %v6038_v22  ;;  %v706_v36 = vpop.f32.mrb[29].mxu0  ;;  %vm6413_vm9 = vcmp.le.s32.totalorder %v1068_v27, 14  ;;  %v7683_v35 = vmov 0  ;;  %v2110_v15 = vsel %vm6384_vm0, %v6394_v50, 0.0 }
 0x12e   : > { %7682 = vst [vmem:[#allocation74_spill] sm:$0xff] %v6407_v32  ;;  %v7684_v35 = vsel %vm6413_vm9, 4294967295, %v7683_v35  ;;  %863 = vst.msk [vmem:[#allocation2 + $0xe0] sm:$0xff] %vm7524_vm1, %v824_v11  ;;  %v756_v24 = vmul.f32 %v6038_v22, %v706_v36  ;;  %v5104_v19 = vpop.f32.mrb[30].mxu0  ;;  %v1546_v32 = vpack.c.bf16 %v1522_v4, %v1521_v40  ;;  %v1523_v8 = vld [vmem:[#allocation2 + $0xc8] sm:$0xff]  ;;  %v1082_v29 = vand.u32 15, %v896_v17 }
 0x12f   : > { %7685 = vst [vmem:[#allocation75_spill] sm:$0xff] %v7684_v35  ;;  %v6423_v37 = vpack.c.bf16 %v2110_v15, %v6411_v5  ;;  %v797_v27 = vadd.f32 %v6043_v25, %v758_v44  ;;  %v759_v30 = vmul.f32 %v5104_v19, %v6038_v22  ;;  %v709_v3 = vpop.f32.mrb[31].mxu0  ;;  %v1547_v14 = vpack.c.bf16 %v1524_v6, %v1523_v8  ;;  %v6431_v11 = vld [vmem:[#allocation2 + $0xc1] sm:$0xff]  ;;  %v6441_v44 = vld [vmem:[#allocation2 + $0xb9] sm:$0xff] }
 0x130   : > { %vm6427_vm8 = vcmp.ge.s32.totalorder %v977_v12, 1  ;;  %v7687_v13 = vmov 0  ;;  %v1096_v36 = vand.u32 15, %v898_v9  ;;  %v795_v40 = vadd.f32 %v6043_v25, %v756_v24  ;;  %5130 = vmatmul.mubr.msk.bf16.gmra.mrb[52].mxu0 %vm7524_vm1, %v1546_v32  ;;  %5273 = vmatprep.mubr.msk.bf16.mxu1 %vm7524_vm1, %v1546_v32  ;;  %7692 = vst [vmem:[#allocation78_spill] sm:$0xff] %v6441_v44  ;;  %v6500_v35 = vld [vmem:[#allocation2 + $0x77] sm:$0xff]  ;;  %v6509_v39 = vld [vmem:[#allocation2 + $0x7f] sm:$0xff] }
 0x131   : > { %7686 = vst [vmem:[#allocation76_spill] sm:$0xff] %v6423_v37  ;;  %v7688_v13 = vsel %vm6427_vm8, 4294967295, %v7687_v13  ;;  %v757_v4 = vmul.f32 %v6038_v22, %v709_v3  ;;  %vm6437_vm0 = vcmp.ge.s32.totalorder %v991_v62, 1  ;;  %v7690_v17 = vmov 0  ;;  %5133 = vmatprep.mubr.msk.bf16.mxu0 %vm7524_vm1, %v1547_v14  ;;  %5274 = vmatmul.mubr.msk.bf16.gmra.mrb[20].mxu1 %vm7524_vm1, %v1547_v14  ;;  %v6459_v14 = vld [vmem:[#allocation2 + $0x67] sm:$0xff]  ;;  %7713 = vst [vmem:[#allocation88_spill] sm:$0xff] %v6500_v35 }
 0x132   : > { %7689 = vst [vmem:[#allocation77_spill] sm:$0xff] %v7688_v13  ;;  %v7691_v17 = vsel %vm6437_vm0, 4294967295, %v7690_v17  ;;  %v1005_v6 = vand.u32 15, %v885_v2  ;;  %v1019_v12 = vand.u32 15, %v887_v28  ;;  %v829_v15 = vmax.f32 %v797_v27, 0.0  ;;  %7696 = vst [vmem:[#allocation80_spill] sm:$0xff] %v6459_v14 }
 0x133   : > { %v798_v19 = vadd.f32 %v6043_v25, %v759_v30  ;;  %v6447_v22 = vadd.s32 144, %v6054_v55  ;;  %v900_v3 = vadd.s32 232, %v6054_v55  ;;  %v827_v62 = vmax.f32 %v795_v40, 0.0  ;;  %v6464_v24 = vld [vmem:[#allocation2 + $0xd1] sm:$0xff]  ;;  %v1527_v37 = vld [vmem:[#allocation2 + $0xe8] sm:$0xff]  ;;  %7715 = vst [vmem:[#allocation90_spill] sm:$0xff] %v6509_v39 }
 0x134   : > { %v796_v9 = vadd.f32 %v6043_v25, %v757_v4  ;;  %vm6451_vm15 = vcmp.le.s32.totalorder %v1082_v29, 14  ;;  %v7693_v2 = vmov 0  ;;  %v2112_v30 = vsel %vm6413_vm9, %v6431_v11, 0.0  ;;  %868 = vst.msk [vmem:[#allocation2 + $0x108] sm:$0xff] %vm7524_vm1, %v829_v15  ;;  %v1525_v27 = vld [vmem:[#allocation2 + $0xd8] sm:$0xff]  ;;  %v1528_v40 = vld [vmem:[#allocation2 + $0xf0] sm:$0xff] }
 0x135   : > { %v7694_v2 = vsel %vm6451_vm15, 4294967295, %v7693_v2  ;;  %v830_v28 = vmax.f32 %v798_v19, 0.0  ;;  %v6462_v32 = vadd.s32 160, %v6054_v55  ;;  %vm6466_vm13 = vcmp.le.s32.totalorder %v1096_v36, 14  ;;  %866 = vst.msk [vmem:[#allocation2 + $0xf8] sm:$0xff] %vm7524_vm1, %v827_v62  ;;  %v1526_v62 = vld [vmem:[#allocation2 + $0xe0] sm:$0xff] }
 0x136   : > { %7695 = vst [vmem:[#allocation79_spill] sm:$0xff] %v7694_v2  ;;  %v7697_v25 = vmov 0  ;;  %v6471_v29 = vpack.c.bf16 %v2112_v30, %v6441_v44  ;;  %v828_v8 = vmax.f32 %v796_v9, 0.0  ;;  %v7701_v4 = vand.u32 15, %v6249_v18  ;;  %v6488_v30 = vld [vmem:[#allocation2 + $0xc9] sm:$0xff]  ;;  %v6491_v9 = vld [vmem:[#allocation2 + $0xd9] sm:$0xff] }
 0x137   : > { %v7698_v25 = vsel %vm6466_vm13, 4294967295, %v7697_v25  ;;  %v7702_v15 = vmov 0  ;;  %vm6480_vm11 = vcmp.ge.s32.totalorder %v1005_v6, 1  ;;  %v7705_v19 = vmov 0  ;;  %7711 = vst [vmem:[#allocation86_spill] sm:$0xff] %v6488_v30  ;;  %869 = vst.msk [vmem:[#allocation2 + $0x110] sm:$0xff] %vm7524_vm1, %v830_v28 }
 0x138   : > { %7699 = vst [vmem:[#allocation81_spill] sm:$0xff] %v7698_v25  ;;  %7700 = vst [vmem:[#allocation82_spill] sm:$0xff] %v6471_v29  ;;  %vm6476_vm9 = vcmp.le.s32.totalorder %v7701_v4, 14  ;;  %v7706_v19 = vsel %vm6480_vm11, 4294967295, %v7705_v19  ;;  %vm6484_vm6 = vcmp.ge.s32.totalorder %v1019_v12, 1  ;;  %v7708_v36 = vmov 0 }
 0x139   : > { %v7703_v15 = vsel %vm6476_vm9, 4294967295, %v7702_v15  ;;  %7707 = vst [vmem:[#allocation84_spill] sm:$0xff] %v7706_v19  ;;  %v7709_v36 = vsel %vm6484_vm6, 4294967295, %v7708_v36  ;;  %v6493_v18 = vld [vmem:[#allocation2 + $0xe1] sm:$0xff]  ;;  %v1110_v4 = vand.u32 15, %v900_v3  ;;  %v902_v29 = vadd.s32 248, %v6054_v55 }
 0x13a   : > { %7704 = vst [vmem:[#allocation83_spill] sm:$0xff] %v7703_v15  ;;  %7710 = vst [vmem:[#allocation85_spill] sm:$0xff] %v7709_v36  ;;  %v2114_v6 = vsel %vm6451_vm15, %v6464_v24, 0.0  ;;  %v1548_v12 = vpack.c.bf16 %v1526_v62, %v1525_v27  ;;  %v1033_v28 = vand.u32 15, %v6447_v22  ;;  %v2116_v3 = vsel %vm6466_vm13, %v6493_v18, 0.0  ;;  %v6511_v2 = vld [vmem:[#allocation2 + $0x87] sm:$0xff] }
 0x13b   : > { %7712 = vst [vmem:[#allocation87_spill] sm:$0xff] %v6493_v18  ;;  %867 = vst.msk [vmem:[#allocation2 + $0x100] sm:$0xff] %vm7524_vm1, %v828_v8  ;;  %v6504_v44 = vpack.c.bf16 %v2114_v6, %v6488_v30  ;;  %v1549_v0 = vpack.c.bf16 %v1528_v40, %v1527_v37  ;;  %v6513_v8 = vld [vmem:[#allocation2 + $0x97] sm:$0xff]  ;;  %v1047_v27 = vand.u32 15, %v6462_v32  ;;  %v893_v62 = vadd.s32 176, %v6054_v55  ;;  %v6520_v6 = vld [vmem:[#allocation2 + $0x6f] sm:$0xff] }
 0x13c   : > { %7716 = vst [vmem:[#allocation91_spill] sm:$0xff] %v6511_v2  ;;  %7717 = vst [vmem:[#allocation92_spill] sm:$0xff] %v6513_v8  ;;  %v895_v22 = vadd.s32 192, %v6054_v55  ;;  %5134 = vmatmul.mubr.msk.bf16.gmra.mrb[56].mxu0 %vm7524_vm1, %v1548_v12  ;;  %5277 = vmatprep.mubr.msk.bf16.mxu1 %vm7524_vm1, %v1548_v12  ;;  %v897_v37 = vadd.s32 208, %v6054_v55  ;;  %v6526_v40 = vadd.s32 224, %v6054_v55  ;;  %v6529_v25 = vpack.c.bf16 %v2116_v3, %v6491_v9  ;;  %v6548_v13 = vld [vmem:[#allocation2 + $0x8f] sm:$0xff] }
 0x13d   : > { %7714 = vst [vmem:[#allocation89_spill] sm:$0xff] %v6504_v44  ;;  %v6522_v44 = vld [vmem:[#allocation2 + $0x9f] sm:$0xff]  ;;  %v2436_v32 = vsel %vm6427_vm8, %v6459_v14, 0.0  ;;  %5137 = vmatprep.mubr.msk.bf16.mxu0 %vm7524_vm1, %v1549_v0  ;;  %5278 = vmatmul.mubr.msk.bf16.gmra.mrb[24].mxu1 %vm7524_vm1, %v1549_v0  ;;  %vm6536_vm13 = vcmp.le.s32.totalorder %v1110_v4, 14  ;;  %v7720_v12 = vmov 0  ;;  %v1124_v18 = vand.u32 15, %v902_v29 }
 0x13e   : > { %7718 = vst [vmem:[#allocation93_spill] sm:$0xff] %v6522_v44  ;;  %7719 = vst [vmem:[#allocation94_spill] sm:$0xff] %v6529_v25  ;;  %v7721_v12 = vsel %vm6536_vm13, 4294967295, %v7720_v12  ;;  %v6541_v30 = vpack.c.bf16 %v6520_v6, %v2436_v32  ;;  %v2438_v3 = vsel %vm6437_vm0, %v6500_v35, 0.0  ;;  %v1352_v25 = vld [vmem:[#allocation2 + $0xf] sm:$0xff]  ;;  %v1447_v14 = vsel %vm6073_vm2, %v1351_v45, 0.0 }
 0x13f   : > { %7723 = vst [vmem:[#allocation96_spill] sm:$0xff] %v6548_v13  ;;  %v6551_v0 = vpack.c.bf16 %v6509_v39, %v2438_v3  ;;  %v2440_v29 = vsel %vm6480_vm11, %v6511_v2, 0.0  ;;  %v2442_v4 = vsel %vm6484_vm6, %v6513_v8, 0.0  ;;  %v1061_v32 = vand.u32 15, %v893_v62  ;;  %v2762_v3 = vld [vmem:[#allocation2 + $0x110] sm:$0xff]  ;;  %v1529_v8 = vld [vmem:[#allocation2 + $0xf8] sm:$0xff] }
 0x140   : > { %7722 = vst [vmem:[#allocation95_spill] sm:$0xff] %v6541_v30  ;;  %v6559_v30 = vld [vmem:[#allocation2 + $0xf1] sm:$0xff]  ;;  %v901_v35 = vadd.s32 240, %v6054_v55  ;;  %v6563_v45 = vpack.c.bf16 %v6548_v13, %v2440_v29  ;;  %v6566_v53 = vpack.c.bf16 %v6522_v44, %v2442_v4  ;;  %v1075_v39 = vand.u32 15, %v895_v22  ;;  %v6570_v19 = vld [vmem:[#allocation2 + $0xe9] sm:$0xff] }
 0x141   : > { %7724 = vst [vmem:[#allocation97_spill] sm:$0xff] %v6551_v0  ;;  %v6568_v0 = vld [vmem:[#allocation2 + $0xa7] sm:$0xff]  ;;  %v1089_v2 = vand.u32 15, %v897_v37  ;;  %v2118_v62 = vsel %vm6536_vm13, %v6559_v30, 0.0  ;;  %v3069_v55 = vsel %vm6476_vm9, %v6096_v38, 0.0  ;;  %v1483_v29 = vpack.c.bf16 %v1352_v25, %v1447_v14  ;;  %v6591_v13 = vld [vmem:[#allocation2 + $0xb7] sm:$0xff] }
 0x142   : > { %7725 = vst [vmem:[#allocation98_spill] sm:$0xff] %v6563_v45  ;;  %7726 = vst [vmem:[#allocation99_spill] sm:$0xff] %v6566_v53  ;;  %v1530_v36 = vld [vmem:[#allocation2 + $0x100] sm:$0xff]  ;;  %vm6580_vm1 = vcmp.le.s32.totalorder %v1124_v18, 14  ;;  %v7728_v53 = vmov 0  ;;  %v6585_v22 = vpack.c.bf16 %v2118_v62, %v6570_v19  ;;  %v2761_v45 = vld [vmem:[#allocation2 + $0x108] sm:$0xff] }
 0x143   : > { %7727 = vst [vmem:[#allocation100_spill] sm:$0xff] %v6568_v0  ;;  %v6578_v4 = vld [vmem:[#allocation2 + $0x101] sm:$0xff]  ;;  %v7729_v53 = vsel %vm6580_vm1, 4294967295, %v7728_v53  ;;  %v1550_v37 = vpack.c.bf16 %v1530_v36, %v1529_v8  ;;  %vm6587_vm2 = vcmp.ge.s32.totalorder %v1033_v28, 1  ;;  %v1103_v38 = vand.u32 15, %v6526_v40  ;;  %v6594_v14 = vld [vmem:[#allocation2 + $0xf9] sm:$0xff] }
 0x144   : > { %7730 = vst [vmem:[#allocation101_spill] sm:$0xff] %v7729_v53  ;;  %7731 = vst [vmem:[#allocation102_spill] sm:$0xff] %v6585_v22  ;;  %v2782_v25 = vpack.c.bf16 %v2762_v3, %v2761_v45  ;;  %vm6596_vm9 = vcmp.ge.s32.totalorder %v1047_v27, 1  ;;  %vm6600_vm6 = vcmp.ge.s32.totalorder %v1061_v32, 1  ;;  %v6604_v36 = vld [vmem:[#allocation2 + $0xbf] sm:$0xff]  ;;  %v6606_v28 = vld [vmem:[#allocation2 + $0xc7] sm:$0xff]  ;;  %v3104_v27 = vpack.c.bf16 %v3069_v55, %v6110_v52 }
 0x145   : > { %v6608_v8 = vld [vmem:[#allocation2 + $0xd7] sm:$0xff]  ;;  %v1117_v22 = vand.u32 15, %v901_v35  ;;  %vm7739_vm11 = vcmask 261120   ;;  %v6613_v40 = vld [vmem:[#allocation2 + $0xaf] sm:$0xff]  ;;  %vm6615_vm8 = vcmp.ge.s32.totalorder %v1075_v39, 1  ;;  %v6619_v45 = vld [vmem:[#allocation2 + $0xdf] sm:$0xff] }
 0x146   : > { %7738 = vst [vmem:[#allocation103_spill] sm:$0xff] %v6608_v8  ;;  %5138 = vmatmul.mubr.msk.bf16.gmra.mrb[60].mxu0 %vm7739_vm11, %v1550_v37  ;;  %vm7740_vm0 = vmmov %vm7739_vm11  ;;  %v2120_v3 = vsel %vm6580_vm1, %v6578_v4, 0.0  ;;  %v2444_v35 = vsel %vm6587_vm2, %v6568_v0, 0.0  ;;  %vm6629_vm13 = vcmp.ge.s32.totalorder %v1089_v2, 1  ;;  %v7744_v52 = vmov 0  ;;  %v6633_v39 = vld [vmem:[#allocation2 + $0xe7] sm:$0xff] }
 0x147   : > { %5281 = vmatprep.mubr.msk.bf16.mxu1 %vm7740_vm0, %v1550_v37  ;;  %vm7743_vm11 = vmmov %vm7740_vm0  ;;  %5145 = vmatprep.mubr.msk.bf16.mxu0 %vm7740_vm0, %v1483_v29  ;;  %v7745_v52 = vsel %vm6629_vm13, 4294967295, %v7744_v52  ;;  %v6635_v55 = vld [vmem:[#allocation2 + $0xf7] sm:$0xff]  ;;  %v6638_v37 = vpack.c.bf16 %v2120_v3, %v6594_v14  ;;  %v6641_v53 = vpack.c.bf16 %v6613_v40, %v2444_v35  ;;  %v6647_v2 = vld [vmem:[#allocation2 + $0xcf] sm:$0xff]  ;;  %v7749_v29 = vmov 0 }
 0x148   : > { %5282 = vmatmul.mubr.msk.bf16.gmra.mrb[28].mxu1 %vm7743_vm11, %v2782_v25  ;;  %v2446_v25 = vsel %vm6596_vm9, %v6591_v13, 0.0  ;;  %vm7748_vm11 = vmmov %vm7740_vm0  ;;  %vm6649_vm0 = vcmp.ge.s32.totalorder %v1103_v38, 1  ;;  %v6653_v15 = vld [vmem:[#allocation2 + $0xff] sm:$0xff]  ;;  %v6655_v0 = vld [vmem:[#allocation2 + $0x107] sm:$0xff]  ;;  %v2448_v35 = vsel %vm6600_vm6, %v6606_v28, 0.0  ;;  %v1449_v38 = vsel %vm6112_vm4, %v6077_v54, 0.0 }
 0x149   : > { %7746 = vst [vmem:[#allocation104_spill] sm:$0xff] %v6638_v37  ;;  %7747 = vst [vmem:[#allocation105_spill] sm:$0xff] %v6641_v53  ;;  %5289 = vmatprep.mubr.msk.bf16.mxu1 %vm7748_vm11, %v3104_v27  ;;  %v7750_v29 = vsel %vm6649_vm0, 4294967295, %v7749_v29  ;;  %v6658_v3 = vpack.c.bf16 %v6604_v36, %v2446_v25  ;;  %v2450_v27 = vsel %vm6615_vm8, %v6608_v8, 0.0  ;;  %vm6669_vm11 = vcmp.ge.s32.totalorder %v1117_v22, 1  ;;  %v6685_v59 = vld [vmem:[#allocation2 + $0xef] sm:$0xff] }
 0x14a   : > { %7751 = vst [vmem:[#allocation106_spill] sm:$0xff] %v6653_v15  ;;  %7752 = vst [vmem:[#allocation107_spill] sm:$0xff] %v6655_v0  ;;  %v7754_v53 = vmov 0  ;;  %v6674_v37 = vpack.c.bf16 %v6647_v2, %v2448_v35  ;;  %v6677_v25 = vpack.c.bf16 %v6619_v45, %v2450_v27  ;;  %v3071_v8 = vsel %vm6090_vm3, %v6143_v21, 0.0  ;;  %v6696_v27 = vld [vmem:[#allocation2 + $0x10f] sm:$0xff] }
 0x14b   : > { %7753 = vst [vmem:[#allocation108_spill] sm:$0xff] %v6658_v3  ;;  %v7755_v53 = vsel %vm6669_vm11, 4294967295, %v7754_v53  ;;  %v1451_v3 = vsel %vm6195_vm7, %v6116_v60, 0.0  ;;  %v2452_v54 = vsel %vm6629_vm13, %v6633_v39, 0.0  ;;  %v2454_v22 = vsel %vm6649_vm0, %v6635_v55, 0.0  ;;  %7759 = vst [vmem:[#allocation112_spill] sm:$0xff] %v6696_v27 }
 0x14c   : > { %7756 = vst [vmem:[#allocation109_spill] sm:$0xff] %v7755_v53  ;;  %7757 = vst [vmem:[#allocation110_spill] sm:$0xff] %v6674_v37  ;;  %v3073_v35 = vsel %vm6118_vm5, %v6180_v48, 0.0  ;;  %v6699_v60 = vpack.c.bf16 %v6685_v59, %v2452_v54  ;;  %v6702_v21 = vpack.c.bf16 %v6653_v15, %v2454_v22  ;;  %v2456_v26 = vsel %vm6669_vm11, %v6655_v0, 0.0  ;;  %v5705_v54 = vld [vmem:[%s7421_s6 + $0x68] sm:$0xff]   ;;  %v7796_v15 = vld [vmem:[#allocation52_spill] sm:$0xff] }
 0x14d   : > { %7758 = vst [vmem:[#allocation111_spill] sm:$0xff] %v6677_v25  ;;  %v1484_v25 = vpack.c.bf16 %v6101_v42, %v1449_v38  ;;  %v6709_v37 = vpack.c.bf16 %v6696_v27, %v2456_v26  ;;  %v1485_v1 = vpack.c.bf16 %v6141_v20, %v1451_v3  ;;  %v3105_v48 = vpack.c.bf16 %v3071_v8, %v6158_v47  ;;  %v5707_v47 = vld [vmem:[%s7421_s6 + $0x28] sm:$0xff]   ;;  %v6735_v8 = vld [vmem:[#allocation2 + $0x111] sm:$0xff] }
 0x14e   : > { %7760 = vst [vmem:[#allocation113_spill] sm:$0xff] %v6699_v60  ;;  %7761 = vst [vmem:[#allocation114_spill] sm:$0xff] %v6702_v21  ;;  %vm7763_vm5 = vcmask 261120   ;;  %v3106_v22 = vpack.c.bf16 %v3073_v35, %v6187_v7  ;;  %v1453_v21 = vsel %vm6302_vm12, %v6189_v23, 0.0  ;;  %v1455_v26 = vsel %vm6354_vm14, %v6306_v33, 0.0  ;;  %v7783_v27 = vld [vmem:[#allocation79_spill] sm:$0xff] }
 0x14f   : > { %7762 = vst [vmem:[#allocation115_spill] sm:$0xff] %v6709_v37  ;;  %5146 = vmatmul.mubr.msk.bf16.vlgmr.msra.gmra.mrb[32].mxu0 %vm7763_vm5, %v1484_v25  ;;  %v4060_v42 = vsel %vm6257_vm10, %v6329_v34, 0.0  ;;  %vm7764_vm3 = vmmov %vm7763_vm5  ;;  %vm7766_vm7 = vnez %v7630_v46  ;;  %vm7768_vm14 = vnez %v7657_v51  ;;  %vm7769_vm12 = vnez %v7666_v58  ;;  %v7780_v46 = vld [vmem:[#allocation87_spill] sm:$0xff]  ;;  %v7828_v51 = vld [vmem:[#allocation92_spill] sm:$0xff] }
 0x150   : > { %5149 = vmatprep.mubr.msk.bf16.mxu0 %vm7764_vm3, %v1485_v1  ;;  %vm7765_vm5 = vmmov %vm7764_vm3  ;;  %v3075_v7 = vsel %vm7766_vm7, %v6211_v41, 0.0  ;;  %v6738_v3 = vpack.c.bf16 %v4060_v42, %v6346_v49  ;;  %v4062_v38 = vsel %vm7768_vm14, %v6363_v63, 0.0  ;;  %v4064_v25 = vsel %vm7769_vm12, %v6394_v50, 0.0  ;;  %v6748_v1 = vld [vmem:[#allocation2 + $0x109] sm:$0xff]  ;;  %v7773_v42 = vld [vmem:[#allocation72_spill] sm:$0xff] }
 0x151   : > { %5290 = vmatmul.mubr.msk.bf16.vlgmr.msra.gmra.mrb[0].mxu1 %vm7765_vm5, %v3105_v48  ;;  %v6751_v41 = vpack.c.bf16 %v4062_v38, %v6377_v10  ;;  %v6754_v35 = vpack.c.bf16 %v4064_v25, %v6411_v5  ;;  %vm7772_vm5 = vnez %v7675_v56  ;;  %vm7774_vm7 = vnez %v7773_v42  ;;  %v7776_v38 = vld [vmem:[#allocation78_spill] sm:$0xff]  ;;  %v7781_v37 = vld [vmem:[#allocation75_spill] sm:$0xff]  ;;  %v7829_v58 = vld [vmem:[#allocation100_spill] sm:$0xff] }
 0x152   : > { %7767 = vst [vmem:[#allocation116_spill] sm:$0xff] %v6738_v3  ;;  %5322 = vmatpush3.bf16.msra.mxu1 %v6139_v61  ;;  %5293 = vmatprep.mubr.msk.bf16.mxu1 %vm7764_vm3, %v3106_v22  ;;  %v4066_v48 = vsel %vm7772_vm5, %v6431_v11, 0.0  ;;  %v4068_v3 = vsel %vm7774_vm7, %v6464_v24, 0.0  ;;  %v7775_v61 = vld [vmem:[#allocation44_spill] sm:$0xff]  ;;  %v6766_v22 = vld [vmem:[%s7421_s6 + $0x70] sm:$0xff]   ;;  %v7778_v25 = vld [vmem:[#allocation86_spill] sm:$0xff]  ;;  %vm7782_vm3 = vnez %v7781_v37  ;;  %vm7788_vm1 = vnez %v7721_v12 }
 0x153   : > { %7770 = vst [vmem:[#allocation117_spill] sm:$0xff] %v6751_v41  ;;  %7771 = vst [vmem:[#allocation118_spill] sm:$0xff] %v6754_v35  ;;  %5323 = vmatprep.subr.bf16.mxu1 %v5705_v54  ;;  %5178 = vmatpush3.bf16.msra.mxu0 %v7775_v61  ;;  %v6769_v41 = vpack.c.bf16 %v4066_v48, %v7776_v38  ;;  %v6772_v35 = vpack.c.bf16 %v4068_v3, %v7778_v25  ;;  %v4070_v60 = vsel %vm7782_vm3, %v7780_v46, 0.0  ;;  %v6783_v61 = vld [vmem:[%s7421_s6 + $0x30] sm:$0xff]  }
 0x154   : > { %v4072_v0 = vsel %vm6451_vm15, %v6559_v30, 0.0  ;;  %5179 = vmatprep.subr.bf16.mxu0 %v5707_v47  ;;  %v6786_v48 = vpack.c.bf16 %v4070_v60, %v6491_v9  ;;  %v4076_v31 = vsel %vm7788_vm1, %v6735_v8, 0.0  ;;  %vm7791_vm11 = vnez %v7790_v43  ;;  %v7798_v43 = vld [vmem:[#allocation56_spill] sm:$0xff]  ;;  %v7905_v32 = vld [vmem:[#allocation107_spill] sm:$0xff] }
 0x155   : > { %7777 = vst [vmem:[#allocation72_spill] sm:$0xff] %v6769_v41  ;;  %7779 = vst [vmem:[#allocation44_spill] sm:$0xff] %v6772_v35  ;;  %v6789_v3 = vpack.c.bf16 %v4072_v0, %v6570_v19  ;;  %v7786_v35 = vld [vmem:[#allocation81_spill] sm:$0xff]  ;;  %v3077_v33 = vsel %vm7791_vm11, %v7789_v16, 0.0  ;;  %v6804_v60 = vpack.c.bf16 %v4076_v31, %v6748_v1  ;;  %v7794_v0 = vld [vmem:[#allocation48_spill] sm:$0xff]  ;;  %v3107_v53 = vpack.c.bf16 %v3075_v7, %v7796_v15 }
 0x156   : > { %7784 = vst [vmem:[#allocation78_spill] sm:$0xff] %v6786_v48  ;;  %vm7787_vm4 = vnez %v7786_v35  ;;  %5324 = vmatpush3.bf16.msra.mxu1 %v5705_v54  ;;  %v7795_v48 = vld [vmem:[#allocation65_spill] sm:$0xff]  ;;  %vm7797_vm1 = vcmask 261120   ;;  %v3108_v16 = vpack.c.bf16 %v3077_v33, %v7798_v43  ;;  %v7802_v31 = vld [vmem:[#allocation70_spill] sm:$0xff]  ;;  %v7805_v15 = vld [vmem:[#allocation80_spill] sm:$0xff]  ;;  %vm7806_vm15 = vnez %v7691_v17 }
 0x157   : > { %7785 = vst [vmem:[#allocation86_spill] sm:$0xff] %v6789_v3  ;;  %v4074_v41 = vsel %vm7787_vm4, %v6578_v4, 0.0  ;;  %7793 = vst [vmem:[#allocation75_spill] sm:$0xff] %v6804_v60  ;;  %v1486_v3 = vpack.c.bf16 %v7794_v0, %v1453_v21  ;;  %v1487_v20 = vpack.c.bf16 %v7795_v48, %v1455_v26  ;;  %5180 = vmatpush3.bf16.msra.mxu0 %v5707_v47  ;;  %5357 = vmatprep.subr.bf16.mxu1 %v6766_v22  ;;  %v7803_v21 = vld [vmem:[#allocation77_spill] sm:$0xff]  ;;  %v7808_v7 = vld [vmem:[#allocation55_spill] sm:$0xff] }
 0x158   : > { %v6801_v23 = vpack.c.bf16 %v4074_v41, %v6594_v14  ;;  %5213 = vmatprep.subr.bf16.mxu0 %v6783_v61  ;;  %vm7799_vm11 = vmmov %vm7797_vm1  ;;  %vm7804_vm13 = vnez %v7803_v21  ;;  %v1459_v26 = vsel %vm7806_vm15, %v7805_v15, 0.0  ;;  %v7807_v47 = vld [vmem:[#allocation57_spill] sm:$0xff]  ;;  %v7811_v41 = vld [vmem:[#allocation71_spill] sm:$0xff]  ;;  %v1469_v56 = vsel %vm6600_vm6, %v6591_v13, 0.0 }
 0x159   : > { %5150 = vmatmul.mubr.msk.bf16.gmra.mrb[36].mxu0 %vm7797_vm1, %v1486_v3  ;;  %vm7800_vm4 = vmmov %vm7797_vm1  ;;  %v1457_v54 = vsel %vm7804_vm13, %v7802_v31, 0.0  ;;  %v7810_v33 = vld [vmem:[#allocation61_spill] sm:$0xff]  ;;  %v1489_v3 = vpack.c.bf16 %v6520_v6, %v1459_v26  ;;  %v1494_v42 = vpack.c.bf16 %v6604_v36, %v1469_v56  ;;  %v3429_v44 = vsel %vm6615_vm8, %v6633_v39, 0.0 }
 0x15a   : > { %7792 = vst [vmem:[#allocation87_spill] sm:$0xff] %v6801_v23  ;;  %5153 = vmatprep.mubr.msk.bf16.mxu0 %vm7799_vm11, %v1487_v20  ;;  %5294 = vmatmul.mubr.msk.bf16.gmra.mrb[4].mxu1 %vm7800_vm4, %v3107_v53  ;;  %vm7801_vm0 = vmmov %vm7797_vm1  ;;  %vm7809_vm1 = vnez %v7808_v7  ;;  %v3081_v20 = vsel %vm6257_vm10, %v7810_v33, 0.0  ;;  %v1488_v53 = vpack.c.bf16 %v7811_v41, %v1457_v54  ;;  %v7814_v23 = vld [vmem:[#allocation64_spill] sm:$0xff]  ;;  %v7820_v33 = vld [vmem:[#allocation91_spill] sm:$0xff] }
 0x15b   : > { %5297 = vmatprep.mubr.msk.bf16.mxu1 %vm7801_vm0, %v3108_v16  ;;  %v3079_v43 = vsel %vm7809_vm1, %v7807_v47, 0.0  ;;  %v7812_v16 = vld [vmem:[#allocation59_spill] sm:$0xff]  ;;  %vm7813_vm4 = vmmov %vm7801_vm0  ;;  %v3110_v21 = vpack.c.bf16 %v3081_v20, %v7814_v23  ;;  %v7817_v47 = vld [vmem:[#allocation88_spill] sm:$0xff]  ;;  %v3085_v23 = vsel %vm7769_vm12, %v6363_v63, 0.0  ;;  %v1465_v63 = vsel %vm6587_vm2, %v7828_v51, 0.0 }
 0x15c   : > { %v3109_v60 = vpack.c.bf16 %v3079_v43, %v7812_v16  ;;  %vm7815_vm11 = vmmov %vm7801_vm0  ;;  %v7818_v7 = vld [vmem:[#allocation84_spill] sm:$0xff]  ;;  %v7821_v54 = vld [vmem:[#allocation85_spill] sm:$0xff]  ;;  %v3083_v43 = vsel %vm7768_vm14, %v6329_v34, 0.0  ;;  %v3112_v16 = vpack.c.bf16 %v3085_v23, %v6377_v10  ;;  %v1467_v34 = vsel %vm6596_vm9, %v7829_v58, 0.0 }
 0x15d   : > { %vm7816_vm15 = vmmov %vm7801_vm0  ;;  %vm7819_vm1 = vnez %v7818_v7  ;;  %vm7822_vm10 = vnez %v7821_v54  ;;  %v7823_v20 = vld [vmem:[#allocation90_spill] sm:$0xff]  ;;  %v3089_v10 = vsel %vm7774_vm7, %v6431_v11, 0.0  ;;  %vm7835_vm7 = vnez %v7783_v27 }
 0x15e   : > { %v1461_v57 = vsel %vm7819_vm1, %v7817_v47, 0.0  ;;  %v1463_v26 = vsel %vm7822_vm10, %v7820_v33, 0.0  ;;  %vm7831_vm12 = vmmov %vm7801_vm0  ;;  %v3093_v11 = vsel %vm7835_vm7, %v7780_v46, 0.0  ;;  %v3423_v7 = vsel %vm6587_vm2, %v6591_v13, 0.0 }
 0x15f   : > { %vm7832_vm14 = vmmov %vm7801_vm0  ;;  %v3425_v54 = vsel %vm6596_vm9, %v6606_v28, 0.0 }
 0x160   : > { %vm7844_vm7 = vmmov %vm7801_vm0 }
 0x161   : > { %5154 = vmatmul.mubr.msk.bf16.gmra.mrb[40].mxu0 %vm7813_vm4, %v1488_v53  ;;  %v7824_v53 = vld [vmem:[#allocation96_spill] sm:$0xff]  ;;  %vm7826_vm4 = vmmov %vm7801_vm0 }
 0x162   : > { %5157 = vmatprep.mubr.msk.bf16.mxu0 %vm7801_vm0, %v1489_v3  ;;  %5298 = vmatmul.mubr.msk.bf16.gmra.mrb[8].mxu1 %vm7815_vm11, %v3109_v60  ;;  %v1490_v60 = vpack.c.bf16 %v7823_v20, %v1461_v57  ;;  %v3111_v3 = vpack.c.bf16 %v3083_v43, %v6346_v49  ;;  %vm7827_vm11 = vmmov %vm7801_vm0  ;;  %v3087_v49 = vsel %vm7772_vm5, %v6394_v50, 0.0  ;;  %v7830_v57 = vld [vmem:[#allocation93_spill] sm:$0xff]  ;;  %v1493_v43 = vpack.c.bf16 %v6613_v40, %v1467_v34 }
 0x163   : > { %5301 = vmatprep.mubr.msk.bf16.mxu1 %vm7816_vm15, %v3110_v21  ;;  %v1491_v21 = vpack.c.bf16 %v7824_v53, %v1463_v26  ;;  %vm7825_vm15 = vmmov %vm7801_vm0  ;;  %v1492_v26 = vpack.c.bf16 %v7830_v57, %v1465_v63  ;;  %v3113_v23 = vpack.c.bf16 %v3087_v49, %v6411_v5  ;;  %v1471_v50 = vsel %vm6615_vm8, %v6606_v28, 0.0  ;;  %v7849_v49 = vld [vmem:[#allocation83_spill] sm:$0xff] }
 0x164   : > { %v3091_v5 = vsel %vm7782_vm3, %v6464_v24, 0.0  ;;  %vm7836_vm5 = vmmov %vm7801_vm0  ;;  %v7839_v24 = vld [vmem:[#allocation103_spill] sm:$0xff]  ;;  %vm7840_vm3 = vnez %v7745_v52  ;;  %v3453_v28 = vpack.c.bf16 %v6685_v59, %v3429_v44  ;;  %v3404_v52 = vld [vmem:[#allocation2 + $0x11f] sm:$0xff] }
 0x165   : > { %v1473_v46 = vsel %vm7840_vm3, %v7839_v24, 0.0  ;;  %v3427_v13 = vsel %vm6600_vm6, %v7839_v24, 0.0  ;;  %vm7900_vm2 = vmmov %vm7801_vm0  ;;  %v3431_v62 = vsel %vm7840_vm3, %v6635_v55, 0.0  ;;  %v7906_v24 = vld [vmem:[#allocation94_spill] sm:$0xff]  ;;  %v7943_v44 = vld [vmem:[#allocation108_spill] sm:$0xff] }
 0x166   : > { %v3452_v18 = vpack.c.bf16 %v6619_v45, %v3427_v13  ;;  %vm7902_vm9 = vmmov %vm7801_vm0 }
 0x167   : > { %vm7907_vm6 = vmmov %vm7801_vm0 }
 0x168   : > { %vm7910_vm8 = vmmov %vm7801_vm0 }
 0x169   : > { %5158 = vmatmul.mubr.msk.bf16.gmra.mrb[44].mxu0 %vm7825_vm15, %v1490_v60  ;;  %v3114_v60 = vpack.c.bf16 %v3089_v10, %v7776_v38  ;;  %vm7833_vm15 = vmmov %vm7801_vm0  ;;  %v1495_v38 = vpack.c.bf16 %v6647_v2, %v1471_v50 }
 0x16a   : > { %5161 = vmatprep.mubr.msk.bf16.mxu0 %vm7826_vm4, %v1491_v21  ;;  %5302 = vmatmul.mubr.msk.bf16.gmra.mrb[12].mxu1 %vm7801_vm0, %v3111_v3  ;;  %vm7834_vm4 = vmmov %vm7801_vm0  ;;  %v3115_v21 = vpack.c.bf16 %v3091_v5, %v7778_v25  ;;  %v3116_v3 = vpack.c.bf16 %v3093_v11, %v6491_v9  ;;  %v1496_v25 = vpack.c.bf16 %v6619_v45, %v1473_v46  ;;  %v7857_v11 = vld [vmem:[#allocation40_spill] sm:$0xff]  ;;  %v7864_v46 = vld [vmem:[#allocation47_spill] sm:$0xff] }
 0x16b   : > { %5305 = vmatprep.mubr.msk.bf16.mxu1 %vm7827_vm11, %v3112_v16  ;;  %vm7837_vm11 = vmmov %vm7801_vm0 }
 0x16c   : > { %vm7913_vm3 = vmmov %vm7801_vm0 }
 0x171   : > { %5162 = vmatmul.mubr.msk.bf16.gmra.mrb[48].mxu0 %vm7831_vm12, %v1492_v26  ;;  %vm7838_vm12 = vmmov %vm7801_vm0 }
 0x172   : > { %5165 = vmatprep.mubr.msk.bf16.mxu0 %vm7832_vm14, %v1493_v43  ;;  %5306 = vmatmul.mubr.msk.bf16.gmra.mrb[16].mxu1 %vm7833_vm15, %v3113_v23  ;;  %vm7841_vm14 = vnez %v7750_v29  ;;  %vm7842_vm15 = vnez %v7786_v35  ;;  %v1994_v35 = vld [vmem:[#allocation2 + $0x11] sm:$0xff] }
 0x173   : > { %5309 = vmatprep.mubr.msk.bf16.mxu1 %vm7834_vm4, %v3114_v60  ;;  %v1475_v37 = vsel %vm7841_vm14, %v6633_v39, 0.0  ;;  %v3095_v27 = vsel %vm7842_vm15, %v6559_v30, 0.0  ;;  %vm7843_vm4 = vnez %v7721_v12  ;;  %v7847_v30 = vld [vmem:[#allocation109_spill] sm:$0xff]  ;;  %vm7850_vm15 = vnez %v7849_v49  ;;  %v7853_v43 = vld [vmem:[#allocation35_spill] sm:$0xff]  ;;  %v7855_v60 = vld [vmem:[#allocation106_spill] sm:$0xff] }
 0x174   : > { %v3097_v9 = vsel %vm7843_vm4, %v6578_v4, 0.0  ;;  %v1497_v16 = vpack.c.bf16 %v6685_v59, %v1475_v37  ;;  %v3117_v63 = vpack.c.bf16 %v3095_v27, %v6570_v19  ;;  %v1993_v4 = vld [vmem:[#allocation2 + $0x9] sm:$0xff]  ;;  %v2090_v10 = vsel %vm7850_vm15, %v1994_v35, 0.0  ;;  %v7851_v19 = vld [vmem:[#allocation101_spill] sm:$0xff]  ;;  %vm7859_vm15 = vmmov %vm7801_vm0 }
 0x175   : > { %v3118_v34 = vpack.c.bf16 %v3097_v9, %v6594_v14  ;;  %vm7852_vm4 = vnez %v7851_v19  ;;  %v5714_v14 = vld [vmem:[#allocation2 + $0x27] sm:$0xff]  ;;  %v2125_v50 = vpack.c.bf16 %v2090_v10, %v1993_v4  ;;  %v5709_v27 = vld [vmem:[%s7421_s6 + $0x78] sm:$0xff]   ;;  %v3433_v45 = vsel %vm7841_vm14, %v7905_v32, 0.0  ;;  %v3711_v29 = vld [vmem:[#allocation2 + $0x30] sm:$0xff] }
 0x176   : > { %v3099_v26 = vsel %vm7852_vm4, %v6735_v8, 0.0  ;;  %v7860_v8 = vld [vmem:[#allocation46_spill] sm:$0xff]  ;;  %v7866_v9 = vld [vmem:[#allocation41_spill] sm:$0xff]  ;;  %v7873_v35 = vld [vmem:[#allocation68_spill] sm:$0xff]  ;;  %v3454_v39 = vpack.c.bf16 %v7855_v60, %v3431_v62 }
 0x177   : > { %v3119_v5 = vpack.c.bf16 %v3099_v26, %v6748_v1  ;;  %v7877_v10 = vld [vmem:[#allocation53_spill] sm:$0xff]  ;;  %v7908_v59 = vld [vmem:[#allocation112_spill] sm:$0xff]  ;;  %vm7915_vm14 = vmmov %vm7801_vm0 }
 0x178   : > { %v3734_v62 = vld [vmem:[#allocation2 + $0xe8] sm:$0xff] }
 0x179   : > { %5166 = vmatmul.mubr.msk.bf16.gmra.mrb[52].mxu0 %vm7836_vm5, %v1494_v42  ;;  %vm7845_vm5 = vmmov %vm7801_vm0  ;;  %v7947_v32 = vld [vmem:[#allocation110_spill] sm:$0xff] }
 0x17a   : > { %5169 = vmatprep.mubr.msk.bf16.mxu0 %vm7801_vm0, %v1495_v38  ;;  %5310 = vmatmul.mubr.msk.bf16.gmra.mrb[20].mxu1 %vm7837_vm11, %v3115_v21  ;;  %vm7846_vm11 = vmmov %vm7801_vm0  ;;  %v7861_v38 = vld [vmem:[#allocation37_spill] sm:$0xff] }
 0x17b   : > { %5313 = vmatprep.mubr.msk.bf16.mxu1 %vm7838_vm12, %v3116_v3  ;;  %vm7848_vm12 = vnez %v7847_v30  ;;  %vm7862_vm4 = vnez %v7861_v38  ;;  %v7863_v3 = vld [vmem:[#allocation63_spill] sm:$0xff]  ;;  %v3714_v30 = vld [vmem:[#allocation2 + $0x48] sm:$0xff] }
 0x17c   : > { %v1477_v12 = vsel %vm7848_vm12, %v6635_v55, 0.0  ;;  %v3407_v21 = vsel %vm7862_vm4, %v7860_v8, 0.0  ;;  %vm7870_vm4 = vmmov %vm7801_vm0  ;;  %v7914_v38 = vld [vmem:[#allocation39_spill] sm:$0xff] }
 0x17d   : > { %v1498_v56 = vpack.c.bf16 %v7855_v60, %v1477_v12  ;;  %v3442_v1 = vpack.c.bf16 %v7794_v0, %v3407_v21  ;;  %v7871_v0 = vld [vmem:[#allocation62_spill] sm:$0xff]  ;;  %v3713_v21 = vld [vmem:[#allocation2 + $0x40] sm:$0xff] }
 0x17e   : > { %v3710_v60 = vld [vmem:[#allocation2 + $0x28] sm:$0xff] }
 0x17f   : > { %v3746_v8 = vpack.c.bf16 %v3711_v29, %v3710_v60  ;;  %v7955_v29 = vld [vmem:[#allocation114_spill] sm:$0xff]  ;;  %v3741_v60 = vld [vmem:[#allocation2 + $0x120] sm:$0xff] }
 0x181   : > { %5170 = vmatmul.mubr.msk.bf16.gmra.mrb[56].mxu0 %vm7844_vm7, %v1496_v25  ;;  %vm7854_vm7 = vnez %v7853_v43  ;;  %v7884_v43 = vld [vmem:[#allocation60_spill] sm:$0xff] }
 0x182   : > { %5173 = vmatprep.mubr.msk.bf16.mxu0 %vm7845_vm5, %v1497_v16  ;;  %5314 = vmatmul.mubr.msk.bf16.gmra.mrb[24].mxu1 %vm7801_vm0, %v3117_v63  ;;  %v3405_v23 = vsel %vm7854_vm7, %v5714_v14, 0.0  ;;  %vm7856_vm5 = vmmov %vm7801_vm0  ;;  %vm7865_vm7 = vnez %v7864_v46  ;;  %v5711_v16 = vld [vmem:[%s7421_s6 + $0x38] sm:$0xff]   ;;  %v7868_v63 = vld [vmem:[#allocation45_spill] sm:$0xff] }
 0x183   : > { %5317 = vmatprep.mubr.msk.bf16.mxu1 %vm7846_vm11, %v3118_v34  ;;  %v3441_v42 = vpack.c.bf16 %v7857_v11, %v3405_v23  ;;  %vm7858_vm11 = vmmov %vm7801_vm0  ;;  %v3409_v37 = vsel %vm7865_vm7, %v7863_v3, 0.0  ;;  %vm7874_vm7 = vnez %v7873_v35  ;;  %v7882_v14 = vld [vmem:[#allocation58_spill] sm:$0xff]  ;;  %v7890_v23 = vld [vmem:[#allocation69_spill] sm:$0xff] }
 0x184   : > { %v3443_v25 = vpack.c.bf16 %v7795_v48, %v3409_v37  ;;  %v6958_v48 = vld [vmem:[%s7421_s6 + $0x80] sm:$0xff]   ;;  %v3413_v12 = vsel %vm7874_vm7, %v7805_v15, 0.0  ;;  %v3415_v15 = vsel %vm7804_vm13, %v7817_v47, 0.0  ;;  %vm7883_vm7 = vmmov %vm7801_vm0  ;;  %v3419_v47 = vsel %vm7819_vm1, %v7828_v51, 0.0  ;;  %v3715_v3 = vld [vmem:[#allocation2 + $0x50] sm:$0xff] }
 0x185   : > { %v3445_v4 = vpack.c.bf16 %v6520_v6, %v3413_v12  ;;  %v3446_v26 = vpack.c.bf16 %v7823_v20, %v3415_v15  ;;  %v7888_v20 = vld [vmem:[#allocation66_spill] sm:$0xff]  ;;  %vm7889_vm13 = vmmov %vm7801_vm0  ;;  %v3450_v51 = vpack.c.bf16 %v6604_v36, %v3423_v7  ;;  %v3712_v46 = vld [vmem:[#allocation2 + $0x38] sm:$0xff] }
 0x186   : > { %vm7894_vm1 = vmmov %vm7801_vm0  ;;  %v7899_v36 = vld [vmem:[#allocation82_spill] sm:$0xff]  ;;  %v3747_v37 = vpack.c.bf16 %v3713_v21, %v3712_v46  ;;  %v7924_v12 = vld [vmem:[#allocation67_spill] sm:$0xff] }
 0x187   : > { %v3718_v35 = vld [vmem:[#allocation2 + $0x68] sm:$0xff]  ;;  %v3729_v7 = vld [vmem:[#allocation2 + $0xc0] sm:$0xff] }
 0x188   : > { %v3722_v15 = vld [vmem:[#allocation2 + $0x88] sm:$0xff] }
 0x189   : > { %5174 = vmatmul.mubr.msk.bf16.gmra.mrb[60].mxu0 %vm7856_vm5, %v1498_v56  ;;  %vm7867_vm5 = vmmov %vm7801_vm0  ;;  %v3455_v56 = vpack.c.bf16 %v7908_v59, %v3433_v45  ;;  %v3739_v59 = vld [vmem:[#allocation2 + $0x110] sm:$0xff] }
 0x18a   : > { %5181 = vmatprep.mubr.msk.bf16.mxu0 %vm7801_vm0, %v2125_v50  ;;  %5318 = vmatmul.mubr.msk.bf16.gmra.mrb[28].mxu1 %vm7858_vm11, %v3119_v5  ;;  %vm7872_vm11 = vnez %v7871_v0  ;;  %v7909_v50 = vld [vmem:[#allocation102_spill] sm:$0xff]  ;;  %v3403_v5 = vld [vmem:[#allocation2 + $0x117] sm:$0xff] }
 0x18b   : > { %5325 = vmatprep.mubr.msk.bf16.mxu1 %vm7859_vm15, %v3441_v42  ;;  %vm7869_vm15 = vmmov %vm7801_vm0  ;;  %v3411_v34 = vsel %vm7872_vm11, %v7802_v31, 0.0  ;;  %vm7881_vm11 = vnez %v7691_v17  ;;  %v3421_v17 = vsel %vm7822_vm10, %v7829_v58, 0.0  ;;  %v7893_v58 = vld [vmem:[#allocation73_spill] sm:$0xff]  ;;  %v3435_v55 = vsel %vm7848_vm12, %v3403_v5, 0.0  ;;  %v7912_v42 = vld [vmem:[#allocation104_spill] sm:$0xff] }
 0x18c   : > { %vm7896_vm10 = vmmov %vm7801_vm0  ;;  %v3456_v11 = vpack.c.bf16 %v3404_v52, %v3435_v55  ;;  %v3716_v0 = vld [vmem:[#allocation2 + $0x58] sm:$0xff]  ;;  %v3738_v5 = vld [vmem:[#allocation2 + $0x108] sm:$0xff] }
 0x18d   : > { %vm7919_vm12 = vmmov %vm7801_vm0  ;;  %v7953_v52 = vld [vmem:[#allocation113_spill] sm:$0xff]  ;;  %v3760_v55 = vpack.c.bf16 %v3739_v59, %v3738_v5  ;;  %v4015_v21 = vld [vmem:[#allocation2 + $0x29] sm:$0xff] }
 0x18e   : > { %v8004_v59 = vld [vmem:[#allocation10_spill] sm:$0xff]  ;;  %v8007_v5 = vld [vmem:[#allocation13_spill] sm:$0xff] }
 0x191   : > { %5182 = vmatmul.mubr.msk.bf16.vlgmr.msra.gmra.mrb[32].mxu0 %vm7867_vm5, %v7866_v9  ;;  %vm7876_vm5 = vmmov %vm7801_vm0  ;;  %v3748_v9 = vpack.c.bf16 %v3715_v3, %v3714_v30  ;;  %v7959_v3 = vld [vmem:[#allocation115_spill] sm:$0xff] }
 0x192   : > { %5185 = vmatprep.mubr.msk.bf16.mxu0 %vm7869_vm15, %v7868_v63  ;;  %5326 = vmatmul.mubr.msk.bf16.vlgmr.msra.gmra.mrb[0].mxu1 %vm7870_vm4, %v3442_v1  ;;  %vm7878_vm15 = vmmov %vm7801_vm0  ;;  %v5713_v1 = vld [vmem:[%s7421_s6 + $0x88] sm:$0xff]   ;;  %v3719_v63 = vld [vmem:[#allocation2 + $0x70] sm:$0xff] }
 0x193   : > { %5358 = vmatpush3.bf16.msra.mxu1 %v6766_v22  ;;  %5329 = vmatprep.mubr.msk.bf16.mxu1 %vm7801_vm0, %v3443_v25  ;;  %v3444_v22 = vpack.c.bf16 %v7811_v41, %v3411_v34  ;;  %vm7879_vm4 = vmmov %vm7801_vm0  ;;  %v3417_v41 = vsel %vm7881_vm11, %v7820_v33, 0.0  ;;  %v3448_v33 = vpack.c.bf16 %v7830_v57, %v3419_v47  ;;  %v7895_v57 = vld [vmem:[#allocation76_spill] sm:$0xff]  ;;  %v7920_v25 = vld [vmem:[#allocation51_spill] sm:$0xff] }
 0x194   : > { %5359 = vmatprep.subr.bf16.mxu1 %v5709_v27  ;;  %5214 = vmatpush3.bf16.msra.mxu0 %v6783_v61  ;;  %v7875_v61 = vld [vmem:[#allocation50_spill] sm:$0xff]  ;;  %v3447_v6 = vpack.c.bf16 %v7824_v53, %v3417_v41  ;;  %v3449_v53 = vpack.c.bf16 %v6613_v40, %v3421_v17  ;;  %vm7891_vm11 = vmmov %vm7801_vm0  ;;  %v3451_v40 = vpack.c.bf16 %v6647_v2, %v3425_v54  ;;  %v7901_v2 = vld [vmem:[#allocation89_spill] sm:$0xff] }
 0x195   : > { %5215 = vmatprep.subr.bf16.mxu0 %v5711_v16  ;;  %v7930_v41 = vld [vmem:[#allocation95_spill] sm:$0xff]  ;;  %v3724_v47 = vld [vmem:[#allocation2 + $0x98] sm:$0xff] }
 0x196   : > { %v3731_v54 = vld [vmem:[#allocation2 + $0xd0] sm:$0xff] }
 0x197   : > { %5360 = vmatpush3.bf16.msra.mxu1 %v5709_v27  ;;  %v7918_v27 = vld [vmem:[#allocation42_spill] sm:$0xff]  ;;  %v4020_v30 = vld [vmem:[#allocation2 + $0x51] sm:$0xff] }
 0x198   : > { %5216 = vmatpush3.bf16.msra.mxu0 %v5711_v16  ;;  %5393 = vmatprep.subr.bf16.mxu1 %v6958_v48  ;;  %v3717_v16 = vld [vmem:[#allocation2 + $0x60] sm:$0xff] }
 0x199   : > { %5186 = vmatmul.mubr.msk.bf16.gmra.mrb[36].mxu0 %vm7876_vm5, %v7875_v61  ;;  %vm7885_vm5 = vmmov %vm7801_vm0  ;;  %v3749_v34 = vpack.c.bf16 %v3717_v16, %v3716_v0  ;;  %v7926_v61 = vld [vmem:[#allocation74_spill] sm:$0xff] }
 0x19a   : > { %5189 = vmatprep.mubr.msk.bf16.mxu0 %vm7878_vm15, %v7877_v10  ;;  %5330 = vmatmul.mubr.msk.bf16.gmra.mrb[4].mxu1 %vm7879_vm4, %v3444_v22  ;;  %vm7886_vm15 = vmmov %vm7801_vm0  ;;  %v3750_v22 = vpack.c.bf16 %v3719_v63, %v3718_v35  ;;  %v3720_v10 = vld [vmem:[#allocation2 + $0x78] sm:$0xff]  ;;  %v4019_v63 = vld [vmem:[#allocation2 + $0x49] sm:$0xff] }
 0x19b   : > { %5333 = vmatprep.mubr.msk.bf16.mxu1 %vm7801_vm0, %v3445_v4  ;;  %vm7887_vm4 = vmmov %vm7801_vm0  ;;  %v3723_v4 = vld [vmem:[#allocation2 + $0x90] sm:$0xff] }
 0x19c   : > { %v4024_v35 = vld [vmem:[#allocation2 + $0x71] sm:$0xff] }
 0x1a1   : > { %5190 = vmatmul.mubr.msk.bf16.gmra.mrb[40].mxu0 %vm7883_vm7, %v7882_v14  ;;  %vm7892_vm7 = vmmov %vm7801_vm0  ;;  %v7932_v14 = vld [vmem:[#allocation97_spill] sm:$0xff] }
 0x1a2   : > { %5193 = vmatprep.mubr.msk.bf16.mxu0 %vm7885_vm5, %v7884_v43  ;;  %5334 = vmatmul.mubr.msk.bf16.gmra.mrb[8].mxu1 %vm7886_vm15, %v3446_v26  ;;  %vm7897_vm5 = vmmov %vm7801_vm0  ;;  %v3752_v26 = vpack.c.bf16 %v3723_v4, %v3722_v15  ;;  %v3727_v43 = vld [vmem:[#allocation2 + $0xb0] sm:$0xff] }
 0x1a3   : > { %5337 = vmatprep.mubr.msk.bf16.mxu1 %vm7887_vm4, %v3447_v6  ;;  %vm7898_vm15 = vmmov %vm7801_vm0  ;;  %v3725_v6 = vld [vmem:[#allocation2 + $0xa0] sm:$0xff] }
 0x1a4   : > { %vm7903_vm4 = vmmov %vm7801_vm0  ;;  %v3753_v17 = vpack.c.bf16 %v3725_v6, %v3724_v47  ;;  %v7978_v47 = vld [vmem:[#allocation116_spill] sm:$0xff] }
 0x1a9   : > { %5194 = vmatmul.mubr.msk.bf16.gmra.mrb[44].mxu0 %vm7889_vm13, %v7888_v20  ;;  %vm7904_vm13 = vmmov %vm7801_vm0  ;;  %v7935_v20 = vld [vmem:[#allocation98_spill] sm:$0xff] }
 0x1aa   : > { %5197 = vmatprep.mubr.msk.bf16.mxu0 %vm7801_vm0, %v7890_v23  ;;  %5338 = vmatmul.mubr.msk.bf16.gmra.mrb[12].mxu1 %vm7891_vm11, %v3448_v33  ;;  %vm7911_vm11 = vmmov %vm7801_vm0  ;;  %v3726_v33 = vld [vmem:[#allocation2 + $0xa8] sm:$0xff]  ;;  %v7937_v23 = vld [vmem:[#allocation99_spill] sm:$0xff] }
 0x1ab   : > { %5341 = vmatprep.mubr.msk.bf16.mxu1 %vm7892_vm7, %v3449_v53  ;;  %vm7916_vm7 = vmmov %vm7801_vm0  ;;  %v3754_v53 = vpack.c.bf16 %v3727_v43, %v3726_v33  ;;  %v7981_v33 = vld [vmem:[#allocation118_spill] sm:$0xff] }
 0x1b1   : > { %5198 = vmatmul.mubr.msk.bf16.gmra.mrb[48].mxu0 %vm7894_vm1, %v7893_v58  ;;  %vm7917_vm1 = vmmov %vm7801_vm0 }
 0x1b2   : > { %5201 = vmatprep.mubr.msk.bf16.mxu0 %vm7896_vm10, %v7895_v57  ;;  %5342 = vmatmul.mubr.msk.bf16.gmra.mrb[16].mxu1 %vm7897_vm5, %v3450_v51  ;;  %vm7921_vm10 = vmmov %vm7801_vm0  ;;  %v3728_v51 = vld [vmem:[#allocation2 + $0xb8] sm:$0xff]  ;;  %v7941_v57 = vld [vmem:[#allocation105_spill] sm:$0xff] }
 0x1b3   : > { %5345 = vmatprep.mubr.msk.bf16.mxu1 %vm7898_vm15, %v3451_v40  ;;  %vm7922_vm5 = vmmov %vm7801_vm0  ;;  %v3755_v58 = vpack.c.bf16 %v3729_v7, %v3728_v51  ;;  %v3730_v40 = vld [vmem:[#allocation2 + $0xc8] sm:$0xff]  ;;  %v7991_v51 = vld [vmem:[#allocation87_spill] sm:$0xff] }
 0x1b4   : > { %vm7923_vm15 = vmmov %vm7801_vm0  ;;  %v3756_v13 = vpack.c.bf16 %v3731_v54, %v3730_v40  ;;  %v7989_v7 = vld [vmem:[#allocation86_spill] sm:$0xff]  ;;  %v4045_v40 = vld [vmem:[#allocation2 + $0x119] sm:$0xff] }
 0x1b5   : > { %v4046_v54 = vld [vmem:[#allocation2 + $0x121] sm:$0xff] }
 0x1b9   : > { %5202 = vmatmul.mubr.msk.bf16.gmra.mrb[52].mxu0 %vm7900_vm2, %v7899_v36  ;;  %vm7925_vm2 = vmmov %vm7801_vm0  ;;  %v3735_v36 = vld [vmem:[#allocation2 + $0xf0] sm:$0xff] }
 0x1ba   : > { %5205 = vmatprep.mubr.msk.bf16.mxu0 %vm7902_vm9, %v7901_v2  ;;  %5346 = vmatmul.mubr.msk.bf16.gmra.mrb[20].mxu1 %vm7903_vm4, %v3452_v18  ;;  %vm7927_vm9 = vmmov %vm7801_vm0  ;;  %v3733_v18 = vld [vmem:[#allocation2 + $0xe0] sm:$0xff]  ;;  %v3758_v45 = vpack.c.bf16 %v3735_v36, %v3734_v62  ;;  %v7999_v62 = vld [vmem:[#allocation4_spill] sm:$0xff] }
 0x1bb   : > { %5349 = vmatprep.mubr.msk.bf16.mxu1 %vm7904_vm13, %v3453_v28  ;;  %vm7928_vm4 = vmmov %vm7801_vm0  ;;  %v3732_v28 = vld [vmem:[#allocation2 + $0xd8] sm:$0xff] }
 0x1bc   : > { %vm7929_vm13 = vmmov %vm7801_vm0  ;;  %v3757_v2 = vpack.c.bf16 %v3733_v18, %v3732_v28  ;;  %v7997_v28 = vld [vmem:[#allocation5_spill] sm:$0xff] }
 0x1c1   : > { %5206 = vmatmul.mubr.msk.bf16.gmra.mrb[56].mxu0 %vm7907_vm6, %v7906_v24  ;;  %vm7931_vm6 = vmmov %vm7801_vm0  ;;  %v3737_v24 = vld [vmem:[#allocation2 + $0x100] sm:$0xff] }
 0x1c2   : > { %5209 = vmatprep.mubr.msk.bf16.mxu0 %vm7910_vm8, %v7909_v50  ;;  %5350 = vmatmul.mubr.msk.bf16.gmra.mrb[24].mxu1 %vm7801_vm0, %v3454_v39  ;;  %vm7933_vm8 = vmmov %vm7801_vm0  ;;  %v7949_v39 = vld [vmem:[#allocation111_spill] sm:$0xff] }
 0x1c3   : > { %5353 = vmatprep.mubr.msk.bf16.mxu1 %vm7911_vm11, %v3455_v56  ;;  %vm7934_vm11 = vmmov %vm7801_vm0  ;;  %v3736_v56 = vld [vmem:[#allocation2 + $0xf8] sm:$0xff] }
 0x1c4   : > { %v3759_v50 = vpack.c.bf16 %v3737_v24, %v3736_v56  ;;  %v8003_v24 = vld [vmem:[#allocation9_spill] sm:$0xff]  ;;  %v8005_v56 = vld [vmem:[#allocation11_spill] sm:$0xff] }
 0x1c9   : > { %5210 = vmatmul.mubr.msk.bf16.gmra.mrb[60].mxu0 %vm7913_vm3, %v7912_v42  ;;  %vm7936_vm3 = vmmov %vm7801_vm0  ;;  %v4016_v42 = vld [vmem:[#allocation2 + $0x31] sm:$0xff] }
 0x1ca   : > { %5217 = vmatprep.mubr.msk.bf16.mxu0 %vm7915_vm14, %v7914_v38  ;;  %5354 = vmatmul.mubr.msk.bf16.gmra.mrb[28].mxu1 %vm7916_vm7, %v3456_v11  ;;  %vm7938_vm14 = vmmov %vm7801_vm0  ;;  %v3740_v11 = vld [vmem:[#allocation2 + $0x118] sm:$0xff] }
 0x1cb   : > { %5361 = vmatprep.mubr.msk.bf16.mxu1 %vm7917_vm1, %v3746_v8  ;;  %vm7939_vm7 = vmmov %vm7801_vm0  ;;  %v3761_v8 = vpack.c.bf16 %v3741_v60, %v3740_v11  ;;  %v8011_v11 = vld [vmem:[#allocation17_spill] sm:$0xff]  ;;  %v8012_v60 = vld [vmem:[#allocation18_spill] sm:$0xff] }
 0x1cc   : > { %vm7940_vm1 = vmmov %vm7801_vm0 }
 0x1d1   : > { %5218 = vmatmul.mubr.msk.bf16.vlgmr.msra.gmra.mrb[32].mxu0 %vm7919_vm12, %v7918_v27  ;;  %vm7942_vm12 = vmmov %vm7801_vm0  ;;  %v7963_v27 = vld [vmem:[#allocation36_spill] sm:$0xff] }
 0x1d2   : > { %5221 = vmatprep.mubr.msk.bf16.mxu0 %vm7921_vm10, %v7920_v25  ;;  %5362 = vmatmul.mubr.msk.bf16.vlgmr.msra.gmra.mrb[0].mxu1 %vm7922_vm5, %v3747_v37  ;;  %vm7944_vm10 = vmmov %vm7801_vm0  ;;  %v4018_v37 = vld [vmem:[#allocation2 + $0x41] sm:$0xff] }
 0x1d3   : > { %5394 = vmatpush3.bf16.msra.mxu1 %v6958_v48  ;;  %5365 = vmatprep.mubr.msk.bf16.mxu1 %vm7923_vm15, %v3748_v9  ;;  %v3721_v48 = vld [vmem:[#allocation2 + $0x80] sm:$0xff]  ;;  %vm7945_vm5 = vmmov %vm7801_vm0  ;;  %v7965_v25 = vld [vmem:[#allocation38_spill] sm:$0xff] }
 0x1d4   : > { %5395 = vmatprep.subr.bf16.mxu1 %v5713_v1  ;;  %v3751_v31 = vpack.c.bf16 %v3721_v48, %v3720_v10  ;;  %vm7946_vm15 = vmmov %vm7801_vm0  ;;  %v7971_v48 = vld [vmem:[#allocation49_spill] sm:$0xff] }
 0x1d7   : > { %5396 = vmatpush3.bf16.msra.mxu1 %v5713_v1  ;;  %v4017_v1 = vld [vmem:[#allocation2 + $0x39] sm:$0xff] }
 0x1d9   : > { %5222 = vmatmul.mubr.msk.bf16.gmra.mrb[36].mxu0 %vm7925_vm2, %v7924_v12  ;;  %vm7948_vm2 = vmmov %vm7801_vm0  ;;  %v4021_v12 = vld [vmem:[#allocation2 + $0x59] sm:$0xff] }
 0x1da   : > { %5225 = vmatprep.mubr.msk.bf16.mxu0 %vm7927_vm9, %v7926_v61  ;;  %5366 = vmatmul.mubr.msk.bf16.gmra.mrb[4].mxu1 %vm7928_vm4, %v3749_v34  ;;  %vm7950_vm9 = vmmov %vm7801_vm0  ;;  %v4022_v34 = vld [vmem:[#allocation2 + $0x61] sm:$0xff] }
 0x1db   : > { %5369 = vmatprep.mubr.msk.bf16.mxu1 %vm7929_vm13, %v3750_v22  ;;  %vm7951_vm4 = vmmov %vm7801_vm0  ;;  %v7969_v22 = vld [vmem:[#allocation43_spill] sm:$0xff] }
 0x1dc   : > { %vm7952_vm13 = vmmov %vm7801_vm0 }
 0x1e1   : > { %5226 = vmatmul.mubr.msk.bf16.gmra.mrb[40].mxu0 %vm7931_vm6, %v7930_v41  ;;  %vm7954_vm6 = vmmov %vm7801_vm0  ;;  %v4026_v41 = vld [vmem:[#allocation2 + $0x81] sm:$0xff] }
 0x1e2   : > { %5229 = vmatprep.mubr.msk.bf16.mxu0 %vm7933_vm8, %v7932_v14  ;;  %5370 = vmatmul.mubr.msk.bf16.gmra.mrb[8].mxu1 %vm7801_vm0, %v3751_v31  ;;  %vm7956_vm8 = vmmov %vm7801_vm0  ;;  %v4023_v31 = vld [vmem:[#allocation2 + $0x69] sm:$0xff] }
 0x1e3   : > { %5373 = vmatprep.mubr.msk.bf16.mxu1 %vm7934_vm11, %v3752_v26  ;;  %vm7957_vm11 = vmmov %vm7801_vm0  ;;  %v4025_v26 = vld [vmem:[#allocation2 + $0x79] sm:$0xff]  ;;  %v7975_v14 = vld [vmem:[#allocation55_spill] sm:$0xff] }
 0x1e9   : > { %5230 = vmatmul.mubr.msk.bf16.gmra.mrb[44].mxu0 %vm7936_vm3, %v7935_v20  ;;  %vm7958_vm3 = vnez %v7849_v49  ;;  %v7983_v20 = vld [vmem:[#allocation72_spill] sm:$0xff] }
 0x1ea   : > { %5233 = vmatprep.mubr.msk.bf16.mxu0 %vm7938_vm14, %v7937_v23  ;;  %5374 = vmatmul.mubr.msk.bf16.gmra.mrb[12].mxu1 %vm7939_vm7, %v3753_v17  ;;  %v4048_v38 = vsel %vm7958_vm3, %v4016_v42, 0.0  ;;  %vm7960_vm14 = vmmov %vm7801_vm0  ;;  %v7979_v17 = vld [vmem:[#allocation117_spill] sm:$0xff]  ;;  %v7987_v23 = vld [vmem:[#allocation78_spill] sm:$0xff] }
 0x1eb   : > { %5377 = vmatprep.mubr.msk.bf16.mxu1 %vm7940_vm1, %v3754_v53  ;;  %v4083_v46 = vpack.c.bf16 %v4048_v38, %v4015_v21  ;;  %vm7961_vm7 = vmmov %vm7801_vm0  ;;  %v7985_v53 = vld [vmem:[#allocation44_spill] sm:$0xff]  ;;  %v8013_v42 = vld [vmem:[#allocation19_spill] sm:$0xff] }
 0x1ec   : > { %vm7962_vm1 = vmmov %vm7801_vm0  ;;  %v8015_v38 = vld [vmem:[#allocation21_spill] sm:$0xff]  ;;  %v8016_v21 = vld [vmem:[#allocation22_spill] sm:$0xff] }
 0x1ed   : > { %vm7982_vm3 = vmmov %vm7801_vm0 }
 0x1f1   : > { %5234 = vmatmul.mubr.msk.bf16.gmra.mrb[48].mxu0 %vm7942_vm12, %v7941_v57  ;;  %vm7964_vm12 = vnez %v7963_v27  ;;  %v8022_v27 = vld [vmem:[#allocation28_spill] sm:$0xff] }
 0x1f2   : > { %5237 = vmatprep.mubr.msk.bf16.mxu0 %vm7944_vm10, %v7943_v44  ;;  %5378 = vmatmul.mubr.msk.bf16.gmra.mrb[16].mxu1 %vm7945_vm5, %v3755_v58  ;;  %v4050_v9 = vsel %vm7964_vm12, %v4018_v37, 0.0  ;;  %vm7966_vm10 = vnez %v7965_v25  ;;  %vm7967_vm5 = vmmov %vm7801_vm0  ;;  %v7993_v58 = vld [vmem:[#allocation75_spill] sm:$0xff]  ;;  %v8019_v37 = vld [vmem:[#allocation25_spill] sm:$0xff] }
 0x1f3   : > { %5381 = vmatprep.mubr.msk.bf16.mxu1 %vm7946_vm15, %v3756_v13  ;;  %v4052_v16 = vsel %vm7966_vm10, %v4020_v30, 0.0  ;;  %v4084_v49 = vpack.c.bf16 %v4050_v9, %v4017_v1  ;;  %vm7968_vm15 = vmmov %vm7801_vm0  ;;  %v8020_v30 = vld [vmem:[#allocation26_spill] sm:$0xff]  ;;  %v8021_v1 = vld [vmem:[#allocation27_spill] sm:$0xff] }
 0x1f4   : > { %v4085_v0 = vpack.c.bf16 %v4052_v16, %v4019_v63  ;;  %vm7990_vm12 = vmmov %vm7801_vm0  ;;  %v8023_v9 = vld [vmem:[#allocation29_spill] sm:$0xff]  ;;  %v8024_v25 = vld [vmem:[#allocation30_spill] sm:$0xff] }
 0x1f5   : > { %vm7992_vm10 = vmmov %vm7801_vm0  ;;  %v8025_v16 = vld [vmem:[#allocation31_spill] sm:$0xff]  ;;  %v8027_v63 = vld [vmem:[#allocation33_spill] sm:$0xff] }
 0x1f9   : > { %5238 = vmatmul.mubr.msk.bf16.gmra.mrb[52].mxu0 %vm7948_vm2, %v7947_v32  ;;  %vm7970_vm2 = vnez %v7969_v22  ;;  %v8000_v32 = vld [vmem:[#allocation6_spill] sm:$0xff] }
 0x1fa   : > { %5241 = vmatprep.mubr.msk.bf16.mxu0 %vm7950_vm9, %v7949_v39  ;;  %5382 = vmatmul.mubr.msk.bf16.gmra.mrb[20].mxu1 %vm7951_vm4, %v3757_v2  ;;  %v4054_v61 = vsel %vm7970_vm2, %v4022_v34, 0.0  ;;  %vm7972_vm9 = vnez %v7971_v48  ;;  %vm7973_vm4 = vmmov %vm7801_vm0  ;;  %v7998_v2 = vld [vmem:[#allocation3_spill] sm:$0xff]  ;;  %v8002_v39 = vld [vmem:[#allocation8_spill] sm:$0xff] }
 0x1fb   : > { %5385 = vmatprep.mubr.msk.bf16.mxu1 %vm7952_vm13, %v3758_v45  ;;  %v4056_v4 = vsel %vm7972_vm9, %v4024_v35, 0.0  ;;  %v4086_v10 = vpack.c.bf16 %v4054_v61, %v4021_v12  ;;  %vm7974_vm13 = vmmov %vm7801_vm0  ;;  %vm312_vm9 = vcmask 125952   ;;  %v8001_v45 = vld [vmem:[#allocation7_spill] sm:$0xff] }
 0x1fc   : > { %v4087_v15 = vpack.c.bf16 %v4056_v4, %v4023_v31  ;;  %vm7996_vm2 = vmmov %vm7801_vm0  ;;  %315 = vst.msk [vmem:[%s7152_s15 + $0x8] sm:$0xf] %vm312_vm9, %v7997_v28 }
 0x1fd   : > { %313 = vst.msk [vmem:[%s7152_s15] sm:$0xf] %vm312_vm9, %v7998_v2  ;;  %314 = vst.msk [vmem:[%s7152_s15 + $0x4] sm:$0xf] %vm312_vm9, %v7999_v62 }
 0x1fe   : > { %316 = vst.msk [vmem:[%s7152_s15 + $0xc] sm:$0xf] %vm312_vm9, %v8000_v32  ;;  %317 = vst.msk [vmem:[%s7152_s15 + $0x10] sm:$0xf] %vm312_vm9, %v8001_v45 }
 0x1ff   : > { %318 = vst.msk [vmem:[%s7152_s15 + $0x14] sm:$0xf] %vm312_vm9, %v8002_v39  ;;  %319 = vst.msk [vmem:[%s7152_s15 + $0x18] sm:$0xf] %vm312_vm9, %v8003_v24 }
 0x200   : > { %320 = vst.msk [vmem:[%s7152_s15 + $0x1c] sm:$0xf] %vm312_vm9, %v8004_v59  ;;  %321 = vst.msk [vmem:[%s7152_s15 + $0x20] sm:$0xf] %vm312_vm9, %v8005_v56 }
 0x201   : > { %5242 = vmatmul.mubr.msk.bf16.gmra.mrb[56].mxu0 %vm7954_vm6, %v7953_v52  ;;  %vm7976_vm6 = vnez %v7975_v14  ;;  %323 = vst.msk [vmem:[%s7152_s15 + $0x28] sm:$0xf] %vm312_vm9, %v8007_v5  ;;  %v8008_v52 = vld [vmem:[#allocation14_spill] sm:$0xff]  ;;  %327 = vst.msk [vmem:[%s7152_s15 + $0x38] sm:$0xf] %vm312_vm9, %v8011_v11 }
 0x202   : > { %5245 = vmatprep.mubr.msk.bf16.mxu0 %vm7956_vm8, %v7955_v29  ;;  %5386 = vmatmul.mubr.msk.bf16.gmra.mrb[24].mxu1 %vm7801_vm0, %v3759_v50  ;;  %v4058_v6 = vsel %vm7976_vm6, %v4026_v41, 0.0  ;;  %vm7977_vm8 = vmmov %vm7801_vm0  ;;  %v8006_v50 = vld [vmem:[#allocation12_spill] sm:$0xff]  ;;  %324 = vst.msk [vmem:[%s7152_s15 + $0x2c] sm:$0xf] %vm312_vm9, %v8008_v52 }
 0x203   : > { %5389 = vmatprep.mubr.msk.bf16.mxu1 %vm7957_vm11, %v3760_v55  ;;  %v4088_v43 = vpack.c.bf16 %v4058_v6, %v4025_v26  ;;  %vm7980_vm11 = vmmov %vm7801_vm0  ;;  %322 = vst.msk [vmem:[%s7152_s15 + $0x24] sm:$0xf] %vm312_vm9, %v8006_v50  ;;  %v8009_v55 = vld [vmem:[#allocation15_spill] sm:$0xff]  ;;  %v8010_v29 = vld [vmem:[#allocation16_spill] sm:$0xff] }
 0x204   : > { %325 = vst.msk [vmem:[%s7152_s15 + $0x30] sm:$0xf] %vm312_vm9, %v8009_v55  ;;  %326 = vst.msk [vmem:[%s7152_s15 + $0x34] sm:$0xf] %vm312_vm9, %v8010_v29 }
 0x205   : > { %328 = vst.msk [vmem:[%s7152_s15 + $0x3c] sm:$0xf] %vm312_vm9, %v8012_v60  ;;  %329 = vst.msk [vmem:[%s7152_s15 + $0x40] sm:$0xf] %vm312_vm9, %v8013_v42 }
 0x206   : > { %331 = vst.msk [vmem:[%s7152_s15 + $0x48] sm:$0xf] %vm312_vm9, %v8015_v38  ;;  %332 = vst.msk [vmem:[%s7152_s15 + $0x4c] sm:$0xf] %vm312_vm9, %v8016_v21 }
 0x207   : > { %335 = vst.msk [vmem:[%s7152_s15 + $0x58] sm:$0xf] %vm312_vm9, %v8019_v37  ;;  %336 = vst.msk [vmem:[%s7152_s15 + $0x5c] sm:$0xf] %vm312_vm9, %v8020_v30 }
 0x208   : > { %337 = vst.msk [vmem:[%s7152_s15 + $0x60] sm:$0xf] %vm312_vm9, %v8021_v1  ;;  %338 = vst.msk [vmem:[%s7152_s15 + $0x64] sm:$0xf] %vm312_vm9, %v8022_v27 }
 0x209   : > { %5246 = vmatmul.mubr.msk.bf16.gmra.mrb[60].mxu0 %vm7960_vm14, %v7959_v3  ;;  %vm7984_vm14 = vmmov %vm7801_vm0  ;;  %v8017_v3 = vld [vmem:[#allocation23_spill] sm:$0xff]  ;;  %339 = vst.msk [vmem:[%s7152_s15 + $0x68] sm:$0xf] %vm312_vm9, %v8023_v9 }
 0x20a   : > { %5390 = vmatmul.mubr.msk.bf16.gmra.mrb[28].mxu1 %vm7961_vm7, %v3761_v8  ;;  %vm7986_vm7 = vmmov %vm7801_vm0  ;;  %v8014_v8 = vld [vmem:[#allocation20_spill] sm:$0xff]  ;;  %333 = vst.msk [vmem:[%s7152_s15 + $0x50] sm:$0xf] %vm312_vm9, %v8017_v3 }
 0x20b   : > { %5397 = vmatprep.mubr.msk.bf16.mxu1 %vm7962_vm1, %v4083_v46  ;;  %vm7988_vm1 = vmmov %vm7801_vm0  ;;  %330 = vst.msk [vmem:[%s7152_s15 + $0x44] sm:$0xf] %vm312_vm9, %v8014_v8  ;;  %v8018_v46 = vld [vmem:[#allocation24_spill] sm:$0xff] }
 0x20c   : > { %334 = vst.msk [vmem:[%s7152_s15 + $0x54] sm:$0xf] %vm312_vm9, %v8018_v46  ;;  %340 = vst.msk [vmem:[%s7152_s15 + $0x6c] sm:$0xf] %vm312_vm9, %v8024_v25 }
 0x20d   : > { %341 = vst.msk [vmem:[%s7152_s15 + $0x70] sm:$0xf] %vm312_vm9, %v8025_v16  ;;  %343 = vst.msk [vmem:[%s7152_s15 + $0x78] sm:$0xf] %vm312_vm9, %v8027_v63 }
 0x212   : > { %5398 = vmatmul.mubr.msk.bf16.vlgmr.msra.gmra.mrb[0].mxu1 %vm7967_vm5, %v4084_v49  ;;  %vm7994_vm5 = vmmov %vm7801_vm0  ;;  %v8026_v49 = vld [vmem:[#allocation32_spill] sm:$0xff] }
 0x213   : > { %5401 = vmatprep.mubr.msk.bf16.mxu1 %vm7968_vm15, %v4085_v0  ;;  %vm7995_vm15 = vnez %v7851_v19  ;;  %342 = vst.msk [vmem:[%s7152_s15 + $0x74] sm:$0xf] %vm312_vm9, %v8026_v49  ;;  %v8028_v0 = vld [vmem:[#allocation34_spill] sm:$0xff] }
 0x214   : > { %v4078_v57 = vsel %vm7995_vm15, %v4046_v54, 0.0  ;;  %344 = vst.msk [vmem:[%s7152_s15 + $0x7c] sm:$0xf] %vm312_vm9, %v8028_v0 }
 0x215   : > { %v4098_v13 = vpack.c.bf16 %v4078_v57, %v4045_v40 }
 0x21a   : > { %5402 = vmatmul.mubr.msk.bf16.gmra.mrb[4].mxu1 %vm7973_vm4, %v4086_v10  ;;  %vm4544_vm4 = vcmask 191616  }
 0x21b   : > { %5405 = vmatprep.mubr.msk.bf16.mxu1 %vm7974_vm13, %v4087_v15 }
 0x222   : > { %5406 = vmatmul.mubr.msk.bf16.gmra.mrb[8].mxu1 %vm7977_vm8, %v4088_v43 }
 0x223   : > { %5409 = vmatprep.mubr.msk.bf16.mxu1 %vm7801_vm0, %v7978_v47 }
 0x22a   : > { %5410 = vmatmul.mubr.msk.bf16.gmra.mrb[12].mxu1 %vm7980_vm11, %v7979_v17 }
 0x22b   : > { %5413 = vmatprep.mubr.msk.bf16.mxu1 %vm7982_vm3, %v7981_v33 }
 0x232   : > { %5414 = vmatmul.mubr.msk.bf16.gmra.mrb[16].mxu1 %vm7984_vm14, %v7983_v20 }
 0x233   : > { %5417 = vmatprep.mubr.msk.bf16.mxu1 %vm7986_vm7, %v7985_v53 }
 0x23a   : > { %5418 = vmatmul.mubr.msk.bf16.gmra.mrb[20].mxu1 %vm7988_vm1, %v7987_v23 }
 0x23b   : > { %5421 = vmatprep.mubr.msk.bf16.mxu1 %vm7990_vm12, %v7989_v7 }
 0x242   : > { %5422 = vmatmul.mubr.msk.bf16.gmra.mrb[24].mxu1 %vm7992_vm10, %v7991_v51 }
 0x243   : > { %5425 = vmatprep.mubr.msk.bf16.mxu1 %vm7994_vm5, %v7993_v58 }
 0x24a   : > { %5426 = vmatmul.mubr.msk.bf16.gmra.mrb[28].mxu1 %vm7996_vm2, %v4098_v13 }
 0x2a4   : > { %v7141_v44 = vpop.f32.mrb[32].mxu0 }
 0x2a5   : > { %v7143_v18 = vpop.f32.mrb[33].mxu0 }
 0x2a6   : > { %v7145_v36 = vpop.f32.mrb[34].mxu0 }
 0x2a7   : > { %v7154_v19 = vpop.f32.mrb[35].mxu0 }
 0x2ac   : > { %v5223_v34 = vpop.f32.mrb[36].mxu0 }
 0x2ad   : > { %v2588_v35 = vpop.f32.mrb[37].mxu0 }
 0x2ae   : > { %v5224_v12 = vpop.f32.mrb[38].mxu0 }
 0x2af   : > { %v2591_v22 = vpop.f32.mrb[39].mxu0 }
 0x2b4   : > { %v5227_v61 = vpop.f32.mrb[40].mxu0 }
 0x2b5   : > { %v2604_v48 = vpop.f32.mrb[41].mxu0 }
 0x2b6   : > { %v5228_v4 = vpop.f32.mrb[42].mxu0 }
 0x2b7   : > { %v2607_v10 = vpop.f32.mrb[43].mxu0 }
 0x2bc   : > { %v7252_v31 = vpop.f32.mrb[44].mxu0 }
 0x2bd   : > { %v7254_v15 = vpop.f32.mrb[45].mxu0 }
 0x2be   : > { %v7256_v41 = vpop.f32.mrb[46].mxu0 }
 0x2bf   : > { %v7258_v26 = vpop.f32.mrb[47].mxu0 }
 0x2c4   : > { %v7260_v14 = vpop.f32.mrb[48].mxu0 }
 0x2c5   : > { %v7262_v6 = vpop.f32.mrb[49].mxu0 }
 0x2c6   : > { %v7264_v43 = vpop.f32.mrb[50].mxu0 }
 0x2c7   : > { %v7266_v47 = vpop.f32.mrb[51].mxu0 }
 0x2cc   : > { %v7268_v17 = vpop.f32.mrb[52].mxu0 }
 0x2cd   : > { %v7270_v33 = vpop.f32.mrb[53].mxu0 }
 0x2ce   : > { %v7272_v20 = vpop.f32.mrb[54].mxu0 }
 0x2cf   : > { %v7274_v53 = vpop.f32.mrb[55].mxu0 }
 0x2d4   : > { %v7276_v23 = vpop.f32.mrb[56].mxu0 }
 0x2d5   : > { %v7278_v7 = vpop.f32.mrb[57].mxu0 }
 0x2d6   : > { %v7280_v54 = vpop.f32.mrb[58].mxu0 }
 0x2d7   : > { %v7282_v51 = vpop.f32.mrb[59].mxu0 }
 0x2dc   : > { %v7284_v58 = vpop.f32.mrb[60].mxu0 }
 0x2dd   : > { %v7286_v40 = vpop.f32.mrb[61].mxu0 }
 0x2de   : > { %v7288_v57 = vpop.f32.mrb[62].mxu0 }
 0x2df   : > { %v7290_v13 = vpop.f32.mrb[63].mxu0 }
 0x2e5   : > { %v5399_v28 = vpop.f32.mrb[0].mxu1 }
 0x2e6   : > { %v5429_v2 = vadd.f32 %v5399_v28, %v7141_v44  ;;  %v4193_v62 = vpop.f32.mrb[1].mxu1 }
 0x2e7   : > { %v5430_v32 = vadd.f32 %v4193_v62, %v7143_v18  ;;  %v5400_v45 = vpop.f32.mrb[2].mxu1 }
 0x2e8   : > { %v4862_v39 = vpack.c.bf16 %v5429_v2, %v5429_v2  ;;  %v5431_v24 = vadd.f32 %v5400_v45, %v7145_v36  ;;  %v4196_v59 = vpop.f32.mrb[3].mxu1 }
 0x2e9   : > { %v4860_v56 = vpack.c.bf16 %v5430_v32, %v5430_v32  ;;  %v5432_v50 = vadd.f32 %v4196_v59, %v7154_v19 }
 0x2ea   : > { %4452 = vrot.lane.b32.xlu1 %v4862_v39, %s5724_s25  ;;  %v4863_v5 = vpack.c.bf16 %v5431_v24, %v5431_v24 }
 0x2eb   : > { %4448 = vrot.lane.b32.xlu0 %v4860_v56, %s5724_s25  ;;  %v4861_v52 = vpack.c.bf16 %v5432_v50, %v5432_v50 }
 0x2ed   : > { %v5403_v55 = vpop.f32.mrb[4].mxu1 }
 0x2ee   : > { %v5433_v44 = vadd.f32 %v5403_v55, %v5223_v34  ;;  %v4209_v29 = vpop.f32.mrb[5].mxu1  ;;  %4454 = vrot.lane.b32.xlu1 %v4863_v5, %s5724_s25 }
 0x2ef   : > { %v5434_v18 = vadd.f32 %v4209_v29, %v2588_v35  ;;  %v5404_v11 = vpop.f32.mrb[6].mxu1  ;;  %4450 = vrot.lane.b32.xlu0 %v4861_v52, %s5724_s25 }
 0x2f0   : > { %v4866_v36 = vpack.c.bf16 %v5433_v44, %v5433_v44  ;;  %v5435_v60 = vadd.f32 %v5404_v11, %v5224_v12  ;;  %v4212_v42 = vpop.f32.mrb[7].mxu1 }
 0x2f1   : > { %v5436_v19 = vadd.f32 %v4212_v42, %v2591_v22  ;;  %v4864_v38 = vpack.c.bf16 %v5434_v18, %v5434_v18 }
 0x2f2   : > { %v4867_v8 = vpack.c.bf16 %v5435_v60, %v5435_v60 }
 0x2f3   : > { %4460 = vrot.lane.b32.xlu0 %v4866_v36, %s5724_s25  ;;  %v4865_v3 = vpack.c.bf16 %v5436_v19, %v5436_v19 }
 0x2f4   : > { %4462 = vrot.lane.b32.xlu1 %v4867_v8, %s5724_s25 }
 0x2f5   : > { %v5407_v21 = vpop.f32.mrb[8].mxu1 }
 0x2f6   : > { %v5437_v46 = vadd.f32 %v5407_v21, %v5227_v61  ;;  %v4225_v37 = vpop.f32.mrb[9].mxu1 }
 0x2f7   : > { %v5438_v30 = vadd.f32 %v4225_v37, %v2604_v48  ;;  %v5408_v1 = vpop.f32.mrb[10].mxu1  ;;  %4456 = vrot.lane.b32.xlu0 %v4864_v38, %s5724_s25 }
 0x2f8   : > { %v4870_v27 = vpack.c.bf16 %v5437_v46, %v5437_v46  ;;  %v5439_v9 = vadd.f32 %v5408_v1, %v5228_v4  ;;  %v4228_v25 = vpop.f32.mrb[11].mxu1  ;;  %4458 = vrot.lane.b32.xlu1 %v4865_v3, %s5724_s25 }
 0x2f9   : > { %v5440_v16 = vadd.f32 %v4228_v25, %v2607_v10  ;;  %v4868_v63 = vpack.c.bf16 %v5438_v30, %v5438_v30 }
 0x2fa   : > { %v4871_v49 = vpack.c.bf16 %v5439_v9, %v5439_v9 }
 0x2fb   : > { %4468 = vrot.lane.b32.xlu0 %v4870_v27, %s5724_s25  ;;  %v4869_v34 = vpack.c.bf16 %v5440_v16, %v5440_v16 }
 0x2fc   : > { %4470 = vrot.lane.b32.xlu1 %v4871_v49, %s5724_s25 }
 0x2fd   : > { %v5411_v0 = vpop.f32.mrb[12].mxu1 }
 0x2fe   : > { %v5441_v35 = vadd.f32 %v5411_v0, %v7252_v31  ;;  %v4241_v12 = vpop.f32.mrb[13].mxu1 }
 0x2ff   : > { %v5442_v22 = vadd.f32 %v4241_v12, %v7254_v15  ;;  %v5412_v61 = vpop.f32.mrb[14].mxu1  ;;  %4464 = vrot.lane.b32.xlu0 %v4868_v63, %s5724_s25 }
 0x300   : > { %v4874_v48 = vpack.c.bf16 %v5441_v35, %v5441_v35  ;;  %v5443_v4 = vadd.f32 %v5412_v61, %v7256_v41  ;;  %v4244_v10 = vpop.f32.mrb[15].mxu1  ;;  %4466 = vrot.lane.b32.xlu1 %v4869_v34, %s5724_s25 }
 0x301   : > { %v5444_v28 = vadd.f32 %v4244_v10, %v7258_v26  ;;  %v4872_v31 = vpack.c.bf16 %v5442_v22, %v5442_v22 }
 0x302   : > { %v4875_v2 = vpack.c.bf16 %v5443_v4, %v5443_v4 }
 0x303   : > { %4476 = vrot.lane.b32.xlu0 %v4874_v48, %s5724_s25  ;;  %v4873_v32 = vpack.c.bf16 %v5444_v28, %v5444_v28 }
 0x304   : > { %4478 = vrot.lane.b32.xlu1 %v4875_v2, %s5724_s25 }
 0x305   : > { %v5415_v62 = vpop.f32.mrb[16].mxu1 }
 0x306   : > { %v5445_v15 = vadd.f32 %v5415_v62, %v7260_v14  ;;  %v4257_v45 = vpop.f32.mrb[17].mxu1 }
 0x307   : > { %v5446_v39 = vadd.f32 %v4257_v45, %v7262_v6  ;;  %v5416_v24 = vpop.f32.mrb[18].mxu1  ;;  %4472 = vrot.lane.b32.xlu0 %v4872_v31, %s5724_s25 }
 0x308   : > { %v4878_v41 = vpack.c.bf16 %v5445_v15, %v5445_v15  ;;  %v5447_v59 = vadd.f32 %v5416_v24, %v7264_v43  ;;  %v4260_v26 = vpop.f32.mrb[19].mxu1  ;;  %4474 = vrot.lane.b32.xlu1 %v4873_v32, %s5724_s25 }
 0x309   : > { %v5448_v56 = vadd.f32 %v4260_v26, %v7266_v47  ;;  %v4876_v14 = vpack.c.bf16 %v5446_v39, %v5446_v39 }
 0x30a   : > { %v4879_v50 = vpack.c.bf16 %v5447_v59, %v5447_v59 }
 0x30b   : > { %4484 = vrot.lane.b32.xlu0 %v4878_v41, %s5724_s25  ;;  %v4877_v52 = vpack.c.bf16 %v5448_v56, %v5448_v56 }
 0x30c   : > { %4486 = vrot.lane.b32.xlu1 %v4879_v50, %s5724_s25 }
 0x30d   : > { %v5419_v5 = vpop.f32.mrb[20].mxu1 }
 0x30e   : > { %v5449_v6 = vadd.f32 %v5419_v5, %v7268_v17  ;;  %v4273_v55 = vpop.f32.mrb[21].mxu1 }
 0x30f   : > { %v5450_v44 = vadd.f32 %v4273_v55, %v7270_v33  ;;  %v5420_v29 = vpop.f32.mrb[22].mxu1  ;;  %4480 = vrot.lane.b32.xlu0 %v4876_v14, %s5724_s25 }
 0x310   : > { %v4882_v43 = vpack.c.bf16 %v5449_v6, %v5449_v6  ;;  %v5451_v18 = vadd.f32 %v5420_v29, %v7272_v20  ;;  %v4276_v47 = vpop.f32.mrb[23].mxu1  ;;  %4482 = vrot.lane.b32.xlu1 %v4877_v52, %s5724_s25 }
 0x311   : > { %v5452_v11 = vadd.f32 %v4276_v47, %v7274_v53  ;;  %v4880_v17 = vpack.c.bf16 %v5450_v44, %v5450_v44 }
 0x312   : > { %v4883_v36 = vpack.c.bf16 %v5451_v18, %v5451_v18 }
 0x313   : > { %4492 = vrot.lane.b32.xlu0 %v4882_v43, %s5724_s25  ;;  %v4881_v42 = vpack.c.bf16 %v5452_v11, %v5452_v11 }
 0x314   : > { %4494 = vrot.lane.b32.xlu1 %v4883_v36, %s5724_s25 }
 0x315   : > { %v5423_v60 = vpop.f32.mrb[24].mxu1 }
 0x316   : > { %v5453_v33 = vadd.f32 %v5423_v60, %v7276_v23  ;;  %v4289_v19 = vpop.f32.mrb[25].mxu1 }
 0x317   : > { %v5454_v8 = vadd.f32 %v4289_v19, %v7278_v7  ;;  %v5424_v38 = vpop.f32.mrb[26].mxu1  ;;  %4488 = vrot.lane.b32.xlu0 %v4880_v17, %s5724_s25 }
 0x318   : > { %v4886_v20 = vpack.c.bf16 %v5453_v33, %v5453_v33  ;;  %v5455_v21 = vadd.f32 %v5424_v38, %v7280_v54  ;;  %v4292_v53 = vpop.f32.mrb[27].mxu1  ;;  %4490 = vrot.lane.b32.xlu1 %v4881_v42, %s5724_s25 }
 0x319   : > { %v5456_v3 = vadd.f32 %v4292_v53, %v7282_v51  ;;  %v4884_v23 = vpack.c.bf16 %v5454_v8, %v5454_v8 }
 0x31a   : > { %v4887_v46 = vpack.c.bf16 %v5455_v21, %v5455_v21 }
 0x31b   : > { %4500 = vrot.lane.b32.xlu0 %v4886_v20, %s5724_s25  ;;  %v4885_v30 = vpack.c.bf16 %v5456_v3, %v5456_v3 }
 0x31c   : > { %4502 = vrot.lane.b32.xlu1 %v4887_v46, %s5724_s25 }
 0x31d   : > { %v5427_v37 = vpop.f32.mrb[28].mxu1 }
 0x31e   : > { %v5457_v7 = vadd.f32 %v5427_v37, %v7284_v58  ;;  %v4305_v1 = vpop.f32.mrb[29].mxu1 }
 0x31f   : > { %v5458_v27 = vadd.f32 %v4305_v1, %v7286_v40  ;;  %v5428_v9 = vpop.f32.mrb[30].mxu1  ;;  %4496 = vrot.lane.b32.xlu0 %v4884_v23, %s5724_s25 }
 0x320   : > { %v5459_v54 = vadd.f32 %v5428_v9, %v7288_v57  ;;  %v4308_v51 = vpop.f32.mrb[31].mxu1  ;;  %4498 = vrot.lane.b32.xlu1 %v4885_v30, %s5724_s25  ;;  %v4890_v58 = vpack.c.bf16 %v5457_v7, %v5457_v7 }
 0x321   : > { %v4888_v25 = vpack.c.bf16 %v5458_v27, %v5458_v27  ;;  %v5460_v16 = vadd.f32 %v4308_v51, %v7290_v13 }
 0x322   : > { %v4891_v40 = vpack.c.bf16 %v5459_v54, %v5459_v54 }
 0x323   : > { %v4889_v49 = vpack.c.bf16 %v5460_v16, %v5460_v16  ;;  %4504 = vrot.lane.b32.xlu0 %v4888_v25, %s5724_s25 }
 0x325   : > { %4506 = vrot.lane.b32.xlu1 %v4889_v49, %s5724_s25 }
 0x327   : > { %4508 = vrot.lane.b32.xlu0 %v4890_v58, %s5724_s25 }
 0x329   : > { %4510 = vrot.lane.b32.xlu1 %v4891_v40, %s5724_s25 }
 0x35c   : > { %v4453_v57 = vpop.permute.xlu1 %4452 }
 0x35d   : > { %4547 = vst.msk [vmem:[%s7152_s15 + $0x8] sm:$0xf] %vm4544_vm4, %v4453_v57  ;;  %v4449_v13 = vpop.permute.xlu0 %4448 }
 0x35e   : > { %4545 = vst.msk [vmem:[%s7152_s15] sm:$0xf] %vm4544_vm4, %v4449_v13 }
 0x360   : > { %v4455_v63 = vpop.permute.xlu1 %4454 }
 0x361   : > { %4548 = vst.msk [vmem:[%s7152_s15 + $0xc] sm:$0xf] %vm4544_vm4, %v4455_v63  ;;  %v4451_v0 = vpop.permute.xlu0 %4450 }
 0x362   : > { %4546 = vst.msk [vmem:[%s7152_s15 + $0x4] sm:$0xf] %vm4544_vm4, %v4451_v0 }
 0x365   : > { %v4461_v34 = vpop.permute.xlu0 %4460 }
 0x366   : > { %4551 = vst.msk [vmem:[%s7152_s15 + $0x18] sm:$0xf] %vm4544_vm4, %v4461_v34  ;;  %v4463_v35 = vpop.permute.xlu1 %4462 }
 0x367   : > { %4552 = vst.msk [vmem:[%s7152_s15 + $0x1c] sm:$0xf] %vm4544_vm4, %v4463_v35 }
 0x369   : > { %v4457_v12 = vpop.permute.xlu0 %4456 }
 0x36a   : > { %4549 = vst.msk [vmem:[%s7152_s15 + $0x10] sm:$0xf] %vm4544_vm4, %v4457_v12  ;;  %v4459_v22 = vpop.permute.xlu1 %4458 }
 0x36b   : > { %4550 = vst.msk [vmem:[%s7152_s15 + $0x14] sm:$0xf] %vm4544_vm4, %v4459_v22 }
 0x36d   : > { %v4469_v61 = vpop.permute.xlu0 %4468 }
 0x36e   : > { %4555 = vst.msk [vmem:[%s7152_s15 + $0x28] sm:$0xf] %vm4544_vm4, %v4469_v61  ;;  %v4471_v48 = vpop.permute.xlu1 %4470 }
 0x36f   : > { %4556 = vst.msk [vmem:[%s7152_s15 + $0x2c] sm:$0xf] %vm4544_vm4, %v4471_v48 }
 0x371   : > { %v4465_v4 = vpop.permute.xlu0 %4464 }
 0x372   : > { %4553 = vst.msk [vmem:[%s7152_s15 + $0x20] sm:$0xf] %vm4544_vm4, %v4465_v4  ;;  %v4467_v10 = vpop.permute.xlu1 %4466 }
 0x373   : > { %4554 = vst.msk [vmem:[%s7152_s15 + $0x24] sm:$0xf] %vm4544_vm4, %v4467_v10 }
 0x375   : > { %v4477_v28 = vpop.permute.xlu0 %4476 }
 0x376   : > { %4559 = vst.msk [vmem:[%s7152_s15 + $0x38] sm:$0xf] %vm4544_vm4, %v4477_v28  ;;  %v4479_v2 = vpop.permute.xlu1 %4478 }
 0x377   : > { %4560 = vst.msk [vmem:[%s7152_s15 + $0x3c] sm:$0xf] %vm4544_vm4, %v4479_v2 }
 0x379   : > { %v4473_v31 = vpop.permute.xlu0 %4472 }
 0x37a   : > { %4557 = vst.msk [vmem:[%s7152_s15 + $0x30] sm:$0xf] %vm4544_vm4, %v4473_v31  ;;  %v4475_v62 = vpop.permute.xlu1 %4474 }
 0x37b   : > { %4558 = vst.msk [vmem:[%s7152_s15 + $0x34] sm:$0xf] %vm4544_vm4, %v4475_v62 }
 0x37d   : > { %v4485_v32 = vpop.permute.xlu0 %4484 }
 0x37e   : > { %4563 = vst.msk [vmem:[%s7152_s15 + $0x48] sm:$0xf] %vm4544_vm4, %v4485_v32  ;;  %v4487_v15 = vpop.permute.xlu1 %4486 }
 0x37f   : > { %4564 = vst.msk [vmem:[%s7152_s15 + $0x4c] sm:$0xf] %vm4544_vm4, %v4487_v15 }
 0x381   : > { %v4481_v45 = vpop.permute.xlu0 %4480 }
 0x382   : > { %4561 = vst.msk [vmem:[%s7152_s15 + $0x40] sm:$0xf] %vm4544_vm4, %v4481_v45  ;;  %v4483_v39 = vpop.permute.xlu1 %4482 }
 0x383   : > { %4562 = vst.msk [vmem:[%s7152_s15 + $0x44] sm:$0xf] %vm4544_vm4, %v4483_v39 }
 0x385   : > { %v4493_v24 = vpop.permute.xlu0 %4492 }
 0x386   : > { %4567 = vst.msk [vmem:[%s7152_s15 + $0x58] sm:$0xf] %vm4544_vm4, %v4493_v24  ;;  %v4495_v41 = vpop.permute.xlu1 %4494 }
 0x387   : > { %4568 = vst.msk [vmem:[%s7152_s15 + $0x5c] sm:$0xf] %vm4544_vm4, %v4495_v41 }
 0x389   : > { %v4489_v59 = vpop.permute.xlu0 %4488 }
 0x38a   : > { %4565 = vst.msk [vmem:[%s7152_s15 + $0x50] sm:$0xf] %vm4544_vm4, %v4489_v59  ;;  %v4491_v26 = vpop.permute.xlu1 %4490 }
 0x38b   : > { %4566 = vst.msk [vmem:[%s7152_s15 + $0x54] sm:$0xf] %vm4544_vm4, %v4491_v26 }
 0x38d   : > { %v4501_v56 = vpop.permute.xlu0 %4500 }
 0x38e   : > { %4571 = vst.msk [vmem:[%s7152_s15 + $0x68] sm:$0xf] %vm4544_vm4, %v4501_v56  ;;  %v4503_v50 = vpop.permute.xlu1 %4502 }
 0x38f   : > { %4572 = vst.msk [vmem:[%s7152_s15 + $0x6c] sm:$0xf] %vm4544_vm4, %v4503_v50 }
 0x391   : > { %v4497_v14 = vpop.permute.xlu0 %4496 }
 0x392   : > { %4569 = vst.msk [vmem:[%s7152_s15 + $0x60] sm:$0xf] %vm4544_vm4, %v4497_v14  ;;  %v4499_v5 = vpop.permute.xlu1 %4498 }
 0x393   : > { %4570 = vst.msk [vmem:[%s7152_s15 + $0x64] sm:$0xf] %vm4544_vm4, %v4499_v5 }
 0x395   : > { %v4505_v52 = vpop.permute.xlu0 %4504 }
 0x396   : > { %4573 = vst.msk [vmem:[%s7152_s15 + $0x70] sm:$0xf] %vm4544_vm4, %v4505_v52 }
 0x397   : > { %v4507_v6 = vpop.permute.xlu1 %4506 }
 0x398   : > { %4574 = vst.msk [vmem:[%s7152_s15 + $0x74] sm:$0xf] %vm4544_vm4, %v4507_v6 }
 0x399   : > { %v4509_v55 = vpop.permute.xlu0 %4508 }
 0x39a   : > { %4575 = vst.msk [vmem:[%s7152_s15 + $0x78] sm:$0xf] %vm4544_vm4, %v4509_v55 }
 0x39b   : > { %v4511_v44 = vpop.permute.xlu1 %4510 }
 0x39c   : > { %4576 = vst.msk [vmem:[%s7152_s15 + $0x7c] sm:$0xf] %vm4544_vm4, %v4511_v44 }
 0x39d PF: > { %s17_s24 = sadd.s32 1, %s5721_s24  }
 0x39e   : > { %p14_p4 = scmp.ge.s32.totalorder %s17_s24, 4  }
 0x3a0   :  { %16 = sbr.rel (!%p14_p4) target bundleno = 1 (0x1), region = 78 }

</bundles_post_ra>
